<compile_context>
chip_gen: v6e
topology: v6e:2x2x1
jax: 0.10.0
libtpu: 0.0.40
codegen_flags: <defaults>
</compile_context>

<pallas_src>
import functools

import jax
import jax.numpy as jnp
import numpy as np
from jax import lax
from jax.experimental import pallas as pl
from jax.experimental.pallas import tpu as pltpu


def make_divisible(v, divisor, min_val=None):
    if min_val is None:
        min_val = divisor
    new_v = max(min_val, int(v + divisor / 2) // divisor * divisor)
    if new_v < 0.9 * v:
        new_v += divisor
    return new_v


def _inverted_block_kernel(x_ref, w1_ref, b1_ref, mw_ref, b2_ref, w2_ref,
                           b3_ref, o_ref, xs_ref, *, k, W, HW, Bc):
    """One batch-chunk (Bc images) per grid step; activations (C, Bc*HW)."""
    CHW = Bc * HW
    p = k // 2

    # ---- stage 0: stage the (Bc, Cin, HW) input block into channel-major
    # (Cin, Bc*HW).  Each copy is a 256-lane-aligned slice (pure vld/vst). ----
    for b in range(Bc):
        xs_ref[:, b * HW:(b + 1) * HW] = x_ref[b]

    # ---- stage 1: 1x1 expand conv (bf16 MXU matmul over the whole chunk; BN
    # scale pre-folded into w1) + bias + relu6 ----
    y1 = jnp.dot(w1_ref[...], xs_ref[...], preferred_element_type=jnp.float32)
    y1 = jnp.clip(y1 + b1_ref[...], 0.0, 6.0)                 # (Cmid, CHW) f32

    # ---- stage 2: depthwise kxk conv, 'same' pad, stride 1.  Spatial shift
    # (dh, dw) == lane roll of the flattened axis by dh*W+dw (XLU, runs
    # alongside the VPU FMAs).  Boundary masks are pre-multiplied into the
    # BN-folded depthwise weights (mw), so wrapped / out-of-image taps --
    # including wraps across images inside the chunk -- contribute zero, and
    # only one vmul per tap remains.  Taps run in mw's dtype (f32 by default,
    # optionally bf16 on bf16-VPU chips); accumulation is f32. ----
    y1d = y1.astype(mw_ref.dtype)
    acc = jnp.zeros_like(y1)
    for kh in range(k):
        for kw in range(k):
            t = kh * k + kw
            d = (kh - p) * W + (kw - p)          # flattened source offset
            src = y1d if d == 0 else pltpu.roll(y1d, shift=(-d) % CHW, axis=1)
            acc = acc + src * mw_ref[t]
    y2 = jnp.clip(acc + b2_ref[...], 0.0, 6.0)                # (Cmid, CHW) f32

    # ---- stage 3: 1x1 project conv (bf16 MXU matmul over the whole chunk; BN
    # scale pre-folded into w2) + bias, no activation.  Per-image lane-dense
    # (256-wide, 256-aligned) stores directly in NCHW layout. ----
    y3 = jnp.dot(w2_ref[...], y2.astype(jnp.bfloat16),
                 preferred_element_type=jnp.float32)
    y3 = y3 + b3_ref[...]                                     # (Cout, CHW) f32
    for b in range(Bc):
        o_ref[b] = y3[:, b * HW:(b + 1) * HW].astype(o_ref.dtype)


def _fuse_bn(params, eps):
    gamma, beta, mean, var = params
    scale = (gamma / jnp.sqrt(var + eps)).astype(jnp.float32)
    bias = (beta - mean * scale).astype(jnp.float32)
    return scale, bias


def _pick_batch_chunk(N, HW, Cin, Cmid, Cout, kk, dw_bytes, out_bytes,
                      max_chunk, vmem_budget_bytes):
    """Largest per-step image count that fits the VMEM budget, divides N and
    keeps >= 2 grid steps (so the 'parallel' batch axis can be split across
    both v7x TensorCores)."""
    per_img = (2 * (Cin * HW * 2)                 # x block (bf16), double-buffered
               + 2 * (Cout * HW * out_bytes)      # out block, double-buffered
               + 2 * (kk * Cmid * HW * dw_bytes)  # mask-folded dw weights (resident)
               + Cin * HW * 2                     # channel-major staging scratch
               + 4 * (Cmid * HW * 4))             # live f32 intermediates
    cap = int(max(1, min(max_chunk, vmem_budget_bytes // per_img)))
    best = 1
    for c in range(1, min(cap, N) + 1):
        if N % c == 0 and (N // c) >= 2:
            best = c
    return best


def dynamic_inverted_conv2d(x_nchw, w1_oihw, wd_oihw, w2_oihw, bn1, bn2, bn3,
                            kernel_size, stride=1, eps=1e-5,
                            out_dtype=jnp.float32,
                            dw_compute_dtype=jnp.float32,
                            max_batch_chunk=32):
    # TODO(synk): NAS sub-kernel transform matrices (active_kernel_size < max),
    # channel slicing (active expand/out-channel < max), stride > 1 depthwise
    # and training-mode BatchNorm are not implemented (default forward uses
    # the max config, stride=1, eval-mode BN).
    assert stride == 1
    k = int(kernel_size)
    kk = k * k
    p = k // 2
    N, Cin, H, W = x_nchw.shape
    Cmid = w1_oihw.shape[0]
    Cout = w2_oihw.shape[0]
    HW = H * W

    dw_bytes = np.dtype(dw_compute_dtype).itemsize
    out_bytes = np.dtype(out_dtype).itemsize
    Bc = _pick_batch_chunk(N, HW, Cin, Cmid, Cout, kk, dw_bytes, out_bytes,
                           max_chunk=max_batch_chunk,
                           vmem_budget_bytes=24 << 20)
    CHW = Bc * HW
    G = N // Bc

    s1, b1 = _fuse_bn(bn1, eps)
    s2, b2 = _fuse_bn(bn2, eps)
    s3, b3 = _fuse_bn(bn3, eps)

    # Fold BN scales into the conv weights (per output channel).
    w1 = (w1_oihw[:, :, 0, 0] * s1[:, None]).astype(jnp.bfloat16)   # (Cmid, Cin)
    w2 = (w2_oihw[:, :, 0, 0] * s3[:, None]).astype(jnp.bfloat16)   # (Cout, Cmid)
    wd = wd_oihw[:, 0, :, :].reshape(Cmid, kk) * s2[:, None]        # (Cmid, kk) f32
    b1 = b1.reshape(Cmid, 1)
    b2 = b2.reshape(Cmid, 1)
    b3 = b3.reshape(Cout, 1)

    # Per-tap boundary masks on the flattened spatial axis, tiled across the
    # batch chunk: mask[t, b*HW+n] = 1 iff output position n of image b has a
    # valid in-image source for shift (dh, dw).  Pre-multiplied into the
    # BN-folded depthwise weights (one fewer vmul per element per tap); also
    # makes cross-image roll wrap inside a chunk contribute zero.
    hh = np.arange(HW) // W
    ww = np.arange(HW) % W
    masks = np.zeros((kk, HW), np.float32)
    for kh in range(k):
        for kw in range(k):
            oh, ow = kh - p, kw - p
            valid = ((hh + oh >= 0) & (hh + oh < H) &
                     (ww + ow >= 0) & (ww + ow < W))
            masks[kh * k + kw, :] = valid.astype(np.float32)
    masks_c = jnp.asarray(np.tile(masks, (1, Bc)))                    # (kk, CHW)
    mw = (jnp.transpose(wd, (1, 0))[:, :, None] *
          masks_c[:, None, :]).astype(dw_compute_dtype)               # (kk, Cmid, CHW)

    # NCHW -> (N, Cin, H*W) is a free reshape; bf16 halves the input DMA bytes.
    x = x_nchw.reshape(N, Cin, HW).astype(jnp.bfloat16)

    flops = 2 * N * HW * (Cin * Cmid + kk * Cmid + Cmid * Cout)
    bytes_accessed = (x.size * 2 + N * Cout * HW * out_bytes + w1.size * 2 +
                      w2.size * 2 + mw.size * dw_bytes +
                      (2 * Cmid + Cout) * 4)

    kernel = functools.partial(_inverted_block_kernel, k=k, W=W, HW=HW, Bc=Bc)
    out = pl.pallas_call(
        kernel,
        out_shape=jax.ShapeDtypeStruct((N, Cout, HW), out_dtype),
        grid_spec=pltpu.PrefetchScalarGridSpec(
            num_scalar_prefetch=0,
            grid=(G,),
            in_specs=[
                pl.BlockSpec((Bc, Cin, HW), lambda g: (g, 0, 0)),     # x (bf16)
                pl.BlockSpec((Cmid, Cin), lambda g: (0, 0)),          # w1 (bf16)
                pl.BlockSpec((Cmid, 1), lambda g: (0, 0)),            # b1
                pl.BlockSpec((kk, Cmid, CHW), lambda g: (0, 0, 0)),   # mw
                pl.BlockSpec((Cmid, 1), lambda g: (0, 0)),            # b2
                pl.BlockSpec((Cout, Cmid), lambda g: (0, 0)),         # w2 (bf16)
                pl.BlockSpec((Cout, 1), lambda g: (0, 0)),            # b3
            ],
            out_specs=pl.BlockSpec((Bc, Cout, HW), lambda g: (g, 0, 0)),
            scratch_shapes=[pltpu.VMEM((Cin, CHW), jnp.bfloat16)],
        ),
        compiler_params=pltpu.CompilerParams(
            dimension_semantics=("parallel",),
            vmem_limit_bytes=32 * 1024 * 1024),
        cost_estimate=pl.CostEstimate(
            flops=flops, transcendentals=0, bytes_accessed=bytes_accessed),
    )(x, w1, b1, mw, b2, w2, b3)
    # (N, Cout, H*W) is already NCHW up to a free reshape.
    return out.reshape(N, Cout, H, W)


def _reference(x, w1_oihw, wd_oihw, w2_oihw, bn1, bn2, bn3, k, stride, eps):
    hp = lax.Precision.HIGHEST
    dn = ('NCHW', 'OIHW', 'NCHW')
    p = k // 2

    def bn(y, params):
        g, b, m, v = params
        sc = g / jnp.sqrt(v + eps)
        return y * sc[None, :, None, None] + (b - m * sc)[None, :, None, None]

    y = lax.conv_general_dilated(x, w1_oihw, (1, 1), ((0, 0), (0, 0)),
                                 dimension_numbers=dn, precision=hp)
    y = jnp.clip(bn(y, bn1), 0.0, 6.0)
    y = lax.conv_general_dilated(y, wd_oihw, (stride, stride),
                                 ((p, p), (p, p)), dimension_numbers=dn,
                                 feature_group_count=y.shape[1], precision=hp)
    y = jnp.clip(bn(y, bn2), 0.0, 6.0)
    y = lax.conv_general_dilated(y, w2_oihw, (1, 1), ((0, 0), (0, 0)),
                                 dimension_numbers=dn, precision=hp)
    return bn(y, bn3)


if __name__ == "__main__":
    # Module config: in_channel_list=[8], out_channel_list=[16],
    # kernel_size_list=[3], expand_ratio_list=[6], stride=1, activation=relu6,
    # dw_layer=nn.Conv2d (required so depth_conv is not None in forward()).
    # batch=8 exercises batch folding (B_chunk=4 -> grid=(2,) parallel steps).
    N, Cin, H, W = 8, 8, 16, 16
    Cout, expand, K, stride = 16, 6, 3, 1
    Cmid = make_divisible(round(Cin * expand), 8)   # 48
    eps = 1e-5

    keys = jax.random.split(jax.random.PRNGKey(0), 16)
    x = jax.random.normal(keys[0], (N, Cin, H, W), jnp.float32)
    # PyTorch-layout weights (OIHW), deterministic kaiming-ish init.
    w1_oihw = jax.random.normal(keys[1], (Cmid, Cin, 1, 1), jnp.float32) / np.sqrt(Cin)
    wd_oihw = jax.random.normal(keys[2], (Cmid, 1, K, K), jnp.float32) / np.sqrt(K * K)
    w2_oihw = jax.random.normal(keys[3], (Cout, Cmid, 1, 1), jnp.float32) / np.sqrt(Cmid)

    def bn_params(kg, kb, km, kv, C):
        gamma = 1.0 + 0.1 * jax.random.normal(kg, (C,), jnp.float32)
        beta = 0.1 * jax.random.normal(kb, (C,), jnp.float32)
        mean = 0.1 * jax.random.normal(km, (C,), jnp.float32)
        var = jax.random.uniform(kv, (C,), jnp.float32, minval=0.5, maxval=1.5)
        return gamma, beta, mean, var

    bn1 = bn_params(keys[4], keys[5], keys[6], keys[7], Cmid)
    bn2 = bn_params(keys[8], keys[9], keys[10], keys[11], Cmid)
    bn3 = bn_params(keys[12], keys[13], keys[14], keys[15], Cout)

    out = dynamic_inverted_conv2d(x, w1_oihw, wd_oihw, w2_oihw, bn1, bn2, bn3,
                                  K, stride, eps)
    out = jax.block_until_ready(out)
    assert out.shape == (N, Cout, H, W), out.shape

    ref = _reference(x, w1_oihw, wd_oihw, w2_oihw, bn1, bn2, bn3, K, stride, eps)
    max_err = float(jnp.max(jnp.abs(out - ref)))
    mean_err = float(jnp.mean(jnp.abs(out - ref)))
    # Loose tolerance: the two 1x1 convs intentionally use bf16 MXU operands
    # (per the perf review); the reference runs in f32 / HIGHEST precision.
    assert max_err < 1.5e-1, f"max abs error {max_err}"
    assert mean_err < 2e-2, f"mean abs error {mean_err}"
    print("KERNEL_OK")
</pallas_src>

<mosaic_0001>
module attributes {stable_mosaic.version = 11 : i64} {
  func.func @_inverted_block_kernel(%arg0: i32, %arg1: memref<4x8x256xbf16, #tpu.memory_space<vmem>>, %arg2: memref<48x8xbf16, #tpu.memory_space<vmem>>, %arg3: memref<48x1xf32, #tpu.memory_space<vmem>>, %arg4: memref<9x48x1024xf32, #tpu.memory_space<vmem>>, %arg5: memref<48x1xf32, #tpu.memory_space<vmem>>, %arg6: memref<16x48xbf16, #tpu.memory_space<vmem>>, %arg7: memref<16x1xf32, #tpu.memory_space<vmem>>, %arg8: memref<4x16x256xf32, #tpu.memory_space<vmem>>, %arg9: memref<8x1024xbf16, #tpu.memory_space<vmem>>) attributes {dimension_semantics = [#tpu.dimension_semantics<parallel>], iteration_bounds = array<i64: 2>, scalar_prefetch = 0 : i64, scratch_operands = 1 : i64, tpu.core_type = #tpu.core_type<tc>, window_params = [{transform_indices = @transform_0, window_bounds = array<i64: 4, 8, 256>}, {pipeline_mode = #tpu.pipeline_mode<synchronous>, transform_indices = @transform_1, window_bounds = array<i64: 48, 8>}, {pipeline_mode = #tpu.pipeline_mode<synchronous>, transform_indices = @transform_2, window_bounds = array<i64: 48, 1>}, {pipeline_mode = #tpu.pipeline_mode<synchronous>, transform_indices = @transform_3, window_bounds = array<i64: 9, 48, 1024>}, {pipeline_mode = #tpu.pipeline_mode<synchronous>, transform_indices = @transform_4, window_bounds = array<i64: 48, 1>}, {pipeline_mode = #tpu.pipeline_mode<synchronous>, transform_indices = @transform_5, window_bounds = array<i64: 16, 48>}, {pipeline_mode = #tpu.pipeline_mode<synchronous>, transform_indices = @transform_6, window_bounds = array<i64: 16, 1>}, {transform_indices = @transform_7, window_bounds = array<i64: 4, 16, 256>}]} {
    %c0 = arith.constant 0 : index
    %c0_0 = arith.constant 0 : index
    %c0_1 = arith.constant 0 : index
    %0 = vector.load %arg1[%c0, %c0_0, %c0_1] : memref<4x8x256xbf16, #tpu.memory_space<vmem>>, vector<1x8x256xbf16>
    %1 = vector.shape_cast %0 : vector<1x8x256xbf16> to vector<8x256xbf16>
    %c0_2 = arith.constant 0 : index
    %c0_3 = arith.constant 0 : index
    %2 = vector.load %arg9[%c0_2, %c0_3] : memref<8x1024xbf16, #tpu.memory_space<vmem>>, vector<8x256xbf16>
    tpu.vector_store %arg9[%c0_2, %c0_3], %1 {strides = array<i32>} : memref<8x1024xbf16, #tpu.memory_space<vmem>>, vector<8x256xbf16>,
    %c1 = arith.constant 1 : index
    %c0_4 = arith.constant 0 : index
    %c0_5 = arith.constant 0 : index
    %3 = vector.load %arg1[%c1, %c0_4, %c0_5] : memref<4x8x256xbf16, #tpu.memory_space<vmem>>, vector<1x8x256xbf16>
    %4 = vector.shape_cast %3 : vector<1x8x256xbf16> to vector<8x256xbf16>
    %c0_6 = arith.constant 0 : index
    %c256 = arith.constant 256 : index
    %5 = vector.load %arg9[%c0_6, %c256] : memref<8x1024xbf16, #tpu.memory_space<vmem>>, vector<8x256xbf16>
    tpu.vector_store %arg9[%c0_6, %c256], %4 {strides = array<i32>} : memref<8x1024xbf16, #tpu.memory_space<vmem>>, vector<8x256xbf16>,
    %c2 = arith.constant 2 : index
    %c0_7 = arith.constant 0 : index
    %c0_8 = arith.constant 0 : index
    %6 = vector.load %arg1[%c2, %c0_7, %c0_8] : memref<4x8x256xbf16, #tpu.memory_space<vmem>>, vector<1x8x256xbf16>
    %7 = vector.shape_cast %6 : vector<1x8x256xbf16> to vector<8x256xbf16>
    %c0_9 = arith.constant 0 : index
    %c512 = arith.constant 512 : index
    %8 = vector.load %arg9[%c0_9, %c512] : memref<8x1024xbf16, #tpu.memory_space<vmem>>, vector<8x256xbf16>
    tpu.vector_store %arg9[%c0_9, %c512], %7 {strides = array<i32>} : memref<8x1024xbf16, #tpu.memory_space<vmem>>, vector<8x256xbf16>,
    %c3 = arith.constant 3 : index
    %c0_10 = arith.constant 0 : index
    %c0_11 = arith.constant 0 : index
    %9 = vector.load %arg1[%c3, %c0_10, %c0_11] : memref<4x8x256xbf16, #tpu.memory_space<vmem>>, vector<1x8x256xbf16>
    %10 = vector.shape_cast %9 : vector<1x8x256xbf16> to vector<8x256xbf16>
    %c0_12 = arith.constant 0 : index
    %c768 = arith.constant 768 : index
    %11 = vector.load %arg9[%c0_12, %c768] : memref<8x1024xbf16, #tpu.memory_space<vmem>>, vector<8x256xbf16>
    tpu.vector_store %arg9[%c0_12, %c768], %10 {strides = array<i32>} : memref<8x1024xbf16, #tpu.memory_space<vmem>>, vector<8x256xbf16>,
    %c0_13 = arith.constant 0 : index
    %c0_14 = arith.constant 0 : index
    %12 = vector.load %arg2[%c0_13, %c0_14] : memref<48x8xbf16, #tpu.memory_space<vmem>>, vector<48x8xbf16>
    %c0_15 = arith.constant 0 : index
    %c0_16 = arith.constant 0 : index
    %13 = vector.load %arg9[%c0_15, %c0_16] : memref<8x1024xbf16, #tpu.memory_space<vmem>>, vector<8x1024xbf16>
    %cst = arith.constant dense<0.000000e+00> : vector<48x1024xf32>
    %14 = tpu.matmul %12, %13, %cst {dimension_numbers = #tpu.dot_dimension_numbers<[1], [0], [0], [1], [0, 0, 1, 1], [], []>} : vector<48x8xbf16>, vector<8x1024xbf16>, vector<48x1024xf32> -> vector<48x1024xf32>
    %c0_17 = arith.constant 0 : index
    %c0_18 = arith.constant 0 : index
    %15 = vector.load %arg3[%c0_17, %c0_18] : memref<48x1xf32, #tpu.memory_space<vmem>>, vector<48x1xf32>
    %16 = vector.broadcast %15 : vector<48x1xf32> to vector<48x1024xf32>
    %17 = arith.addf %14, %16 : vector<48x1024xf32>
    %cst_19 = arith.constant 0.000000e+00 : f32
    %cst_20 = arith.constant 6.000000e+00 : f32
    %18 = vector.broadcast %cst_19 : f32 to vector<48x1024xf32>
    %19 = arith.maximumf %18, %17 : vector<48x1024xf32>
    %20 = vector.broadcast %cst_20 : f32 to vector<48x1024xf32>
    %21 = arith.minimumf %20, %19 : vector<48x1024xf32>
    %cst_21 = arith.constant 0.000000e+00 : f32
    %22 = vector.broadcast %cst_21 : f32 to vector<48x1024xf32>
    %c17_i32 = arith.constant 17 : i32
    %23 = tpu.dynamic_rotate %21 by %c17_i32 dim 1 : vector<48x1024xf32>, i32 -> vector<48x1024xf32>
    %c0_22 = arith.constant 0 : index
    %c0_23 = arith.constant 0 : index
    %c0_24 = arith.constant 0 : index
    %24 = vector.load %arg4[%c0_22, %c0_23, %c0_24] : memref<9x48x1024xf32, #tpu.memory_space<vmem>>, vector<1x48x1024xf32>
    %25 = vector.shape_cast %24 : vector<1x48x1024xf32> to vector<48x1024xf32>
    %26 = arith.mulf %23, %25 : vector<48x1024xf32>
    %27 = arith.addf %22, %26 : vector<48x1024xf32>
    %c16_i32 = arith.constant 16 : i32
    %28 = tpu.dynamic_rotate %21 by %c16_i32 dim 1 : vector<48x1024xf32>, i32 -> vector<48x1024xf32>
    %c1_25 = arith.constant 1 : index
    %c0_26 = arith.constant 0 : index
    %c0_27 = arith.constant 0 : index
    %29 = vector.load %arg4[%c1_25, %c0_26, %c0_27] : memref<9x48x1024xf32, #tpu.memory_space<vmem>>, vector<1x48x1024xf32>
    %30 = vector.shape_cast %29 : vector<1x48x1024xf32> to vector<48x1024xf32>
    %31 = arith.mulf %28, %30 : vector<48x1024xf32>
    %32 = arith.addf %27, %31 : vector<48x1024xf32>
    %c15_i32 = arith.constant 15 : i32
    %33 = tpu.dynamic_rotate %21 by %c15_i32 dim 1 : vector<48x1024xf32>, i32 -> vector<48x1024xf32>
    %c2_28 = arith.constant 2 : index
    %c0_29 = arith.constant 0 : index
    %c0_30 = arith.constant 0 : index
    %34 = vector.load %arg4[%c2_28, %c0_29, %c0_30] : memref<9x48x1024xf32, #tpu.memory_space<vmem>>, vector<1x48x1024xf32>
    %35 = vector.shape_cast %34 : vector<1x48x1024xf32> to vector<48x1024xf32>
    %36 = arith.mulf %33, %35 : vector<48x1024xf32>
    %37 = arith.addf %32, %36 : vector<48x1024xf32>
    %c1_i32 = arith.constant 1 : i32
    %38 = tpu.dynamic_rotate %21 by %c1_i32 dim 1 : vector<48x1024xf32>, i32 -> vector<48x1024xf32>
    %c3_31 = arith.constant 3 : index
    %c0_32 = arith.constant 0 : index
    %c0_33 = arith.constant 0 : index
    %39 = vector.load %arg4[%c3_31, %c0_32, %c0_33] : memref<9x48x1024xf32, #tpu.memory_space<vmem>>, vector<1x48x1024xf32>
    %40 = vector.shape_cast %39 : vector<1x48x1024xf32> to vector<48x1024xf32>
    %41 = arith.mulf %38, %40 : vector<48x1024xf32>
    %42 = arith.addf %37, %41 : vector<48x1024xf32>
    %c4 = arith.constant 4 : index
    %c0_34 = arith.constant 0 : index
    %c0_35 = arith.constant 0 : index
    %43 = vector.load %arg4[%c4, %c0_34, %c0_35] : memref<9x48x1024xf32, #tpu.memory_space<vmem>>, vector<1x48x1024xf32>
    %44 = vector.shape_cast %43 : vector<1x48x1024xf32> to vector<48x1024xf32>
    %45 = arith.mulf %21, %44 : vector<48x1024xf32>
    %46 = arith.addf %42, %45 : vector<48x1024xf32>
    %c1023_i32 = arith.constant 1023 : i32
    %47 = tpu.dynamic_rotate %21 by %c1023_i32 dim 1 : vector<48x1024xf32>, i32 -> vector<48x1024xf32>
    %c5 = arith.constant 5 : index
    %c0_36 = arith.constant 0 : index
    %c0_37 = arith.constant 0 : index
    %48 = vector.load %arg4[%c5, %c0_36, %c0_37] : memref<9x48x1024xf32, #tpu.memory_space<vmem>>, vector<1x48x1024xf32>
    %49 = vector.shape_cast %48 : vector<1x48x1024xf32> to vector<48x1024xf32>
    %50 = arith.mulf %47, %49 : vector<48x1024xf32>
    %51 = arith.addf %46, %50 : vector<48x1024xf32>
    %c1009_i32 = arith.constant 1009 : i32
    %52 = tpu.dynamic_rotate %21 by %c1009_i32 dim 1 : vector<48x1024xf32>, i32 -> vector<48x1024xf32>
    %c6 = arith.constant 6 : index
    %c0_38 = arith.constant 0 : index
    %c0_39 = arith.constant 0 : index
    %53 = vector.load %arg4[%c6, %c0_38, %c0_39] : memref<9x48x1024xf32, #tpu.memory_space<vmem>>, vector<1x48x1024xf32>
    %54 = vector.shape_cast %53 : vector<1x48x1024xf32> to vector<48x1024xf32>
    %55 = arith.mulf %52, %54 : vector<48x1024xf32>
    %56 = arith.addf %51, %55 : vector<48x1024xf32>
    %c1008_i32 = arith.constant 1008 : i32
    %57 = tpu.dynamic_rotate %21 by %c1008_i32 dim 1 : vector<48x1024xf32>, i32 -> vector<48x1024xf32>
    %c7 = arith.constant 7 : index
    %c0_40 = arith.constant 0 : index
    %c0_41 = arith.constant 0 : index
    %58 = vector.load %arg4[%c7, %c0_40, %c0_41] : memref<9x48x1024xf32, #tpu.memory_space<vmem>>, vector<1x48x1024xf32>
    %59 = vector.shape_cast %58 : vector<1x48x1024xf32> to vector<48x1024xf32>
    %60 = arith.mulf %57, %59 : vector<48x1024xf32>
    %61 = arith.addf %56, %60 : vector<48x1024xf32>
    %c1007_i32 = arith.constant 1007 : i32
    %62 = tpu.dynamic_rotate %21 by %c1007_i32 dim 1 : vector<48x1024xf32>, i32 -> vector<48x1024xf32>
    %c8 = arith.constant 8 : index
    %c0_42 = arith.constant 0 : index
    %c0_43 = arith.constant 0 : index
    %63 = vector.load %arg4[%c8, %c0_42, %c0_43] : memref<9x48x1024xf32, #tpu.memory_space<vmem>>, vector<1x48x1024xf32>
    %64 = vector.shape_cast %63 : vector<1x48x1024xf32> to vector<48x1024xf32>
    %65 = arith.mulf %62, %64 : vector<48x1024xf32>
    %66 = arith.addf %61, %65 : vector<48x1024xf32>
    %c0_44 = arith.constant 0 : index
    %c0_45 = arith.constant 0 : index
    %67 = vector.load %arg5[%c0_44, %c0_45] : memref<48x1xf32, #tpu.memory_space<vmem>>, vector<48x1xf32>
    %68 = vector.broadcast %67 : vector<48x1xf32> to vector<48x1024xf32>
    %69 = arith.addf %66, %68 : vector<48x1024xf32>
    %cst_46 = arith.constant 0.000000e+00 : f32
    %cst_47 = arith.constant 6.000000e+00 : f32
    %70 = vector.broadcast %cst_46 : f32 to vector<48x1024xf32>
    %71 = arith.maximumf %70, %69 : vector<48x1024xf32>
    %72 = vector.broadcast %cst_47 : f32 to vector<48x1024xf32>
    %73 = arith.minimumf %72, %71 : vector<48x1024xf32>
    %c0_48 = arith.constant 0 : index
    %c0_49 = arith.constant 0 : index
    %74 = vector.load %arg6[%c0_48, %c0_49] : memref<16x48xbf16, #tpu.memory_space<vmem>>, vector<16x48xbf16>
    %75 = arith.truncf %73 : vector<48x1024xf32> to vector<48x1024xbf16>
    %cst_50 = arith.constant dense<0.000000e+00> : vector<16x1024xf32>
    %76 = tpu.matmul %74, %75, %cst_50 {dimension_numbers = #tpu.dot_dimension_numbers<[1], [0], [0], [1], [0, 0, 1, 1], [], []>} : vector<16x48xbf16>, vector<48x1024xbf16>, vector<16x1024xf32> -> vector<16x1024xf32>
    %c0_51 = arith.constant 0 : index
    %c0_52 = arith.constant 0 : index
    %77 = vector.load %arg7[%c0_51, %c0_52] : memref<16x1xf32, #tpu.memory_space<vmem>>, vector<16x1xf32>
    %78 = vector.broadcast %77 : vector<16x1xf32> to vector<16x1024xf32>
    %79 = arith.addf %76, %78 : vector<16x1024xf32>
    %80 = vector.extract_strided_slice %79 {offsets = [0, 0], sizes = [16, 256], strides = [1, 1]} : vector<16x1024xf32> to vector<16x256xf32>
    %c0_53 = arith.constant 0 : index
    %c0_54 = arith.constant 0 : index
    %c0_55 = arith.constant 0 : index
    %81 = vector.load %arg8[%c0_53, %c0_54, %c0_55] : memref<4x16x256xf32, #tpu.memory_space<vmem>>, vector<1x16x256xf32>
    %82 = vector.shape_cast %81 : vector<1x16x256xf32> to vector<16x256xf32>
    %83 = vector.shape_cast %80 : vector<16x256xf32> to vector<1x16x256xf32>
    tpu.vector_store %arg8[%c0_53, %c0_54, %c0_55], %83 {strides = array<i32>} : memref<4x16x256xf32, #tpu.memory_space<vmem>>, vector<1x16x256xf32>,
    %84 = vector.extract_strided_slice %79 {offsets = [0, 256], sizes = [16, 256], strides = [1, 1]} : vector<16x1024xf32> to vector<16x256xf32>
    %c1_56 = arith.constant 1 : index
    %c0_57 = arith.constant 0 : index
    %c0_58 = arith.constant 0 : index
    %85 = vector.load %arg8[%c1_56, %c0_57, %c0_58] : memref<4x16x256xf32, #tpu.memory_space<vmem>>, vector<1x16x256xf32>
    %86 = vector.shape_cast %85 : vector<1x16x256xf32> to vector<16x256xf32>
    %87 = vector.shape_cast %84 : vector<16x256xf32> to vector<1x16x256xf32>
    tpu.vector_store %arg8[%c1_56, %c0_57, %c0_58], %87 {strides = array<i32>} : memref<4x16x256xf32, #tpu.memory_space<vmem>>, vector<1x16x256xf32>,
    %88 = vector.extract_strided_slice %79 {offsets = [0, 512], sizes = [16, 256], strides = [1, 1]} : vector<16x1024xf32> to vector<16x256xf32>
    %c2_59 = arith.constant 2 : index
    %c0_60 = arith.constant 0 : index
    %c0_61 = arith.constant 0 : index
    %89 = vector.load %arg8[%c2_59, %c0_60, %c0_61] : memref<4x16x256xf32, #tpu.memory_space<vmem>>, vector<1x16x256xf32>
    %90 = vector.shape_cast %89 : vector<1x16x256xf32> to vector<16x256xf32>
    %91 = vector.shape_cast %88 : vector<16x256xf32> to vector<1x16x256xf32>
    tpu.vector_store %arg8[%c2_59, %c0_60, %c0_61], %91 {strides = array<i32>} : memref<4x16x256xf32, #tpu.memory_space<vmem>>, vector<1x16x256xf32>,
    %92 = vector.extract_strided_slice %79 {offsets = [0, 768], sizes = [16, 256], strides = [1, 1]} : vector<16x1024xf32> to vector<16x256xf32>
    %c3_62 = arith.constant 3 : index
    %c0_63 = arith.constant 0 : index
    %c0_64 = arith.constant 0 : index
    %93 = vector.load %arg8[%c3_62, %c0_63, %c0_64] : memref<4x16x256xf32, #tpu.memory_space<vmem>>, vector<1x16x256xf32>
    %94 = vector.shape_cast %93 : vector<1x16x256xf32> to vector<16x256xf32>
    %95 = vector.shape_cast %92 : vector<16x256xf32> to vector<1x16x256xf32>
    tpu.vector_store %arg8[%c3_62, %c0_63, %c0_64], %95 {strides = array<i32>} : memref<4x16x256xf32, #tpu.memory_space<vmem>>, vector<1x16x256xf32>,
    return
  }
  func.func @transform_0(%arg0: i32) -> (i32, i32, i32) {
    %c0_i32 = arith.constant 0 : i32
    %c0_i32_0 = arith.constant 0 : i32
    %c0_i32_1 = arith.constant 0 : i32
    return %arg0, %c0_i32, %c0_i32_0 : i32, i32, i32
  }
  func.func @transform_1(%arg0: i32) -> (i32, i32) {
    %c0_i32 = arith.constant 0 : i32
    %c0_i32_0 = arith.constant 0 : i32
    %c0_i32_1 = arith.constant 0 : i32
    return %c0_i32, %c0_i32_0 : i32, i32
  }
  func.func @transform_2(%arg0: i32) -> (i32, i32) {
    %c0_i32 = arith.constant 0 : i32
    %c0_i32_0 = arith.constant 0 : i32
    %c0_i32_1 = arith.constant 0 : i32
    return %c0_i32, %c0_i32_0 : i32, i32
  }
  func.func @transform_3(%arg0: i32) -> (i32, i32, i32) {
    %c0_i32 = arith.constant 0 : i32
    %c0_i32_0 = arith.constant 0 : i32
    %c0_i32_1 = arith.constant 0 : i32
    %c0_i32_2 = arith.constant 0 : i32
    return %c0_i32, %c0_i32_0, %c0_i32_1 : i32, i32, i32
  }
  func.func @transform_4(%arg0: i32) -> (i32, i32) {
    %c0_i32 = arith.constant 0 : i32
    %c0_i32_0 = arith.constant 0 : i32
    %c0_i32_1 = arith.constant 0 : i32
    return %c0_i32, %c0_i32_0 : i32, i32
  }
  func.func @transform_5(%arg0: i32) -> (i32, i32) {
    %c0_i32 = arith.constant 0 : i32
    %c0_i32_0 = arith.constant 0 : i32
    %c0_i32_1 = arith.constant 0 : i32
    return %c0_i32, %c0_i32_0 : i32, i32
  }
  func.func @transform_6(%arg0: i32) -> (i32, i32) {
    %c0_i32 = arith.constant 0 : i32
    %c0_i32_0 = arith.constant 0 : i32
    %c0_i32_1 = arith.constant 0 : i32
    return %c0_i32, %c0_i32_0 : i32, i32
  }
  func.func @transform_7(%arg0: i32) -> (i32, i32, i32) {
    %c0_i32 = arith.constant 0 : i32
    %c0_i32_0 = arith.constant 0 : i32
    %c0_i32_1 = arith.constant 0 : i32
    return %arg0, %c0_i32, %c0_i32_0 : i32, i32, i32
  }
}

</mosaic_0001>

<bundles_post_ra>
// kernel: tpu_custom_call.1
= control target key start
LH: loop header
LB: loop body
LE: loop exit
PB: predicated region body
PF: predicated region fallthrough
CT: control target
= control target key end

     0   :  { %s8293_s0 = inlined_call_operand.hbm [shape: bf16[8,8,256], index: 0, kind: input, shape index: {}]   ;;  %s8294_s1 = inlined_call_operand.vmem [shape: bf16[48,8], index: 1, kind: input, shape index: {}]   ;;  %s8295_s2 = inlined_call_operand.vmem [shape: f32[48,1], index: 2, kind: input, shape index: {}]   ;;  %s8296_s3 = inlined_call_operand.hbm [shape: f32[9,48,1024], index: 3, kind: input, shape index: {}]   ;;  %s8297_s4 = inlined_call_operand.vmem [shape: f32[48,1], index: 4, kind: input, shape index: {}]   ;;  %s8298_s5 = inlined_call_operand.hbm [shape: bf16[16,48], index: 5, kind: input, shape index: {}]   ;;  %s8299_s6 = inlined_call_operand.vmem [shape: f32[16,1], index: 6, kind: input, shape index: {}]   ;;  %s8300_s7 = inlined_call_operand.hbm [shape: f32[8,16,256], index: 7, kind: output, shape index: {}]  }
   0x1   :  { %8673 = sst [smem:[#allocation315_spill]] %s8296_s3 }
   0x2   :  { %12 = vsyncpa [#allocation4], 0 }
   0x3   :  { %14 = vsyncpa [#allocation4 + $0x1], 0 }
   0x4   :  { %15 = vsyncpa [#allocation7], 0 }
   0x5   :  { %16 = vsyncpa [#allocation5], 0 }
   0x6   :  { %18 = vsyncpa [#allocation5 + $0x1], 0  ;;  %s4173_s24 = smov 0   ;;  %s4175_s25 = smov 0  }
   0x7   :  { %s4177_s26 = smov 0   ;;  %s4179_s27 = smov 0  }
   0x8 LB: > { %s4194_s28 = sadd.s32 4294967295, %s4112_s27   ;;  %s3796_s29 = sadd.s32 4294967294, %s4112_s27   ;;  %s4112_s27 = sphi %s4179_s27, %s9700_s27   ;;  %s4108_s26 = sphi %s4177_s26, %s9699_s26   ;;  %s4104_s25 = sphi %s4175_s25, %s9698_s25   ;;  %s4100_s24 = sphi %s4173_s24, %s9697_s24  }
   0x9   : > { %p44_p0 = scmp.ne.s32.totalorder %s4104_s25, %s4100_s24  ;;  %p8301_p1 = scmp.eq.s32.totalorder %s4194_s28, 0 }
   0xa   : > { %p200_p3 = scmp.eq.s32.totalorder %s3796_s29, 1  ;;  %p3797_p5 = scmp.ge.s32.totalorder %s4112_s27, 1 }
   0xb   : > { %p4203_p4 = por %p8301_p1, %p44_p0  ;;  %p207_p7 = scmp.lt.s32.totalorder %s4112_s27, 3 }
   0xc   : > { %p4208_p6 = por %p200_p3, %p44_p0  ;;  %s4114_s10 = smov [#allocation6]  }
   0xd   : > { %s8674_s30 = scalar_select %p4203_p4, 1, 0 }
   0xe   : > { %s8675_s8 = scalar_select %p4208_p6, 1, 0 }
   0xf   : > { %p4213_p8 = pnand %p3797_p5, %p207_p7  ;;  %s225_s11 = sshll.u32 %s4114_s10, 4  ;;  %s226_s11 = int_to_ptr.vmem [resolvable:$true] %s225_s11 }
  0x10   : > { %s4115_s13 = smov [#allocation8]   ;;  %s3975_s15 = scalar_lea.vmem %s226_s11, 55296 }
  0x11   : > { %s8676_s9 = scalar_select %p4213_p8, 1, 0 }
  0x12   : > { %p3879_p9 = pneg %p4213_p8  ;;  %s241_s14 = sshll.u32 %s4115_s13, 4  ;;  %s242_s14 = int_to_ptr.vmem [resolvable:$true] %s241_s14 }
  0x13   : > { %p3976_p13 = scmp.ne.s32.totalorder %s226_s11, %s3975_s15  ;;  %p3983_p5 = scmp.lt.s32.totalorder %s226_s11, %s226_s11 }
  0x14   : > { %p4222_p11 = pnand %p3879_p9, %p8301_p1  ;;  %p3984_p7 = scmp.lt.s32.totalorder %s3975_s15, %s3975_s15 }
  0x16   : > { %p3966_p12 = pneg %p4222_p11  ;;  %p3985_p10 = por %p3984_p7, %p3983_p5 }
  0x18   : > { %p3978_p0 = pnand %p3976_p13, %p3966_p12 }
  0x1a   : > { %p3979_p3 = pneg %p3978_p0 }
  0x1c   : > { %p3986_p9 = pnand %p3985_p10, %p3979_p3 }
  0x1e   : > { %3989 = shalt.err (!%p3986_p9)
}
  0x1f   : > { %s4116_s16 = smov 1024   ;;  %s4117_s17 = smov 64  }
  0x20   : > { %s8678_s3 = sld [smem:[#allocation315_spill]]  ;;  %s4001_s20 = scalar_lea.vmem %s242_s14, 128 }
  0x21   : > { %p4002_p1 = scmp.ne.s32.totalorder %s242_s14, %s4001_s20  ;;  %p4009_p2 = scmp.lt.s32.totalorder %s242_s14, %s242_s14 }
  0x22   : > { %p4010_p6 = scmp.lt.s32.totalorder %s4001_s20, %s4001_s20 }
  0x23   : > { %p4004_p13 = pnand %p4002_p1, %p3966_p12 }
  0x24   : > { %p4011_p5 = por %p4010_p6, %p4009_p2 }
  0x25   : > { %p4005_p0 = pneg %p4004_p13 }
  0x26   : > { %3882 = dma.hbm_to_vmem [thread:$0]  (!%p4222_p11), %s8678_s3, 55296, %s226_s11, [#allocation7], %s4116_s16, %s4116_s16, %s4117_s17  }
  0x27   : > { %p4012_p10 = pnand %p4011_p5, %p4005_p0 }
  0x29   : > { %4015 = shalt.err (!%p4012_p10)
}
  0x2a   : > { %s4118_s21 = smov 4   ;;  %s4245_s29 = sadd.s32 1, %s4112_s27  }
  0x2b   : > { %3885 = dma.hbm_to_vmem [thread:$0]  (!%p4222_p11), %s8298_s5, 128, %s242_s14, [#allocation7], %s4117_s17, %s4117_s17, %s4118_s21  }
  0x2c   : > { %s28_s10 = ssub.s32 %s4112_s27, %s4245_s29  ;;  %s31_s11 = sadd.s32 1, %s4108_s26 }
  0x2d   : > { %p29_p1 = scmp.eq.s32.totalorder %s28_s10, 0  ;;  %p38_p2 = scmp.ne.s32.totalorder %s4108_s26, %s4104_s25 }
  0x2e   : > { %p39_p6 = scmp.eq.s32.totalorder %s4112_s27, 0  ;;  %p3896_p12 = scmp.lt.s32.totalorder %s4112_s27, 2 }
  0x2f   : > { %s4255_s12 = scalar_select %p29_p1, %s4108_s26, %s31_s11  }
  0x30   : > { %p40_p3 = por %p39_p6, %p38_p2  ;;  %p8679_p7 = scmp.eq.s32.totalorder %s4194_s28, 1 }
  0x31   : > { %s258_s15 = sand.u32 1, %s4108_s26   ;;  %s3864_s16 = sshll.u32 %s4112_s27, 9 }
  0x32   : > { %p4259_p9 = por %p8679_p7, %p38_p2  ;;  %s3801_s14 = sshll.u32 %s258_s15, 5 }
  0x33   : > { %s4268_s19 = scalar_lea.hbm %s8293_s0, %s3864_s16  ;;  %s262_s20 = scalar_lea.vmem [#allocation3], %s3801_s14 }
  0x34   : > { %s8680_s13 = scalar_select %p4259_p9, 1, 0 }
  0x35   : > { %s270_s21 = sshll.u32 %s262_s20, 4  ;;  %p4270_p11 = pnand %p3896_p12, %p40_p3  ;;  %s4274_s21 = int_to_ptr.vmem [resolvable:$true] %s270_s21 }
  0x36   : > { %s4276_s23 = scalar_lea.sflag [#allocation4], %s258_s15  ;;  %s4016_s10 = scalar_lea.hbm %s4268_s19, 512 }
  0x37   : > { %p4017_p13 = scmp.ne.s32.totalorder %s4268_s19, %s4016_s10  ;;  %p4018_p0 = pneg %p4270_p11 }
  0x38   : > { %s4021_s14 = scalar_lea.hbm %s8293_s0, 1024  ;;  %p4022_p1 = scmp.lt.s32.totalorder %s4268_s19, %s8293_s0 }
  0x39   : > { %p4019_p5 = pnand %p4018_p0, %p4017_p13  ;;  %p4023_p2 = scmp.lt.s32.totalorder %s4021_s14, %s4016_s10 }
  0x3b   : > { %p4020_p10 = pneg %p4019_p5  ;;  %p4024_p6 = por %p4023_p2, %p4022_p1 }
  0x3d   : > { %p4025_p12 = pnand %p4024_p6, %p4020_p10 }
  0x3f   : > { %4028 = shalt.err (!%p4025_p12)
}
  0x40   : > { %s4029_s15 = scalar_lea.vmem %s4274_s21, 512  ;;  %s4119_s20 = smov [#allocation3]  }
  0x41   : > { %p4030_p3 = scmp.ne.s32.totalorder %s4274_s21, %s4029_s15  ;;  %s4034_s3 = sshll.u32 %s4119_s20, 4  ;;  %s4035_s3 = int_to_ptr.vmem [resolvable:$false] %s4034_s3 }
  0x42   : > { %s4036_s11 = scalar_lea.vmem %s4035_s3, 1024  ;;  %p4037_p5 = scmp.lt.s32.totalorder %s4274_s21, %s4035_s3 }
  0x43   : > { %p4032_p7 = pnand %p4030_p3, %p4018_p0  ;;  %p4038_p9 = scmp.lt.s32.totalorder %s4036_s11, %s4029_s15 }
  0x45   : > { %p4033_p13 = pneg %p4032_p7  ;;  %p4039_p4 = por %p4038_p9, %p4037_p5 }
  0x47   : > { %p4040_p8 = pnand %p4039_p4, %p4033_p13 }
  0x49   : > { %4043 = shalt.err (!%p4040_p8)
}
  0x4a   : > { %s4120_s10 = smov 128   ;;  %s4121_s16 = smov 8  }
  0x4b   : > { %3889 = dma.hbm_to_vmem [thread:$0]  (!%p4270_p11), %s4268_s19, 512, %s4274_s21, %s4276_s23, %s4120_s10, %s4120_s10, %s4121_s16  }
  0x4c   : > { %p8682_p0 = scmp.ne.s32.totalorder %s8676_s9, 0 }
  0x4e   : > { %282 = sbr.rel (%p8682_p0) target bundleno = 1482 (0x5ca), region = 48 }
  0x53   : > { %s4300_s14 = sand.u32 1, %s4104_s25   ;;  %p8683_p4 = scmp.ne.s32.totalorder %s8674_s30, 0 }
  0x54   : > { %s3806_s3 = sshll.u32 %s4300_s14, 5  ;;  %s285_s17 = scalar_lea.sflag [#allocation4], %s4300_s14 }
  0x55   : > { %s288_s18 = scalar_lea.vmem [#allocation3], %s3806_s3 }
  0x56   : > { %4087 = dma.done.wait (%p8683_p4), %s285_s17, 512  }
  0x57   : > { %4089 = vsyncadd (%p8683_p4), %s285_s17, 4294966784  ;;  %p8684_p8 = scmp.eq.s32.totalorder %s4194_s28, 0 }
  0x59   : > { %4091 = dma.done.wait (%p8684_p8), [#allocation7], 55424   ;;  %p8685_p9 = pmov %p8684_p8 }
  0x5a   : > { %v8305_v0 = vmov 0   ;;  %v330_v1 = vld [vmem:[%s288_s18] sm:$0xff]  ;;  %vm432_vm0 = vcmask 1043456   ;;  %v3810_v2 = vld [vmem:[%s288_s18 + $0x8] sm:$0xff]  ;;  %v3811_v10 = vld [vmem:[%s288_s18 + $0x10] sm:$0xff]  ;;  %vm422_vm1 = vcmask 64512  }
  0x5b   : > { %4093 = vsyncadd (%p8685_p9), [#allocation7], 4294911872  ;;  %489 = vmatprep.mubr.bf16.mxu0 %v8305_v0  ;;  %552 = vmatprep.mubr.bf16.mxu1 %v8305_v0  ;;  %v3817_v3 = vcombine.high %v330_v1, %v330_v1  ;;  %v3819_v4 = vcombine.high %v3810_v2, %v3810_v2  ;;  %v3816_v5 = vcombine.low %v330_v1, %v330_v1  ;;  %v3955_v9 = vld [vmem:[%s8294_s1] sm:$0xff]   ;;  %v3812_v12 = vld [vmem:[%s288_s18 + $0x18] sm:$0xff]  ;;  %s4123_s22 = smov 17   ;;  %s4124_s23 = smov 16  }
  0x5c   : > { %3949 = vset.pattern.permute.xlu0 %v8305_v0  ;;  %3950 = vset.pattern.permute.xlu1 %v8305_v0  ;;  %v3818_v6 = vcombine.low %v3810_v2, %v3810_v2  ;;  %v3821_v11 = vcombine.high %v3811_v10, %v3811_v10  ;;  %v3820_v13 = vcombine.low %v3811_v10, %v3811_v10  ;;  %v351_v14 = vld [vmem:[%s8295_s2] sm:$0xff]  ;;  %v353_v17 = vld [vmem:[%s8295_s2 + $0x10] sm:$0xff]  ;;  %v352_v20 = vld [vmem:[%s8295_s2 + $0x8] sm:$0xff]  ;;  %s4125_s15 = smov 15   ;;  %s4126_s20 = smov 1   ;;  %vm3494_vm10 = vcmask 392192  }
  0x5d   : > { %3824 = vmatprep.subr.msk.bf16.mxu0 %vm432_vm0, %v3817_v3  ;;  %3828 = vmatprep.subr.msk.bf16.mxu1 %vm432_vm0, %v3819_v4  ;;  %v434_v7 = vsel %vm432_vm0, %v3816_v5, 0  ;;  %v3823_v15 = vcombine.high %v3812_v12, %v3812_v12  ;;  %v3822_v16 = vcombine.low %v3812_v12, %v3812_v12  ;;  %v354_v21 = vld [vmem:[%s8295_s2 + $0x18] sm:$0xff]  ;;  %v3956_v22 = vld [vmem:[%s8294_s1 + $0x8] sm:$0xff]   ;;  %v355_v23 = vld [vmem:[%s8295_s2 + $0x20] sm:$0xff]  ;;  %s4127_s11 = smov 127   ;;  %s4128_s10 = smov 113  }
  0x5e   : > { %v440_v8 = vsel %vm432_vm0, %v3818_v6, 0  ;;  %472 = vmatpush1.bf16.msra.mxu0 %v434_v7  ;;  %359 = vperm.xlu0 %3949, %v351_v14   ;;  %v446_v18 = vsel %vm432_vm0, %v3820_v13, 0  ;;  %v356_v24 = vld [vmem:[%s8295_s2 + $0x28] sm:$0xff]  ;;  %v3957_v25 = vld [vmem:[%s8294_s1 + $0x10] sm:$0xff]   ;;  %s4129_s16 = smov 112   ;;  %s4130_s3 = smov 111  }
  0x5f   : > { %535 = vmatpush1.bf16.msra.mxu1 %v440_v8  ;;  %3832 = vmatprep.subr.msk.bf16.mxu0 %vm432_vm0, %v3821_v11  ;;  %v452_v19 = vsel %vm432_vm0, %v3822_v16, 0  ;;  %s3866_s21 = sshll.u32 %s4194_s28, 11  ;;  %s3690_s28 = scalar_lea.sflag [#allocation5], %s4300_s14 }
  0x60   : > { %369 = vperm.xlu1 %3950, %v353_v17   ;;  %3836 = vmatprep.subr.msk.bf16.mxu1 %vm432_vm0, %v3823_v15  ;;  %p9694_p10 = scmp.ne.s32.totalorder %s8680_s13, 0  ;;  %s4131_s18 = smov [#allocation9]  }
  0x61   : > { %3825 = vmatmul.mubr.msk.bf16.vlgmr.msra.gmra.mxu0 %vm422_vm1, %v3955_v9 }
  0x62   : > { %3829 = vmatmul.mubr.msk.bf16.vlgmr.msra.gmra.mxu1 %vm422_vm1, %v3955_v9  ;;  %499 = vmatprep.mubr.bf16.mxu0 %v8305_v0 }
  0x63   : > { %562 = vmatprep.mubr.bf16.mxu1 %v8305_v0  ;;  %598 = vmatpush1.bf16.msra.mxu0 %v446_v18 }
  0x64   : > { %661 = vmatpush1.bf16.msra.mxu1 %v452_v19  ;;  %364 = vperm.xlu0 %3949, %v352_v20  }
  0x65   : > { %374 = vperm.xlu1 %3950, %v354_v21  }
  0x68   : > { %379 = vperm.xlu0 %3949, %v355_v23  }
  0x69   : > { %3826 = vmatmul.mubr.msk.bf16.gmra.mxu0 %vm422_vm1, %v3956_v22  ;;  %384 = vperm.xlu1 %3950, %v356_v24  }
  0x6a   : > { %3830 = vmatmul.mubr.msk.bf16.gmra.mxu1 %vm422_vm1, %v3956_v22  ;;  %509 = vmatprep.mubr.bf16.mxu0 %v8305_v0 }
  0x6b   : > { %572 = vmatprep.mubr.bf16.mxu1 %v8305_v0 }
  0x71   : > { %3827 = vmatmul.mubr.msk.bf16.gmra.mxu0 %vm422_vm1, %v3957_v25 }
  0x72   : > { %3831 = vmatmul.mubr.msk.bf16.gmra.mxu1 %vm422_vm1, %v3957_v25  ;;  %615 = vmatprep.mubr.bf16.mxu0 %v8305_v0 }
  0x73   : > { %678 = vmatprep.mubr.bf16.mxu1 %v8305_v0 }
  0x79   : > { %3833 = vmatmul.mubr.msk.bf16.vlgmr.msra.gmra.mxu0 %vm422_vm1, %v3955_v9 }
  0x7a   : > { %3837 = vmatmul.mubr.msk.bf16.vlgmr.msra.gmra.mxu1 %vm422_vm1, %v3955_v9  ;;  %625 = vmatprep.mubr.bf16.mxu0 %v8305_v0 }
  0x7b   : > { %688 = vmatprep.mubr.bf16.mxu1 %v8305_v0 }
  0x81   : > { %3834 = vmatmul.mubr.msk.bf16.gmra.mxu0 %vm422_vm1, %v3956_v22 }
  0x82   : > { %3838 = vmatmul.mubr.msk.bf16.gmra.mxu1 %vm422_vm1, %v3956_v22  ;;  %635 = vmatprep.mubr.bf16.mxu0 %v8305_v0 }
  0x83   : > { %698 = vmatprep.mubr.bf16.mxu1 %v8305_v0 }
  0x89   : > { %3835 = vmatmul.mubr.msk.bf16.gmra.mxu0 %vm422_vm1, %v3957_v25 }
  0x8a   : > { %3839 = vmatmul.mubr.msk.bf16.gmra.mxu1 %vm422_vm1, %v3957_v25  ;;  %3530 = vmatprep.mubr.bf16.mxu0 %v8305_v0 }
  0x8b   : > { %3573 = vmatprep.mubr.bf16.mxu1 %v8305_v0 }
  0xd9   : > { %v4375_v26 = vpop.permute.xlu0 %359 }
  0xdb   : > { %v4437_v61 = vpop.permute.xlu1 %369 }
  0xdf   : > { %v4379_v36 = vpop.permute.xlu0 %364 }
  0xe0   : > { %v4446_v3 = vpop.permute.xlu1 %374 }
 0x121   : > { %v491_v27 = vpop.f32.mrf.mxu0 }
 0x122   : > { %v554_v28 = vpop.f32.mrf.mxu1  ;;  %v492_v29 = vadd.f32 %v491_v27, %v4375_v26 }
 0x123   : > { %v555_v30 = vadd.f32 %v554_v28, %v4375_v26  ;;  %v493_v31 = vpop.f32.mrf.mxu0 }
 0x124   : > { %v556_v32 = vpop.f32.mrf.mxu1  ;;  %v709_v33 = vmax.f32 %v492_v29, 0.0  ;;  %v494_v46 = vadd.f32 %v493_v31, %v4375_v26 }
 0x125   : > { %v495_v34 = vpop.f32.mrf.mxu0  ;;  %v711_v38 = vmax.f32 %v555_v30, 0.0  ;;  %v557_v49 = vadd.f32 %v556_v32, %v4375_v26 }
 0x126   : > { %v558_v35 = vpop.f32.mrf.mxu1  ;;  %v4381_v37 = vmin.f32 %v709_v33, 6.0  ;;  %v496_v39 = vadd.f32 %v495_v34, %v4379_v36  ;;  %v710_v48 = vmax.f32 %v494_v46, 0.0  ;;  %v4515_v33 = vpop.permute.xlu0 %379 }
 0x127   : > { %v559_v40 = vadd.f32 %v558_v35, %v4379_v36  ;;  %v4387_v42 = vmin.f32 %v711_v38, 6.0  ;;  %v497_v47 = vpop.f32.mrf.mxu0  ;;  %v712_v53 = vmax.f32 %v557_v49, 0.0 }
 0x128   : > { %8686 = vst [vmem:[#allocation13_spill] sm:$0xff] %v4381_v37  ;;  %805 = vrot.lane.b32.xlu0 %v4381_v37, %s4123_s22  ;;  %v717_v41 = vmax.f32 %v496_v39, 0.0  ;;  %v498_v50 = vadd.f32 %v497_v47, %v4379_v36  ;;  %v560_v51 = vpop.f32.mrf.mxu1  ;;  %v4416_v52 = vmin.f32 %v710_v48, 6.0  ;;  %v4520_v39 = vpop.permute.xlu1 %384 }
 0x129   : > { %8687 = vst [vmem:[#allocation14_spill] sm:$0xff] %v4387_v42  ;;  %v719_v44 = vmax.f32 %v559_v40, 0.0  ;;  %v561_v55 = vadd.f32 %v560_v51, %v4379_v36  ;;  %v4423_v56 = vmin.f32 %v712_v53, 6.0  ;;  %v501_v60 = vpop.f32.mrf.mxu0 }
 0x12a   : > { %v4389_v43 = vmin.f32 %v717_v41, 6.0  ;;  %8690 = vst [vmem:[#allocation17_spill] sm:$0xff] %v4416_v52  ;;  %v718_v54 = vmax.f32 %v498_v50, 0.0  ;;  %v502_v62 = vadd.f32 %v501_v60, %v4437_v61  ;;  %v564_v63 = vpop.f32.mrf.mxu1 }
 0x12b   : > { %v4395_v45 = vmin.f32 %v719_v44, 6.0  ;;  %8691 = vst [vmem:[#allocation18_spill] sm:$0xff] %v4423_v56  ;;  %v720_v58 = vmax.f32 %v561_v55, 0.0  ;;  %v503_v1 = vpop.f32.mrf.mxu0  ;;  %v565_v6 = vadd.f32 %v564_v63, %v4437_v61 }
 0x12c   : > { %8688 = vst [vmem:[#allocation15_spill] sm:$0xff] %v4389_v43  ;;  %829 = vrot.lane.b32.xlu0 %v4387_v42, %s4123_s22  ;;  %807 = vrot.lane.b32.xlu1 %v4389_v43, %s4123_s22  ;;  %v4425_v57 = vmin.f32 %v718_v54, 6.0  ;;  %v725_v2 = vmax.f32 %v502_v62, 0.0  ;;  %v566_v4 = vpop.f32.mrf.mxu1  ;;  %v504_v17 = vadd.f32 %v503_v1, %v4437_v61 }
 0x12d   : > { %8689 = vst [vmem:[#allocation16_spill] sm:$0xff] %v4395_v45  ;;  %v4431_v59 = vmin.f32 %v720_v58, 6.0  ;;  %v505_v5 = vpop.f32.mrf.mxu0  ;;  %v727_v10 = vmax.f32 %v565_v6, 0.0  ;;  %v567_v19 = vadd.f32 %v566_v4, %v4437_v61 }
 0x12e   : > { %8692 = vst [vmem:[#allocation19_spill] sm:$0xff] %v4425_v57  ;;  %v506_v7 = vadd.f32 %v505_v5, %v4446_v3  ;;  %v4452_v8 = vmin.f32 %v725_v2, 6.0  ;;  %v568_v9 = vpop.f32.mrf.mxu1  ;;  %v726_v20 = vmax.f32 %v504_v17, 0.0 }
 0x12f   : > { %v569_v11 = vadd.f32 %v568_v9, %v4446_v3  ;;  %v4463_v13 = vmin.f32 %v727_v10, 6.0  ;;  %v507_v18 = vpop.f32.mrf.mxu0  ;;  %v728_v23 = vmax.f32 %v567_v19, 0.0 }
 0x130   : > { %1096 = vrot.lane.b32.xlu0 %v4381_v37, %s4124_s23  ;;  %831 = vrot.lane.b32.xlu1 %v4395_v45, %s4123_s22  ;;  %v733_v12 = vmax.f32 %v506_v7, 0.0  ;;  %v508_v21 = vadd.f32 %v507_v18, %v4446_v3  ;;  %v570_v22 = vpop.f32.mrf.mxu1  ;;  %v4492_v24 = vmin.f32 %v726_v20, 6.0 }
 0x131   : > { %v735_v14 = vmax.f32 %v569_v11, 0.0  ;;  %v571_v25 = vadd.f32 %v570_v22, %v4446_v3  ;;  %v4499_v28 = vmin.f32 %v728_v23, 6.0  ;;  %v511_v32 = vpop.f32.mrf.mxu0 }
 0x132   : > { %v4465_v15 = vmin.f32 %v733_v12, 6.0  ;;  %v734_v27 = vmax.f32 %v508_v21, 0.0  ;;  %v512_v34 = vadd.f32 %v511_v32, %v4515_v33  ;;  %v574_v35 = vpop.f32.mrf.mxu1 }
 0x133   : > { %v4471_v16 = vmin.f32 %v735_v14, 6.0  ;;  %v736_v29 = vmax.f32 %v571_v25, 0.0  ;;  %v513_v38 = vpop.f32.mrf.mxu0  ;;  %v575_v41 = vadd.f32 %v574_v35, %v4515_v33 }
 0x134   : > { %1120 = vrot.lane.b32.xlu0 %v4387_v42, %s4124_s23  ;;  %1098 = vrot.lane.b32.xlu1 %v4389_v43, %s4124_s23  ;;  %v4501_v30 = vmin.f32 %v734_v27, 6.0  ;;  %v741_v40 = vmax.f32 %v512_v34, 0.0  ;;  %v576_v44 = vpop.f32.mrf.mxu1  ;;  %v514_v62 = vadd.f32 %v513_v38, %v4515_v33 }
 0x135   : > { %v4507_v31 = vmin.f32 %v736_v29, 6.0  ;;  %v515_v46 = vpop.f32.mrf.mxu0  ;;  %v743_v49 = vmax.f32 %v575_v41, 0.0  ;;  %v577_v1 = vadd.f32 %v576_v44, %v4515_v33 }
 0x136   : > { %v516_v47 = vadd.f32 %v515_v46, %v4520_v39  ;;  %v4532_v48 = vmin.f32 %v741_v40, 6.0  ;;  %v578_v50 = vpop.f32.mrf.mxu1  ;;  %v742_v63 = vmax.f32 %v514_v62, 0.0 }
 0x137   : > { %8693 = vst [vmem:[#allocation20_spill] sm:$0xff] %v4507_v31  ;;  %v579_v51 = vadd.f32 %v578_v50, %v4520_v39  ;;  %v4539_v54 = vmin.f32 %v743_v49, 6.0  ;;  %v517_v2 = vpop.f32.mrf.mxu0  ;;  %v744_v7 = vmax.f32 %v577_v1, 0.0 }
 0x138   : > { %1386 = vrot.lane.b32.xlu0 %v4381_v37, %s4125_s15  ;;  %1122 = vrot.lane.b32.xlu1 %v4395_v45, %s4124_s23  ;;  %v749_v53 = vmax.f32 %v516_v47, 0.0  ;;  %v518_v5 = vadd.f32 %v517_v2, %v4520_v39  ;;  %v4570_v6 = vmin.f32 %v742_v63, 6.0  ;;  %v580_v9 = vpop.f32.mrf.mxu1 }
 0x139   : > { %v751_v55 = vmax.f32 %v579_v51, 0.0  ;;  %v581_v11 = vadd.f32 %v580_v9, %v4520_v39  ;;  %v4581_v17 = vmin.f32 %v744_v7, 6.0  ;;  %v617_v27 = vpop.f32.mrf.mxu0 }
 0x13a   : > { %v4541_v58 = vmin.f32 %v749_v53, 6.0  ;;  %v750_v12 = vmax.f32 %v518_v5, 0.0  ;;  %v680_v34 = vpop.f32.mrf.mxu1  ;;  %v618_v38 = vadd.f32 %v617_v27, %v4375_v26 }
 0x13b   : > { %v4547_v60 = vmin.f32 %v751_v55, 6.0  ;;  %v752_v19 = vmax.f32 %v581_v11, 0.0  ;;  %v619_v35 = vpop.f32.mrf.mxu0  ;;  %v681_v49 = vadd.f32 %v680_v34, %v4375_v26 }
 0x13c   : > { %1410 = vrot.lane.b32.xlu0 %v4387_v42, %s4125_s15  ;;  %1388 = vrot.lane.b32.xlu1 %v4389_v43, %s4125_s15  ;;  %v4585_v20 = vmin.f32 %v750_v12, 6.0  ;;  %v682_v44 = vpop.f32.mrf.mxu1  ;;  %v713_v47 = vmax.f32 %v618_v38, 0.0 }
 0x13d   : > { %v4595_v23 = vmin.f32 %v752_v19, 6.0  ;;  %v621_v46 = vpop.f32.mrf.mxu0  ;;  %v715_v63 = vmax.f32 %v681_v49, 0.0 }
 0x13e   : > { %v622_v51 = vadd.f32 %v621_v46, %v4379_v36  ;;  %v684_v55 = vpop.f32.mrf.mxu1  ;;  %v4630_v62 = vmin.f32 %v713_v47, 6.0  ;;  %v620_v47 = vadd.f32 %v619_v35, %v4375_v26 }
 0x13f   : > { %v685_v5 = vadd.f32 %v684_v55, %v4379_v36  ;;  %v4641_v9 = vmin.f32 %v715_v63, 6.0  ;;  %v623_v55 = vpop.f32.mrf.mxu0 }
 0x140   : > { %817 = vrot.lane.b32.xlu0 %v4416_v52, %s4123_s22  ;;  %1412 = vrot.lane.b32.xlu1 %v4395_v45, %s4125_s15  ;;  %v721_v2 = vmax.f32 %v622_v51, 0.0  ;;  %v714_v63 = vmax.f32 %v620_v47, 0.0  ;;  %v686_v35 = vpop.f32.mrf.mxu1 }
 0x141   : > { %8707 = vst [vmem:[#allocation34_spill] sm:$0xff] %v4641_v9  ;;  %v723_v19 = vmax.f32 %v685_v5, 0.0 }
 0x142   : > { %v4645_v12 = vmin.f32 %v721_v2, 6.0  ;;  %v683_v2 = vadd.f32 %v682_v44, %v4375_v26  ;;  %v687_v26 = vadd.f32 %v686_v35, %v4379_v36 }
 0x143   : > { %v4655_v38 = vmin.f32 %v723_v19, 6.0  ;;  %v624_v19 = vadd.f32 %v623_v55, %v4379_v36  ;;  %v690_v36 = vpop.f32.mrf.mxu1 }
 0x144   : > { %841 = vrot.lane.b32.xlu0 %v4423_v56, %s4123_s22  ;;  %819 = vrot.lane.b32.xlu1 %v4425_v57, %s4123_s22 }
 0x145   : > { %8711 = vst [vmem:[#allocation38_spill] sm:$0xff] %v4655_v38  ;;  %v722_v47 = vmax.f32 %v624_v19, 0.0 }
 0x148   : > { %1108 = vrot.lane.b32.xlu0 %v4416_v52, %s4124_s23  ;;  %843 = vrot.lane.b32.xlu1 %v4431_v59, %s4123_s22 }
 0x14c   : > { %1132 = vrot.lane.b32.xlu0 %v4423_v56, %s4124_s23  ;;  %1110 = vrot.lane.b32.xlu1 %v4425_v57, %s4124_s23 }
 0x150   : > { %1398 = vrot.lane.b32.xlu0 %v4416_v52, %s4125_s15  ;;  %1134 = vrot.lane.b32.xlu1 %v4431_v59, %s4124_s23 }
 0x154   : > { %1422 = vrot.lane.b32.xlu0 %v4423_v56, %s4125_s15  ;;  %1400 = vrot.lane.b32.xlu1 %v4425_v57, %s4125_s15 }
 0x158   : > { %809 = vrot.lane.b32.xlu0 %v4452_v8, %s4123_s22  ;;  %1424 = vrot.lane.b32.xlu1 %v4431_v59, %s4125_s15 }
 0x15c   : > { %833 = vrot.lane.b32.xlu0 %v4463_v13, %s4123_s22  ;;  %811 = vrot.lane.b32.xlu1 %v4465_v15, %s4123_s22 }
 0x160   : > { %1100 = vrot.lane.b32.xlu0 %v4452_v8, %s4124_s23  ;;  %835 = vrot.lane.b32.xlu1 %v4471_v16, %s4123_s22 }
 0x164   : > { %1124 = vrot.lane.b32.xlu0 %v4463_v13, %s4124_s23  ;;  %1102 = vrot.lane.b32.xlu1 %v4465_v15, %s4124_s23 }
 0x168   : > { %1390 = vrot.lane.b32.xlu0 %v4452_v8, %s4125_s15  ;;  %1126 = vrot.lane.b32.xlu1 %v4471_v16, %s4124_s23 }
 0x16c   : > { %1414 = vrot.lane.b32.xlu0 %v4463_v13, %s4125_s15  ;;  %1392 = vrot.lane.b32.xlu1 %v4465_v15, %s4125_s15 }
 0x170   : > { %821 = vrot.lane.b32.xlu0 %v4492_v24, %s4123_s22  ;;  %1416 = vrot.lane.b32.xlu1 %v4471_v16, %s4125_s15 }
 0x174   : > { %845 = vrot.lane.b32.xlu0 %v4499_v28, %s4123_s22  ;;  %823 = vrot.lane.b32.xlu1 %v4501_v30, %s4123_s22 }
 0x178   : > { %1112 = vrot.lane.b32.xlu0 %v4492_v24, %s4124_s23  ;;  %847 = vrot.lane.b32.xlu1 %v4507_v31, %s4123_s22 }
 0x17c   : > { %1136 = vrot.lane.b32.xlu0 %v4499_v28, %s4124_s23  ;;  %1114 = vrot.lane.b32.xlu1 %v4501_v30, %s4124_s23 }
 0x180   : > { %1402 = vrot.lane.b32.xlu0 %v4492_v24, %s4125_s15  ;;  %1138 = vrot.lane.b32.xlu1 %v4507_v31, %s4124_s23 }
 0x184   : > { %1426 = vrot.lane.b32.xlu0 %v4499_v28, %s4125_s15  ;;  %1404 = vrot.lane.b32.xlu1 %v4501_v30, %s4125_s15 }
 0x188   : > { %813 = vrot.lane.b32.xlu0 %v4532_v48, %s4123_s22  ;;  %1428 = vrot.lane.b32.xlu1 %v4507_v31, %s4125_s15 }
 0x18c   : > { %837 = vrot.lane.b32.xlu0 %v4539_v54, %s4123_s22  ;;  %815 = vrot.lane.b32.xlu1 %v4541_v58, %s4123_s22 }
 0x190   : > { %1104 = vrot.lane.b32.xlu0 %v4532_v48, %s4124_s23  ;;  %839 = vrot.lane.b32.xlu1 %v4547_v60, %s4123_s22 }
 0x194   : > { %1128 = vrot.lane.b32.xlu0 %v4539_v54, %s4124_s23  ;;  %1106 = vrot.lane.b32.xlu1 %v4541_v58, %s4124_s23 }
 0x198   : > { %1394 = vrot.lane.b32.xlu0 %v4532_v48, %s4125_s15  ;;  %1130 = vrot.lane.b32.xlu1 %v4547_v60, %s4124_s23 }
 0x19a   : > { %v4563_v4 = vpop.permute.xlu0 %805 }
 0x19b   : > { %8694 = vst [vmem:[#allocation21_spill] sm:$0xff] %v4563_v4 }
 0x19c   : > { %1418 = vrot.lane.b32.xlu0 %v4539_v54, %s4125_s15  ;;  %1396 = vrot.lane.b32.xlu1 %v4541_v58, %s4125_s15 }
 0x19e   : > { %v4572_v10 = vpop.permute.xlu0 %829  ;;  %v4575_v14 = vpop.permute.xlu1 %807 }
 0x19f   : > { %8695 = vst [vmem:[#allocation22_spill] sm:$0xff] %v4575_v14 }
 0x1a0   : > { %825 = vrot.lane.b32.xlu0 %v4570_v6, %s4123_s22  ;;  %1420 = vrot.lane.b32.xlu1 %v4547_v60, %s4125_s15 }
 0x1a2   : > { %v4583_v18 = vpop.permute.xlu0 %1096  ;;  %v4587_v21 = vpop.permute.xlu1 %831 }
 0x1a3   : > { %8696 = vst [vmem:[#allocation23_spill] sm:$0xff] %v4583_v18  ;;  %8697 = vst [vmem:[#allocation24_spill] sm:$0xff] %v4587_v21  ;;  %v1976_v21 = vld [vmem:[#allocation6 + $0x648] sm:$0xff]  ;;  %v1999_v18 = vld [vmem:[#allocation6 + $0x700] sm:$0xff] }
 0x1a4   : > { %849 = vrot.lane.b32.xlu0 %v4581_v17, %s4123_s22  ;;  %827 = vrot.lane.b32.xlu1 %v4585_v20, %s4123_s22 }
 0x1a6   : > { %v4593_v22 = vpop.permute.xlu0 %1120  ;;  %v4597_v25 = vpop.permute.xlu1 %1098 }
 0x1a7   : > { %8698 = vst [vmem:[#allocation25_spill] sm:$0xff] %v4593_v22  ;;  %8699 = vst [vmem:[#allocation26_spill] sm:$0xff] %v4597_v25 }
 0x1a8   : > { %1116 = vrot.lane.b32.xlu0 %v4570_v6, %s4124_s23  ;;  %851 = vrot.lane.b32.xlu1 %v4595_v23, %s4123_s22 }
 0x1aa   : > { %v4603_v29 = vpop.permute.xlu0 %1386  ;;  %v4605_v32 = vpop.permute.xlu1 %1122 }
 0x1ab   : > { %8700 = vst [vmem:[#allocation27_spill] sm:$0xff] %v4603_v29  ;;  %8701 = vst [vmem:[#allocation28_spill] sm:$0xff] %v4605_v32 }
 0x1ac   : > { %1140 = vrot.lane.b32.xlu0 %v4581_v17, %s4124_s23  ;;  %1118 = vrot.lane.b32.xlu1 %v4585_v20, %s4124_s23 }
 0x1ae   : > { %v4612_v40 = vpop.permute.xlu0 %1410  ;;  %v4614_v41 = vpop.permute.xlu1 %1388 }
 0x1af   : > { %8702 = vst [vmem:[#allocation29_spill] sm:$0xff] %v4612_v40  ;;  %8703 = vst [vmem:[#allocation30_spill] sm:$0xff] %v4614_v41  ;;  %v4682_v41 = vmin.f32 %v714_v63, 6.0  ;;  %v4697_v63 = vmin.f32 %v722_v47, 6.0  ;;  %v692_v47 = vpop.f32.mrf.mxu1 }
 0x1b0   : > { %1406 = vrot.lane.b32.xlu0 %v4570_v6, %s4125_s15  ;;  %1142 = vrot.lane.b32.xlu1 %v4595_v23, %s4124_s23 }
 0x1b1   : > { %8717 = vst [vmem:[#allocation44_spill] sm:$0xff] %v4682_v41  ;;  %8722 = vst [vmem:[#allocation49_spill] sm:$0xff] %v4697_v63 }
 0x1b2   : > { %v4621_v50 = vpop.permute.xlu0 %817  ;;  %v4624_v53 = vpop.permute.xlu1 %1412 }
 0x1b3   : > { %8704 = vst [vmem:[#allocation31_spill] sm:$0xff] %v4624_v53  ;;  %v716_v53 = vmax.f32 %v683_v2, 0.0  ;;  %v724_v2 = vmax.f32 %v687_v26, 0.0 }
 0x1b4   : > { %1430 = vrot.lane.b32.xlu0 %v4581_v17, %s4125_s15  ;;  %1408 = vrot.lane.b32.xlu1 %v4585_v20, %s4125_s15 }
 0x1b5   : > { %v4693_v55 = vmin.f32 %v716_v53, 6.0 }
 0x1b6   : > { %v4632_v1 = vpop.permute.xlu0 %841  ;;  %v4635_v7 = vpop.permute.xlu1 %819 }
 0x1b7   : > { %8705 = vst [vmem:[#allocation32_spill] sm:$0xff] %v4632_v1  ;;  %8706 = vst [vmem:[#allocation33_spill] sm:$0xff] %v4635_v7  ;;  %v1993_v1 = vld [vmem:[#allocation6 + $0x6d0] sm:$0xff] }
 0x1b8   : > { %853 = vrot.lane.b32.xlu0 %v4630_v62, %s4123_s22  ;;  %1432 = vrot.lane.b32.xlu1 %v4595_v23, %s4125_s15  ;;  %8720 = vst [vmem:[#allocation47_spill] sm:$0xff] %v4693_v55 }
 0x1ba   : > { %v4643_v11 = vpop.permute.xlu0 %1108  ;;  %v4647_v27 = vpop.permute.xlu1 %843 }
 0x1bb   : > { %8708 = vst [vmem:[#allocation35_spill] sm:$0xff] %v4643_v11  ;;  %8709 = vst [vmem:[#allocation36_spill] sm:$0xff] %v4647_v27 }
 0x1bc   : > { %877 = vrot.lane.b32.xlu0 %v4641_v9, %s4123_s22  ;;  %855 = vrot.lane.b32.xlu1 %v4645_v12, %s4123_s22 }
 0x1be   : > { %v4653_v34 = vpop.permute.xlu0 %1132  ;;  %v4657_v46 = vpop.permute.xlu1 %1110 }
 0x1bf   : > { %8710 = vst [vmem:[#allocation37_spill] sm:$0xff] %v4653_v34  ;;  %8712 = vst [vmem:[#allocation39_spill] sm:$0xff] %v4657_v46 }
 0x1c0   : > { %1144 = vrot.lane.b32.xlu0 %v4630_v62, %s4124_s23  ;;  %879 = vrot.lane.b32.xlu1 %v4655_v38, %s4123_s22 }
 0x1c2   : > { %v4664_v49 = vpop.permute.xlu0 %1398  ;;  %v4666_v51 = vpop.permute.xlu1 %1134 }
 0x1c3   : > { %8713 = vst [vmem:[#allocation40_spill] sm:$0xff] %v4664_v49  ;;  %8714 = vst [vmem:[#allocation41_spill] sm:$0xff] %v4666_v51 }
 0x1c4   : > { %1168 = vrot.lane.b32.xlu0 %v4641_v9, %s4124_s23  ;;  %1146 = vrot.lane.b32.xlu1 %v4645_v12, %s4124_s23 }
 0x1c6   : > { %v4673_v5 = vpop.permute.xlu0 %1422  ;;  %v4676_v0 = vpop.permute.xlu1 %1400 }
 0x1c7   : > { %8715 = vst [vmem:[#allocation42_spill] sm:$0xff] %v4673_v5  ;;  %8716 = vst [vmem:[#allocation43_spill] sm:$0xff] %v4676_v0  ;;  %v627_v0 = vpop.f32.mrf.mxu0 }
 0x1c8   : > { %1434 = vrot.lane.b32.xlu0 %v4630_v62, %s4125_s15  ;;  %1170 = vrot.lane.b32.xlu1 %v4655_v38, %s4124_s23  ;;  %v628_v35 = vadd.f32 %v627_v0, %v4437_v61 }
 0x1c9   : > { %v629_v19 = vpop.f32.mrf.mxu0 }
 0x1ca   : > { %v4684_v29 = vpop.permute.xlu0 %809  ;;  %v4687_v44 = vpop.permute.xlu1 %1424  ;;  %v729_v49 = vmax.f32 %v628_v35, 0.0 }
 0x1cb   : > { %8718 = vst [vmem:[#allocation45_spill] sm:$0xff] %v4684_v29  ;;  %8719 = vst [vmem:[#allocation46_spill] sm:$0xff] %v4687_v44  ;;  %v4708_v44 = vmin.f32 %v724_v2, 6.0  ;;  %v631_v26 = vpop.f32.mrf.mxu0  ;;  %v694_v2 = vpop.f32.mrf.mxu1 }
 0x1cc   : > { %865 = vrot.lane.b32.xlu0 %v4682_v41, %s4123_s22  ;;  %1436 = vrot.lane.b32.xlu1 %v4645_v12, %s4125_s15  ;;  %v632_v0 = vadd.f32 %v631_v26, %v4446_v3  ;;  %v4726_v51 = vmin.f32 %v729_v49, 6.0 }
 0x1cd   : > { %8725 = vst [vmem:[#allocation52_spill] sm:$0xff] %v4708_v44 }
 0x1ce   : > { %v4695_v5 = vpop.permute.xlu0 %833  ;;  %v4699_v29 = vpop.permute.xlu1 %811  ;;  %v737_v35 = vmax.f32 %v632_v0, 0.0  ;;  %v630_v0 = vadd.f32 %v629_v19, %v4437_v61 }
 0x1cf   : > { %8721 = vst [vmem:[#allocation48_spill] sm:$0xff] %v4695_v5  ;;  %8723 = vst [vmem:[#allocation50_spill] sm:$0xff] %v4699_v29  ;;  %v691_v29 = vadd.f32 %v690_v36, %v4437_v61  ;;  %v695_v36 = vadd.f32 %v694_v2, %v4446_v3 }
 0x1d0   : > { %889 = vrot.lane.b32.xlu0 %v4693_v55, %s4123_s22  ;;  %867 = vrot.lane.b32.xlu1 %v4697_v63, %s4123_s22  ;;  %v4741_v49 = vmin.f32 %v737_v35, 6.0  ;;  %v693_v35 = vadd.f32 %v692_v47, %v4437_v61 }
 0x1d2   : > { %v4706_v53 = vpop.permute.xlu0 %1100  ;;  %v4710_v5 = vpop.permute.xlu1 %835 }
 0x1d3   : > { %8724 = vst [vmem:[#allocation51_spill] sm:$0xff] %v4706_v53  ;;  %8726 = vst [vmem:[#allocation53_spill] sm:$0xff] %v4710_v5  ;;  %v731_v5 = vmax.f32 %v691_v29, 0.0  ;;  %v739_v29 = vmax.f32 %v695_v36, 0.0  ;;  %v633_v36 = vpop.f32.mrf.mxu0 }
 0x1d4   : > { %1156 = vrot.lane.b32.xlu0 %v4682_v41, %s4124_s23  ;;  %891 = vrot.lane.b32.xlu1 %v4708_v44, %s4123_s22  ;;  %v634_v19 = vadd.f32 %v633_v36, %v4446_v3 }
 0x1d5   : > { %v4737_v26 = vmin.f32 %v731_v5, 6.0 }
 0x1d6   : > { %v4717_v40 = vpop.permute.xlu0 %1124  ;;  %v4720_v53 = vpop.permute.xlu1 %1102  ;;  %v738_v47 = vmax.f32 %v634_v19, 0.0 }
 0x1d7   : > { %8727 = vst [vmem:[#allocation54_spill] sm:$0xff] %v4717_v40  ;;  %8728 = vst [vmem:[#allocation55_spill] sm:$0xff] %v4720_v53 }
 0x1d8   : > { %1180 = vrot.lane.b32.xlu0 %v4693_v55, %s4124_s23  ;;  %1158 = vrot.lane.b32.xlu1 %v4697_v63, %s4124_s23  ;;  %8731 = vst [vmem:[#allocation58_spill] sm:$0xff] %v4737_v26 }
 0x1da   : > { %v4728_v25 = vpop.permute.xlu0 %1390  ;;  %v4731_v40 = vpop.permute.xlu1 %1126 }
 0x1db   : > { %8729 = vst [vmem:[#allocation56_spill] sm:$0xff] %v4728_v25  ;;  %8730 = vst [vmem:[#allocation57_spill] sm:$0xff] %v4731_v40  ;;  %v4752_v25 = vmin.f32 %v739_v29, 6.0  ;;  %v696_v29 = vpop.f32.mrf.mxu1 }
 0x1dc   : > { %857 = vrot.lane.b32.xlu0 %v4726_v51, %s4123_s22  ;;  %1182 = vrot.lane.b32.xlu1 %v4708_v44, %s4124_s23  ;;  %v697_v61 = vadd.f32 %v696_v29, %v4446_v3 }
 0x1dd   : > { %8735 = vst [vmem:[#allocation62_spill] sm:$0xff] %v4752_v25 }
 0x1de   : > { %v4739_v53 = vpop.permute.xlu0 %1414  ;;  %v4743_v46 = vpop.permute.xlu1 %1392 }
 0x1df   : > { %8732 = vst [vmem:[#allocation59_spill] sm:$0xff] %v4739_v53  ;;  %8733 = vst [vmem:[#allocation60_spill] sm:$0xff] %v4743_v46  ;;  %v730_v46 = vmax.f32 %v630_v0, 0.0 }
 0x1e0   : > { %881 = vrot.lane.b32.xlu0 %v4737_v26, %s4123_s22  ;;  %859 = vrot.lane.b32.xlu1 %v4741_v49, %s4123_s22 }
 0x1e2   : > { %v4750_v2 = vpop.permute.xlu0 %821  ;;  %v4754_v5 = vpop.permute.xlu1 %1416 }
 0x1e3   : > { %8734 = vst [vmem:[#allocation61_spill] sm:$0xff] %v4750_v2  ;;  %8736 = vst [vmem:[#allocation63_spill] sm:$0xff] %v4754_v5  ;;  %v732_v5 = vmax.f32 %v693_v35, 0.0  ;;  %v4770_v2 = vmin.f32 %v730_v46, 6.0  ;;  %v637_v35 = vpop.f32.mrf.mxu0  ;;  %v740_v46 = vmax.f32 %v697_v61, 0.0 }
 0x1e4   : > { %1148 = vrot.lane.b32.xlu0 %v4726_v51, %s4124_s23  ;;  %883 = vrot.lane.b32.xlu1 %v4752_v25, %s4123_s22  ;;  %v638_v3 = vadd.f32 %v637_v35, %v4515_v33 }
 0x1e5   : > { %8739 = vst [vmem:[#allocation66_spill] sm:$0xff] %v4770_v2  ;;  %v4781_v36 = vmin.f32 %v732_v5, 6.0  ;;  %v700_v5 = vpop.f32.mrf.mxu1  ;;  %v4796_v29 = vmin.f32 %v740_v46, 6.0  ;;  %v639_v35 = vpop.f32.mrf.mxu0 }
 0x1e6   : > { %v4761_v53 = vpop.permute.xlu0 %845  ;;  %v4764_v40 = vpop.permute.xlu1 %823  ;;  %v745_v61 = vmax.f32 %v638_v3, 0.0 }
 0x1e7   : > { %8737 = vst [vmem:[#allocation64_spill] sm:$0xff] %v4761_v53  ;;  %8738 = vst [vmem:[#allocation65_spill] sm:$0xff] %v4764_v40  ;;  %v4785_v53 = vmin.f32 %v738_v47, 6.0  ;;  %v701_v47 = vadd.f32 %v700_v5, %v4515_v33 }
 0x1e8   : > { %1172 = vrot.lane.b32.xlu0 %v4737_v26, %s4124_s23  ;;  %1150 = vrot.lane.b32.xlu1 %v4741_v49, %s4124_s23  ;;  %8742 = vst [vmem:[#allocation69_spill] sm:$0xff] %v4781_v36  ;;  %8747 = vst [vmem:[#allocation74_spill] sm:$0xff] %v4796_v29  ;;  %v4813_v46 = vmin.f32 %v745_v61, 6.0 }
 0x1e9   : > { %8744 = vst [vmem:[#allocation71_spill] sm:$0xff] %v4785_v53 }
 0x1ea   : > { %v4772_v32 = vpop.permute.xlu0 %1112  ;;  %v4775_v0 = vpop.permute.xlu1 %847 }
 0x1eb   : > { %8740 = vst [vmem:[#allocation67_spill] sm:$0xff] %v4772_v32  ;;  %8741 = vst [vmem:[#allocation68_spill] sm:$0xff] %v4775_v0 }
 0x1ec   : > { %869 = vrot.lane.b32.xlu0 %v4770_v2, %s4123_s22  ;;  %1174 = vrot.lane.b32.xlu1 %v4752_v25, %s4124_s23 }
 0x1ee   : > { %v4783_v40 = vpop.permute.xlu0 %1136  ;;  %v4787_v32 = vpop.permute.xlu1 %1114 }
 0x1ef   : > { %8743 = vst [vmem:[#allocation70_spill] sm:$0xff] %v4783_v40  ;;  %8745 = vst [vmem:[#allocation72_spill] sm:$0xff] %v4787_v32 }
 0x1f0   : > { %893 = vrot.lane.b32.xlu0 %v4781_v36, %s4123_s22  ;;  %871 = vrot.lane.b32.xlu1 %v4785_v53, %s4123_s22 }
 0x1f2   : > { %v4794_v19 = vpop.permute.xlu0 %1402  ;;  %v4798_v0 = vpop.permute.xlu1 %1138 }
 0x1f3   : > { %8746 = vst [vmem:[#allocation73_spill] sm:$0xff] %v4794_v19  ;;  %8748 = vst [vmem:[#allocation75_spill] sm:$0xff] %v4798_v0  ;;  %v747_v0 = vmax.f32 %v701_v47, 0.0  ;;  %v641_v19 = vpop.f32.mrf.mxu0 }
 0x1f4   : > { %1160 = vrot.lane.b32.xlu0 %v4770_v2, %s4124_s23  ;;  %895 = vrot.lane.b32.xlu1 %v4796_v29, %s4123_s22  ;;  %v642_v3 = vadd.f32 %v641_v19, %v4520_v39  ;;  %v640_v19 = vadd.f32 %v639_v35, %v4515_v33 }
 0x1f6   : > { %v4805_v40 = vpop.permute.xlu0 %1426  ;;  %v4807_v32 = vpop.permute.xlu1 %1404  ;;  %v753_v22 = vmax.f32 %v642_v3, 0.0 }
 0x1f7   : > { %8749 = vst [vmem:[#allocation76_spill] sm:$0xff] %v4805_v40  ;;  %8750 = vst [vmem:[#allocation77_spill] sm:$0xff] %v4807_v32  ;;  %v702_v40 = vpop.f32.mrf.mxu1  ;;  %v4824_v32 = vmin.f32 %v747_v0, 6.0 }
 0x1f8   : > { %1184 = vrot.lane.b32.xlu0 %v4781_v36, %s4124_s23  ;;  %1162 = vrot.lane.b32.xlu1 %v4785_v53, %s4124_s23  ;;  %v4838_v14 = vmin.f32 %v753_v22, 6.0  ;;  %v703_v3 = vadd.f32 %v702_v40, %v4515_v33 }
 0x1f9   : > { %8753 = vst [vmem:[#allocation80_spill] sm:$0xff] %v4824_v32  ;;  %v704_v34 = vpop.f32.mrf.mxu1 }
 0x1fa   : > { %v4815_v27 = vpop.permute.xlu0 %813  ;;  %v4818_v5 = vpop.permute.xlu1 %1428  ;;  %v705_v47 = vadd.f32 %v704_v34, %v4520_v39  ;;  %8757 = vst [vmem:[#allocation84_spill] sm:$0xff] %v4838_v14  ;;  %v746_v34 = vmax.f32 %v640_v19, 0.0 }
 0x1fb   : > { %8751 = vst [vmem:[#allocation78_spill] sm:$0xff] %v4815_v27  ;;  %8752 = vst [vmem:[#allocation79_spill] sm:$0xff] %v4818_v5  ;;  %v706_v19 = vpop.f32.mrf.mxu1 }
 0x1fc   : > { %861 = vrot.lane.b32.xlu0 %v4813_v46, %s4123_s22  ;;  %1186 = vrot.lane.b32.xlu1 %v4796_v29, %s4124_s23  ;;  %v755_v0 = vmax.f32 %v705_v47, 0.0  ;;  %v643_v47 = vpop.f32.mrf.mxu0  ;;  %v4857_v22 = vmin.f32 %v746_v34, 6.0 }
 0x1fd   : > { %v644_v33 = vadd.f32 %v643_v47, %v4520_v39 }
 0x1fe   : > { %v4826_v61 = vpop.permute.xlu0 %837  ;;  %v4829_v27 = vpop.permute.xlu1 %815  ;;  %8762 = vst [vmem:[#allocation89_spill] sm:$0xff] %v4857_v22 }
 0x1ff   : > { %8754 = vst [vmem:[#allocation81_spill] sm:$0xff] %v4826_v61  ;;  %8755 = vst [vmem:[#allocation82_spill] sm:$0xff] %v4829_v27  ;;  %v4849_v61 = vmin.f32 %v755_v0, 6.0  ;;  %v754_v34 = vmax.f32 %v644_v33, 0.0 }
 0x200   : > { %885 = vrot.lane.b32.xlu0 %v4824_v32, %s4123_s22  ;;  %1440 = vrot.lane.b32.xlu1 %v4741_v49, %s4125_s15 }
 0x201   : > { %8760 = vst [vmem:[#allocation87_spill] sm:$0xff] %v4849_v61 }
 0x202   : > { %v4836_v5 = vpop.permute.xlu0 %1104  ;;  %v4840_v7 = vpop.permute.xlu1 %839 }
 0x203   : > { %8756 = vst [vmem:[#allocation83_spill] sm:$0xff] %v4836_v5  ;;  %8758 = vst [vmem:[#allocation85_spill] sm:$0xff] %v4840_v7  ;;  %v748_v7 = vmax.f32 %v703_v3, 0.0  ;;  %v707_v3 = vadd.f32 %v706_v19, %v4520_v39 }
 0x204   : > { %1152 = vrot.lane.b32.xlu0 %v4813_v46, %s4124_s23  ;;  %863 = vrot.lane.b32.xlu1 %v4838_v14, %s4123_s22 }
 0x205   : > { %v4868_v0 = vmin.f32 %v748_v7, 6.0 }
 0x206   : > { %v4847_v27 = vpop.permute.xlu0 %1128  ;;  %v4851_v35 = vpop.permute.xlu1 %1106 }
 0x207   : > { %8759 = vst [vmem:[#allocation86_spill] sm:$0xff] %v4847_v27  ;;  %8761 = vst [vmem:[#allocation88_spill] sm:$0xff] %v4851_v35 }
 0x208   : > { %1176 = vrot.lane.b32.xlu0 %v4824_v32, %s4124_s23  ;;  %887 = vrot.lane.b32.xlu1 %v4849_v61, %s4123_s22  ;;  %8765 = vst [vmem:[#allocation92_spill] sm:$0xff] %v4868_v0 }
 0x20a   : > { %v4859_v5 = vpop.permute.xlu0 %1394  ;;  %v4862_v40 = vpop.permute.xlu1 %1130 }
 0x20b   : > { %8763 = vst [vmem:[#allocation90_spill] sm:$0xff] %v4859_v5  ;;  %8764 = vst [vmem:[#allocation91_spill] sm:$0xff] %v4862_v40  ;;  %v4881_v5 = vmin.f32 %v754_v34, 6.0  ;;  %v756_v40 = vmax.f32 %v707_v3, 0.0 }
 0x20c   : > { %873 = vrot.lane.b32.xlu0 %v4857_v22, %s4123_s22  ;;  %1154 = vrot.lane.b32.xlu1 %v4838_v14, %s4124_s23 }
 0x20d   : > { %8769 = vst [vmem:[#allocation96_spill] sm:$0xff] %v4881_v5  ;;  %v4891_v33 = vmin.f32 %v756_v40, 6.0 }
 0x20e   : > { %v4870_v35 = vpop.permute.xlu0 %1418  ;;  %v4873_v27 = vpop.permute.xlu1 %1396 }
 0x20f   : > { %8766 = vst [vmem:[#allocation93_spill] sm:$0xff] %v4870_v35  ;;  %8767 = vst [vmem:[#allocation94_spill] sm:$0xff] %v4873_v27 }
 0x210   : > { %897 = vrot.lane.b32.xlu0 %v4868_v0, %s4123_s22  ;;  %1178 = vrot.lane.b32.xlu1 %v4849_v61, %s4124_s23  ;;  %8772 = vst [vmem:[#allocation99_spill] sm:$0xff] %v4891_v33 }
 0x212   : > { %v4879_v47 = vpop.permute.xlu0 %825  ;;  %v4883_v7 = vpop.permute.xlu1 %1420 }
 0x213   : > { %8768 = vst [vmem:[#allocation95_spill] sm:$0xff] %v4879_v47  ;;  %8770 = vst [vmem:[#allocation97_spill] sm:$0xff] %v4883_v7  ;;  %v1969_v47 = vld [vmem:[#allocation6 + $0x610] sm:$0xff] }
 0x214   : > { %1164 = vrot.lane.b32.xlu0 %v4857_v22, %s4124_s23  ;;  %875 = vrot.lane.b32.xlu1 %v4881_v5, %s4123_s22 }
 0x216   : > { %v4889_v39 = vpop.permute.xlu0 %849  ;;  %v4893_v19 = vpop.permute.xlu1 %827 }
 0x217   : > { %8771 = vst [vmem:[#allocation98_spill] sm:$0xff] %v4889_v39  ;;  %8773 = vst [vmem:[#allocation100_spill] sm:$0xff] %v4893_v19 }
 0x218   : > { %1188 = vrot.lane.b32.xlu0 %v4868_v0, %s4124_s23  ;;  %899 = vrot.lane.b32.xlu1 %v4891_v33, %s4123_s22 }
 0x21a   : > { %v4899_v34 = vpop.permute.xlu0 %1116  ;;  %v4901_v3 = vpop.permute.xlu1 %851 }
 0x21b   : > { %8774 = vst [vmem:[#allocation101_spill] sm:$0xff] %v4899_v34  ;;  %8775 = vst [vmem:[#allocation102_spill] sm:$0xff] %v4901_v3  ;;  %v1970_v34 = vld [vmem:[#allocation6 + $0x618] sm:$0xff] }
 0x21c   : > { %1438 = vrot.lane.b32.xlu0 %v4726_v51, %s4125_s15  ;;  %1166 = vrot.lane.b32.xlu1 %v4881_v5, %s4124_s23 }
 0x21e   : > { %v4907_v40 = vpop.permute.xlu0 %1140  ;;  %v4909_v27 = vpop.permute.xlu1 %1118 }
 0x21f   : > { %8776 = vst [vmem:[#allocation103_spill] sm:$0xff] %v4907_v40  ;;  %8777 = vst [vmem:[#allocation104_spill] sm:$0xff] %v4909_v27  ;;  %v1967_v40 = vld [vmem:[#allocation6 + $0x600] sm:$0xff] }
 0x220   : > { %1442 = vrot.lane.b32.xlu0 %v4813_v46, %s4125_s15  ;;  %1190 = vrot.lane.b32.xlu1 %v4891_v33, %s4124_s23 }
 0x222   : > { %v4915_v7 = vpop.permute.xlu0 %1406  ;;  %v4917_v35 = vpop.permute.xlu1 %1142 }
 0x223   : > { %8778 = vst [vmem:[#allocation105_spill] sm:$0xff] %v4915_v7  ;;  %8779 = vst [vmem:[#allocation106_spill] sm:$0xff] %v4917_v35 }
 0x224   : > { %1446 = vrot.lane.b32.xlu0 %v4682_v41, %s4125_s15  ;;  %1444 = vrot.lane.b32.xlu1 %v4838_v14, %s4125_s15 }
 0x226   : > { %v4923_v3 = vpop.permute.xlu0 %1430  ;;  %v4925_v39 = vpop.permute.xlu1 %1408 }
 0x227   : > { %8780 = vst [vmem:[#allocation107_spill] sm:$0xff] %v4923_v3  ;;  %8781 = vst [vmem:[#allocation108_spill] sm:$0xff] %v4925_v39 }
 0x228   : > { %1450 = vrot.lane.b32.xlu0 %v4770_v2, %s4125_s15  ;;  %1448 = vrot.lane.b32.xlu1 %v4697_v63, %s4125_s15 }
 0x22a   : > { %v4931_v27 = vpop.permute.xlu0 %853  ;;  %v4933_v7 = vpop.permute.xlu1 %1432 }
 0x22b   : > { %8782 = vst [vmem:[#allocation109_spill] sm:$0xff] %v4931_v27  ;;  %8783 = vst [vmem:[#allocation110_spill] sm:$0xff] %v4933_v7 }
 0x22c   : > { %1454 = vrot.lane.b32.xlu0 %v4857_v22, %s4125_s15  ;;  %1452 = vrot.lane.b32.xlu1 %v4785_v53, %s4125_s15 }
 0x22e   : > { %v4939_v35 = vpop.permute.xlu0 %877  ;;  %v4941_v3 = vpop.permute.xlu1 %855 }
 0x22f   : > { %8784 = vst [vmem:[#allocation111_spill] sm:$0xff] %v4939_v35  ;;  %8785 = vst [vmem:[#allocation112_spill] sm:$0xff] %v4941_v3 }
 0x230   : > { %1458 = vrot.lane.b32.xlu0 %v4641_v9, %s4125_s15  ;;  %1456 = vrot.lane.b32.xlu1 %v4881_v5, %s4125_s15 }
 0x232   : > { %v4947_v39 = vpop.permute.xlu0 %1144  ;;  %v4949_v27 = vpop.permute.xlu1 %879 }
 0x233   : > { %8786 = vst [vmem:[#allocation113_spill] sm:$0xff] %v4947_v39  ;;  %8787 = vst [vmem:[#allocation114_spill] sm:$0xff] %v4949_v27 }
 0x234   : > { %1462 = vrot.lane.b32.xlu0 %v4737_v26, %s4125_s15  ;;  %1460 = vrot.lane.b32.xlu1 %v4655_v38, %s4125_s15 }
 0x236   : > { %v4955_v7 = vpop.permute.xlu0 %1168  ;;  %v4957_v35 = vpop.permute.xlu1 %1146 }
 0x237   : > { %8788 = vst [vmem:[#allocation115_spill] sm:$0xff] %v4955_v7  ;;  %8789 = vst [vmem:[#allocation116_spill] sm:$0xff] %v4957_v35 }
 0x238   : > { %1466 = vrot.lane.b32.xlu0 %v4824_v32, %s4125_s15  ;;  %1464 = vrot.lane.b32.xlu1 %v4752_v25, %s4125_s15 }
 0x23a   : > { %v4963_v3 = vpop.permute.xlu0 %1434  ;;  %v4965_v39 = vpop.permute.xlu1 %1170 }
 0x23b   : > { %8790 = vst [vmem:[#allocation117_spill] sm:$0xff] %v4963_v3  ;;  %8791 = vst [vmem:[#allocation118_spill] sm:$0xff] %v4965_v39 }
 0x23c   : > { %1470 = vrot.lane.b32.xlu0 %v4693_v55, %s4125_s15  ;;  %1468 = vrot.lane.b32.xlu1 %v4849_v61, %s4125_s15 }
 0x23e   : > { %v4971_v27 = vpop.permute.xlu0 %865  ;;  %v4973_v7 = vpop.permute.xlu1 %1436 }
 0x23f   : > { %8792 = vst [vmem:[#allocation119_spill] sm:$0xff] %v4971_v27  ;;  %8793 = vst [vmem:[#allocation120_spill] sm:$0xff] %v4973_v7 }
 0x240   : > { %1474 = vrot.lane.b32.xlu0 %v4781_v36, %s4125_s15  ;;  %1472 = vrot.lane.b32.xlu1 %v4708_v44, %s4125_s15 }
 0x242   : > { %v4979_v35 = vpop.permute.xlu0 %889  ;;  %v4981_v3 = vpop.permute.xlu1 %867 }
 0x243   : > { %8794 = vst [vmem:[#allocation121_spill] sm:$0xff] %v4979_v35  ;;  %8795 = vst [vmem:[#allocation122_spill] sm:$0xff] %v4981_v3 }
 0x244   : > { %1478 = vrot.lane.b32.xlu0 %v4868_v0, %s4125_s15  ;;  %1476 = vrot.lane.b32.xlu1 %v4796_v29, %s4125_s15 }
 0x246   : > { %v4987_v39 = vpop.permute.xlu0 %1156  ;;  %v4989_v27 = vpop.permute.xlu1 %891 }
 0x247   : > { %8796 = vst [vmem:[#allocation123_spill] sm:$0xff] %v4987_v39  ;;  %8797 = vst [vmem:[#allocation124_spill] sm:$0xff] %v4989_v27 }
 0x248   : > { %1676 = vrot.lane.b32.xlu0 %v4381_v37, %s4126_s20  ;;  %1480 = vrot.lane.b32.xlu1 %v4891_v33, %s4125_s15 }
 0x24a   : > { %v4995_v35 = vpop.permute.xlu0 %1180  ;;  %v4997_v3 = vpop.permute.xlu1 %1158 }
 0x24b   : > { %8798 = vst [vmem:[#allocation125_spill] sm:$0xff] %v4995_v35  ;;  %8799 = vst [vmem:[#allocation126_spill] sm:$0xff] %v4997_v3 }
 0x24c   : > { %1680 = vrot.lane.b32.xlu0 %v4452_v8, %s4126_s20  ;;  %1678 = vrot.lane.b32.xlu1 %v4389_v43, %s4126_s20 }
 0x24e   : > { %v5003_v39 = vpop.permute.xlu0 %857  ;;  %v5005_v27 = vpop.permute.xlu1 %1182 }
 0x24f   : > { %8800 = vst [vmem:[#allocation127_spill] sm:$0xff] %v5003_v39  ;;  %8801 = vst [vmem:[#allocation128_spill] sm:$0xff] %v5005_v27 }
 0x250   : > { %1684 = vrot.lane.b32.xlu0 %v4532_v48, %s4126_s20  ;;  %1682 = vrot.lane.b32.xlu1 %v4465_v15, %s4126_s20 }
 0x252   : > { %v5011_v7 = vpop.permute.xlu0 %881  ;;  %v5013_v35 = vpop.permute.xlu1 %859 }
 0x253   : > { %8802 = vst [vmem:[#allocation129_spill] sm:$0xff] %v5011_v7  ;;  %8803 = vst [vmem:[#allocation130_spill] sm:$0xff] %v5013_v35 }
 0x254   : > { %1688 = vrot.lane.b32.xlu0 %v4416_v52, %s4126_s20  ;;  %1686 = vrot.lane.b32.xlu1 %v4541_v58, %s4126_s20 }
 0x256   : > { %v5019_v3 = vpop.permute.xlu0 %1148  ;;  %v5021_v39 = vpop.permute.xlu1 %883 }
 0x257   : > { %8804 = vst [vmem:[#allocation131_spill] sm:$0xff] %v5019_v3  ;;  %8805 = vst [vmem:[#allocation132_spill] sm:$0xff] %v5021_v39 }
 0x258   : > { %1692 = vrot.lane.b32.xlu0 %v4492_v24, %s4126_s20  ;;  %1690 = vrot.lane.b32.xlu1 %v4425_v57, %s4126_s20 }
 0x25a   : > { %v5027_v27 = vpop.permute.xlu0 %1172  ;;  %v5029_v7 = vpop.permute.xlu1 %1150 }
 0x25b   : > { %8806 = vst [vmem:[#allocation133_spill] sm:$0xff] %v5027_v27  ;;  %8807 = vst [vmem:[#allocation134_spill] sm:$0xff] %v5029_v7 }
 0x25c   : > { %1696 = vrot.lane.b32.xlu0 %v4570_v6, %s4126_s20  ;;  %1694 = vrot.lane.b32.xlu1 %v4501_v30, %s4126_s20 }
 0x25e   : > { %v5035_v35 = vpop.permute.xlu0 %869  ;;  %v5037_v3 = vpop.permute.xlu1 %1174 }
 0x25f   : > { %8808 = vst [vmem:[#allocation135_spill] sm:$0xff] %v5035_v35  ;;  %8809 = vst [vmem:[#allocation136_spill] sm:$0xff] %v5037_v3 }
 0x260   : > { %1700 = vrot.lane.b32.xlu0 %v4387_v42, %s4126_s20  ;;  %1698 = vrot.lane.b32.xlu1 %v4585_v20, %s4126_s20 }
 0x262   : > { %v5043_v39 = vpop.permute.xlu0 %893  ;;  %v5045_v27 = vpop.permute.xlu1 %871 }
 0x263   : > { %8810 = vst [vmem:[#allocation137_spill] sm:$0xff] %v5043_v39  ;;  %8811 = vst [vmem:[#allocation138_spill] sm:$0xff] %v5045_v27 }
 0x264   : > { %1704 = vrot.lane.b32.xlu0 %v4463_v13, %s4126_s20  ;;  %1702 = vrot.lane.b32.xlu1 %v4395_v45, %s4126_s20 }
 0x266   : > { %v5051_v7 = vpop.permute.xlu0 %1160  ;;  %v5053_v35 = vpop.permute.xlu1 %895 }
 0x267   : > { %8812 = vst [vmem:[#allocation139_spill] sm:$0xff] %v5051_v7  ;;  %8813 = vst [vmem:[#allocation140_spill] sm:$0xff] %v5053_v35 }
 0x268   : > { %1708 = vrot.lane.b32.xlu0 %v4539_v54, %s4126_s20  ;;  %1706 = vrot.lane.b32.xlu1 %v4471_v16, %s4126_s20 }
 0x26a   : > { %v5059_v3 = vpop.permute.xlu0 %1184  ;;  %v5061_v39 = vpop.permute.xlu1 %1162 }
 0x26b   : > { %8814 = vst [vmem:[#allocation141_spill] sm:$0xff] %v5059_v3  ;;  %8815 = vst [vmem:[#allocation142_spill] sm:$0xff] %v5061_v39 }
 0x26c   : > { %1712 = vrot.lane.b32.xlu0 %v4423_v56, %s4126_s20  ;;  %1710 = vrot.lane.b32.xlu1 %v4547_v60, %s4126_s20 }
 0x26e   : > { %v5067_v27 = vpop.permute.xlu0 %861  ;;  %v5069_v7 = vpop.permute.xlu1 %1186 }
 0x26f   : > { %8816 = vst [vmem:[#allocation143_spill] sm:$0xff] %v5067_v27  ;;  %8817 = vst [vmem:[#allocation144_spill] sm:$0xff] %v5069_v7 }
 0x270   : > { %1716 = vrot.lane.b32.xlu0 %v4499_v28, %s4126_s20  ;;  %1714 = vrot.lane.b32.xlu1 %v4431_v59, %s4126_s20 }
 0x272   : > { %v5075_v35 = vpop.permute.xlu0 %885  ;;  %v5077_v3 = vpop.permute.xlu1 %1440 }
 0x273   : > { %8818 = vst [vmem:[#allocation145_spill] sm:$0xff] %v5075_v35  ;;  %8819 = vst [vmem:[#allocation146_spill] sm:$0xff] %v5077_v3 }
 0x274   : > { %1720 = vrot.lane.b32.xlu0 %v4581_v17, %s4126_s20  ;;  %1718 = vrot.lane.b32.xlu1 %v4507_v31, %s4126_s20 }
 0x276   : > { %v5083_v39 = vpop.permute.xlu0 %1152  ;;  %v5085_v27 = vpop.permute.xlu1 %863 }
 0x277   : > { %8820 = vst [vmem:[#allocation147_spill] sm:$0xff] %v5083_v39  ;;  %8821 = vst [vmem:[#allocation148_spill] sm:$0xff] %v5085_v27 }
 0x278   : > { %1724 = vrot.lane.b32.xlu0 %v4630_v62, %s4126_s20  ;;  %1722 = vrot.lane.b32.xlu1 %v4595_v23, %s4126_s20 }
 0x27a   : > { %v5091_v7 = vpop.permute.xlu0 %1176  ;;  %v5093_v35 = vpop.permute.xlu1 %887 }
 0x27b   : > { %8822 = vst [vmem:[#allocation149_spill] sm:$0xff] %v5091_v7  ;;  %8823 = vst [vmem:[#allocation150_spill] sm:$0xff] %v5093_v35 }
 0x27c   : > { %1728 = vrot.lane.b32.xlu0 %v4726_v51, %s4126_s20  ;;  %1726 = vrot.lane.b32.xlu1 %v4645_v12, %s4126_s20 }
 0x27e   : > { %v5099_v3 = vpop.permute.xlu0 %873  ;;  %v5101_v39 = vpop.permute.xlu1 %1154 }
 0x27f   : > { %8824 = vst [vmem:[#allocation151_spill] sm:$0xff] %v5099_v3  ;;  %8825 = vst [vmem:[#allocation152_spill] sm:$0xff] %v5101_v39 }
 0x280   : > { %1732 = vrot.lane.b32.xlu0 %v4813_v46, %s4126_s20  ;;  %1730 = vrot.lane.b32.xlu1 %v4741_v49, %s4126_s20 }
 0x282   : > { %v5107_v27 = vpop.permute.xlu0 %897  ;;  %v5109_v7 = vpop.permute.xlu1 %1178 }
 0x283   : > { %8826 = vst [vmem:[#allocation153_spill] sm:$0xff] %v5107_v27  ;;  %8827 = vst [vmem:[#allocation154_spill] sm:$0xff] %v5109_v7 }
 0x284   : > { %1736 = vrot.lane.b32.xlu0 %v4682_v41, %s4126_s20  ;;  %1734 = vrot.lane.b32.xlu1 %v4838_v14, %s4126_s20 }
 0x286   : > { %v5115_v35 = vpop.permute.xlu0 %1164  ;;  %v5117_v3 = vpop.permute.xlu1 %875 }
 0x287   : > { %8828 = vst [vmem:[#allocation155_spill] sm:$0xff] %v5115_v35  ;;  %8829 = vst [vmem:[#allocation156_spill] sm:$0xff] %v5117_v3 }
 0x288   : > { %1740 = vrot.lane.b32.xlu0 %v4770_v2, %s4126_s20  ;;  %1738 = vrot.lane.b32.xlu1 %v4697_v63, %s4126_s20 }
 0x28a   : > { %v5123_v39 = vpop.permute.xlu0 %1188  ;;  %v5125_v27 = vpop.permute.xlu1 %899 }
 0x28b   : > { %8830 = vst [vmem:[#allocation157_spill] sm:$0xff] %v5123_v39  ;;  %8831 = vst [vmem:[#allocation158_spill] sm:$0xff] %v5125_v27 }
 0x28c   : > { %1744 = vrot.lane.b32.xlu0 %v4857_v22, %s4126_s20  ;;  %1742 = vrot.lane.b32.xlu1 %v4785_v53, %s4126_s20 }
 0x28e   : > { %v5131_v7 = vpop.permute.xlu0 %1438  ;;  %v5133_v35 = vpop.permute.xlu1 %1166 }
 0x28f   : > { %8832 = vst [vmem:[#allocation159_spill] sm:$0xff] %v5131_v7  ;;  %8833 = vst [vmem:[#allocation160_spill] sm:$0xff] %v5133_v35 }
 0x290   : > { %1748 = vrot.lane.b32.xlu0 %v4641_v9, %s4126_s20  ;;  %1746 = vrot.lane.b32.xlu1 %v4881_v5, %s4126_s20 }
 0x292   : > { %v5139_v3 = vpop.permute.xlu0 %1442  ;;  %v5141_v39 = vpop.permute.xlu1 %1190 }
 0x293   : > { %8834 = vst [vmem:[#allocation161_spill] sm:$0xff] %v5139_v3  ;;  %8835 = vst [vmem:[#allocation162_spill] sm:$0xff] %v5141_v39 }
 0x294   : > { %1752 = vrot.lane.b32.xlu0 %v4737_v26, %s4126_s20  ;;  %1750 = vrot.lane.b32.xlu1 %v4655_v38, %s4126_s20 }
 0x296   : > { %v5147_v27 = vpop.permute.xlu0 %1446  ;;  %v5149_v7 = vpop.permute.xlu1 %1444 }
 0x297   : > { %8836 = vst [vmem:[#allocation163_spill] sm:$0xff] %v5147_v27  ;;  %8837 = vst [vmem:[#allocation164_spill] sm:$0xff] %v5149_v7 }
 0x298   : > { %1756 = vrot.lane.b32.xlu0 %v4824_v32, %s4126_s20  ;;  %1754 = vrot.lane.b32.xlu1 %v4752_v25, %s4126_s20 }
 0x29a   : > { %v5155_v35 = vpop.permute.xlu0 %1450  ;;  %v5157_v3 = vpop.permute.xlu1 %1448 }
 0x29b   : > { %8838 = vst [vmem:[#allocation165_spill] sm:$0xff] %v5155_v35  ;;  %8839 = vst [vmem:[#allocation166_spill] sm:$0xff] %v5157_v3 }
 0x29c   : > { %1760 = vrot.lane.b32.xlu0 %v4693_v55, %s4126_s20  ;;  %1758 = vrot.lane.b32.xlu1 %v4849_v61, %s4126_s20 }
 0x29e   : > { %v5163_v39 = vpop.permute.xlu0 %1454  ;;  %v5165_v27 = vpop.permute.xlu1 %1452 }
 0x29f   : > { %8840 = vst [vmem:[#allocation167_spill] sm:$0xff] %v5163_v39  ;;  %8841 = vst [vmem:[#allocation168_spill] sm:$0xff] %v5165_v27 }
 0x2a0   : > { %1764 = vrot.lane.b32.xlu0 %v4781_v36, %s4126_s20  ;;  %1762 = vrot.lane.b32.xlu1 %v4708_v44, %s4126_s20 }
 0x2a2   : > { %v5171_v7 = vpop.permute.xlu0 %1458  ;;  %v5173_v35 = vpop.permute.xlu1 %1456 }
 0x2a3   : > { %8842 = vst [vmem:[#allocation169_spill] sm:$0xff] %v5171_v7  ;;  %8843 = vst [vmem:[#allocation170_spill] sm:$0xff] %v5173_v35 }
 0x2a4   : > { %1768 = vrot.lane.b32.xlu0 %v4868_v0, %s4126_s20  ;;  %1766 = vrot.lane.b32.xlu1 %v4796_v29, %s4126_s20 }
 0x2a6   : > { %v5179_v3 = vpop.permute.xlu0 %1462  ;;  %v5181_v39 = vpop.permute.xlu1 %1460 }
 0x2a7   : > { %8844 = vst [vmem:[#allocation171_spill] sm:$0xff] %v5179_v3  ;;  %8845 = vst [vmem:[#allocation172_spill] sm:$0xff] %v5181_v39 }
 0x2a8   : > { %2111 = vrot.lane.b32.xlu0 %v4381_v37, %s4127_s11  ;;  %1770 = vrot.lane.b32.xlu1 %v4891_v33, %s4126_s20 }
 0x2aa   : > { %v5187_v7 = vpop.permute.xlu0 %1466  ;;  %v5189_v35 = vpop.permute.xlu1 %1464 }
 0x2ab   : > { %8846 = vst [vmem:[#allocation173_spill] sm:$0xff] %v5187_v7  ;;  %8847 = vst [vmem:[#allocation174_spill] sm:$0xff] %v5189_v35 }
 0x2ac   : > { %2115 = vrot.lane.b32.xlu0 %v4452_v8, %s4127_s11  ;;  %2113 = vrot.lane.b32.xlu1 %v4389_v43, %s4127_s11 }
 0x2ae   : > { %v5195_v3 = vpop.permute.xlu0 %1470  ;;  %v5197_v39 = vpop.permute.xlu1 %1468 }
 0x2af   : > { %8848 = vst [vmem:[#allocation175_spill] sm:$0xff] %v5195_v3  ;;  %8849 = vst [vmem:[#allocation176_spill] sm:$0xff] %v5197_v39 }
 0x2b0   : > { %2119 = vrot.lane.b32.xlu0 %v4532_v48, %s4127_s11  ;;  %2117 = vrot.lane.b32.xlu1 %v4465_v15, %s4127_s11 }
 0x2b2   : > { %v5203_v27 = vpop.permute.xlu0 %1474  ;;  %v5205_v7 = vpop.permute.xlu1 %1472 }
 0x2b3   : > { %8850 = vst [vmem:[#allocation177_spill] sm:$0xff] %v5203_v27  ;;  %8851 = vst [vmem:[#allocation178_spill] sm:$0xff] %v5205_v7 }
 0x2b4   : > { %2123 = vrot.lane.b32.xlu0 %v4416_v52, %s4127_s11  ;;  %2121 = vrot.lane.b32.xlu1 %v4541_v58, %s4127_s11 }
 0x2b6   : > { %v5211_v35 = vpop.permute.xlu0 %1478  ;;  %v5213_v3 = vpop.permute.xlu1 %1476 }
 0x2b7   : > { %8852 = vst [vmem:[#allocation179_spill] sm:$0xff] %v5211_v35  ;;  %8853 = vst [vmem:[#allocation180_spill] sm:$0xff] %v5213_v3 }
 0x2b8   : > { %2127 = vrot.lane.b32.xlu0 %v4492_v24, %s4127_s11  ;;  %2125 = vrot.lane.b32.xlu1 %v4425_v57, %s4127_s11 }
 0x2ba   : > { %v5219_v39 = vpop.permute.xlu0 %1676  ;;  %v5221_v27 = vpop.permute.xlu1 %1480 }
 0x2bb   : > { %8854 = vst [vmem:[#allocation181_spill] sm:$0xff] %v5219_v39  ;;  %8855 = vst [vmem:[#allocation182_spill] sm:$0xff] %v5221_v27 }
 0x2bc   : > { %2131 = vrot.lane.b32.xlu0 %v4570_v6, %s4127_s11  ;;  %2129 = vrot.lane.b32.xlu1 %v4501_v30, %s4127_s11 }
 0x2be   : > { %v5227_v7 = vpop.permute.xlu0 %1680  ;;  %v5229_v35 = vpop.permute.xlu1 %1678 }
 0x2bf   : > { %8856 = vst [vmem:[#allocation183_spill] sm:$0xff] %v5227_v7  ;;  %8857 = vst [vmem:[#allocation184_spill] sm:$0xff] %v5229_v35 }
 0x2c0   : > { %2135 = vrot.lane.b32.xlu0 %v4387_v42, %s4127_s11  ;;  %2133 = vrot.lane.b32.xlu1 %v4585_v20, %s4127_s11 }
 0x2c2   : > { %v5235_v3 = vpop.permute.xlu0 %1684  ;;  %v5237_v39 = vpop.permute.xlu1 %1682 }
 0x2c3   : > { %8858 = vst [vmem:[#allocation185_spill] sm:$0xff] %v5235_v3  ;;  %8859 = vst [vmem:[#allocation186_spill] sm:$0xff] %v5237_v39 }
 0x2c4   : > { %2139 = vrot.lane.b32.xlu0 %v4463_v13, %s4127_s11  ;;  %2137 = vrot.lane.b32.xlu1 %v4395_v45, %s4127_s11 }
 0x2c6   : > { %v5243_v27 = vpop.permute.xlu0 %1688  ;;  %v5245_v7 = vpop.permute.xlu1 %1686 }
 0x2c7   : > { %8860 = vst [vmem:[#allocation187_spill] sm:$0xff] %v5243_v27  ;;  %8861 = vst [vmem:[#allocation188_spill] sm:$0xff] %v5245_v7 }
 0x2c8   : > { %2143 = vrot.lane.b32.xlu0 %v4539_v54, %s4127_s11  ;;  %2141 = vrot.lane.b32.xlu1 %v4471_v16, %s4127_s11 }
 0x2ca   : > { %v5251_v35 = vpop.permute.xlu0 %1692  ;;  %v5253_v3 = vpop.permute.xlu1 %1690 }
 0x2cb   : > { %8862 = vst [vmem:[#allocation189_spill] sm:$0xff] %v5251_v35  ;;  %8863 = vst [vmem:[#allocation190_spill] sm:$0xff] %v5253_v3 }
 0x2cc   : > { %2147 = vrot.lane.b32.xlu0 %v4423_v56, %s4127_s11  ;;  %2145 = vrot.lane.b32.xlu1 %v4547_v60, %s4127_s11 }
 0x2ce   : > { %v5259_v39 = vpop.permute.xlu0 %1696  ;;  %v5261_v27 = vpop.permute.xlu1 %1694 }
 0x2cf   : > { %8864 = vst [vmem:[#allocation191_spill] sm:$0xff] %v5259_v39  ;;  %8865 = vst [vmem:[#allocation192_spill] sm:$0xff] %v5261_v27 }
 0x2d0   : > { %2151 = vrot.lane.b32.xlu0 %v4499_v28, %s4127_s11  ;;  %2149 = vrot.lane.b32.xlu1 %v4431_v59, %s4127_s11 }
 0x2d2   : > { %v5267_v7 = vpop.permute.xlu0 %1700  ;;  %v5269_v35 = vpop.permute.xlu1 %1698 }
 0x2d3   : > { %8866 = vst [vmem:[#allocation193_spill] sm:$0xff] %v5267_v7  ;;  %8867 = vst [vmem:[#allocation194_spill] sm:$0xff] %v5269_v35 }
 0x2d4   : > { %2155 = vrot.lane.b32.xlu0 %v4581_v17, %s4127_s11  ;;  %2153 = vrot.lane.b32.xlu1 %v4507_v31, %s4127_s11 }
 0x2d6   : > { %v5275_v3 = vpop.permute.xlu0 %1704  ;;  %v5277_v39 = vpop.permute.xlu1 %1702 }
 0x2d7   : > { %8868 = vst [vmem:[#allocation195_spill] sm:$0xff] %v5275_v3  ;;  %8869 = vst [vmem:[#allocation196_spill] sm:$0xff] %v5277_v39 }
 0x2d8   : > { %2159 = vrot.lane.b32.xlu0 %v4630_v62, %s4127_s11  ;;  %2157 = vrot.lane.b32.xlu1 %v4595_v23, %s4127_s11 }
 0x2da   : > { %v5283_v27 = vpop.permute.xlu0 %1708  ;;  %v5285_v7 = vpop.permute.xlu1 %1706 }
 0x2db   : > { %8870 = vst [vmem:[#allocation197_spill] sm:$0xff] %v5283_v27  ;;  %8871 = vst [vmem:[#allocation198_spill] sm:$0xff] %v5285_v7 }
 0x2dc   : > { %2163 = vrot.lane.b32.xlu0 %v4726_v51, %s4127_s11  ;;  %2161 = vrot.lane.b32.xlu1 %v4645_v12, %s4127_s11 }
 0x2de   : > { %v5291_v35 = vpop.permute.xlu0 %1712  ;;  %v5293_v3 = vpop.permute.xlu1 %1710 }
 0x2df   : > { %8872 = vst [vmem:[#allocation199_spill] sm:$0xff] %v5291_v35  ;;  %8873 = vst [vmem:[#allocation200_spill] sm:$0xff] %v5293_v3 }
 0x2e0   : > { %2167 = vrot.lane.b32.xlu0 %v4813_v46, %s4127_s11  ;;  %2165 = vrot.lane.b32.xlu1 %v4741_v49, %s4127_s11 }
 0x2e2   : > { %v5299_v39 = vpop.permute.xlu0 %1716  ;;  %v5301_v27 = vpop.permute.xlu1 %1714 }
 0x2e3   : > { %8874 = vst [vmem:[#allocation201_spill] sm:$0xff] %v5299_v39  ;;  %8875 = vst [vmem:[#allocation202_spill] sm:$0xff] %v5301_v27 }
 0x2e4   : > { %2171 = vrot.lane.b32.xlu0 %v4682_v41, %s4127_s11  ;;  %2169 = vrot.lane.b32.xlu1 %v4838_v14, %s4127_s11 }
 0x2e6   : > { %v5307_v7 = vpop.permute.xlu0 %1720  ;;  %v5309_v35 = vpop.permute.xlu1 %1718 }
 0x2e7   : > { %8876 = vst [vmem:[#allocation203_spill] sm:$0xff] %v5307_v7  ;;  %8877 = vst [vmem:[#allocation204_spill] sm:$0xff] %v5309_v35 }
 0x2e8   : > { %2175 = vrot.lane.b32.xlu0 %v4770_v2, %s4127_s11  ;;  %2173 = vrot.lane.b32.xlu1 %v4697_v63, %s4127_s11 }
 0x2ea   : > { %v5315_v3 = vpop.permute.xlu0 %1724  ;;  %v5317_v39 = vpop.permute.xlu1 %1722 }
 0x2eb   : > { %8878 = vst [vmem:[#allocation205_spill] sm:$0xff] %v5315_v3  ;;  %8879 = vst [vmem:[#allocation206_spill] sm:$0xff] %v5317_v39 }
 0x2ec   : > { %2179 = vrot.lane.b32.xlu0 %v4857_v22, %s4127_s11  ;;  %2177 = vrot.lane.b32.xlu1 %v4785_v53, %s4127_s11 }
 0x2ee   : > { %v5323_v27 = vpop.permute.xlu0 %1728  ;;  %v5325_v7 = vpop.permute.xlu1 %1726 }
 0x2ef   : > { %8880 = vst [vmem:[#allocation207_spill] sm:$0xff] %v5323_v27  ;;  %8881 = vst [vmem:[#allocation208_spill] sm:$0xff] %v5325_v7 }
 0x2f0   : > { %2183 = vrot.lane.b32.xlu0 %v4641_v9, %s4127_s11  ;;  %2181 = vrot.lane.b32.xlu1 %v4881_v5, %s4127_s11  ;;  %v1991_v5 = vld [vmem:[#allocation6 + $0x6c0] sm:$0xff] }
 0x2f2   : > { %v5331_v35 = vpop.permute.xlu0 %1732  ;;  %v5333_v3 = vpop.permute.xlu1 %1730 }
 0x2f3   : > { %8882 = vst [vmem:[#allocation209_spill] sm:$0xff] %v5331_v35  ;;  %8883 = vst [vmem:[#allocation210_spill] sm:$0xff] %v5333_v3 }
 0x2f4   : > { %2187 = vrot.lane.b32.xlu0 %v4737_v26, %s4127_s11  ;;  %2185 = vrot.lane.b32.xlu1 %v4655_v38, %s4127_s11 }
 0x2f6   : > { %v5339_v39 = vpop.permute.xlu0 %1736  ;;  %v5341_v27 = vpop.permute.xlu1 %1734 }
 0x2f7   : > { %8884 = vst [vmem:[#allocation211_spill] sm:$0xff] %v5339_v39  ;;  %8885 = vst [vmem:[#allocation212_spill] sm:$0xff] %v5341_v27 }
 0x2f8   : > { %2191 = vrot.lane.b32.xlu0 %v4824_v32, %s4127_s11  ;;  %2189 = vrot.lane.b32.xlu1 %v4752_v25, %s4127_s11  ;;  %v5558_v32 = vmul.f32 %v1967_v40, %v4381_v37 }
 0x2fa   : > { %v5347_v7 = vpop.permute.xlu0 %1740  ;;  %v5349_v35 = vpop.permute.xlu1 %1738  ;;  %8938 = vst [vmem:[#allocation265_spill] sm:$0xff] %v5558_v32  ;;  %v2001_v32 = vld [vmem:[#allocation6 + $0x710] sm:$0xff] }
 0x2fb   : > { %8886 = vst [vmem:[#allocation213_spill] sm:$0xff] %v5347_v7  ;;  %8887 = vst [vmem:[#allocation214_spill] sm:$0xff] %v5349_v35 }
 0x2fc   : > { %2195 = vrot.lane.b32.xlu0 %v4693_v55, %s4127_s11  ;;  %2193 = vrot.lane.b32.xlu1 %v4849_v61, %s4127_s11  ;;  %v1977_v61 = vld [vmem:[#allocation6 + $0x650] sm:$0xff] }
 0x2fd   : > { %v5572_v40 = vmul.f32 %v1977_v61, %v4395_v45  ;;  %v2008_v61 = vld [vmem:[#allocation6 + $0x748] sm:$0xff] }
 0x2fe   : > { %v5355_v3 = vpop.permute.xlu0 %1744  ;;  %v5357_v39 = vpop.permute.xlu1 %1742 }
 0x2ff   : > { %8888 = vst [vmem:[#allocation215_spill] sm:$0xff] %v5355_v3  ;;  %8889 = vst [vmem:[#allocation216_spill] sm:$0xff] %v5357_v39 }
 0x300   : > { %2199 = vrot.lane.b32.xlu0 %v4781_v36, %s4127_s11  ;;  %2197 = vrot.lane.b32.xlu1 %v4708_v44, %s4127_s11  ;;  %8942 = vst [vmem:[#allocation269_spill] sm:$0xff] %v5572_v40  ;;  %v2009_v40 = vld [vmem:[#allocation6 + $0x750] sm:$0xff] }
 0x302   : > { %v5363_v27 = vpop.permute.xlu0 %1748  ;;  %v5365_v7 = vpop.permute.xlu1 %1746 }
 0x303   : > { %8890 = vst [vmem:[#allocation217_spill] sm:$0xff] %v5363_v27  ;;  %8891 = vst [vmem:[#allocation218_spill] sm:$0xff] %v5365_v7 }
 0x304   : > { %2203 = vrot.lane.b32.xlu0 %v4868_v0, %s4127_s11  ;;  %2201 = vrot.lane.b32.xlu1 %v4796_v29, %s4127_s11  ;;  %v1992_v29 = vld [vmem:[#allocation6 + $0x6c8] sm:$0xff] }
 0x306   : > { %v5371_v35 = vpop.permute.xlu0 %1752  ;;  %v5373_v3 = vpop.permute.xlu1 %1750 }
 0x307   : > { %8892 = vst [vmem:[#allocation219_spill] sm:$0xff] %v5371_v35  ;;  %8893 = vst [vmem:[#allocation220_spill] sm:$0xff] %v5373_v3 }
 0x308   : > { %2401 = vrot.lane.b32.xlu0 %v4381_v37, %s4128_s10  ;;  %2205 = vrot.lane.b32.xlu1 %v4891_v33, %s4127_s11  ;;  %s8245_s11 = scalar_lea.hbm %s8300_s7, %s3866_s21 }
 0x30a   : > { %v5379_v27 = vpop.permute.xlu0 %1756  ;;  %v5381_v7 = vpop.permute.xlu1 %1754 }
 0x30b   : > { %8894 = vst [vmem:[#allocation221_spill] sm:$0xff] %v5379_v27  ;;  %8895 = vst [vmem:[#allocation222_spill] sm:$0xff] %v5381_v7 }
 0x30c   : > { %2405 = vrot.lane.b32.xlu0 %v4452_v8, %s4128_s10  ;;  %2403 = vrot.lane.b32.xlu1 %v4389_v43, %s4128_s10 }
 0x30e   : > { %v5387_v35 = vpop.permute.xlu0 %1760  ;;  %v5389_v3 = vpop.permute.xlu1 %1758 }
 0x30f   : > { %8896 = vst [vmem:[#allocation223_spill] sm:$0xff] %v5387_v35  ;;  %8897 = vst [vmem:[#allocation224_spill] sm:$0xff] %v5389_v3 }
 0x310   : > { %2409 = vrot.lane.b32.xlu0 %v4532_v48, %s4128_s10  ;;  %2407 = vrot.lane.b32.xlu1 %v4465_v15, %s4128_s10 }
 0x312   : > { %v5395_v39 = vpop.permute.xlu0 %1764  ;;  %v5397_v27 = vpop.permute.xlu1 %1762 }
 0x313   : > { %8898 = vst [vmem:[#allocation225_spill] sm:$0xff] %v5395_v39  ;;  %8899 = vst [vmem:[#allocation226_spill] sm:$0xff] %v5397_v27 }
 0x314   : > { %2413 = vrot.lane.b32.xlu0 %v4416_v52, %s4128_s10  ;;  %2411 = vrot.lane.b32.xlu1 %v4541_v58, %s4128_s10 }
 0x316   : > { %v5403_v7 = vpop.permute.xlu0 %1768  ;;  %v5405_v35 = vpop.permute.xlu1 %1766 }
 0x317   : > { %8900 = vst [vmem:[#allocation227_spill] sm:$0xff] %v5403_v7  ;;  %8901 = vst [vmem:[#allocation228_spill] sm:$0xff] %v5405_v35 }
 0x318   : > { %2417 = vrot.lane.b32.xlu0 %v4492_v24, %s4128_s10  ;;  %2415 = vrot.lane.b32.xlu1 %v4425_v57, %s4128_s10 }
 0x31a   : > { %v5411_v3 = vpop.permute.xlu0 %2111  ;;  %v5413_v39 = vpop.permute.xlu1 %1770 }
 0x31b   : > { %8902 = vst [vmem:[#allocation229_spill] sm:$0xff] %v5411_v3  ;;  %8903 = vst [vmem:[#allocation230_spill] sm:$0xff] %v5413_v39 }
 0x31c   : > { %2421 = vrot.lane.b32.xlu0 %v4570_v6, %s4128_s10  ;;  %2419 = vrot.lane.b32.xlu1 %v4501_v30, %s4128_s10 }
 0x31e   : > { %v5419_v27 = vpop.permute.xlu0 %2115  ;;  %v5421_v7 = vpop.permute.xlu1 %2113 }
 0x31f   : > { %8904 = vst [vmem:[#allocation231_spill] sm:$0xff] %v5419_v27  ;;  %8905 = vst [vmem:[#allocation232_spill] sm:$0xff] %v5421_v7 }
 0x320   : > { %2433 = vrot.lane.b32.xlu0 %v4539_v54, %s4128_s10  ;;  %2423 = vrot.lane.b32.xlu1 %v4585_v20, %s4128_s10 }
 0x322   : > { %v5427_v35 = vpop.permute.xlu0 %2119  ;;  %v5429_v3 = vpop.permute.xlu1 %2117 }
 0x323   : > { %8906 = vst [vmem:[#allocation233_spill] sm:$0xff] %v5427_v35  ;;  %8907 = vst [vmem:[#allocation234_spill] sm:$0xff] %v5429_v3 }
 0x324   : > { %2445 = vrot.lane.b32.xlu0 %v4581_v17, %s4128_s10  ;;  %2435 = vrot.lane.b32.xlu1 %v4547_v60, %s4128_s10 }
 0x326   : > { %v5435_v39 = vpop.permute.xlu0 %2123  ;;  %v5437_v27 = vpop.permute.xlu1 %2121 }
 0x327   : > { %8908 = vst [vmem:[#allocation235_spill] sm:$0xff] %v5435_v39  ;;  %8909 = vst [vmem:[#allocation236_spill] sm:$0xff] %v5437_v27 }
 0x328   : > { %2457 = vrot.lane.b32.xlu0 %v4813_v46, %s4128_s10  ;;  %2447 = vrot.lane.b32.xlu1 %v4595_v23, %s4128_s10 }
 0x32a   : > { %v5443_v7 = vpop.permute.xlu0 %2127  ;;  %v5445_v35 = vpop.permute.xlu1 %2125 }
 0x32b   : > { %8910 = vst [vmem:[#allocation237_spill] sm:$0xff] %v5443_v7  ;;  %8911 = vst [vmem:[#allocation238_spill] sm:$0xff] %v5445_v35 }
 0x32c   : > { %2711 = vrot.lane.b32.xlu0 %v4570_v6, %s4129_s16  ;;  %2459 = vrot.lane.b32.xlu1 %v4838_v14, %s4128_s10 }
 0x32e   : > { %v5451_v39 = vpop.permute.xlu0 %2131  ;;  %v5453_v3 = vpop.permute.xlu1 %2129 }
 0x32f   : > { %8912 = vst [vmem:[#allocation239_spill] sm:$0xff] %v5451_v39  ;;  %8913 = vst [vmem:[#allocation240_spill] sm:$0xff] %v5453_v3 }
 0x330   : > { %2723 = vrot.lane.b32.xlu0 %v4539_v54, %s4129_s16  ;;  %2713 = vrot.lane.b32.xlu1 %v4585_v20, %s4129_s16 }
 0x332   : > { %v5459_v7 = vpop.permute.xlu0 %2135  ;;  %v5461_v35 = vpop.permute.xlu1 %2133 }
 0x333   : > { %8914 = vst [vmem:[#allocation241_spill] sm:$0xff] %v5459_v7  ;;  %8915 = vst [vmem:[#allocation242_spill] sm:$0xff] %v5461_v35 }
 0x334   : > { %2735 = vrot.lane.b32.xlu0 %v4581_v17, %s4129_s16  ;;  %2725 = vrot.lane.b32.xlu1 %v4547_v60, %s4129_s16 }
 0x336   : > { %v5467_v27 = vpop.permute.xlu0 %2139  ;;  %v5469_v39 = vpop.permute.xlu1 %2137 }
 0x337   : > { %8916 = vst [vmem:[#allocation243_spill] sm:$0xff] %v5467_v27  ;;  %8917 = vst [vmem:[#allocation244_spill] sm:$0xff] %v5469_v39 }
 0x338   : > { %2747 = vrot.lane.b32.xlu0 %v4813_v46, %s4129_s16  ;;  %2737 = vrot.lane.b32.xlu1 %v4595_v23, %s4129_s16 }
 0x33a   : > { %v5475_v3 = vpop.permute.xlu0 %2143  ;;  %v5477_v7 = vpop.permute.xlu1 %2141 }
 0x33b   : > { %8918 = vst [vmem:[#allocation245_spill] sm:$0xff] %v5475_v3  ;;  %8919 = vst [vmem:[#allocation246_spill] sm:$0xff] %v5477_v7 }
 0x33c   : > { %2699 = vrot.lane.b32.xlu0 %v4532_v48, %s4129_s16  ;;  %2749 = vrot.lane.b32.xlu1 %v4838_v14, %s4129_s16 }
 0x33e   : > { %v5483_v35 = vpop.permute.xlu0 %2147  ;;  %v5485_v27 = vpop.permute.xlu1 %2145 }
 0x33f   : > { %8920 = vst [vmem:[#allocation247_spill] sm:$0xff] %v5483_v35  ;;  %8921 = vst [vmem:[#allocation248_spill] sm:$0xff] %v5485_v27 }
 0x340   : > { %2429 = vrot.lane.b32.xlu0 %v4463_v13, %s4128_s10  ;;  %2701 = vrot.lane.b32.xlu1 %v4541_v58, %s4129_s16 }
 0x342   : > { %v5491_v39 = vpop.permute.xlu0 %2151  ;;  %v5493_v3 = vpop.permute.xlu1 %2149 }
 0x343   : > { %8922 = vst [vmem:[#allocation249_spill] sm:$0xff] %v5491_v39  ;;  %8923 = vst [vmem:[#allocation250_spill] sm:$0xff] %v5493_v3 }
 0x344   : > { %2441 = vrot.lane.b32.xlu0 %v4499_v28, %s4128_s10  ;;  %2431 = vrot.lane.b32.xlu1 %v4471_v16, %s4128_s10 }
 0x346   : > { %v5499_v7 = vpop.permute.xlu0 %2155  ;;  %v5501_v35 = vpop.permute.xlu1 %2153 }
 0x347   : > { %8924 = vst [vmem:[#allocation251_spill] sm:$0xff] %v5499_v7  ;;  %8925 = vst [vmem:[#allocation252_spill] sm:$0xff] %v5501_v35 }
 0x348   : > { %2453 = vrot.lane.b32.xlu0 %v4726_v51, %s4128_s10  ;;  %2443 = vrot.lane.b32.xlu1 %v4507_v31, %s4128_s10 }
 0x34a   : > { %v5507_v27 = vpop.permute.xlu0 %2159  ;;  %v5509_v39 = vpop.permute.xlu1 %2157 }
 0x34b   : > { %8926 = vst [vmem:[#allocation253_spill] sm:$0xff] %v5507_v27  ;;  %8927 = vst [vmem:[#allocation254_spill] sm:$0xff] %v5509_v39 }
 0x34c   : > { %3001 = vrot.lane.b32.xlu0 %v4570_v6, %s4130_s3  ;;  %2455 = vrot.lane.b32.xlu1 %v4741_v49, %s4128_s10 }
 0x34e   : > { %v5515_v3 = vpop.permute.xlu0 %2163  ;;  %v5517_v35 = vpop.permute.xlu1 %2161 }
 0x34f   : > { %8928 = vst [vmem:[#allocation255_spill] sm:$0xff] %v5515_v3  ;;  %8929 = vst [vmem:[#allocation256_spill] sm:$0xff] %v5517_v35  ;;  %v3275_v35 = vld [vmem:[%s8297_s4 + $0x20] sm:$0xff] }
 0x350   : > { %3013 = vrot.lane.b32.xlu0 %v4539_v54, %s4130_s3  ;;  %3003 = vrot.lane.b32.xlu1 %v4585_v20, %s4130_s3 }
 0x352   : > { %v5523_v27 = vpop.permute.xlu0 %2167  ;;  %v5525_v39 = vpop.permute.xlu1 %2165 }
 0x353   : > { %8930 = vst [vmem:[#allocation257_spill] sm:$0xff] %v5523_v27  ;;  %8931 = vst [vmem:[#allocation258_spill] sm:$0xff] %v5525_v39  ;;  %v901_v39 = vlaneseq }
 0x354   : > { %3025 = vrot.lane.b32.xlu0 %v4581_v17, %s4130_s3  ;;  %3015 = vrot.lane.b32.xlu1 %v4547_v60, %s4130_s3 }
 0x355   : > { %v5548_v33 = vand.u32 127, %v901_v39  ;;  %v5561_v39 = vmul.f32 %v1969_v47, %v4387_v42  ;;  %v5575_v47 = vmul.f32 %v1970_v34, %v4423_v56  ;;  %v5590_v34 = vmul.f32 %v1991_v5, %v4465_v15 }
 0x356   : > { %v5531_v7 = vpop.permute.xlu0 %2171  ;;  %v5533_v3 = vpop.permute.xlu1 %2169  ;;  %v5605_v5 = vmul.f32 %v1999_v18, %v4532_v48  ;;  %v1980_v18 = vld [vmem:[#allocation6 + $0x668] sm:$0xff] }
 0x357   : > { %8932 = vst [vmem:[#allocation259_spill] sm:$0xff] %v5531_v7  ;;  %8933 = vst [vmem:[#allocation260_spill] sm:$0xff] %v5533_v3  ;;  %v1975_v7 = vld [vmem:[#allocation6 + $0x640] sm:$0xff]  ;;  %v1968_v3 = vld [vmem:[#allocation6 + $0x608] sm:$0xff]  ;;  %vm903_vm2 = vcmp.lt.s32.totalorder %v5548_v33, 17  ;;  %vm1192_vm3 = vcmp.lt.s32.totalorder %v5548_v33, 16 }
 0x358   : > { %3037 = vrot.lane.b32.xlu0 %v4813_v46, %s4130_s3  ;;  %3027 = vrot.lane.b32.xlu1 %v4595_v23, %s4130_s3  ;;  %8939 = vst [vmem:[#allocation266_spill] sm:$0xff] %v5561_v39  ;;  %v5566_v25 = vmul.f32 %v1975_v7, %v4389_v43  ;;  %v5569_v36 = vmul.f32 %v1968_v3, %v4416_v52  ;;  %8943 = vst [vmem:[#allocation270_spill] sm:$0xff] %v5575_v47  ;;  %v2002_v39 = vld [vmem:[#allocation6 + $0x718] sm:$0xff]  ;;  %v2007_v7 = vld [vmem:[#allocation6 + $0x740] sm:$0xff]  ;;  %vm1482_vm4 = vcmp.lt.s32.totalorder %v5548_v33, 15 }
 0x359   : > { %8948 = vst [vmem:[#allocation275_spill] sm:$0xff] %v5590_v34  ;;  %v1986_v47 = vld [vmem:[#allocation6 + $0x698] sm:$0xff]  ;;  %8953 = vst [vmem:[#allocation280_spill] sm:$0xff] %v5605_v5  ;;  %vm1772_vm5 = vcmp.lt.s32.totalorder %v5548_v33, 1  ;;  %vm2207_vm6 = vcmp.lt.s32.totalorder %v5548_v33, 127  ;;  %vm2497_vm7 = vcmp.lt.s32.totalorder %v5548_v33, 113 }
 0x35a   : > { %v5542_v27 = vpop.permute.xlu0 %2175  ;;  %v5544_v19 = vpop.permute.xlu1 %2173  ;;  %8940 = vst [vmem:[#allocation267_spill] sm:$0xff] %v5566_v25  ;;  %8941 = vst [vmem:[#allocation268_spill] sm:$0xff] %v5569_v36  ;;  %v5582_v25 = vmul.f32 %v1976_v21, %v4425_v57  ;;  %v1971_v36 = vld [vmem:[#allocation6 + $0x620] sm:$0xff]  ;;  %v5599_v21 = vmul.f32 %v1993_v1, %v4471_v16  ;;  %v1974_v34 = vld [vmem:[#allocation6 + $0x638] sm:$0xff]  ;;  %vm2787_vm8 = vcmp.lt.s32.totalorder %v5548_v33, 112  ;;  %vm3077_vm9 = vcmp.lt.s32.totalorder %v5548_v33, 111 }
 0x35b   : > { %8934 = vst [vmem:[#allocation261_spill] sm:$0xff] %v5542_v27  ;;  %8935 = vst [vmem:[#allocation262_spill] sm:$0xff] %v5544_v19  ;;  %v3276_v27 = vld [vmem:[%s8297_s4 + $0x28] sm:$0xff]  ;;  %v1983_v19 = vld [vmem:[#allocation6 + $0x680] sm:$0xff] }
 0x35c   : > { %3299 = vperm.xlu0 %3949, %v3275_v35   ;;  %3039 = vrot.lane.b32.xlu1 %v4838_v14, %s4130_s3  ;;  %v1984_v35 = vld [vmem:[#allocation6 + $0x688] sm:$0xff]  ;;  %v1985_v14 = vld [vmem:[#allocation6 + $0x690] sm:$0xff]  ;;  %v5579_v37 = vmul.f32 %v1983_v19, %v4452_v8  ;;  %8945 = vst [vmem:[#allocation272_spill] sm:$0xff] %v5582_v25  ;;  %8951 = vst [vmem:[#allocation278_spill] sm:$0xff] %v5599_v21  ;;  %v5616_v21 = vmul.f32 %v2007_v7, %v4541_v58 }
 0x35d   : > { %v5585_v3 = vmul.f32 %v1984_v35, %v4492_v24  ;;  %v5596_v19 = vmul.f32 %v1985_v14, %v4463_v13  ;;  %v1994_v35 = vld [vmem:[#allocation6 + $0x6d8] sm:$0xff]  ;;  %v5611_v14 = vmul.f32 %v2001_v32, %v4539_v54  ;;  %v1979_v1 = vld [vmem:[#allocation6 + $0x660] sm:$0xff]  ;;  %v1988_v32 = vld [vmem:[#allocation6 + $0x6a8] sm:$0xff] }
 0x35e   : > { %v5550_v0 = vpop.permute.xlu0 %2179  ;;  %v5555_v11 = vpop.permute.xlu1 %2177  ;;  %8944 = vst [vmem:[#allocation271_spill] sm:$0xff] %v5579_v37  ;;  %v1972_v37 = vld [vmem:[#allocation6 + $0x628] sm:$0xff]  ;;  %8956 = vst [vmem:[#allocation283_spill] sm:$0xff] %v5616_v21  ;;  %v1987_v54 = vld [vmem:[#allocation6 + $0x6a0] sm:$0xff] }
 0x35f   : > { %8936 = vst [vmem:[#allocation263_spill] sm:$0xff] %v5550_v0  ;;  %8937 = vst [vmem:[#allocation264_spill] sm:$0xff] %v5555_v11  ;;  %v1978_v0 = vld [vmem:[#allocation6 + $0x658] sm:$0xff]  ;;  %v2000_v11 = vld [vmem:[#allocation6 + $0x708] sm:$0xff] }
 0x360   : > { %2989 = vrot.lane.b32.xlu0 %v4532_v48, %s4130_s3  ;;  %3304 = vperm.xlu1 %3950, %v3276_v27   ;;  %8946 = vst [vmem:[#allocation273_spill] sm:$0xff] %v5585_v3  ;;  %v5593_v27 = vmul.f32 %v1992_v29, %v4501_v30  ;;  %8950 = vst [vmem:[#allocation277_spill] sm:$0xff] %v5596_v19  ;;  %v1973_v3 = vld [vmem:[#allocation6 + $0x630] sm:$0xff]  ;;  %v5608_v29 = vmul.f32 %v2000_v11, %v4570_v6  ;;  %v1996_v7 = vld [vmem:[#allocation6 + $0x6e8] sm:$0xff] }
 0x361   : > { %8955 = vst [vmem:[#allocation282_spill] sm:$0xff] %v5611_v14  ;;  %v5619_v19 = vmul.f32 %v2008_v61, %v4585_v20  ;;  %v5622_v48 = vmul.f32 %v2009_v40, %v4547_v60  ;;  %v5625_v6 = vmul.f32 %v1978_v0, %v4431_v59  ;;  %v5631_v11 = vmul.f32 %v1986_v47, %v4499_v28  ;;  %v1995_v40 = vld [vmem:[#allocation6 + $0x6e0] sm:$0xff]  ;;  %v1982_v61 = vld [vmem:[#allocation6 + $0x678] sm:$0xff]  ;;  %v9016_v21 = vld [vmem:[#allocation29_spill] sm:$0xff] }
 0x362   : > { %v5587_v43 = vpop.permute.xlu0 %2183  ;;  %8949 = vst [vmem:[#allocation276_spill] sm:$0xff] %v5593_v27  ;;  %v5601_v25 = vpop.permute.xlu1 %2181  ;;  %8954 = vst [vmem:[#allocation281_spill] sm:$0xff] %v5608_v29  ;;  %v5634_v20 = vmul.f32 %v1994_v35, %v4507_v31  ;;  %v5637_v60 = vmul.f32 %v2002_v39, %v4581_v17  ;;  %v5648_v47 = vmul.f32 %v1979_v1, %v4645_v12  ;;  %v2004_v39 = vld [vmem:[#allocation6 + $0x728] sm:$0xff]  ;;  %v1997_v1 = vld [vmem:[#allocation6 + $0x6f0] sm:$0xff] }
 0x363   : > { %8947 = vst [vmem:[#allocation274_spill] sm:$0xff] %v5587_v43  ;;  %8952 = vst [vmem:[#allocation279_spill] sm:$0xff] %v5601_v25  ;;  %v2010_v43 = vld [vmem:[#allocation6 + $0x758] sm:$0xff]  ;;  %v1981_v25 = vld [vmem:[#allocation6 + $0x670] sm:$0xff]  ;;  %v5651_v35 = vmul.f32 %v1972_v37, %v4682_v41 }
 0x364   : > { %2707 = vrot.lane.b32.xlu0 %v4492_v24, %s4129_s16  ;;  %8957 = vst [vmem:[#allocation284_spill] sm:$0xff] %v5619_v19  ;;  %8958 = vst [vmem:[#allocation285_spill] sm:$0xff] %v5622_v48  ;;  %2991 = vrot.lane.b32.xlu1 %v4541_v58, %s4130_s3  ;;  %v5642_v58 = vmul.f32 %v2010_v43, %v4595_v23  ;;  %v5659_v43 = vmul.f32 %v1980_v18, %v4697_v63  ;;  %v1990_v37 = vld [vmem:[#allocation6 + $0x6b8] sm:$0xff]  ;;  %v9003_v63 = vld [vmem:[#allocation33_spill] sm:$0xff] }
 0x365   : > { %8959 = vst [vmem:[#allocation286_spill] sm:$0xff] %v5625_v6  ;;  %8960 = vst [vmem:[#allocation287_spill] sm:$0xff] %v5631_v11  ;;  %v5645_v6 = vmul.f32 %v1971_v36, %v4630_v62  ;;  %v2003_v11 = vld [vmem:[#allocation6 + $0x720] sm:$0xff]  ;;  %v5662_v23 = vmul.f32 %v1988_v32, %v4770_v2  ;;  %v5667_v36 = vmul.f32 %v1973_v3, %v4641_v9  ;;  %v1998_v3 = vld [vmem:[#allocation6 + $0x6f8] sm:$0xff] }
 0x366   : > { %8961 = vst [vmem:[#allocation288_spill] sm:$0xff] %v5634_v20  ;;  %8962 = vst [vmem:[#allocation289_spill] sm:$0xff] %v5637_v60  ;;  %v5639_v0 = vpop.permute.xlu0 %2187  ;;  %v5653_v17 = vpop.permute.xlu1 %2185  ;;  %v1989_v20 = vld [vmem:[#allocation6 + $0x6b0] sm:$0xff]  ;;  %v5678_v18 = vmul.f32 %v1974_v34, %v4693_v55  ;;  %v5681_v32 = vmul.f32 %v1981_v25, %v4655_v38  ;;  %v9002_v55 = vld [vmem:[#allocation24_spill] sm:$0xff] }
 0x367   : > { %8963 = vst [vmem:[#allocation290_spill] sm:$0xff] %v5639_v0  ;;  %8964 = vst [vmem:[#allocation291_spill] sm:$0xff] %v5642_v58  ;;  %v5656_v0 = vmul.f32 %v1987_v54, %v4726_v51  ;;  %v5675_v54 = vmul.f32 %v1996_v7, %v4785_v53  ;;  %v5692_v7 = vmul.f32 %v1982_v61, %v4708_v44  ;;  %v2013_v25 = vld [vmem:[#allocation6 + $0x770] sm:$0xff]  ;;  %v8983_v61 = vld [vmem:[#allocation69_spill] sm:$0xff] }
 0x368   : > { %8965 = vst [vmem:[#allocation292_spill] sm:$0xff] %v5645_v6  ;;  %8966 = vst [vmem:[#allocation293_spill] sm:$0xff] %v5648_v47  ;;  %2719 = vrot.lane.b32.xlu0 %v4463_v13, %s4129_s16  ;;  %2709 = vrot.lane.b32.xlu1 %v4501_v30, %s4129_s16  ;;  %v5695_v34 = vmul.f32 %v1989_v20, %v4737_v26  ;;  %v8985_v20 = vld [vmem:[#allocation62_spill] sm:$0xff]  ;;  %v8988_v47 = vld [vmem:[#allocation84_spill] sm:$0xff]  ;;  %v935_v9 = vsel %vm903_vm2, %v9003_v63, %v9002_v55 }
 0x369   : > { %8967 = vst [vmem:[#allocation294_spill] sm:$0xff] %v5651_v35  ;;  %8968 = vst [vmem:[#allocation295_spill] sm:$0xff] %v5653_v17  ;;  %v5670_v17 = vmul.f32 %v1995_v40, %v4741_v49  ;;  %v2011_v35 = vld [vmem:[#allocation6 + $0x760] sm:$0xff]  ;;  %v5687_v40 = vmul.f32 %v2004_v39, %v4857_v22  ;;  %v8995_v44 = vld [vmem:[#allocation23_spill] sm:$0xff] }
 0x36a   : > { %8969 = vst [vmem:[#allocation296_spill] sm:$0xff] %v5656_v0  ;;  %8970 = vst [vmem:[#allocation297_spill] sm:$0xff] %v5659_v43  ;;  %v5689_v43 = vpop.permute.xlu0 %2191  ;;  %v5705_v39 = vpop.permute.xlu1 %2189  ;;  %v5718_v6 = vmul.f32 %v2011_v35, %v8988_v47  ;;  %v8998_v35 = vld [vmem:[#allocation92_spill] sm:$0xff]  ;;  %v9005_v27 = vld [vmem:[#allocation99_spill] sm:$0xff] }
 0x36b   : > { %8971 = vst [vmem:[#allocation298_spill] sm:$0xff] %v5662_v23  ;;  %8972 = vst [vmem:[#allocation299_spill] sm:$0xff] %v5667_v36  ;;  %v2005_v36 = vld [vmem:[#allocation6 + $0x730] sm:$0xff]  ;;  %v5684_v23 = vmul.f32 %v2003_v11, %v4813_v46  ;;  %v934_v46 = vsel %vm903_vm2, %v4621_v50, %v4572_v10  ;;  %v940_v11 = vsel %vm903_vm2, %v4563_v4, %v4621_v50  ;;  %v9013_v53 = vld [vmem:[#allocation39_spill] sm:$0xff] }
 0x36c   : > { %8973 = vst [vmem:[#allocation300_spill] sm:$0xff] %v5670_v17  ;;  %8974 = vst [vmem:[#allocation301_spill] sm:$0xff] %v5675_v54  ;;  %v2012_v17 = vld [vmem:[#allocation6 + $0x768] sm:$0xff]  ;;  %v954_v54 = vld [vmem:[#allocation6 + $0x10] sm:$0xff]  ;;  %2731 = vrot.lane.b32.xlu0 %v4499_v28, %s4129_s16  ;;  %2721 = vrot.lane.b32.xlu1 %v4471_v16, %s4129_s16 }
 0x36d   : > { %8975 = vst [vmem:[#allocation302_spill] sm:$0xff] %v5678_v18  ;;  %8976 = vst [vmem:[#allocation303_spill] sm:$0xff] %v5681_v32  ;;  %v2006_v18 = vld [vmem:[#allocation6 + $0x738] sm:$0xff]  ;;  %v953_v32 = vld [vmem:[#allocation6 + $0x8] sm:$0xff] }
 0x36e   : > { %8977 = vst [vmem:[#allocation304_spill] sm:$0xff] %v5684_v23  ;;  %8978 = vst [vmem:[#allocation305_spill] sm:$0xff] %v5687_v40  ;;  %v955_v40 = vld [vmem:[#allocation6 + $0x18] sm:$0xff]  ;;  %v8987_v23 = vld [vmem:[#allocation32_spill] sm:$0xff]  ;;  %v5747_v41 = vpop.permute.xlu0 %2195 }
 0x36f   : > { %8979 = vst [vmem:[#allocation306_spill] sm:$0xff] %v5689_v43  ;;  %8980 = vst [vmem:[#allocation307_spill] sm:$0xff] %v5692_v7  ;;  %v5708_v43 = vmul.f32 %v1990_v37, %v8983_v61  ;;  %v5711_v7 = vmul.f32 %v1997_v1, %v8985_v20  ;;  %v928_v0 = vsel %vm903_vm2, %v4572_v10, %v8987_v23  ;;  %v8990_v50 = vld [vmem:[#allocation74_spill] sm:$0xff]  ;;  %v8992_v37 = vld [vmem:[#allocation80_spill] sm:$0xff] }
 0x370   : > { %8981 = vst [vmem:[#allocation308_spill] sm:$0xff] %v5695_v34  ;;  %8982 = vst [vmem:[#allocation309_spill] sm:$0xff] %v5705_v39  ;;  %v2014_v34 = vld [vmem:[#allocation6 + $0x778] sm:$0xff]  ;;  %v5723_v39 = vmul.f32 %v1998_v3, %v8990_v50  ;;  %v1243_v1 = vld [vmem:[#allocation6 + $0x188] sm:$0xff]  ;;  %2743 = vrot.lane.b32.xlu0 %v4726_v51, %s4129_s16  ;;  %2733 = vrot.lane.b32.xlu1 %v4507_v31, %s4129_s16 }
 0x371   : > { %8984 = vst [vmem:[#allocation310_spill] sm:$0xff] %v5708_v43  ;;  %8986 = vst [vmem:[#allocation311_spill] sm:$0xff] %v5711_v7  ;;  %v5726_v43 = vmul.f32 %v2005_v36, %v8992_v37  ;;  %v8994_v7 = vld [vmem:[#allocation35_spill] sm:$0xff]  ;;  %v8996_v10 = vld [vmem:[#allocation96_spill] sm:$0xff]  ;;  %v1001_v36 = vmul.f32 %v953_v32, %v940_v11  ;;  %v5750_v50 = vmul.f32 %v2014_v34, %v9005_v27 }
 0x372   : > { %8989 = vst [vmem:[#allocation32_spill] sm:$0xff] %v5718_v6  ;;  %8991 = vst [vmem:[#allocation84_spill] sm:$0xff] %v5723_v39  ;;  %v1229_v38 = vsel %vm1192_vm3, %v8995_v44, %v8994_v7  ;;  %v5735_v47 = vmul.f32 %v2012_v17, %v8996_v10  ;;  %v5738_v6 = vmul.f32 %v2006_v18, %v8998_v35  ;;  %v9000_v3 = vld [vmem:[#allocation87_spill] sm:$0xff]  ;;  %v961_v17 = vld [vmem:[#allocation6 + $0x48] sm:$0xff]  ;;  %v5806_v57 = vpop.permute.xlu0 %2199 }
 0x373   : > { %8993 = vst [vmem:[#allocation312_spill] sm:$0xff] %v5726_v43  ;;  %v5741_v39 = vmul.f32 %v2013_v25, %v9000_v3  ;;  %v1002_v43 = vmul.f32 %v954_v54, %v934_v46  ;;  %9004 = vst [vmem:[#allocation24_spill] sm:$0xff] %v5747_v41  ;;  %v1003_v25 = vmul.f32 %v955_v40, %v928_v0  ;;  %v9008_v32 = vld [vmem:[#allocation25_spill] sm:$0xff]  ;;  %v1245_v46 = vld [vmem:[#allocation6 + $0x198] sm:$0xff]  ;;  %v5764_v41 = vpop.permute.xlu1 %2193 }
 0x374   : > { %8997 = vst [vmem:[#allocation35_spill] sm:$0xff] %v5735_v47  ;;  %8999 = vst [vmem:[#allocation313_spill] sm:$0xff] %v5738_v6  ;;  %v9007_v47 = vld [vmem:[#allocation22_spill] sm:$0xff]  ;;  %v1223_v54 = vsel %vm1192_vm3, %v8994_v7, %v9008_v32  ;;  %v9009_v11 = vld [vmem:[#allocation37_spill] sm:$0xff]  ;;  %v1291_v0 = vmul.f32 %v1243_v1, %v1229_v38  ;;  %2695 = vrot.lane.b32.xlu0 %v4452_v8, %s4129_s16  ;;  %2745 = vrot.lane.b32.xlu1 %v4741_v49, %s4129_s16 }
 0x375   : > { %9001 = vst [vmem:[#allocation314_spill] sm:$0xff] %v5741_v39  ;;  %9006 = vst [vmem:[#allocation33_spill] sm:$0xff] %v5750_v50  ;;  %v941_v18 = vsel %vm903_vm2, %v9007_v47, %v9003_v63  ;;  %v1244_v6 = vld [vmem:[#allocation6 + $0x190] sm:$0xff]  ;;  %v1217_v34 = vsel %vm1192_vm3, %v9008_v32, %v9009_v11  ;;  %v9011_v39 = vld [vmem:[#allocation36_spill] sm:$0xff] }
 0x376   : > { %9010 = vst [vmem:[#allocation25_spill] sm:$0xff] %v5764_v41  ;;  %v962_v50 = vld [vmem:[#allocation6 + $0x50] sm:$0xff]  ;;  %v929_v63 = vsel %vm903_vm2, %v9002_v55, %v9011_v39  ;;  %v1251_v40 = vld [vmem:[#allocation6 + $0x1c8] sm:$0xff]  ;;  %v9012_v61 = vld [vmem:[#allocation28_spill] sm:$0xff]  ;;  %v1292_v29 = vmul.f32 %v1244_v6, %v1223_v54  ;;  %v1293_v27 = vmul.f32 %v1245_v46, %v1217_v34 }
 0x377   : > { %v1252_v20 = vld [vmem:[#allocation6 + $0x1d0] sm:$0xff]  ;;  %v1224_v7 = vsel %vm1192_vm3, %v9013_v53, %v9012_v61  ;;  %v1253_v41 = vld [vmem:[#allocation6 + $0x1d8] sm:$0xff]  ;;  %v9015_v2 = vld [vmem:[#allocation41_spill] sm:$0xff]  ;;  %9023 = vst [vmem:[#allocation37_spill] sm:$0xff] %v5806_v57  ;;  %v5812_v46 = vpop.permute.xlu1 %2197 }
 0x378   : > { %v9014_v26 = vld [vmem:[#allocation26_spill] sm:$0xff]  ;;  %v1218_v38 = vsel %vm1192_vm3, %v9012_v61, %v9015_v2  ;;  %v1533_v55 = vld [vmem:[#allocation6 + $0x308] sm:$0xff]  ;;  %v9017_v58 = vld [vmem:[#allocation40_spill] sm:$0xff]  ;;  %9025 = vst [vmem:[#allocation36_spill] sm:$0xff] %v5812_v46  ;;  %2425 = vrot.lane.b32.xlu0 %v4387_v42, %s4128_s10  ;;  %2697 = vrot.lane.b32.xlu1 %v4465_v15, %s4129_s16 }
 0x379   : > { %v1230_v32 = vsel %vm1192_vm3, %v9014_v26, %v9013_v53  ;;  %v1534_v1 = vld [vmem:[#allocation6 + $0x310] sm:$0xff]  ;;  %v1513_v60 = vsel %vm1482_vm4, %v9017_v58, %v9016_v21  ;;  %v9018_v5 = vld [vmem:[#allocation27_spill] sm:$0xff]  ;;  %v1541_v3 = vld [vmem:[#allocation6 + $0x348] sm:$0xff]  ;;  %v1300_v26 = vmul.f32 %v1252_v20, %v1224_v7  ;;  %v1301_v34 = vmul.f32 %v1253_v41, %v1218_v38 }
 0x37a   : > { %v1519_v53 = vsel %vm1482_vm4, %v9018_v5, %v9017_v58  ;;  %v1535_v48 = vld [vmem:[#allocation6 + $0x318] sm:$0xff]  ;;  %v9019_v14 = vld [vmem:[#allocation42_spill] sm:$0xff]  ;;  %v1299_v52 = vmul.f32 %v1251_v40, %v1230_v32  ;;  %v1582_v4 = vmul.f32 %v1534_v1, %v1513_v60  ;;  %v1339_v20 = vadd.f32 %v1291_v0, %v1001_v36  ;;  %v5818_v32 = vpop.permute.xlu0 %2203  ;;  %v969_v60 = vld [vmem:[#allocation6 + $0x88] sm:$0xff] }
 0x37b   : > { %v1507_v19 = vsel %vm1482_vm4, %v9016_v21, %v9019_v14  ;;  %v963_v61 = vld [vmem:[#allocation6 + $0x58] sm:$0xff]  ;;  %v1542_v35 = vld [vmem:[#allocation6 + $0x350] sm:$0xff]  ;;  %v1009_v21 = vmul.f32 %v961_v17, %v941_v18  ;;  %v1581_v44 = vmul.f32 %v1533_v55, %v1519_v53  ;;  %v1340_v40 = vadd.f32 %v1292_v29, %v1002_v43  ;;  %9026 = vst [vmem:[#allocation28_spill] sm:$0xff] %v5818_v32  ;;  %v9028_v55 = vld [vmem:[#allocation61_spill] sm:$0xff] }
 0x37c   : > { %v9020_v10 = vld [vmem:[#allocation31_spill] sm:$0xff]  ;;  %v9022_v58 = vld [vmem:[#allocation30_spill] sm:$0xff]  ;;  %v1583_v31 = vmul.f32 %v1535_v48, %v1507_v19  ;;  %v1011_v57 = vmul.f32 %v963_v61, %v929_v63  ;;  %v1341_v7 = vadd.f32 %v1293_v27, %v1003_v25  ;;  %v9027_v48 = vld [vmem:[#allocation48_spill] sm:$0xff]  ;;  %2437 = vrot.lane.b32.xlu0 %v4423_v56, %s4128_s10  ;;  %2427 = vrot.lane.b32.xlu1 %v4395_v45, %s4128_s10 }
 0x37d   : > { %v9021_v37 = vld [vmem:[#allocation43_spill] sm:$0xff]  ;;  %v9024_v6 = vld [vmem:[#allocation46_spill] sm:$0xff]  ;;  %v1347_v41 = vadd.f32 %v1299_v52, %v1009_v21  ;;  %v5830_v29 = vadd.f32 %v1581_v44, %v1339_v20  ;;  %v5832_v43 = vadd.f32 %v1582_v4, %v1340_v40  ;;  %v1267_v20 = vld [vmem:[#allocation6 + $0x248] sm:$0xff] }
 0x37e   : > { %v1514_v22 = vsel %vm1482_vm4, %v9021_v37, %v9020_v10  ;;  %v1520_v5 = vsel %vm1482_vm4, %v9022_v58, %v9021_v37  ;;  %v1543_v47 = vld [vmem:[#allocation6 + $0x358] sm:$0xff]  ;;  %v1508_v54 = vsel %vm1482_vm4, %v9020_v10, %v9024_v6  ;;  %v1010_v37 = vmul.f32 %v962_v50, %v935_v9  ;;  %v970_v19 = vld [vmem:[#allocation6 + $0x90] sm:$0xff]  ;;  %v5828_v50 = vpop.permute.xlu1 %2201  ;;  %v5858_v21 = vpop.permute.xlu0 %2401  ;;  %v9045_v40 = vld [vmem:[#allocation72_spill] sm:$0xff] }
 0x37f   : > { %v1589_v17 = vmul.f32 %v1541_v3, %v1520_v5  ;;  %v1590_v18 = vmul.f32 %v1542_v35, %v1514_v22  ;;  %v1591_v10 = vmul.f32 %v1543_v47, %v1508_v54  ;;  %v936_v9 = vsel %vm903_vm2, %v9028_v55, %v9027_v48  ;;  %v9029_v22 = vld [vmem:[#allocation45_spill] sm:$0xff]  ;;  %9030 = vst [vmem:[#allocation39_spill] sm:$0xff] %v5828_v50  ;;  %v971_v35 = vld [vmem:[#allocation6 + $0x98] sm:$0xff]  ;;  %v9036_v3 = vld [vmem:[#allocation64_spill] sm:$0xff] }
 0x380   : > { %v1348_v38 = vadd.f32 %v1300_v26, %v1010_v37  ;;  %v942_v5 = vsel %vm903_vm2, %v9029_v22, %v9028_v55  ;;  %v1349_v27 = vadd.f32 %v1301_v34, %v1011_v57  ;;  %9031 = vst [vmem:[#allocation41_spill] sm:$0xff] %v5830_v29  ;;  %9032 = vst [vmem:[#allocation29_spill] sm:$0xff] %v5832_v43  ;;  %v1259_v57 = vld [vmem:[#allocation6 + $0x208] sm:$0xff]  ;;  %v9037_v44 = vld [vmem:[#allocation67_spill] sm:$0xff]  ;;  %2449 = vrot.lane.b32.xlu0 %v4630_v62, %s4128_s10 }
 0x381   : > { %v5834_v52 = vadd.f32 %v1583_v31, %v1341_v7  ;;  %v5838_v26 = vadd.f32 %v1589_v17, %v1347_v41  ;;  %v930_v36 = vsel %vm903_vm2, %v9027_v48, %v9036_v3  ;;  %v9038_v25 = vld [vmem:[#allocation51_spill] sm:$0xff]  ;;  %v1017_v63 = vmul.f32 %v969_v60, %v942_v5  ;;  %v1260_v1 = vld [vmem:[#allocation6 + $0x210] sm:$0xff]  ;;  %9041 = vst [vmem:[#allocation46_spill] sm:$0xff] %v5858_v21  ;;  %v9042_v54 = vld [vmem:[#allocation53_spill] sm:$0xff] }
 0x382   : > { %v5840_v47 = vadd.f32 %v1590_v18, %v1348_v38  ;;  %v1231_v31 = vsel %vm1192_vm3, %v9038_v25, %v9037_v44  ;;  %v5852_v4 = vadd.f32 %v1591_v10, %v1349_v27  ;;  %v1018_v0 = vmul.f32 %v970_v19, %v936_v9  ;;  %v9040_v53 = vld [vmem:[#allocation54_spill] sm:$0xff]  ;;  %v9043_v34 = vld [vmem:[#allocation65_spill] sm:$0xff]  ;;  %v9046_v7 = vld [vmem:[#allocation55_spill] sm:$0xff]  ;;  %v5876_v19 = vpop.permute.xlu1 %2205  ;;  %2439 = vrot.lane.b32.xlu1 %v4431_v59, %s4128_s10 }
 0x383   : > { %9033 = vst [vmem:[#allocation40_spill] sm:$0xff] %v5834_v52  ;;  %9034 = vst [vmem:[#allocation42_spill] sm:$0xff] %v5838_v26  ;;  %v1225_v61 = vsel %vm1192_vm3, %v9037_v44, %v9040_v53  ;;  %v937_v37 = vsel %vm903_vm2, %v9043_v34, %v9042_v54  ;;  %v9044_v17 = vld [vmem:[#allocation50_spill] sm:$0xff]  ;;  %v1232_v10 = vsel %vm1192_vm3, %v9046_v7, %v9045_v40  ;;  %v1261_v41 = vld [vmem:[#allocation6 + $0x218] sm:$0xff]  ;;  %v5910_v7 = vpop.permute.xlu0 %2405 }
 0x384   : > { %9035 = vst [vmem:[#allocation31_spill] sm:$0xff] %v5840_v47  ;;  %9039 = vst [vmem:[#allocation43_spill] sm:$0xff] %v5852_v4  ;;  %v943_v18 = vsel %vm903_vm2, %v9044_v17, %v9043_v34  ;;  %v9047_v38 = vld [vmem:[#allocation70_spill] sm:$0xff]  ;;  %v977_v48 = vld [vmem:[#allocation6 + $0xc8] sm:$0xff]  ;;  %v1019_v55 = vmul.f32 %v971_v35, %v930_v36  ;;  %v1307_v9 = vmul.f32 %v1259_v57, %v1231_v31  ;;  %2997 = vrot.lane.b32.xlu0 %v4492_v24, %s4130_s3 }
 0x385   : > { %v1219_v60 = vsel %vm1192_vm3, %v9040_v53, %v9047_v38  ;;  %9048 = vst [vmem:[#allocation48_spill] sm:$0xff] %v5876_v19  ;;  %v1268_v5 = vld [vmem:[#allocation6 + $0x250] sm:$0xff]  ;;  %v9049_v27 = vld [vmem:[#allocation57_spill] sm:$0xff]  ;;  %v9051_v46 = vld [vmem:[#allocation56_spill] sm:$0xff]  ;;  %v1308_v53 = vmul.f32 %v1260_v1, %v1225_v61  ;;  %v1315_v61 = vmul.f32 %v1267_v20, %v1232_v10 }
 0x386   : > { %v1226_v44 = vsel %vm1192_vm3, %v9045_v40, %v9049_v27  ;;  %v1549_v34 = vld [vmem:[#allocation6 + $0x388] sm:$0xff]  ;;  %v1269_v19 = vld [vmem:[#allocation6 + $0x258] sm:$0xff]  ;;  %v1550_v36 = vld [vmem:[#allocation6 + $0x390] sm:$0xff]  ;;  %v1309_v47 = vmul.f32 %v1261_v41, %v1219_v60  ;;  %9058 = vst [vmem:[#allocation61_spill] sm:$0xff] %v5910_v7  ;;  %v5916_v60 = vpop.permute.xlu1 %2403  ;;  %2451 = vrot.lane.b32.xlu1 %v4645_v12, %s4128_s10 }
 0x387   : > { %v9050_v50 = vld [vmem:[#allocation73_spill] sm:$0xff]  ;;  %v9052_v21 = vld [vmem:[#allocation75_spill] sm:$0xff]  ;;  %v9054_v4 = vld [vmem:[#allocation76_spill] sm:$0xff]  ;;  %v1316_v10 = vmul.f32 %v1268_v5, %v1226_v44  ;;  %9060 = vst [vmem:[#allocation64_spill] sm:$0xff] %v5916_v60  ;;  %v5926_v44 = vpop.permute.xlu0 %2409 }
 0x388   : > { %v1521_v32 = vsel %vm1482_vm4, %v9051_v46, %v9050_v50  ;;  %v1220_v35 = vsel %vm1192_vm3, %v9049_v27, %v9052_v21  ;;  %v9053_v57 = vld [vmem:[#allocation59_spill] sm:$0xff]  ;;  %v978_v1 = vld [vmem:[#allocation6 + $0xd0] sm:$0xff]  ;;  %v1557_v43 = vld [vmem:[#allocation6 + $0x3c8] sm:$0xff]  ;;  %9062 = vst [vmem:[#allocation67_spill] sm:$0xff] %v5926_v44  ;;  %3009 = vrot.lane.b32.xlu0 %v4463_v13, %s4130_s3 }
 0x389   : > { %v1515_v31 = vsel %vm1482_vm4, %v9050_v50, %v9053_v57  ;;  %v1551_v40 = vld [vmem:[#allocation6 + $0x398] sm:$0xff]  ;;  %v1509_v52 = vsel %vm1482_vm4, %v9053_v57, %v9054_v4  ;;  %v1558_v27 = vld [vmem:[#allocation6 + $0x3d0] sm:$0xff]  ;;  %v9056_v29 = vld [vmem:[#allocation77_spill] sm:$0xff]  ;;  %v1025_v57 = vmul.f32 %v977_v48, %v943_v18  ;;  %v1597_v41 = vmul.f32 %v1549_v34, %v1521_v32 }
 0x38a   : > { %v9055_v26 = vld [vmem:[#allocation63_spill] sm:$0xff]  ;;  %v9057_v50 = vld [vmem:[#allocation60_spill] sm:$0xff]  ;;  %v1317_v45 = vmul.f32 %v1269_v19, %v1220_v35  ;;  %v1598_v56 = vmul.f32 %v1550_v36, %v1515_v31  ;;  %v1599_v25 = vmul.f32 %v1551_v40, %v1509_v52  ;;  %v1026_v18 = vmul.f32 %v978_v1, %v937_v37  ;;  %v1275_v36 = vld [vmem:[#allocation6 + $0x288] sm:$0xff]  ;;  %2999 = vrot.lane.b32.xlu1 %v4501_v30, %s4130_s3 }
 0x38b   : > { %v1516_v58 = vsel %vm1482_vm4, %v9056_v29, %v9055_v26  ;;  %v1522_v46 = vsel %vm1482_vm4, %v9057_v50, %v9056_v29  ;;  %v979_v4 = vld [vmem:[#allocation6 + $0xd8] sm:$0xff]  ;;  %v9059_v17 = vld [vmem:[#allocation68_spill] sm:$0xff]  ;;  %v1355_v48 = vadd.f32 %v1307_v9, %v1017_v63  ;;  %v1356_v19 = vadd.f32 %v1308_v53, %v1018_v0  ;;  %v9064_v31 = vld [vmem:[#allocation101_spill] sm:$0xff] }
 0x38c   : > { %v931_v20 = vsel %vm903_vm2, %v9042_v54, %v9059_v17  ;;  %v1559_v22 = vld [vmem:[#allocation6 + $0x3d8] sm:$0xff]  ;;  %v1605_v7 = vmul.f32 %v1557_v43, %v1522_v46  ;;  %v1606_v54 = vmul.f32 %v1558_v27, %v1516_v58  ;;  %v1363_v5 = vadd.f32 %v1315_v61, %v1025_v57  ;;  %v5934_v58 = vpop.permute.xlu1 %2407  ;;  %v9069_v0 = vld [vmem:[#allocation86_spill] sm:$0xff]  ;;  %v985_v9 = vld [vmem:[#allocation6 + $0x108] sm:$0xff]  ;;  %3021 = vrot.lane.b32.xlu0 %v4499_v28, %s4130_s3 }
 0x38d   : > { %v9061_v42 = vld [vmem:[#allocation79_spill] sm:$0xff]  ;;  %v1027_v32 = vmul.f32 %v979_v4, %v931_v20  ;;  %v1357_v52 = vadd.f32 %v1309_v47, %v1019_v55  ;;  %v1364_v34 = vadd.f32 %v1316_v10, %v1026_v18  ;;  %v5928_v35 = vadd.f32 %v1597_v41, %v1355_v48  ;;  %9066 = vst [vmem:[#allocation53_spill] sm:$0xff] %v5934_v58  ;;  %v1276_v47 = vld [vmem:[#allocation6 + $0x290] sm:$0xff]  ;;  %v993_v57 = vld [vmem:[#allocation6 + $0x148] sm:$0xff] }
 0x38e   : > { %v1510_v29 = vsel %vm1482_vm4, %v9055_v26, %v9061_v42  ;;  %v9065_v40 = vld [vmem:[#allocation83_spill] sm:$0xff]  ;;  %v5936_v63 = vadd.f32 %v1598_v56, %v1356_v19  ;;  %v1227_v37 = vsel %vm1192_vm3, %v9064_v31, %v9069_v0  ;;  %v986_v24 = vld [vmem:[#allocation6 + $0x110] sm:$0xff]  ;;  %v9076_v20 = vld [vmem:[#allocation100_spill] sm:$0xff]  ;;  %3011 = vrot.lane.b32.xlu1 %v4471_v16, %s4130_s3 }
 0x38f   : > { %9063 = vst [vmem:[#allocation54_spill] sm:$0xff] %v5928_v35  ;;  %v1607_v26 = vmul.f32 %v1559_v22, %v1510_v29  ;;  %v1233_v46 = vsel %vm1192_vm3, %v9065_v40, %v9064_v31  ;;  %v1365_v43 = vadd.f32 %v1317_v45, %v1027_v32  ;;  %v5938_v4 = vadd.f32 %v1599_v25, %v1357_v52  ;;  %v9072_v53 = vld [vmem:[#allocation95_spill] sm:$0xff]  ;;  %v9073_v45 = vld [vmem:[#allocation78_spill] sm:$0xff]  ;;  %v5972_v32 = vpop.permute.xlu0 %2413  ;;  %v9081_v52 = vld [vmem:[#allocation85_spill] sm:$0xff] }
 0x390   : > { %9067 = vst [vmem:[#allocation65_spill] sm:$0xff] %v5936_v63  ;;  %v5946_v22 = vadd.f32 %v1605_v7, %v1363_v5  ;;  %v5948_v55 = vadd.f32 %v1606_v54, %v1364_v34  ;;  %v944_v56 = vsel %vm903_vm2, %v9073_v45, %v9072_v53  ;;  %v1277_v25 = vld [vmem:[#allocation6 + $0x298] sm:$0xff]  ;;  %v9075_v7 = vld [vmem:[#allocation81_spill] sm:$0xff]  ;;  %v9077_v10 = vld [vmem:[#allocation82_spill] sm:$0xff]  ;;  %v1323_v54 = vmul.f32 %v1275_v36, %v1233_v46  ;;  %v5984_v58 = vpop.permute.xlu1 %2411 }
 0x391   : > { %9068 = vst [vmem:[#allocation72_spill] sm:$0xff] %v5938_v4  ;;  %v9074_v1 = vld [vmem:[#allocation103_spill] sm:$0xff]  ;;  %v938_v27 = vsel %vm903_vm2, %v9072_v53, %v9075_v7  ;;  %v945_v41 = vsel %vm903_vm2, %v9077_v10, %v9076_v20  ;;  %v9078_v18 = vld [vmem:[#allocation98_spill] sm:$0xff]  ;;  %9079 = vst [vmem:[#allocation73_spill] sm:$0xff] %v5972_v32  ;;  %v5974_v19 = vadd.f32 %v1607_v26, %v1365_v43  ;;  %3033 = vrot.lane.b32.xlu0 %v4726_v51, %s4130_s3 }
 0x392   : > { %9070 = vst [vmem:[#allocation70_spill] sm:$0xff] %v5946_v22  ;;  %9071 = vst [vmem:[#allocation57_spill] sm:$0xff] %v5948_v55  ;;  %v1221_v61 = vsel %vm1192_vm3, %v9069_v0, %v9074_v1  ;;  %v987_v29 = vld [vmem:[#allocation6 + $0x118] sm:$0xff]  ;;  %v932_v48 = vsel %vm903_vm2, %v9075_v7, %v9078_v18  ;;  %v994_v5 = vld [vmem:[#allocation6 + $0x150] sm:$0xff]  ;;  %v939_v34 = vsel %vm903_vm2, %v9076_v20, %v9081_v52 }
 0x393   : > { %9080 = vst [vmem:[#allocation75_spill] sm:$0xff] %v5974_v19  ;;  %v995_v31 = vld [vmem:[#allocation6 + $0x158] sm:$0xff]  ;;  %v9082_v0 = vld [vmem:[#allocation102_spill] sm:$0xff]  ;;  %v1324_v60 = vmul.f32 %v1276_v47, %v1227_v37  ;;  %9083 = vst [vmem:[#allocation59_spill] sm:$0xff] %v5984_v58  ;;  %v1033_v36 = vmul.f32 %v985_v9, %v944_v56  ;;  %v1325_v4 = vmul.f32 %v1277_v25, %v1221_v61  ;;  %v6006_v61 = vpop.permute.xlu0 %2417 }
 0x394   : > { %v933_v53 = vsel %vm903_vm2, %v9081_v52, %v9082_v0  ;;  %v1283_v46 = vld [vmem:[#allocation6 + $0x2c8] sm:$0xff]  ;;  %v1284_v7 = vld [vmem:[#allocation6 + $0x2d0] sm:$0xff]  ;;  %v9084_v26 = vld [vmem:[#allocation91_spill] sm:$0xff]  ;;  %v1034_v47 = vmul.f32 %v986_v24, %v938_v27  ;;  %v1041_v37 = vmul.f32 %v993_v57, %v945_v41  ;;  %v1035_v52 = vmul.f32 %v987_v29, %v932_v48  ;;  %9090 = vst [vmem:[#allocation63_spill] sm:$0xff] %v6006_v61  ;;  %v6012_v48 = vpop.permute.xlu1 %2415 }
 0x395   : > { %v9085_v43 = vld [vmem:[#allocation104_spill] sm:$0xff]  ;;  %v1565_v9 = vld [vmem:[#allocation6 + $0x408] sm:$0xff]  ;;  %v9088_v55 = vld [vmem:[#allocation90_spill] sm:$0xff]  ;;  %v1042_v22 = vmul.f32 %v994_v5, %v939_v34  ;;  %v1043_v35 = vmul.f32 %v995_v31, %v933_v53  ;;  %v1371_v50 = vadd.f32 %v1323_v54, %v1033_v36  ;;  %9092 = vst [vmem:[#allocation77_spill] sm:$0xff] %v6012_v48 }
 0x396   : > { %v1228_v32 = vsel %vm1192_vm3, %v9085_v43, %v9084_v26  ;;  %v9086_v19 = vld [vmem:[#allocation88_spill] sm:$0xff]  ;;  %v9087_v56 = vld [vmem:[#allocation105_spill] sm:$0xff]  ;;  %v1372_v24 = vadd.f32 %v1324_v60, %v1034_v47  ;;  %v1285_v41 = vld [vmem:[#allocation6 + $0x2d8] sm:$0xff]  ;;  %v1373_v54 = vadd.f32 %v1325_v4, %v1035_v52 }
 0x397   : > { %v1234_v20 = vsel %vm1192_vm3, %v9086_v19, %v9085_v43  ;;  %v1523_v63 = vsel %vm1482_vm4, %v9088_v55, %v9087_v56  ;;  %v1566_v43 = vld [vmem:[#allocation6 + $0x410] sm:$0xff]  ;;  %v9089_v25 = vld [vmem:[#allocation93_spill] sm:$0xff]  ;;  %v1332_v57 = vmul.f32 %v1284_v7, %v1228_v32  ;;  %v1567_v34 = vld [vmem:[#allocation6 + $0x418] sm:$0xff]  ;;  %v6050_v16 = vpop.permute.xlu0 %2421 }
 0x398   : > { %v1517_v13 = vsel %vm1482_vm4, %v9087_v56, %v9089_v25  ;;  %v1331_v27 = vmul.f32 %v1283_v46, %v1234_v20  ;;  %v9091_v29 = vld [vmem:[#allocation106_spill] sm:$0xff]  ;;  %v1613_v5 = vmul.f32 %v1565_v9, %v1523_v63  ;;  %v9093_v31 = vld [vmem:[#allocation107_spill] sm:$0xff]  ;;  %v1246_v36 = vld [vmem:[#allocation6 + $0x1a0] sm:$0xff]  ;;  %9102 = vst [vmem:[#allocation68_spill] sm:$0xff] %v6050_v16 }
 0x399   : > { %v1222_v30 = vsel %vm1192_vm3, %v9084_v26, %v9091_v29  ;;  %v1511_v53 = vsel %vm1482_vm4, %v9089_v25, %v9093_v31  ;;  %v9094_v60 = vld [vmem:[#allocation113_spill] sm:$0xff]  ;;  %v1614_v46 = vmul.f32 %v1566_v43, %v1517_v13  ;;  %v1574_v26 = vld [vmem:[#allocation6 + $0x450] sm:$0xff]  ;;  %v9096_v63 = vld [vmem:[#allocation108_spill] sm:$0xff]  ;;  %v6056_v31 = vpop.permute.xlu1 %2419 }
 0x39a   : > { %v1211_v32 = vsel %vm1192_vm3, %v9009_v11, %v9094_v60  ;;  %v1573_v7 = vld [vmem:[#allocation6 + $0x448] sm:$0xff]  ;;  %v9097_v47 = vld [vmem:[#allocation94_spill] sm:$0xff]  ;;  %v1575_v9 = vld [vmem:[#allocation6 + $0x458] sm:$0xff]  ;;  %v1333_v28 = vmul.f32 %v1285_v41, %v1222_v30  ;;  %v1379_v41 = vadd.f32 %v1331_v27, %v1041_v37  ;;  %v1615_v30 = vmul.f32 %v1567_v34, %v1511_v53  ;;  %9104 = vst [vmem:[#allocation79_spill] sm:$0xff] %v6056_v31 }
 0x39b   : > { %v9095_v4 = vld [vmem:[#allocation97_spill] sm:$0xff]  ;;  %v1524_v52 = vsel %vm1482_vm4, %v9097_v47, %v9096_v63  ;;  %v9098_v56 = vld [vmem:[#allocation110_spill] sm:$0xff]  ;;  %v956_v43 = vld [vmem:[#allocation6 + $0x20] sm:$0xff]  ;;  %v1294_v55 = vmul.f32 %v1246_v36, %v1211_v32  ;;  %v1380_v37 = vadd.f32 %v1332_v57, %v1042_v22 }
 0x39c   : > { %v1518_v20 = vsel %vm1482_vm4, %v9096_v63, %v9095_v4  ;;  %v1512_v11 = vsel %vm1482_vm4, %v9095_v4, %v9098_v56  ;;  %v9099_v25 = vld [vmem:[#allocation109_spill] sm:$0xff]  ;;  %v1254_v48 = vld [vmem:[#allocation6 + $0x1e0] sm:$0xff]  ;;  %v3273_v36 = vld [vmem:[%s8297_s4 + $0x10] sm:$0xff]  ;;  %v1381_v32 = vadd.f32 %v1333_v28, %v1043_v35 }
 0x39d   : > { %v922_v13 = vsel %vm903_vm2, %v8987_v23, %v9099_v25  ;;  %v9100_v61 = vld [vmem:[#allocation116_spill] sm:$0xff]  ;;  %v9101_v44 = vld [vmem:[#allocation117_spill] sm:$0xff]  ;;  %v1622_v19 = vmul.f32 %v1574_v26, %v1518_v20  ;;  %v1623_v10 = vmul.f32 %v1575_v9, %v1512_v11  ;;  %v6071_v26 = vadd.f32 %v1614_v46, %v1372_v24  ;;  %v6073_v20 = vpop.permute.xlu0 %2433  ;;  %v6083_v35 = vpop.permute.xlu1 %2423  ;;  %3289 = vperm.xlu0 %3949, %v3273_v36   ;;  %v959_v28 = vld [vmem:[#allocation6 + $0x38] sm:$0xff] }
 0x39e   : > { %v1212_v63 = vsel %vm1192_vm3, %v9015_v2, %v9100_v61  ;;  %v1536_v58 = vld [vmem:[#allocation6 + $0x320] sm:$0xff]  ;;  %v1501_v4 = vsel %vm1482_vm4, %v9019_v14, %v9101_v44  ;;  %v1621_v2 = vmul.f32 %v1573_v7, %v1524_v52  ;;  %v1004_v27 = vmul.f32 %v956_v43, %v922_v13  ;;  %v957_v57 = vld [vmem:[#allocation6 + $0x28] sm:$0xff]  ;;  %v9108_v52 = vld [vmem:[#allocation119_spill] sm:$0xff]  ;;  %9109 = vst [vmem:[#allocation101_spill] sm:$0xff] %v6083_v35 }
 0x39f   : > { %v964_v56 = vld [vmem:[#allocation6 + $0x60] sm:$0xff]  ;;  %v1302_v34 = vmul.f32 %v1254_v48, %v1212_v63  ;;  %v1584_v53 = vmul.f32 %v1536_v58, %v1501_v4  ;;  %v6069_v7 = vadd.f32 %v1613_v5, %v1371_v50  ;;  %v958_v48 = vld [vmem:[#allocation6 + $0x30] sm:$0xff]  ;;  %v9107_v58 = vld [vmem:[#allocation111_spill] sm:$0xff]  ;;  %v916_v50 = vsel %vm903_vm2, %v9099_v25, %v9108_v52 }
 0x3a0   : > { %v9103_v47 = vld [vmem:[#allocation112_spill] sm:$0xff]  ;;  %v1342_v51 = vadd.f32 %v1294_v55, %v1004_v27  ;;  %v910_v9 = vsel %vm903_vm2, %v9108_v52, %v9107_v58  ;;  %v6085_v24 = vadd.f32 %v1621_v2, %v1379_v41  ;;  %v6087_v5 = vadd.f32 %v1622_v19, %v1380_v37  ;;  %v9111_v43 = vld [vmem:[#allocation121_spill] sm:$0xff]  ;;  %v1248_v4 = vld [vmem:[#allocation6 + $0x1b0] sm:$0xff] }
 0x3a1   : > { %v923_v23 = vsel %vm903_vm2, %v9011_v39, %v9103_v47  ;;  %v1544_v45 = vld [vmem:[#allocation6 + $0x360] sm:$0xff]  ;;  %v6089_v55 = vadd.f32 %v1615_v30, %v1373_v54  ;;  %v904_v25 = vsel %vm903_vm2, %v9107_v58, %v9111_v43  ;;  %v9112_v13 = vld [vmem:[#allocation21_spill] sm:$0xff]  ;;  %v1006_v54 = vmul.f32 %v958_v48, %v910_v9  ;;  %v9113_v41 = vld [vmem:[#allocation115_spill] sm:$0xff]  ;;  %2985 = vrot.lane.b32.xlu0 %v4452_v8, %s4130_s3 }
 0x3a2   : > { %v9105_v40 = vld [vmem:[#allocation120_spill] sm:$0xff]  ;;  %v946_v19 = vsel %vm903_vm2, %v9111_v43, %v9112_v13  ;;  %v1247_v63 = vld [vmem:[#allocation6 + $0x1a8] sm:$0xff]  ;;  %v9114_v30 = vld [vmem:[#allocation123_spill] sm:$0xff]  ;;  %v1007_v52 = vmul.f32 %v959_v28, %v904_v25 }
 0x3a3   : > { %v1502_v14 = vsel %vm1482_vm4, %v9024_v6, %v9105_v40  ;;  %v9106_v39 = vld [vmem:[#allocation20_spill] sm:$0xff]  ;;  %v1012_v6 = vmul.f32 %v964_v56, %v923_v23  ;;  %v6093_v56 = vadd.f32 %v1584_v53, %v1342_v51  ;;  %v1199_v23 = vsel %vm1192_vm3, %v9114_v30, %v9113_v41  ;;  %v9117_v27 = vld [vmem:[#allocation114_spill] sm:$0xff]  ;;  %v1249_v36 = vld [vmem:[#allocation6 + $0x1b8] sm:$0xff] }
 0x3a4   : > { %3023 = vrot.lane.b32.xlu1 %v9106_v39, %s4130_s3  ;;  %v1592_v22 = vmul.f32 %v1544_v45, %v1502_v14  ;;  %v6091_v45 = vadd.f32 %v1623_v10, %v1381_v32  ;;  %v952_v11 = vld [vmem:[#allocation6] sm:$0xff]  ;;  %v1005_v10 = vmul.f32 %v957_v57, %v916_v50  ;;  %v1205_v2 = vsel %vm1192_vm3, %v9094_v60, %v9114_v30  ;;  %v6113_v14 = vpop.permute.xlu0 %2445  ;;  %v9119_v32 = vld [vmem:[#allocation125_spill] sm:$0xff]  ;;  %v6132_v57 = vpop.permute.xlu1 %2435  ;;  %v9122_v50 = vld [vmem:[#allocation126_spill] sm:$0xff] }
 0x3a5   : > { %v1350_v46 = vadd.f32 %v1302_v34, %v1012_v6  ;;  %9110 = vst [vmem:[#allocation86_spill] sm:$0xff] %v6093_v56  ;;  %9115 = vst [vmem:[#allocation95_spill] sm:$0xff] %v6113_v14  ;;  %v9118_v34 = vld [vmem:[#allocation122_spill] sm:$0xff]  ;;  %v1242_v39 = vld [vmem:[#allocation6 + $0x180] sm:$0xff]  ;;  %v1193_v60 = vsel %vm1192_vm3, %v9113_v41, %v9119_v32  ;;  %v1000_v58 = vmul.f32 %v952_v11, %v946_v19 }
 0x3a6   : > { %v911_v53 = vsel %vm903_vm2, %v9118_v34, %v9117_v27  ;;  %v9120_v6 = vld [vmem:[#allocation23_spill] sm:$0xff]  ;;  %9121 = vst [vmem:[#allocation81_spill] sm:$0xff] %v6132_v57  ;;  %v917_v48 = vsel %vm903_vm2, %v9103_v47, %v9118_v34  ;;  %v1255_v9 = vld [vmem:[#allocation6 + $0x1e8] sm:$0xff]  ;;  %v966_v43 = vld [vmem:[#allocation6 + $0x70] sm:$0xff]  ;;  %v1295_v28 = vmul.f32 %v1247_v63, %v1205_v2  ;;  %v1296_v25 = vmul.f32 %v1248_v4, %v1199_v23 }
 0x3a7   : > { %v6118_v37 = vadd.f32 %v1592_v22, %v1350_v46  ;;  %v1235_v51 = vsel %vm1192_vm3, %v9119_v32, %v9120_v6  ;;  %v965_v22 = vld [vmem:[#allocation6 + $0x68] sm:$0xff]  ;;  %v1206_v46 = vsel %vm1192_vm3, %v9100_v61, %v9122_v50  ;;  %v960_v13 = vld [vmem:[#allocation6 + $0x40] sm:$0xff]  ;;  %v967_v41 = vld [vmem:[#allocation6 + $0x78] sm:$0xff]  ;;  %v1297_v6 = vmul.f32 %v1249_v36, %v1193_v60 }
 0x3a8   : > { %3035 = vrot.lane.b32.xlu1 %v4741_v49, %s4130_s3  ;;  %v3274_v49 = vld [vmem:[%s8297_s4 + $0x18] sm:$0xff]  ;;  %v9123_v30 = vld [vmem:[#allocation124_spill] sm:$0xff]  ;;  %v9124_v47 = vld [vmem:[#allocation22_spill] sm:$0xff]  ;;  %v1290_v34 = vmul.f32 %v1242_v39, %v1235_v51  ;;  %v6160_v40 = vpop.permute.xlu0 %2457  ;;  %v6174_v60 = vpop.permute.xlu1 %2447  ;;  %v1013_v51 = vmul.f32 %v965_v22, %v917_v48 }
 0x3a9   : > { %9116 = vst [vmem:[#allocation103_spill] sm:$0xff] %v6118_v37  ;;  %v905_v32 = vsel %vm903_vm2, %v9117_v27, %v9123_v30  ;;  %v947_v11 = vsel %vm903_vm2, %v9123_v30, %v9124_v47  ;;  %v1256_v61 = vld [vmem:[#allocation6 + $0x1f0] sm:$0xff]  ;;  %v1250_v37 = vld [vmem:[#allocation6 + $0x1c0] sm:$0xff]  ;;  %9128 = vst [vmem:[#allocation100_spill] sm:$0xff] %v6160_v40  ;;  %v1303_v30 = vmul.f32 %v1255_v9, %v1206_v46 }
 0x3aa   : > { %v9125_v19 = vld [vmem:[#allocation118_spill] sm:$0xff]  ;;  %v9127_v31 = vld [vmem:[#allocation128_spill] sm:$0xff]  ;;  %v1257_v63 = vld [vmem:[#allocation6 + $0x1f8] sm:$0xff]  ;;  %9131 = vst [vmem:[#allocation98_spill] sm:$0xff] %v6174_v60  ;;  %v1014_v9 = vmul.f32 %v966_v43, %v911_v53  ;;  %v1015_v46 = vmul.f32 %v967_v41, %v905_v32  ;;  %v6188_v53 = vadd.f32 %v1295_v28, %v1005_v10  ;;  %v6198_v32 = vadd.f32 %v1297_v6, %v1007_v52 }
 0x3ab   : > { %v1200_v8 = vsel %vm1192_vm3, %v9122_v50, %v9125_v19  ;;  %v9126_v56 = vld [vmem:[#allocation26_spill] sm:$0xff]  ;;  %v1194_v4 = vsel %vm1192_vm3, %v9125_v19, %v9127_v31  ;;  %v1262_v23 = vld [vmem:[#allocation6 + $0x220] sm:$0xff]  ;;  %v9129_v2 = vld [vmem:[#allocation131_spill] sm:$0xff]  ;;  %v1008_v50 = vmul.f32 %v960_v13, %v947_v11  ;;  %v6192_v13 = vadd.f32 %v1296_v25, %v1006_v54 }
 0x3ac   : > { %3294 = vperm.xlu1 %3950, %v3274_v49   ;;  %v1236_v27 = vsel %vm1192_vm3, %v9127_v31, %v9126_v56  ;;  %v1213_v49 = vsel %vm1192_vm3, %v9047_v38, %v9129_v2  ;;  %v1270_v39 = vld [vmem:[#allocation6 + $0x260] sm:$0xff]  ;;  %v9130_v36 = vld [vmem:[#allocation134_spill] sm:$0xff]  ;;  %v9132_v31 = vld [vmem:[#allocation17_spill] sm:$0xff]  ;;  %v1304_v47 = vmul.f32 %v1256_v61, %v1200_v8  ;;  %9135 = vst [vmem:[#allocation85_spill] sm:$0xff] %v6188_v53  ;;  %v6190_v43 = vpop.permute.xlu0 %2711  ;;  %v6200_v11 = vpop.permute.xlu1 %2459 }
 0x3ad   : > { %v1214_v56 = vsel %vm1192_vm3, %v9052_v21, %v9130_v36  ;;  %2703 = vrot.lane.b32.xlu0 %v9132_v31, %s4129_s16  ;;  %v1298_v19 = vmul.f32 %v1250_v37, %v1236_v27  ;;  %v972_v35 = vld [vmem:[#allocation6 + $0xa0] sm:$0xff]  ;;  %v9133_v57 = vld [vmem:[#allocation127_spill] sm:$0xff]  ;;  %v9134_v14 = vld [vmem:[#allocation130_spill] sm:$0xff]  ;;  %v1305_v22 = vmul.f32 %v1257_v63, %v1194_v4  ;;  %v1310_v48 = vmul.f32 %v1262_v23, %v1213_v49 }
 0x3ae   : > { %v924_v38 = vsel %vm903_vm2, %v9036_v3, %v9133_v57  ;;  %v980_v40 = vld [vmem:[#allocation6 + $0xe0] sm:$0xff]  ;;  %v925_v21 = vsel %vm903_vm2, %v9059_v17, %v9134_v14  ;;  %v1318_v37 = vmul.f32 %v1270_v39, %v1214_v56  ;;  %9136 = vst [vmem:[#allocation102_spill] sm:$0xff] %v6190_v43  ;;  %9137 = vst [vmem:[#allocation91_spill] sm:$0xff] %v6192_v13  ;;  %v974_v10 = vld [vmem:[#allocation6 + $0xb0] sm:$0xff] }
 0x3af   : > { %v6194_v41 = vadd.f32 %v1303_v30, %v1013_v51  ;;  %v6196_v3 = vadd.f32 %v1290_v34, %v1000_v58  ;;  %9140 = vst [vmem:[#allocation93_spill] sm:$0xff] %v6198_v32  ;;  %9141 = vst [vmem:[#allocation106_spill] sm:$0xff] %v6200_v11  ;;  %v1020_v17 = vmul.f32 %v972_v35, %v924_v38  ;;  %v9142_v28 = vld [vmem:[#allocation129_spill] sm:$0xff]  ;;  %v9143_v8 = vld [vmem:[#allocation135_spill] sm:$0xff] }
 0x3b0   : > { %2987 = vrot.lane.b32.xlu1 %v4465_v15, %s4130_s3  ;;  %v1028_v61 = vmul.f32 %v980_v40, %v925_v21  ;;  %v973_v15 = vld [vmem:[#allocation6 + $0xa8] sm:$0xff]  ;;  %v912_v27 = vsel %vm903_vm2, %v9143_v8, %v9142_v28  ;;  %v918_v54 = vsel %vm903_vm2, %v9133_v57, %v9143_v8  ;;  %v9144_v58 = vld [vmem:[#allocation14_spill] sm:$0xff]  ;;  %v6212_v52 = vadd.f32 %v1304_v47, %v1014_v9  ;;  %v968_v40 = vld [vmem:[#allocation6 + $0x80] sm:$0xff]  ;;  %v6236_v9 = vpop.permute.xlu0 %2723 }
 0x3b1   : > { %9138 = vst [vmem:[#allocation104_spill] sm:$0xff] %v6194_v41  ;;  %9139 = vst [vmem:[#allocation105_spill] sm:$0xff] %v6196_v3  ;;  %2715 = vrot.lane.b32.xlu0 %v9144_v58, %s4129_s16  ;;  %v6214_v25 = vadd.f32 %v1298_v19, %v1008_v50  ;;  %v975_v35 = vld [vmem:[#allocation6 + $0xb8] sm:$0xff]  ;;  %v9147_v34 = vld [vmem:[#allocation137_spill] sm:$0xff]  ;;  %v6226_v4 = vadd.f32 %v1305_v22, %v1015_v46  ;;  %v6228_v23 = vadd.f32 %v1310_v48, %v1020_v17  ;;  %v6246_v48 = vpop.permute.xlu1 %2713 }
 0x3b2   : > { %9145 = vst [vmem:[#allocation113_spill] sm:$0xff] %v6212_v52  ;;  %v906_v6 = vsel %vm903_vm2, %v9142_v28, %v9147_v34  ;;  %v9148_v30 = vld [vmem:[#allocation45_spill] sm:$0xff]  ;;  %v9149_v57 = vld [vmem:[#allocation19_spill] sm:$0xff]  ;;  %v6230_v49 = vadd.f32 %v1318_v37, %v1028_v61  ;;  %v9151_v56 = vld [vmem:[#allocation138_spill] sm:$0xff]  ;;  %v1021_v50 = vmul.f32 %v973_v15, %v918_v54  ;;  %v1022_v47 = vmul.f32 %v974_v10, %v912_v27 }
 0x3b3   : > { %9146 = vst [vmem:[#allocation97_spill] sm:$0xff] %v6214_v25  ;;  %v948_v63 = vsel %vm903_vm2, %v9147_v34, %v9148_v30  ;;  %9150 = vst [vmem:[#allocation108_spill] sm:$0xff] %v6226_v4  ;;  %v981_v39 = vld [vmem:[#allocation6 + $0xe8] sm:$0xff]  ;;  %v919_v51 = vsel %vm903_vm2, %v9134_v14, %v9151_v56  ;;  %v9153_v19 = vld [vmem:[#allocation132_spill] sm:$0xff]  ;;  %v1023_v14 = vmul.f32 %v975_v35, %v906_v6 }
 0x3b4   : > { %2705 = vrot.lane.b32.xlu1 %v9149_v57, %s4129_s16  ;;  %9152 = vst [vmem:[#allocation109_spill] sm:$0xff] %v6236_v9  ;;  %v913_v46 = vsel %vm903_vm2, %v9151_v56, %v9153_v19  ;;  %v1263_v38 = vld [vmem:[#allocation6 + $0x228] sm:$0xff]  ;;  %v9154_v21 = vld [vmem:[#allocation139_spill] sm:$0xff]  ;;  %9155 = vst [vmem:[#allocation116_spill] sm:$0xff] %v6246_v48  ;;  %v1016_v17 = vmul.f32 %v968_v40, %v948_v63 }
 0x3b5   : > { %v1207_v22 = vsel %vm1192_vm3, %v9129_v2, %v9154_v21  ;;  %v982_v37 = vld [vmem:[#allocation6 + $0xf0] sm:$0xff]  ;;  %v9156_v28 = vld [vmem:[#allocation133_spill] sm:$0xff]  ;;  %v1258_v10 = vld [vmem:[#allocation6 + $0x200] sm:$0xff]  ;;  %v1029_v2 = vmul.f32 %v981_v39, %v919_v51  ;;  %v6294_v60 = vpop.permute.xlu1 %2725 }
 0x3b6   : > { %v1264_v61 = vld [vmem:[#allocation6 + $0x230] sm:$0xff]  ;;  %v1201_v15 = vsel %vm1192_vm3, %v9154_v21, %v9156_v28  ;;  %v9157_v8 = vld [vmem:[#allocation51_spill] sm:$0xff]  ;;  %v9158_v27 = vld [vmem:[#allocation141_spill] sm:$0xff]  ;;  %v1311_v3 = vmul.f32 %v1263_v38, %v1207_v22  ;;  %9169 = vst [vmem:[#allocation112_spill] sm:$0xff] %v6294_v60 }
 0x3b7   : > { %v1237_v54 = vsel %vm1192_vm3, %v9158_v27, %v9157_v8  ;;  %v9159_v34 = vld [vmem:[#allocation18_spill] sm:$0xff]  ;;  %v1271_v30 = vld [vmem:[#allocation6 + $0x268] sm:$0xff]  ;;  %v9160_v40 = vld [vmem:[#allocation136_spill] sm:$0xff]  ;;  %v1195_v8 = vsel %vm1192_vm3, %v9156_v28, %v9158_v27  ;;  %v6284_v27 = vpop.permute.xlu0 %2735  ;;  %v1312_v38 = vmul.f32 %v1264_v61, %v1201_v15 }
 0x3b8   : > { %2727 = vrot.lane.b32.xlu0 %v9159_v34, %s4129_s16  ;;  %v1272_v56 = vld [vmem:[#allocation6 + $0x270] sm:$0xff]  ;;  %v1265_v21 = vld [vmem:[#allocation6 + $0x238] sm:$0xff]  ;;  %v9162_v39 = vld [vmem:[#allocation16_spill] sm:$0xff]  ;;  %9167 = vst [vmem:[#allocation117_spill] sm:$0xff] %v6284_v27  ;;  %v1306_v22 = vmul.f32 %v1258_v10, %v1237_v54  ;;  %v6304_v10 = vadd.f32 %v1311_v3, %v1021_v50 }
 0x3b9   : > { %v9161_v35 = vld [vmem:[#allocation142_spill] sm:$0xff]  ;;  %2717 = vrot.lane.b32.xlu1 %v9162_v39, %s4129_s16  ;;  %v976_v51 = vld [vmem:[#allocation6 + $0xc0] sm:$0xff]  ;;  %v1273_v13 = vld [vmem:[#allocation6 + $0x278] sm:$0xff]  ;;  %v6320_v3 = vpop.permute.xlu1 %2737 }
 0x3ba   : > { %v1202_v6 = vsel %vm1192_vm3, %v9161_v35, %v9160_v40  ;;  %v1208_v63 = vsel %vm1192_vm3, %v9130_v36, %v9161_v35  ;;  %v9163_v4 = vld [vmem:[#allocation50_spill] sm:$0xff]  ;;  %v9164_v25 = vld [vmem:[#allocation140_spill] sm:$0xff]  ;;  %v9166_v35 = vld [vmem:[#allocation55_spill] sm:$0xff]  ;;  %9171 = vst [vmem:[#allocation20_spill] sm:$0xff] %v6304_v10 }
 0x3bb   : > { %v949_v32 = vsel %vm903_vm2, %v9164_v25, %v9163_v4  ;;  %v1266_v52 = vld [vmem:[#allocation6 + $0x240] sm:$0xff]  ;;  %v983_v53 = vld [vmem:[#allocation6 + $0xf8] sm:$0xff]  ;;  %v907_v4 = vsel %vm903_vm2, %v9153_v19, %v9164_v25  ;;  %v9168_v11 = vld [vmem:[#allocation146_spill] sm:$0xff]  ;;  %v1319_v43 = vmul.f32 %v1271_v30, %v1208_v63  ;;  %v1030_v25 = vmul.f32 %v982_v37, %v913_v46  ;;  %9177 = vst [vmem:[#allocation21_spill] sm:$0xff] %v6320_v3 }
 0x3bc   : > { %v9165_v41 = vld [vmem:[#allocation144_spill] sm:$0xff]  ;;  %v9170_v9 = vld [vmem:[#allocation147_spill] sm:$0xff]  ;;  %2739 = vrot.lane.b32.xlu0 %v4630_v62, %s4129_s16  ;;  %v1024_v19 = vmul.f32 %v976_v51, %v949_v32  ;;  %v6312_v63 = vadd.f32 %v1312_v38, %v1022_v47  ;;  %v6314_v32 = vadd.f32 %v1306_v22, %v1016_v17  ;;  %v9182_v17 = vld [vmem:[#allocation13_spill] sm:$0xff] }
 0x3bd   : > { %v1196_v36 = vsel %vm1192_vm3, %v9160_v40, %v9165_v41  ;;  %v1238_v28 = vsel %vm1192_vm3, %v9165_v41, %v9166_v35  ;;  %v1560_v48 = vld [vmem:[#allocation6 + $0x3e0] sm:$0xff]  ;;  %v1504_v40 = vsel %vm1482_vm4, %v9061_v42, %v9168_v11  ;;  %v1320_v41 = vmul.f32 %v1272_v56, %v1202_v6  ;;  %2729 = vrot.lane.b32.xlu1 %v4431_v59, %s4129_s16  ;;  %v9172_v30 = vld [vmem:[#allocation143_spill] sm:$0xff]  ;;  %v6310_v6 = vpop.permute.xlu0 %2747 }
 0x3be   : > { %v1313_v35 = vmul.f32 %v1265_v21, %v1195_v8  ;;  %v1278_v27 = vld [vmem:[#allocation6 + $0x2a0] sm:$0xff]  ;;  %v1215_v16 = vsel %vm1192_vm3, %v9074_v1, %v9170_v9  ;;  %v1314_v61 = vmul.f32 %v1266_v52, %v1238_v28  ;;  %v1321_v15 = vmul.f32 %v1273_v13, %v1196_v36  ;;  %9173 = vst [vmem:[#allocation111_spill] sm:$0xff] %v6310_v6  ;;  %v1279_v36 = vld [vmem:[#allocation6 + $0x2a8] sm:$0xff]  ;;  %v1280_v28 = vld [vmem:[#allocation6 + $0x2b0] sm:$0xff] }
 0x3bf   : > { %v1031_v42 = vmul.f32 %v983_v53, %v907_v4  ;;  %v988_v54 = vld [vmem:[#allocation6 + $0x120] sm:$0xff]  ;;  %v926_v56 = vsel %vm903_vm2, %v9078_v18, %v9172_v30  ;;  %v1608_v1 = vmul.f32 %v1560_v48, %v1504_v40  ;;  %9174 = vst [vmem:[#allocation119_spill] sm:$0xff] %v6312_v63  ;;  %9175 = vst [vmem:[#allocation121_spill] sm:$0xff] %v6314_v32  ;;  %v9188_v4 = vld [vmem:[#allocation155_spill] sm:$0xff] }
 0x3c0   : > { %v1326_v13 = vmul.f32 %v1278_v27, %v1215_v16  ;;  %v1286_v52 = vld [vmem:[#allocation6 + $0x2e0] sm:$0xff]  ;;  %v6322_v50 = vadd.f32 %v1319_v43, %v1029_v2  ;;  %v6324_v37 = vadd.f32 %v1320_v41, %v1030_v25  ;;  %v6326_v18 = vadd.f32 %v1313_v35, %v1023_v14  ;;  %2691 = vrot.lane.b32.xlu0 %v9182_v17, %s4129_s16  ;;  %v989_v43 = vld [vmem:[#allocation6 + $0x128] sm:$0xff]  ;;  %v9185_v2 = vld [vmem:[#allocation151_spill] sm:$0xff] }
 0x3c1   : > { %v9176_v46 = vld [vmem:[#allocation152_spill] sm:$0xff]  ;;  %v6334_v21 = vadd.f32 %v1314_v61, %v1024_v19  ;;  %v1036_v8 = vmul.f32 %v988_v54, %v926_v56  ;;  %v920_v14 = vsel %vm903_vm2, %v9172_v30, %v9185_v2  ;;  %2741 = vrot.lane.b32.xlu1 %v4645_v12, %s4129_s16  ;;  %v9187_v27 = vld [vmem:[#allocation149_spill] sm:$0xff]  ;;  %v1209_v22 = vsel %vm1192_vm3, %v9170_v9, %v9188_v4  ;;  %v6356_v40 = vpop.permute.xlu0 %2699  ;;  %v6368_v30 = vpop.permute.xlu1 %2749  ;;  %v9202_v32 = vld [vmem:[#allocation158_spill] sm:$0xff] }
 0x3c2   : > { %v1216_v53 = vsel %vm1192_vm3, %v9091_v29, %v9176_v46  ;;  %9178 = vst [vmem:[#allocation115_spill] sm:$0xff] %v6322_v50  ;;  %9179 = vst [vmem:[#allocation123_spill] sm:$0xff] %v6324_v37  ;;  %v996_v48 = vld [vmem:[#allocation6 + $0x160] sm:$0xff]  ;;  %v6336_v29 = vadd.f32 %v1321_v15, %v1031_v42  ;;  %v1203_v38 = vsel %vm1192_vm3, %v9188_v4, %v9187_v27  ;;  %v9190_v25 = vld [vmem:[#allocation145_spill] sm:$0xff] }
 0x3c3   : > { %9180 = vst [vmem:[#allocation114_spill] sm:$0xff] %v6326_v18  ;;  %v9181_v47 = vld [vmem:[#allocation148_spill] sm:$0xff]  ;;  %9183 = vst [vmem:[#allocation122_spill] sm:$0xff] %v6334_v21  ;;  %v1334_v51 = vmul.f32 %v1286_v52, %v1216_v53  ;;  %v6358_v35 = vadd.f32 %v1326_v13, %v1036_v8  ;;  %v914_v19 = vsel %vm903_vm2, %v9185_v2, %v9190_v25  ;;  %v9191_v15 = vld [vmem:[#allocation83_spill] sm:$0xff] }
 0x3c4   : > { %v927_v16 = vsel %vm903_vm2, %v9082_v0, %v9181_v47  ;;  %9184 = vst [vmem:[#allocation125_spill] sm:$0xff] %v6336_v29  ;;  %v6346_v0 = vadd.f32 %v1608_v1, %v6230_v49  ;;  %9189 = vst [vmem:[#allocation126_spill] sm:$0xff] %v6356_v40  ;;  %v990_v49 = vld [vmem:[#allocation6 + $0x130] sm:$0xff]  ;;  %v1274_v61 = vld [vmem:[#allocation6 + $0x280] sm:$0xff]  ;;  %v1037_v9 = vmul.f32 %v989_v43, %v920_v14 }
 0x3c5   : > { %v1044_v41 = vmul.f32 %v996_v48, %v927_v16  ;;  %v9192_v42 = vld [vmem:[#allocation157_spill] sm:$0xff]  ;;  %9193 = vst [vmem:[#allocation124_spill] sm:$0xff] %v6368_v30  ;;  %v984_v56 = vld [vmem:[#allocation6 + $0x100] sm:$0xff]  ;;  %v991_v1 = vld [vmem:[#allocation6 + $0x138] sm:$0xff]  ;;  %v6400_v50 = vpop.permute.xlu0 %2429 }
 0x3c6   : > { %9186 = vst [vmem:[#allocation23_spill] sm:$0xff] %v6346_v0  ;;  %v1239_v54 = vsel %vm1192_vm3, %v9192_v42, %v9191_v15  ;;  %v9194_v52 = vld [vmem:[#allocation153_spill] sm:$0xff]  ;;  %v9195_v53 = vld [vmem:[#allocation78_spill] sm:$0xff]  ;;  %v1281_v16 = vld [vmem:[#allocation6 + $0x2b8] sm:$0xff]  ;;  %v1197_v8 = vsel %vm1192_vm3, %v9187_v27, %v9192_v42  ;;  %v1328_v0 = vmul.f32 %v1280_v28, %v1203_v38  ;;  %v1038_v42 = vmul.f32 %v990_v49, %v914_v19  ;;  %v6406_v28 = vpop.permute.xlu1 %2701 }
 0x3c7   : > { %v908_v13 = vsel %vm903_vm2, %v9190_v25, %v9194_v52  ;;  %v950_v48 = vsel %vm903_vm2, %v9194_v52, %v9195_v53  ;;  %v9196_v43 = vld [vmem:[#allocation89_spill] sm:$0xff]  ;;  %v998_v14 = vld [vmem:[#allocation6 + $0x170] sm:$0xff]  ;;  %v9198_v15 = vld [vmem:[#allocation156_spill] sm:$0xff]  ;;  %v1327_v53 = vmul.f32 %v1279_v36, %v1209_v22  ;;  %v6394_v27 = vadd.f32 %v1334_v51, %v1044_v41  ;;  %9203 = vst [vmem:[#allocation118_spill] sm:$0xff] %v6400_v50 }
 0x3c8   : > { %2469 = vrot.lane.b32.xlu0 %v9196_v43, %s4128_s10  ;;  %v997_v2 = vld [vmem:[#allocation6 + $0x168] sm:$0xff]  ;;  %v9197_v4 = vld [vmem:[#allocation150_spill] sm:$0xff]  ;;  %v921_v52 = vsel %vm903_vm2, %v9181_v47, %v9198_v15  ;;  %v9199_v29 = vld [vmem:[#allocation15_spill] sm:$0xff]  ;;  %v1322_v63 = vmul.f32 %v1274_v61, %v1239_v54  ;;  %v1032_v10 = vmul.f32 %v984_v56, %v950_v48  ;;  %v1039_v11 = vmul.f32 %v991_v1, %v908_v13 }
 0x3c9   : > { %v915_v25 = vsel %vm903_vm2, %v9198_v15, %v9197_v4  ;;  %2693 = vrot.lane.b32.xlu1 %v9199_v29, %s4129_s16  ;;  %9200 = vst [vmem:[#allocation22_spill] sm:$0xff] %v6394_v27  ;;  %v992_v21 = vld [vmem:[#allocation6 + $0x140] sm:$0xff]  ;;  %v9201_v18 = vld [vmem:[#allocation82_spill] sm:$0xff]  ;;  %v999_v47 = vld [vmem:[#allocation6 + $0x178] sm:$0xff]  ;;  %v909_v36 = vsel %vm903_vm2, %v9197_v4, %v9202_v32  ;;  %v1329_v51 = vmul.f32 %v1281_v16, %v1197_v8 }
 0x3ca   : > { %v951_v37 = vsel %vm903_vm2, %v9202_v32, %v9201_v18  ;;  %9204 = vst [vmem:[#allocation26_spill] sm:$0xff] %v6406_v28  ;;  %v1045_v38 = vmul.f32 %v997_v2, %v921_v52  ;;  %v6408_v22 = vmul.f32 %v998_v14, %v915_v25  ;;  %v1287_v41 = vld [vmem:[#allocation6 + $0x2e8] sm:$0xff]  ;;  %v9205_v49 = vld [vmem:[#allocation160_spill] sm:$0xff]  ;;  %v9206_v61 = vld [vmem:[#allocation159_spill] sm:$0xff]  ;;  %v6420_v1 = vadd.f32 %v1327_v53, %v1037_v9 }
 0x3cb   : > { %v1210_v18 = vsel %vm1192_vm3, %v9176_v46, %v9205_v49  ;;  %v1552_v19 = vld [vmem:[#allocation6 + $0x3a0] sm:$0xff]  ;;  %v6422_v13 = vadd.f32 %v1328_v0, %v1038_v42  ;;  %v1040_v48 = vmul.f32 %v992_v21, %v951_v37  ;;  %v1288_v16 = vld [vmem:[#allocation6 + $0x2f0] sm:$0xff]  ;;  %v6430_v14 = vmul.f32 %v999_v47, %v909_v36  ;;  %v1855_v9 = vld [vmem:[#allocation6 + $0x588] sm:$0xff]  ;;  %v6440_v42 = vpop.permute.xlu0 %2441 }
 0x3cc   : > { %v9207_v54 = vld [vmem:[#allocation76_spill] sm:$0xff]  ;;  %9209 = vst [vmem:[#allocation128_spill] sm:$0xff] %v6420_v1  ;;  %v9211_v8 = vld [vmem:[#allocation154_spill] sm:$0xff]  ;;  %v1370_v4 = vadd.f32 %v1322_v63, %v1032_v10  ;;  %v9215_v37 = vld [vmem:[#allocation191_spill] sm:$0xff] }
 0x3cd   : > { %v1503_v56 = vsel %vm1482_vm4, %v9207_v54, %v9206_v61  ;;  %v9208_v32 = vld [vmem:[#allocation80_spill] sm:$0xff]  ;;  %9210 = vst [vmem:[#allocation131_spill] sm:$0xff] %v6422_v13  ;;  %v1204_v46 = vsel %vm1192_vm3, %v9205_v49, %v9211_v8  ;;  %v9214_v52 = vld [vmem:[#allocation162_spill] sm:$0xff]  ;;  %v9216_v21 = vld [vmem:[#allocation185_spill] sm:$0xff]  ;;  %v6442_v49 = vadd.f32 %v1329_v51, %v1039_v11  ;;  %v1335_v54 = vmul.f32 %v1287_v41, %v1210_v18  ;;  %v6448_v13 = vpop.permute.xlu1 %2431 }
 0x3ce   : > { %2481 = vrot.lane.b32.xlu0 %v9208_v32, %s4128_s10  ;;  %v9212_v2 = vld [vmem:[#allocation96_spill] sm:$0xff]  ;;  %v1813_v53 = vsel %vm1772_vm5, %v9216_v21, %v9215_v37  ;;  %9217 = vst [vmem:[#allocation134_spill] sm:$0xff] %v6440_v42  ;;  %v1600_v47 = vmul.f32 %v1552_v19, %v1503_v56  ;;  %v1863_v36 = vld [vmem:[#allocation6 + $0x5c8] sm:$0xff]  ;;  %v9219_v10 = vld [vmem:[#allocation194_spill] sm:$0xff] }
 0x3cf   : > { %2471 = vrot.lane.b32.xlu1 %v9212_v2, %s4128_s10  ;;  %v1282_v15 = vld [vmem:[#allocation6 + $0x2c0] sm:$0xff]  ;;  %9218 = vst [vmem:[#allocation17_spill] sm:$0xff] %v6442_v49  ;;  %9221 = vst [vmem:[#allocation127_spill] sm:$0xff] %v6448_v13  ;;  %v9222_v1 = vld [vmem:[#allocation161_spill] sm:$0xff]  ;;  %v1903_v28 = vmul.f32 %v1855_v9, %v1813_v53 }
 0x3d0   : > { %v9213_v25 = vld [vmem:[#allocation88_spill] sm:$0xff]  ;;  %v9223_v27 = vld [vmem:[#allocation107_spill] sm:$0xff]  ;;  %v9224_v42 = vld [vmem:[#allocation90_spill] sm:$0xff] }
 0x3d1   : > { %v1240_v0 = vsel %vm1192_vm3, %v9214_v52, %v9213_v25  ;;  %v9220_v63 = vld [vmem:[#allocation188_spill] sm:$0xff]  ;;  %v1336_v25 = vmul.f32 %v1288_v16, %v1204_v46  ;;  %v1505_v61 = vsel %vm1482_vm4, %v9223_v27, %v9222_v1  ;;  %v9225_v11 = vld [vmem:[#allocation179_spill] sm:$0xff]  ;;  %v1856_v41 = vld [vmem:[#allocation6 + $0x590] sm:$0xff] }
 0x3d2   : > { %v1814_v50 = vsel %vm1772_vm5, %v9220_v63, %v9219_v10  ;;  %v1564_v2 = vld [vmem:[#allocation6 + $0x400] sm:$0xff]  ;;  %v1529_v51 = vsel %vm1482_vm4, %v9225_v11, %v9224_v42  ;;  %v9226_v18 = vld [vmem:[#allocation197_spill] sm:$0xff]  ;;  %v1330_v16 = vmul.f32 %v1282_v15, %v1240_v0  ;;  %v9228_v13 = vld [vmem:[#allocation94_spill] sm:$0xff] }
 0x3d3   : > { %v1807_v19 = vsel %vm1772_vm5, %v9215_v37, %v9226_v18  ;;  %v9227_v56 = vld [vmem:[#allocation92_spill] sm:$0xff]  ;;  %v9229_v27 = vld [vmem:[#allocation182_spill] sm:$0xff]  ;;  %v9231_v37 = vld [vmem:[#allocation87_spill] sm:$0xff]  ;;  %v1911_v29 = vmul.f32 %v1863_v36, %v1814_v50  ;;  %v6489_v50 = vadd.f32 %v1600_v47, %v6228_v23  ;;  %v6503_v47 = vadd.f32 %v1335_v54, %v1045_v38 }
 0x3d4   : > { %2493 = vrot.lane.b32.xlu0 %v9227_v56, %s4128_s10  ;;  %v1568_v46 = vld [vmem:[#allocation6 + $0x420] sm:$0xff]  ;;  %v1530_v1 = vsel %vm1482_vm4, %v9229_v27, %v9228_v13  ;;  %v1864_v32 = vld [vmem:[#allocation6 + $0x5d0] sm:$0xff]  ;;  %2483 = vrot.lane.b32.xlu1 %v9231_v37, %s4128_s10  ;;  %v1857_v56 = vld [vmem:[#allocation6 + $0x598] sm:$0xff]  ;;  %v6486_v27 = vpop.permute.xlu0 %2453  ;;  %v1904_v37 = vmul.f32 %v1856_v41, %v1807_v19 }
 0x3d5   : > { %v1572_v49 = vld [vmem:[#allocation6 + $0x440] sm:$0xff]  ;;  %v9232_v15 = vld [vmem:[#allocation203_spill] sm:$0xff]  ;;  %v9233_v40 = vld [vmem:[#allocation206_spill] sm:$0xff]  ;;  %9235 = vst [vmem:[#allocation130_spill] sm:$0xff] %v6486_v27 }
 0x3d6   : > { %v9230_v42 = vld [vmem:[#allocation200_spill] sm:$0xff]  ;;  %v1801_v0 = vsel %vm1772_vm5, %v9226_v18, %v9232_v15  ;;  %v1865_v43 = vld [vmem:[#allocation6 + $0x5d8] sm:$0xff]  ;;  %9236 = vst [vmem:[#allocation129_spill] sm:$0xff] %v6489_v50  ;;  %v1198_v18 = vsel %vm1192_vm3, %v9211_v8, %v9214_v52  ;;  %v1612_v15 = vmul.f32 %v1564_v2, %v1529_v51  ;;  %v1620_v30 = vmul.f32 %v1572_v49, %v1530_v1  ;;  %v9247_v19 = vld [vmem:[#allocation245_spill] sm:$0xff] }
 0x3d7   : > { %v1808_v11 = vsel %vm1772_vm5, %v9219_v10, %v9230_v42  ;;  %v1802_v13 = vsel %vm1772_vm5, %v9230_v42, %v9233_v40  ;;  %v1854_v9 = vld [vmem:[#allocation6 + $0x580] sm:$0xff]  ;;  %v9234_v53 = vld [vmem:[#allocation227_spill] sm:$0xff]  ;;  %v6495_v42 = vpop.permute.xlu1 %2443  ;;  %v1616_v40 = vmul.f32 %v1568_v46, %v1505_v61  ;;  %v1378_v1 = vadd.f32 %v1330_v16, %v1040_v48  ;;  %v9249_v16 = vld [vmem:[#allocation242_spill] sm:$0xff] }
 0x3d8   : > { %v1819_v10 = vsel %vm1772_vm5, %v9234_v53, %v9216_v21  ;;  %v1289_v36 = vld [vmem:[#allocation6 + $0x2f8] sm:$0xff]  ;;  %v1912_v3 = vmul.f32 %v1864_v32, %v1808_v11  ;;  %v1862_v60 = vld [vmem:[#allocation6 + $0x5c0] sm:$0xff]  ;;  %v9237_v21 = vld [vmem:[#allocation230_spill] sm:$0xff]  ;;  %2993 = vrot.lane.b32.xlu0 %v9132_v31, %s4130_s3  ;;  %v1905_v53 = vmul.f32 %v1857_v56, %v1801_v0  ;;  %v1913_v8 = vmul.f32 %v1865_v43, %v1802_v13  ;;  %v6509_v11 = vpop.permute.xlu0 %3001 }
 0x3d9   : > { %v1820_v23 = vsel %vm1772_vm5, %v9237_v21, %v9220_v63  ;;  %v1902_v2 = vmul.f32 %v1854_v9, %v1819_v10  ;;  %v9238_v52 = vld [vmem:[#allocation99_spill] sm:$0xff]  ;;  %v1337_v61 = vmul.f32 %v1289_v36, %v1198_v18  ;;  %v1951_v32 = vadd.f32 %v1903_v28, %v6069_v7  ;;  %v9242_v28 = vld [vmem:[#allocation233_spill] sm:$0xff]  ;;  %v9248_v56 = vld [vmem:[#allocation248_spill] sm:$0xff] }
 0x3da   : > { %2495 = vrot.lane.b32.xlu1 %v9238_v52, %s4128_s10  ;;  %v1959_v49 = vadd.f32 %v1911_v29, %v6085_v24  ;;  %v6512_v63 = vadd.f32 %v1336_v25, %v6408_v22  ;;  %v1660_v31 = vadd.f32 %v1612_v15, %v1370_v4  ;;  %v1952_v38 = vadd.f32 %v1904_v37, %v6071_v26  ;;  %v2289_v26 = vld [vmem:[#allocation6 + $0x880] sm:$0xff]  ;;  %v2290_v25 = vld [vmem:[#allocation6 + $0x888] sm:$0xff]  ;;  %v9250_v46 = vld [vmem:[#allocation282_spill] sm:$0xff] }
 0x3db   : > { %v1910_v54 = vmul.f32 %v1862_v60, %v1820_v23  ;;  %v6515_v43 = vpop.permute.xlu1 %2455  ;;  %v6518_v51 = vadd.f32 %v1616_v40, %v6358_v35  ;;  %v1668_v41 = vadd.f32 %v1620_v30, %v1378_v1  ;;  %v1960_v48 = vadd.f32 %v1912_v3, %v6087_v5  ;;  %v9241_v60 = vld [vmem:[#allocation239_spill] sm:$0xff]  ;;  %v9246_v35 = vld [vmem:[#allocation284_spill] sm:$0xff]  ;;  %v2291_v13 = vld [vmem:[#allocation6 + $0x890] sm:$0xff] }
 0x3dc   : > { %9239 = vst [vmem:[#allocation135_spill] sm:$0xff] %v6515_v43  ;;  %3005 = vrot.lane.b32.xlu0 %v9144_v58, %s4130_s3  ;;  %v1953_v7 = vadd.f32 %v1905_v53, %v6089_v55  ;;  %v1961_v24 = vadd.f32 %v1913_v8, %v6091_v45  ;;  %v1950_v29 = vadd.f32 %v1902_v2, %v1660_v31  ;;  %v9244_v3 = vld [vmem:[#allocation163_spill] sm:$0xff]  ;;  %v9245_v45 = vld [vmem:[#allocation281_spill] sm:$0xff]  ;;  %v6543_v22 = vpop.permute.xlu0 %3013  ;;  %v2299_v18 = vld [vmem:[#allocation6 + $0x8d0] sm:$0xff] }
 0x3dd   : > { %9240 = vst [vmem:[#allocation14_spill] sm:$0xff] %v6518_v51  ;;  %v2248_v40 = vsel %vm2207_vm6, %v9242_v28, %v9241_v60  ;;  %v6533_v5 = vadd.f32 %v1337_v61, %v6430_v14  ;;  %v6539_v55 = vsel %vm1482_vm4, %v9101_v44, %v9244_v3  ;;  %v2096_v58 = vadd.f32 %v9245_v45, %v1951_v32  ;;  %v2298_v14 = vld [vmem:[#allocation6 + $0x8c8] sm:$0xff]  ;;  %v9251_v9 = vld [vmem:[#allocation251_spill] sm:$0xff]  ;;  %v9253_v23 = vld [vmem:[#allocation254_spill] sm:$0xff] }
 0x3de   : > { %2995 = vrot.lane.b32.xlu1 %v9149_v57, %s4130_s3  ;;  %v2104_v30 = vadd.f32 %v9246_v35, %v1959_v49  ;;  %v1958_v4 = vadd.f32 %v1910_v54, %v1668_v41  ;;  %v2242_v57 = vsel %vm2207_vm6, %v9241_v60, %v9247_v19  ;;  %v2243_v44 = vsel %vm2207_vm6, %v9249_v16, %v9248_v56  ;;  %v9252_v10 = vld [vmem:[#allocation285_spill] sm:$0xff]  ;;  %v9254_v2 = vld [vmem:[#allocation280_spill] sm:$0xff]  ;;  %v9257_v54 = vld [vmem:[#allocation291_spill] sm:$0xff] }
 0x3df   : > { %9243 = vst [vmem:[#allocation137_spill] sm:$0xff] %v6533_v5  ;;  %v2097_v37 = vadd.f32 %v9250_v46, %v1952_v38  ;;  %v6554_v15 = vpop.permute.xlu1 %3003  ;;  %v2337_v0 = vmul.f32 %v2289_v26, %v2248_v40  ;;  %v2236_v53 = vsel %vm2207_vm6, %v9247_v19, %v9251_v9  ;;  %v2105_v36 = vadd.f32 %v9252_v10, %v1960_v48  ;;  %v2297_v1 = vld [vmem:[#allocation6 + $0x8c0] sm:$0xff]  ;;  %v9256_v31 = vld [vmem:[#allocation289_spill] sm:$0xff]  ;;  %v2292_v60 = vld [vmem:[#allocation6 + $0x898] sm:$0xff] }
 0x3e0   : > { %v2237_v8 = vsel %vm2207_vm6, %v9248_v56, %v9253_v23  ;;  %3017 = vrot.lane.b32.xlu0 %v9159_v34, %s4130_s3  ;;  %v2095_v61 = vadd.f32 %v9254_v2, %v1950_v29  ;;  %v9255_v32 = vld [vmem:[#allocation236_spill] sm:$0xff]  ;;  %v2098_v38 = vadd.f32 %v9256_v31, %v1953_v7  ;;  %v2106_v41 = vadd.f32 %v9257_v54, %v1961_v24  ;;  %v9258_v40 = vld [vmem:[#allocation257_spill] sm:$0xff]  ;;  %v2300_v29 = vld [vmem:[#allocation6 + $0x8d8] sm:$0xff]  ;;  %v6584_v7 = vpop.permute.xlu0 %3025 }
 0x3e1   : > { %v2249_v49 = vsel %vm2207_vm6, %v9255_v32, %v9249_v16  ;;  %v2338_v48 = vmul.f32 %v2290_v25, %v2242_v57  ;;  %v2346_v26 = vmul.f32 %v2298_v14, %v2243_v44  ;;  %v2230_v34 = vsel %vm2207_vm6, %v9251_v9, %v9258_v40  ;;  %v9259_v45 = vld [vmem:[#allocation260_spill] sm:$0xff]  ;;  %v9260_v24 = vld [vmem:[#allocation283_spill] sm:$0xff]  ;;  %v2580_v16 = vld [vmem:[#allocation6 + $0xa08] sm:$0xff] }
 0x3e2   : > { %3007 = vrot.lane.b32.xlu1 %v9162_v39, %s4130_s3  ;;  %v2231_v35 = vsel %vm2207_vm6, %v9253_v23, %v9259_v45  ;;  %v6587_v19 = vadd.f32 %v9260_v24, %v1958_v4  ;;  %v2339_v39 = vmul.f32 %v2291_v13, %v2236_v53  ;;  %v2347_v25 = vmul.f32 %v2299_v18, %v2237_v8  ;;  %v9261_v44 = vld [vmem:[#allocation68_spill] sm:$0xff]  ;;  %v2581_v9 = vld [vmem:[#allocation6 + $0xa10] sm:$0xff]  ;;  %v9262_v53 = vld [vmem:[#allocation95_spill] sm:$0xff] }
 0x3e3   : > { %v6590_v57 = vpop.permute.xlu1 %3015  ;;  %v6592_v14 = vadd.f32 %v2337_v0, %v2095_v61  ;;  %v6594_v56 = vmul.f32 %v2297_v1, %v2249_v49  ;;  %v2532_v46 = vsel %vm2497_vm7, %v9261_v44, %v6073_v20  ;;  %v2340_v4 = vmul.f32 %v2292_v60, %v2230_v34  ;;  %v2582_v10 = vld [vmem:[#allocation6 + $0xa18] sm:$0xff]  ;;  %v9263_v18 = vld [vmem:[#allocation100_spill] sm:$0xff]  ;;  %v2588_v60 = vld [vmem:[#allocation6 + $0xa48] sm:$0xff] }
 0x3e4   : > { %3029 = vrot.lane.b32.xlu0 %v4630_v62, %s4130_s3  ;;  %v2348_v13 = vmul.f32 %v2300_v29, %v2231_v35  ;;  %v2526_v0 = vsel %vm2497_vm7, %v6073_v20, %v9262_v53  ;;  %v2520_v23 = vsel %vm2497_vm7, %v9262_v53, %v9263_v18  ;;  %v3271_v62 = vld [vmem:[%s8297_s4] sm:$0xff]  ;;  %v2386_v8 = vadd.f32 %v2338_v48, %v2096_v58  ;;  %v9264_v1 = vld [vmem:[#allocation67_spill] sm:$0xff]  ;;  %v9266_v34 = vld [vmem:[#allocation101_spill] sm:$0xff] }
 0x3e5   : > { %v2394_v2 = vadd.f32 %v2346_v26, %v2104_v30  ;;  %v2579_v61 = vld [vmem:[#allocation6 + $0xa00] sm:$0xff]  ;;  %v2538_v20 = vsel %vm2497_vm7, %v9264_v1, %v9261_v44  ;;  %v2387_v49 = vadd.f32 %v2339_v39, %v2097_v37  ;;  %v6621_v31 = vadd.f32 %v2347_v25, %v2105_v36  ;;  %v2870_v26 = vld [vmem:[#allocation6 + $0xb88] sm:$0xff]  ;;  %v9268_v24 = vld [vmem:[#allocation102_spill] sm:$0xff]  ;;  %v6635_v39 = vpop.permute.xlu0 %3037 }
 0x3e6   : > { %3019 = vrot.lane.b32.xlu1 %v4431_v59, %s4130_s3  ;;  %v2628_v54 = vmul.f32 %v2580_v16, %v2532_v46  ;;  %v9265_v59 = vld [vmem:[#allocation81_spill] sm:$0xff]  ;;  %v2629_v30 = vmul.f32 %v2581_v9, %v2526_v0  ;;  %v2630_v48 = vmul.f32 %v2582_v10, %v2520_v23  ;;  %v2872_v53 = vld [vmem:[#allocation6 + $0xb98] sm:$0xff]  ;;  %9270 = vst [vmem:[#allocation45_spill] sm:$0xff] %v6635_v39  ;;  %v2589_v9 = vld [vmem:[#allocation6 + $0xa50] sm:$0xff] }
 0x3e7   : > { %v2533_v29 = vsel %vm2497_vm7, %v9266_v34, %v9265_v59  ;;  %v3028_v58 = vpop.permute.xlu1 %3027  ;;  %v9267_v35 = vld [vmem:[#allocation109_spill] sm:$0xff]  ;;  %v2388_v25 = vadd.f32 %v2340_v4, %v2098_v38  ;;  %v2396_v16 = vadd.f32 %v2348_v13, %v2106_v41  ;;  %v6637_v46 = vmul.f32 %v2579_v61, %v2538_v20  ;;  %v9271_v0 = vld [vmem:[#allocation98_spill] sm:$0xff]  ;;  %v9272_v23 = vld [vmem:[#allocation59_spill] sm:$0xff] }
 0x3e8   : > { %v2822_v44 = vsel %vm2787_vm8, %v9268_v24, %v9267_v35  ;;  %v9269_v37 = vld [vmem:[#allocation117_spill] sm:$0xff]  ;;  %3279 = vperm.xlu0 %3949, %v3271_v62   ;;  %v2527_v10 = vsel %vm2497_vm7, %v9265_v59, %v9271_v0  ;;  %v2636_v62 = vmul.f32 %v2588_v60, %v2533_v29  ;;  %v2590_v38 = vld [vmem:[#allocation6 + $0xa58] sm:$0xff]  ;;  %v9273_v41 = vld [vmem:[#allocation106_spill] sm:$0xff]  ;;  %v3112_v60 = vsel %vm3077_vm9, %v6509_v11, %v6543_v22 }
 0x3e9   : > { %v2810_v36 = vsel %vm2787_vm8, %v9269_v37, %v6310_v6  ;;  %v6649_v6 = vsel %vm2497_vm7, %v9272_v23, %v9266_v34  ;;  %v2521_v4 = vsel %vm2497_vm7, %v9271_v0, %v9273_v41  ;;  %v2871_v13 = vld [vmem:[#allocation6 + $0xb90] sm:$0xff]  ;;  %v2816_v61 = vsel %vm2787_vm8, %v9267_v35, %v9269_v37  ;;  %v3160_v34 = vld [vmem:[#allocation6 + $0xd08] sm:$0xff]  ;;  %v3162_v29 = vld [vmem:[#allocation6 + $0xd18] sm:$0xff] }
 0x3ea   : > { %3031 = vrot.lane.b32.xlu1 %v4645_v12, %s4130_s3  ;;  %v3272_v12 = vld [vmem:[%s8297_s4 + $0x8] sm:$0xff]  ;;  %v2918_v20 = vmul.f32 %v2870_v26, %v2822_v44  ;;  %v2920_v59 = vmul.f32 %v2872_v53, %v2810_v36  ;;  %v3100_v0 = vsel %vm3077_vm9, %v6584_v7, %v6635_v39  ;;  %v2676_v23 = vadd.f32 %v2628_v54, %v2386_v8  ;;  %v9274_v44 = vld [vmem:[#allocation112_spill] sm:$0xff]  ;;  %v3161_v41 = vld [vmem:[#allocation6 + $0xd10] sm:$0xff] }
 0x3eb   : > { %v2677_v35 = vadd.f32 %v2629_v30, %v2387_v49  ;;  %v2637_v37 = vmul.f32 %v2589_v9, %v2527_v10  ;;  %v2678_v1 = vadd.f32 %v2630_v48, %v2388_v25  ;;  %v2638_v26 = vmul.f32 %v2590_v38, %v2521_v4  ;;  %v9275_v53 = vld [vmem:[#allocation116_spill] sm:$0xff]  ;;  %v6680_v8 = vpop.permute.xlu1 %3039  ;;  %v2878_v49 = vld [vmem:[#allocation6 + $0xbc8] sm:$0xff]  ;;  %v2879_v54 = vld [vmem:[#allocation6 + $0xbd0] sm:$0xff] }
 0x3ec   : > { %2981 = vrot.lane.b32.xlu0 %v9182_v17, %s4130_s3  ;;  %v2823_v36 = vsel %vm2787_vm8, %v9275_v53, %v9274_v44  ;;  %v2919_v32 = vmul.f32 %v2871_v13, %v2816_v61  ;;  %v3106_v39 = vsel %vm3077_vm9, %v6543_v22, %v6584_v7  ;;  %9276 = vst [vmem:[#allocation19_spill] sm:$0xff] %v6680_v8  ;;  %v9277_v30 = vld [vmem:[#allocation21_spill] sm:$0xff]  ;;  %v2880_v48 = vld [vmem:[#allocation6 + $0xbd8] sm:$0xff]  ;;  %v9278_v25 = vld [vmem:[#allocation124_spill] sm:$0xff] }
 0x3ed   : > { %v2817_v17 = vsel %vm2787_vm8, %v9274_v44, %v9277_v30  ;;  %v2811_v9 = vsel %vm2787_vm8, %v9277_v30, %v9278_v25  ;;  %v3208_v10 = vmul.f32 %v3160_v34, %v3112_v60  ;;  %v3210_v38 = vmul.f32 %v3162_v29, %v3100_v0  ;;  %v2869_v13 = vld [vmem:[#allocation6 + $0xb80] sm:$0xff]  ;;  %v9279_v61 = vld [vmem:[#allocation126_spill] sm:$0xff]  ;;  %v3168_v18 = vld [vmem:[#allocation6 + $0xd48] sm:$0xff] }
 0x3ee   : > { %3284 = vperm.xlu1 %3950, %v3272_v12   ;;  %v2684_v4 = vadd.f32 %v2636_v62, %v2394_v2  ;;  %v2966_v22 = vadd.f32 %v2918_v20, %v2676_v23  ;;  %v2968_v7 = vadd.f32 %v2920_v59, %v2678_v1  ;;  %v2828_v12 = vsel %vm2787_vm8, %v9279_v61, %v9268_v24  ;;  %v3169_v45 = vld [vmem:[#allocation6 + $0xd50] sm:$0xff]  ;;  %v3170_v23 = vld [vmem:[#allocation6 + $0xd58] sm:$0xff]  ;;  %v9280_v62 = vld [vmem:[#allocation89_spill] sm:$0xff] }
 0x3ef   : > { %v3113_v44 = vsel %vm3077_vm9, %v6554_v15, %v6590_v57  ;;  %v3209_v28 = vmul.f32 %v3161_v41, %v3106_v39  ;;  %v3107_v2 = vsel %vm3077_vm9, %v6590_v57, %v3028_v58  ;;  %v3101_v1 = vsel %vm3077_vm9, %v3028_v58, %v6680_v8  ;;  %v9281_v39 = vld [vmem:[#allocation15_spill] sm:$0xff]  ;;  %v2587_v0 = vld [vmem:[#allocation6 + $0xa40] sm:$0xff]  ;;  %v6709_v8 = vpop.permute.xlu0 %3299  ;;  %v9367_v51 = vld [vmem:[#allocation201_spill] sm:$0xff] }
 0x3f0   : > { %2759 = vrot.lane.b32.xlu0 %v9280_v62, %s4129_s16  ;;  %v2685_v24 = vadd.f32 %v2637_v37, %v6621_v31  ;;  %v2926_v20 = vmul.f32 %v2878_v49, %v2823_v36  ;;  %v2927_v59 = vmul.f32 %v2879_v54, %v2817_v17  ;;  %v2928_v34 = vmul.f32 %v2880_v48, %v2811_v9  ;;  %v9283_v36 = vld [vmem:[#allocation80_spill] sm:$0xff]  ;;  %v9328_v21 = vld [vmem:[#allocation91_spill] sm:$0xff] }
 0x3f1   : > { %v2686_v41 = vadd.f32 %v2638_v26, %v2396_v16  ;;  %v2967_v60 = vadd.f32 %v2919_v32, %v2677_v35  ;;  %v3256_v29 = vadd.f32 %v3208_v10, %v2966_v22  ;;  %v3258_v57 = vadd.f32 %v3210_v38, %v2968_v7  ;;  %9282 = vst [vmem:[#allocation138_spill] sm:$0xff] %v6709_v8  ;;  %v2877_v54 = vld [vmem:[#allocation6 + $0xbc0] sm:$0xff]  ;;  %v1537_v22 = vld [vmem:[#allocation6 + $0x328] sm:$0xff]  ;;  %v2284_v50 = vld [vmem:[#allocation6 + $0x858] sm:$0xff] }
 0x3f2   : > { %2983 = vrot.lane.b32.xlu1 %v9281_v39, %s4130_s3  ;;  %v2917_v30 = vmul.f32 %v2869_v13, %v2828_v12  ;;  %v3216_v61 = vmul.f32 %v3168_v18, %v3113_v44  ;;  %v3217_v25 = vmul.f32 %v3169_v45, %v3107_v2  ;;  %v3218_v58 = vmul.f32 %v3170_v23, %v3101_v1  ;;  %v9284_v45 = vld [vmem:[#allocation26_spill] sm:$0xff]  ;;  %v9285_v17 = vld [vmem:[#allocation96_spill] sm:$0xff]  ;;  %v6733_v23 = vpop.permute.xlu1 %3304 }
 0x3f3   : > { %v2675_v31 = vadd.f32 %v6637_v46, %v6592_v14  ;;  %v3257_v37 = vadd.f32 %v3209_v28, %v2967_v60  ;;  %v3340_v49 = vadd.f32 %v6709_v8, %v3256_v29  ;;  %v3342_v32 = vadd.f32 %v6709_v8, %v3258_v57  ;;  %v9286_v28 = vld [vmem:[#allocation164_spill] sm:$0xff]  ;;  %v9287_v14 = vld [vmem:[#allocation110_spill] sm:$0xff]  ;;  %v6731_v44 = vpop.permute.xlu0 %2989  ;;  %9289 = vst [vmem:[#allocation139_spill] sm:$0xff] %v6733_v23 }
 0x3f4   : > { %2771 = vrot.lane.b32.xlu0 %v9283_v36, %s4129_s16  ;;  %v2974_v16 = vadd.f32 %v2926_v20, %v2684_v4  ;;  %v2975_v35 = vadd.f32 %v2927_v59, %v2685_v24  ;;  %v2976_v26 = vadd.f32 %v2928_v34, %v2686_v41  ;;  %v2829_v18 = vsel %vm2787_vm8, %v9284_v45, %v9275_v53  ;;  %v3159_v10 = vld [vmem:[#allocation6 + $0xd00] sm:$0xff] }
 0x3f5   : > { %v1506_v46 = vsel %vm1482_vm4, %v9287_v14, %v9286_v28  ;;  %v2393_v48 = vadd.f32 %v6594_v56, %v6587_v19  ;;  %v2635_v9 = vmul.f32 %v2587_v0, %v6649_v6  ;;  %v3341_v38 = vadd.f32 %v6709_v8, %v3257_v37  ;;  %v1576_v4 = vld [vmem:[#allocation6 + $0x460] sm:$0xff]  ;;  %9288 = vst [vmem:[#allocation132_spill] sm:$0xff] %v6731_v44  ;;  %v9292_v37 = vld [vmem:[#allocation166_spill] sm:$0xff] }
 0x3f6   : > { %2761 = vrot.lane.b32.xlu1 %v9285_v17, %s4129_s16  ;;  %v2965_v7 = vadd.f32 %v2917_v30, %v2675_v31  ;;  %v3264_v53 = vadd.f32 %v3216_v61, %v2974_v16  ;;  %v3265_v13 = vadd.f32 %v3217_v25, %v2975_v35  ;;  %v3266_v12 = vadd.f32 %v3218_v58, %v2976_v26  ;;  %v9290_v6 = vld [vmem:[#allocation92_spill] sm:$0xff]  ;;  %v9291_v61 = vld [vmem:[#allocation87_spill] sm:$0xff]  ;;  %v1545_v31 = vld [vmem:[#allocation6 + $0x368] sm:$0xff] }
 0x3f7   : > { %v2925_v2 = vmul.f32 %v2877_v54, %v2829_v18  ;;  %v3118_v19 = vsel %vm3077_vm9, %v6731_v44, %v6509_v11  ;;  %v3388_v56 = vmax.f32 %v3340_v49, 0.0  ;;  %v3390_v1 = vmax.f32 %v3342_v32, 0.0  ;;  %v3167_v29 = vld [vmem:[#allocation6 + $0xd40] sm:$0xff]  ;;  %v6747_v57 = vpop.permute.xlu0 %2707  ;;  %v1553_v16 = vld [vmem:[#allocation6 + $0x3a8] sm:$0xff]  ;;  %v9295_v26 = vld [vmem:[#allocation159_spill] sm:$0xff]  ;;  %v6757_v18 = vpop.permute.xlu1 %2991 }
 0x3f8   : > { %2783 = vrot.lane.b32.xlu0 %v9290_v6, %s4129_s16  ;;  %v3207_v24 = vmul.f32 %v3159_v10, %v3118_v19  ;;  %v3348_v25 = vadd.f32 %v6733_v23, %v3264_v53  ;;  %v3350_v20 = vadd.f32 %v6733_v23, %v3266_v12  ;;  %v3349_v59 = vadd.f32 %v6733_v23, %v3265_v13  ;;  %v9293_v49 = vld [vmem:[#allocation120_spill] sm:$0xff]  ;;  %v9294_v35 = vld [vmem:[#allocation165_spill] sm:$0xff]  ;;  %v9297_v14 = vld [vmem:[#allocation66_spill] sm:$0xff] }
 0x3f9   : > { %v1624_v34 = vmul.f32 %v1576_v4, %v1506_v46  ;;  %v1585_v39 = vmul.f32 %v1537_v22, %v6539_v55  ;;  %v2683_v41 = vadd.f32 %v2635_v9, %v2393_v48  ;;  %v3389_v11 = vmax.f32 %v3341_v38, 0.0  ;;  %9296 = vst [vmem:[#allocation133_spill] sm:$0xff] %v6757_v18  ;;  %v9326_v45 = vld [vmem:[#allocation176_spill] sm:$0xff] }
 0x3fa   : > { %2773 = vrot.lane.b32.xlu1 %v9291_v61, %s4129_s16  ;;  %v3255_v60 = vadd.f32 %v3207_v24, %v2965_v7  ;;  %v3396_v0 = vmax.f32 %v3348_v25, 0.0  ;;  %v3398_v30 = vmax.f32 %v3350_v20, 0.0  ;;  %v3397_v58 = vmax.f32 %v3349_v59, 0.0  ;;  %v1561_v24 = vld [vmem:[#allocation6 + $0x3e8] sm:$0xff]  ;;  %v9298_v25 = vld [vmem:[#allocation168_spill] sm:$0xff] }
 0x3fb   : > { %v1496_v32 = vsel %vm1482_vm4, %v9293_v49, %v9292_v37  ;;  %v1497_v55 = vsel %vm1482_vm4, %v9295_v26, %v9294_v35  ;;  %v2973_v54 = vadd.f32 %v2925_v2, %v2683_v41  ;;  %v3436_v46 = vmin.f32 %v3388_v56, 6.0  ;;  %v6768_v2 = vpop.permute.xlu0 %2719  ;;  %v1569_v59 = vld [vmem:[#allocation6 + $0x428] sm:$0xff]  ;;  %v9305_v49 = vld [vmem:[#allocation170_spill] sm:$0xff] }
 0x3fc   : > { %2465 = vrot.lane.b32.xlu0 %v9297_v14, %s4128_s10  ;;  %v3119_v48 = vsel %vm3077_vm9, %v6757_v18, %v6554_v15  ;;  %v3444_v9 = vmin.f32 %v3396_v0, 6.0  ;;  %v3438_v10 = vmin.f32 %v3390_v1, 6.0  ;;  %v3446_v38 = vmin.f32 %v3398_v30, 6.0  ;;  %v9299_v15 = vld [vmem:[#allocation146_spill] sm:$0xff]  ;;  %v9300_v1 = vld [vmem:[#allocation167_spill] sm:$0xff]  ;;  %v9301_v41 = vld [vmem:[#allocation161_spill] sm:$0xff] }
 0x3fd   : > { %v3339_v4 = vadd.f32 %v6709_v8, %v3255_v60  ;;  %v3215_v22 = vmul.f32 %v3167_v29, %v3119_v48  ;;  %v3437_v7 = vmin.f32 %v3389_v11, 6.0  ;;  %v3445_v53 = vmin.f32 %v3397_v58, 6.0  ;;  %v6778_v29 = vpop.permute.xlu1 %2709  ;;  %v9302_v0 = vld [vmem:[#allocation58_spill] sm:$0xff]  ;;  %v9303_v58 = vld [vmem:[#allocation85_spill] sm:$0xff]  ;;  %v9314_v18 = vld [vmem:[#allocation104_spill] sm:$0xff] }
 0x3fe   : > { %2785 = vrot.lane.b32.xlu1 %v9238_v52, %s4129_s16  ;;  %v1593_v13 = vmul.f32 %v1545_v31, %v1496_v32  ;;  %v1601_v12 = vmul.f32 %v1553_v16, %v1497_v55  ;;  %v3470_v19 = vpack.c.bf16 %v3444_v9, %v3436_v46  ;;  %v3472_v56 = vpack.c.bf16 %v3446_v38, %v3438_v10  ;;  %v1538_v16 = vld [vmem:[#allocation6 + $0x330] sm:$0xff]  ;;  %v9306_v26 = vld [vmem:[#allocation169_spill] sm:$0xff]  ;;  %v9308_v9 = vld [vmem:[#allocation172_spill] sm:$0xff] }
 0x3ff   : > { %v1498_v20 = vsel %vm1482_vm4, %v9299_v15, %v9298_v25  ;;  %v1499_v60 = vsel %vm1482_vm4, %v9301_v41, %v9300_v1  ;;  %v3263_v11 = vadd.f32 %v3215_v22, %v2973_v54  ;;  %v3471_v30 = vpack.c.bf16 %v3445_v53, %v3437_v7  ;;  %v9307_v54 = vld [vmem:[#allocation71_spill] sm:$0xff]  ;;  %v1577_v46 = vld [vmem:[#allocation6 + $0x468] sm:$0xff]  ;;  %v1546_v48 = vld [vmem:[#allocation6 + $0x370] sm:$0xff] }
 0x400   : > { %2477 = vrot.lane.b32.xlu0 %v9302_v0, %s4128_s10  ;;  %v6783_v31 = vadd.f32 %v1585_v39, %v9303_v58  ;;  %v1500_v32 = vsel %vm1482_vm4, %v9286_v28, %v9305_v49  ;;  %v1489_v55 = vsel %vm1482_vm4, %v9244_v3, %v9306_v26  ;;  %3508 = vmatprep.subr.bf16.mxu0 %v3470_v19  ;;  %v1554_v10 = vld [vmem:[#allocation6 + $0x3b0] sm:$0xff]  ;;  %v9309_v38 = vld [vmem:[#allocation171_spill] sm:$0xff]  ;;  %v3387_v22 = vmax.f32 %v3339_v4, 0.0  ;;  %v9312_v19 = vld [vmem:[#allocation20_spill] sm:$0xff] }
 0x401   : > { %v1490_v39 = vsel %vm1482_vm4, %v9292_v37, %v9308_v9  ;;  %v1491_v28 = vsel %vm1482_vm4, %v9294_v35, %v9309_v38  ;;  %v3347_v3 = vadd.f32 %v6733_v23, %v3263_v11  ;;  %3551 = vmatprep.subr.bf16.mxu1 %v3472_v56  ;;  %v9310_v7 = vld [vmem:[#allocation22_spill] sm:$0xff]  ;;  %v6808_v15 = vadd.f32 %v1601_v12, %v9312_v19  ;;  %v6810_v37 = vpop.permute.xlu0 %2731  ;;  %v9316_v4 = vld [vmem:[#allocation173_spill] sm:$0xff]  ;;  %v6819_v11 = vpop.permute.xlu1 %2721 }
 0x402   : > { %9304 = vst [vmem:[#allocation51_spill] sm:$0xff] %v6783_v31  ;;  %2467 = vrot.lane.b32.xlu1 %v9307_v54, %s4128_s10  ;;  %v6805_v53 = vadd.f32 %v1624_v34, %v9310_v7  ;;  %v1609_v41 = vmul.f32 %v1561_v24, %v1498_v20  ;;  %v1617_v58 = vmul.f32 %v1569_v59, %v1499_v60  ;;  %v1570_v35 = vld [vmem:[#allocation6 + $0x430] sm:$0xff]  ;;  %v9317_v12 = vld [vmem:[#allocation69_spill] sm:$0xff]  ;;  %v9321_v7 = vld [vmem:[#allocation27_spill] sm:$0xff] }
 0x403   : > { %9313 = vst [vmem:[#allocation18_spill] sm:$0xff] %v6808_v15  ;;  %3552 = vmatpush1.bf16.msra.mxu1 %v3471_v30  ;;  %v6813_v8 = vadd.f32 %v1593_v13, %v9314_v18  ;;  %v1586_v44 = vmul.f32 %v1538_v16, %v1489_v55  ;;  %v1493_v56 = vsel %vm1482_vm4, %v9300_v1, %v9316_v4  ;;  %v3395_v34 = vmax.f32 %v3347_v3, 0.0  ;;  %v1562_v60 = vld [vmem:[#allocation6 + $0x3f0] sm:$0xff]  ;;  %v1532_v16 = vld [vmem:[#allocation6 + $0x300] sm:$0xff]  ;;  %v1539_v1 = vld [vmem:[#allocation6 + $0x338] sm:$0xff] }
 0x404   : > { %9311 = vst [vmem:[#allocation141_spill] sm:$0xff] %v6805_v53  ;;  %2489 = vrot.lane.b32.xlu0 %v9317_v12, %s4128_s10  ;;  %v1625_v24 = vmul.f32 %v1577_v46, %v1500_v32  ;;  %v1594_v20 = vmul.f32 %v1546_v48, %v1490_v39  ;;  %v1602_v59 = vmul.f32 %v1554_v10, %v1491_v28  ;;  %v9318_v30 = vld [vmem:[#allocation174_spill] sm:$0xff]  ;;  %v9320_v55 = vld [vmem:[#allocation175_spill] sm:$0xff]  ;;  %v3435_v46 = vmin.f32 %v3387_v22, 6.0 }
 0x405   : > { %9315 = vst [vmem:[#allocation136_spill] sm:$0xff] %v6813_v8  ;;  %v1492_v18 = vsel %vm1482_vm4, %v9298_v25, %v9318_v30  ;;  %v9319_v13 = vld [vmem:[#allocation62_spill] sm:$0xff]  ;;  %v1483_v3 = vsel %vm1482_vm4, %v9306_v26, %v9320_v55  ;;  %v1525_v32 = vsel %vm1482_vm4, %v9320_v55, %v9321_v7  ;;  %v3443_v48 = vmin.f32 %v3395_v34, 6.0  ;;  %v9322_v39 = vld [vmem:[#allocation115_spill] sm:$0xff]  ;;  %v9324_v25 = vld [vmem:[#allocation128_spill] sm:$0xff]  ;;  %v6847_v40 = vpop.permute.xlu0 %2743  ;;  %v6856_v7 = vpop.permute.xlu1 %2733 }
 0x406   : > { %2479 = vrot.lane.b32.xlu1 %v9319_v13, %s4128_s10  ;;  %v6838_v10 = vadd.f32 %v1609_v41, %v9322_v39  ;;  %v6841_v28 = vadd.f32 %v1617_v58, %v9324_v25  ;;  %v1618_v19 = vmul.f32 %v1570_v35, %v1493_v56  ;;  %v1578_v23 = vld [vmem:[#allocation6 + $0x470] sm:$0xff]  ;;  %v1494_v26 = vsel %vm1482_vm4, %v9305_v49, %v9326_v45  ;;  %v1548_v34 = vld [vmem:[#allocation6 + $0x380] sm:$0xff]  ;;  %v9331_v41 = vld [vmem:[#allocation177_spill] sm:$0xff] }
 0x407   : > { %9327 = vst [vmem:[#allocation50_spill] sm:$0xff] %v6847_v40  ;;  %v6850_v15 = vadd.f32 %v1586_v44, %v9328_v21  ;;  %v1610_v22 = vmul.f32 %v1562_v60, %v1492_v18  ;;  %v9330_v55 = vld [vmem:[#allocation56_spill] sm:$0xff]  ;;  %v3469_v35 = vpack.c.bf16 %v3443_v48, %v3435_v46  ;;  %v1580_v56 = vmul.f32 %v1532_v16, %v1525_v32  ;;  %v9332_v25 = vld [vmem:[#allocation30_spill] sm:$0xff]  ;;  %v1555_v44 = vld [vmem:[#allocation6 + $0x3b8] sm:$0xff] }
 0x408   : > { %9323 = vst [vmem:[#allocation142_spill] sm:$0xff] %v6838_v10  ;;  %9325 = vst [vmem:[#allocation16_spill] sm:$0xff] %v6841_v28  ;;  %v1527_v58 = vsel %vm1482_vm4, %v9331_v41, %v9330_v55  ;;  %3049 = vrot.lane.b32.xlu0 %v9280_v62, %s4130_s3  ;;  %v1587_v49 = vmul.f32 %v1539_v1, %v1483_v3  ;;  %v1540_v39 = vld [vmem:[#allocation6 + $0x340] sm:$0xff]  ;;  %v9333_v10 = vld [vmem:[#allocation178_spill] sm:$0xff]  ;;  %v1485_v60 = vsel %vm1482_vm4, %v9309_v38, %v9331_v41 }
 0x409   : > { %9329 = vst [vmem:[#allocation140_spill] sm:$0xff] %v6850_v15  ;;  %v1526_v21 = vsel %vm1482_vm4, %v9333_v10, %v9332_v25  ;;  %v9334_v18 = vld [vmem:[#allocation74_spill] sm:$0xff]  ;;  %v6871_v62 = vadd.f32 %v1625_v24, %v6503_v47  ;;  %v9336_v16 = vld [vmem:[#allocation113_spill] sm:$0xff]  ;;  %v9338_v3 = vld [vmem:[#allocation119_spill] sm:$0xff]  ;;  %v1626_v46 = vmul.f32 %v1578_v23, %v1494_v26  ;;  %3509 = vmatpush1.bf16.msra.mxu0 %v3469_v35 }
 0x40a   : > { %2491 = vrot.lane.b32.xlu1 %v9334_v18, %s4128_s10  ;;  %v6874_v1 = vadd.f32 %v1594_v20, %v9336_v16  ;;  %v6877_v32 = vadd.f32 %v1602_v59, %v9338_v3  ;;  %v9340_v48 = vld [vmem:[#allocation131_spill] sm:$0xff]  ;;  %v1484_v38 = vsel %vm1482_vm4, %v9308_v9, %v9333_v10  ;;  %v1596_v41 = vmul.f32 %v1548_v34, %v1527_v58  ;;  %v1839_v25 = vld [vmem:[#allocation6 + $0x508] sm:$0xff]  ;;  %v6890_v16 = vpop.permute.xlu0 %2695  ;;  %v9346_v3 = vld [vmem:[#allocation186_spill] sm:$0xff]  ;;  %v6900_v34 = vpop.permute.xlu1 %2745 }
 0x40b   : > { %9335 = vst [vmem:[#allocation144_spill] sm:$0xff] %v6871_v62  ;;  %v6880_v55 = vadd.f32 %v1618_v19, %v9340_v48  ;;  %v9342_v47 = vld [vmem:[#allocation189_spill] sm:$0xff]  ;;  %v9343_v24 = vld [vmem:[#allocation183_spill] sm:$0xff]  ;;  %9344 = vst [vmem:[#allocation152_spill] sm:$0xff] %v6890_v16  ;;  %v1588_v23 = vmul.f32 %v1540_v39, %v1526_v21  ;;  %v1603_v26 = vmul.f32 %v1555_v44, %v1485_v60 }
 0x40c   : > { %9337 = vst [vmem:[#allocation55_spill] sm:$0xff] %v6874_v1  ;;  %9339 = vst [vmem:[#allocation147_spill] sm:$0xff] %v6877_v32  ;;  %v1811_v20 = vsel %vm1772_vm5, %v9343_v24, %v9342_v47  ;;  %v1547_v59 = vld [vmem:[#allocation6 + $0x378] sm:$0xff]  ;;  %v1847_v35 = vld [vmem:[#allocation6 + $0x548] sm:$0xff]  ;;  %3061 = vrot.lane.b32.xlu0 %v9283_v36, %s4130_s3  ;;  %v6920_v36 = vadd.f32 %v1626_v46, %v6512_v63 }
 0x40d   : > { %9341 = vst [vmem:[#allocation143_spill] sm:$0xff] %v6880_v55  ;;  %v9345_v19 = vld [vmem:[#allocation192_spill] sm:$0xff]  ;;  %v1840_v55 = vld [vmem:[#allocation6 + $0x510] sm:$0xff]  ;;  %v9347_v9 = vld [vmem:[#allocation195_spill] sm:$0xff] }
 0x40e   : > { %v1812_v48 = vsel %vm1772_vm5, %v9346_v3, %v9345_v19  ;;  %v1805_v10 = vsel %vm1772_vm5, %v9342_v47, %v9347_v9  ;;  %9348 = vst [vmem:[#allocation148_spill] sm:$0xff] %v6900_v34  ;;  %v9349_v58 = vld [vmem:[#allocation123_spill] sm:$0xff]  ;;  %v9351_v21 = vld [vmem:[#allocation105_spill] sm:$0xff]  ;;  %v1848_v1 = vld [vmem:[#allocation6 + $0x550] sm:$0xff]  ;;  %3051 = vrot.lane.b32.xlu1 %v9285_v17, %s4130_s3  ;;  %v6933_v46 = vpop.permute.xlu0 %2425 }
 0x40f   : > { %v6905_v39 = vadd.f32 %v1610_v22, %v9349_v58  ;;  %v6908_v44 = vadd.f32 %v1580_v56, %v9351_v21  ;;  %v9353_v60 = vld [vmem:[#allocation93_spill] sm:$0xff]  ;;  %v9355_v62 = vld [vmem:[#allocation198_spill] sm:$0xff]  ;;  %9356 = vst [vmem:[#allocation155_spill] sm:$0xff] %v6920_v36  ;;  %v1556_v22 = vld [vmem:[#allocation6 + $0x3c0] sm:$0xff]  ;;  %v1895_v15 = vmul.f32 %v1847_v35, %v1812_v48  ;;  %v1888_v63 = vmul.f32 %v1840_v55, %v1805_v10 }
 0x410   : > { %v6911_v32 = vadd.f32 %v1587_v49, %v9353_v60  ;;  %v1806_v47 = vsel %vm1772_vm5, %v9345_v19, %v9355_v62  ;;  %v9357_v58 = vld [vmem:[#allocation60_spill] sm:$0xff]  ;;  %v1571_v49 = vld [vmem:[#allocation6 + $0x438] sm:$0xff]  ;;  %v6930_v19 = vmul.f32 %v1547_v59, %v1484_v38  ;;  %9362 = vst [vmem:[#allocation83_spill] sm:$0xff] %v6933_v46  ;;  %v9363_v36 = vld [vmem:[#allocation97_spill] sm:$0xff]  ;;  %v6945_v38 = vpop.permute.xlu1 %2697  ;;  %3073 = vrot.lane.b32.xlu0 %v9290_v6, %s4130_s3 }
 0x411   : > { %9350 = vst [vmem:[#allocation13_spill] sm:$0xff] %v6905_v39  ;;  %9352 = vst [vmem:[#allocation151_spill] sm:$0xff] %v6908_v44  ;;  %v9358_v39 = vld [vmem:[#allocation180_spill] sm:$0xff]  ;;  %v9359_v21 = vld [vmem:[#allocation179_spill] sm:$0xff]  ;;  %v6936_v28 = vadd.f32 %v1588_v23, %v9363_v36  ;;  %v1896_v31 = vmul.f32 %v1848_v1, %v1806_v47 }
 0x412   : > { %9354 = vst [vmem:[#allocation149_spill] sm:$0xff] %v6911_v32  ;;  %v1528_v56 = vsel %vm1482_vm4, %v9358_v39, %v9357_v58  ;;  %v1487_v60 = vsel %vm1482_vm4, %v9316_v4, %v9359_v21  ;;  %v1887_v32 = vmul.f32 %v1839_v25, %v1811_v20  ;;  %9360 = vst [vmem:[#allocation145_spill] sm:$0xff] %v6930_v19  ;;  %v9361_v44 = vld [vmem:[#allocation121_spill] sm:$0xff]  ;;  %v9365_v8 = vld [vmem:[#allocation114_spill] sm:$0xff]  ;;  %3063 = vrot.lane.b32.xlu1 %v9291_v61, %s4130_s3 }
 0x413   : > { %v1644_v17 = vadd.f32 %v1596_v41, %v9361_v44  ;;  %9364 = vst [vmem:[#allocation157_spill] sm:$0xff] %v6936_v28  ;;  %v6939_v58 = vadd.f32 %v1603_v26, %v9365_v8  ;;  %v1841_v53 = vld [vmem:[#allocation6 + $0x518] sm:$0xff]  ;;  %v1799_v4 = vsel %vm1772_vm5, %v9347_v9, %v9367_v51  ;;  %9368 = vst [vmem:[#allocation78_spill] sm:$0xff] %v6945_v38  ;;  %v1838_v1 = vld [vmem:[#allocation6 + $0x500] sm:$0xff]  ;;  %v6980_v28 = vpop.permute.xlu0 %2437 }
 0x414   : > { %v1563_v55 = vld [vmem:[#allocation6 + $0x3f8] sm:$0xff]  ;;  %v1486_v41 = vsel %vm1482_vm4, %v9318_v30, %v9358_v39  ;;  %v1604_v8 = vmul.f32 %v1556_v22, %v1528_v56  ;;  %v6953_v25 = vmul.f32 %v1571_v49, %v1487_v60  ;;  %v9370_v20 = vld [vmem:[#allocation225_spill] sm:$0xff]  ;;  %v9373_v48 = vld [vmem:[#allocation190_spill] sm:$0xff]  ;;  %v1889_v21 = vmul.f32 %v1841_v53, %v1799_v4  ;;  %9380 = vst [vmem:[#allocation156_spill] sm:$0xff] %v6980_v28 }
 0x415   : > { %9366 = vst [vmem:[#allocation153_spill] sm:$0xff] %v6939_v58  ;;  %v1817_v59 = vsel %vm1772_vm5, %v9370_v20, %v9343_v24  ;;  %v1823_v23 = vld [vmem:[#allocation6 + $0x488] sm:$0xff]  ;;  %v9371_v6 = vld [vmem:[#allocation187_spill] sm:$0xff]  ;;  %v9374_v30 = vld [vmem:[#allocation184_spill] sm:$0xff]  ;;  %v6991_v53 = vsel %vm2497_vm7, %v6933_v46, %v6980_v28  ;;  %2755 = vrot.lane.b32.xlu0 %v9297_v14, %s4129_s16 }
 0x416   : > { %9369 = vst [vmem:[#allocation150_spill] sm:$0xff] %v6953_v25  ;;  %v9372_v26 = vld [vmem:[#allocation181_spill] sm:$0xff]  ;;  %v1810_v9 = vsel %vm1772_vm5, %v9374_v30, %v9373_v48  ;;  %v9375_v10 = vld [vmem:[#allocation54_spill] sm:$0xff]  ;;  %v1849_v44 = vld [vmem:[#allocation6 + $0x558] sm:$0xff]  ;;  %3075 = vrot.lane.b32.xlu1 %v9238_v52, %s4130_s3 }
 0x417   : > { %v1809_v35 = vsel %vm1772_vm5, %v9372_v26, %v9371_v6  ;;  %v1935_v39 = vadd.f32 %v1887_v32, %v9375_v10  ;;  %v9376_v47 = vld [vmem:[#allocation204_spill] sm:$0xff]  ;;  %v1831_v61 = vld [vmem:[#allocation6 + $0x4c8] sm:$0xff]  ;;  %v9377_v36 = vld [vmem:[#allocation70_spill] sm:$0xff]  ;;  %v6982_v32 = vmul.f32 %v1563_v55, %v1486_v41  ;;  %v1886_v26 = vmul.f32 %v1838_v1, %v1817_v59  ;;  %9384 = vst [vmem:[#allocation160_spill] sm:$0xff] %v6991_v53 }
 0x418   : > { %v1800_v24 = vsel %vm1772_vm5, %v9355_v62, %v9376_v47  ;;  %v1943_v22 = vadd.f32 %v1895_v15, %v9377_v36  ;;  %v9378_v56 = vld [vmem:[#allocation65_spill] sm:$0xff]  ;;  %v1846_v60 = vld [vmem:[#allocation6 + $0x540] sm:$0xff]  ;;  %v6985_v62 = vpop.permute.xlu1 %2427  ;;  %v9385_v15 = vld [vmem:[#allocation122_spill] sm:$0xff]  ;;  %v7006_v41 = vmul.f32 %v1831_v61, %v1810_v9 }
 0x419   : > { %v1936_v49 = vadd.f32 %v1888_v63, %v9378_v56  ;;  %v9379_v58 = vld [vmem:[#allocation228_spill] sm:$0xff]  ;;  %9381 = vst [vmem:[#allocation82_spill] sm:$0xff] %v6982_v32  ;;  %v9382_v10 = vld [vmem:[#allocation57_spill] sm:$0xff]  ;;  %9383 = vst [vmem:[#allocation158_spill] sm:$0xff] %v6985_v62  ;;  %v1897_v55 = vmul.f32 %v1849_v44, %v1800_v24  ;;  %2767 = vrot.lane.b32.xlu0 %v9302_v0, %s4129_s16 }
 0x41a   : > { %v1818_v20 = vsel %vm1772_vm5, %v9379_v58, %v9346_v3  ;;  %v1944_v30 = vadd.f32 %v1896_v31, %v9382_v10  ;;  %v1652_v3 = vadd.f32 %v1604_v8, %v9385_v15  ;;  %v9386_v63 = vld [vmem:[#allocation182_spill] sm:$0xff]  ;;  %v7002_v31 = vmul.f32 %v1823_v23, %v1809_v35  ;;  %v9387_v1 = vld [vmem:[#allocation193_spill] sm:$0xff]  ;;  %v9389_v10 = vld [vmem:[#allocation72_spill] sm:$0xff]  ;;  %2757 = vrot.lane.b32.xlu1 %v9307_v54, %s4129_s16 }
 0x41b   : > { %v7000_v4 = vsel %vm1482_vm4, %v9326_v45, %v9386_v63  ;;  %v7012_v59 = vsel %vm1772_vm5, %v9371_v6, %v9387_v1  ;;  %v1894_v8 = vmul.f32 %v1846_v60, %v1818_v20  ;;  %v9388_v36 = vld [vmem:[#allocation273_spill] sm:$0xff]  ;;  %v1937_v45 = vadd.f32 %v1889_v21, %v9389_v10  ;;  %v2273_v15 = vld [vmem:[#allocation6 + $0x800] sm:$0xff]  ;;  %v9391_v35 = vld [vmem:[#allocation231_spill] sm:$0xff]  ;;  %v7022_v63 = vpop.permute.xlu0 %2449 }
 0x41c   : > { %v2080_v56 = vadd.f32 %v9388_v36, %v1935_v39  ;;  %v9390_v23 = vld [vmem:[#allocation237_spill] sm:$0xff]  ;;  %v9392_v52 = vld [vmem:[#allocation276_spill] sm:$0xff]  ;;  %9394 = vst [vmem:[#allocation76_spill] sm:$0xff] %v7022_v63  ;;  %v1934_v58 = vadd.f32 %v1886_v26, %v1644_v17  ;;  %v9395_v53 = vld [vmem:[#allocation243_spill] sm:$0xff] }
 0x41d   : > { %v2246_v44 = vsel %vm2207_vm6, %v9391_v35, %v9390_v23  ;;  %v2088_v9 = vadd.f32 %v9392_v52, %v1943_v22  ;;  %v9393_v24 = vld [vmem:[#allocation277_spill] sm:$0xff]  ;;  %v2240_v20 = vsel %vm2207_vm6, %v9390_v23, %v9395_v53  ;;  %v9396_v21 = vld [vmem:[#allocation246_spill] sm:$0xff]  ;;  %v9397_v60 = vld [vmem:[#allocation240_spill] sm:$0xff]  ;;  %v7033_v22 = vpop.permute.xlu1 %2439  ;;  %2779 = vrot.lane.b32.xlu0 %v9317_v12, %s4129_s16 }
 0x41e   : > { %v2081_v61 = vadd.f32 %v9393_v24, %v1936_v49  ;;  %v2274_v6 = vld [vmem:[#allocation6 + $0x808] sm:$0xff]  ;;  %v2241_v36 = vsel %vm2207_vm6, %v9397_v60, %v9396_v21  ;;  %v9398_v10 = vld [vmem:[#allocation278_spill] sm:$0xff]  ;;  %9399 = vst [vmem:[#allocation154_spill] sm:$0xff] %v7033_v22  ;;  %v9400_v17 = vld [vmem:[#allocation75_spill] sm:$0xff]  ;;  %2769 = vrot.lane.b32.xlu1 %v9319_v13, %s4129_s16 }
 0x41f   : > { %v2282_v39 = vld [vmem:[#allocation6 + $0x848] sm:$0xff]  ;;  %v2089_v35 = vadd.f32 %v9398_v10, %v1944_v30  ;;  %v1945_v26 = vadd.f32 %v1897_v55, %v9400_v17  ;;  %v2275_v49 = vld [vmem:[#allocation6 + $0x810] sm:$0xff]  ;;  %v9402_v28 = vld [vmem:[#allocation252_spill] sm:$0xff]  ;;  %v7050_v30 = vsel %vm2497_vm7, %v6985_v62, %v7033_v22  ;;  %v1942_v55 = vadd.f32 %v1894_v8, %v1652_v3 }
 0x420   : > { %v9401_v52 = vld [vmem:[#allocation249_spill] sm:$0xff]  ;;  %v2283_v24 = vld [vmem:[#allocation6 + $0x850] sm:$0xff]  ;;  %v2235_v63 = vsel %vm2207_vm6, %v9396_v21, %v9402_v28  ;;  %9403 = vst [vmem:[#allocation88_spill] sm:$0xff] %v7050_v30  ;;  %v2321_v10 = vmul.f32 %v2273_v15, %v2246_v44  ;;  %v2276_v17 = vld [vmem:[#allocation6 + $0x818] sm:$0xff]  ;;  %v2322_v5 = vmul.f32 %v2274_v6, %v2240_v20  ;;  %v2330_v22 = vmul.f32 %v2282_v39, %v2241_v36  ;;  %v7067_v15 = vpop.permute.xlu0 %2997 }
 0x421   : > { %v2234_v23 = vsel %vm2207_vm6, %v9395_v53, %v9401_v52  ;;  %v9404_v46 = vld [vmem:[#allocation255_spill] sm:$0xff]  ;;  %v9405_v47 = vld [vmem:[#allocation258_spill] sm:$0xff]  ;;  %v2563_v32 = vld [vmem:[#allocation6 + $0x980] sm:$0xff]  ;;  %v2331_v20 = vmul.f32 %v2283_v24, %v2235_v63  ;;  %v7074_v39 = vpop.permute.xlu1 %2451 }
 0x422   : > { %v2228_v53 = vsel %vm2207_vm6, %v9401_v52, %v9404_v46  ;;  %v2229_v21 = vsel %vm2207_vm6, %v9402_v28, %v9405_v47  ;;  %v9406_v30 = vld [vmem:[#allocation287_spill] sm:$0xff]  ;;  %v9408_v3 = vld [vmem:[#allocation61_spill] sm:$0xff]  ;;  %v2281_v46 = vld [vmem:[#allocation6 + $0x840] sm:$0xff]  ;;  %v2323_v6 = vmul.f32 %v2275_v49, %v2234_v23  ;;  %9411 = vst [vmem:[#allocation162_spill] sm:$0xff] %v7074_v39  ;;  %2781 = vrot.lane.b32.xlu1 %v9334_v18, %s4129_s16 }
 0x423   : > { %v2082_v62 = vadd.f32 %v9406_v30, %v1937_v45  ;;  %v9407_v25 = vld [vmem:[#allocation63_spill] sm:$0xff]  ;;  %v9410_v19 = vld [vmem:[#allocation234_spill] sm:$0xff]  ;;  %v2324_v45 = vmul.f32 %v2276_v17, %v2228_v53  ;;  %v9412_v36 = vld [vmem:[#allocation288_spill] sm:$0xff]  ;;  %v2370_v17 = vadd.f32 %v2322_v5, %v2080_v56  ;;  %v7094_v53 = vadd.f32 %v2330_v22, %v2088_v9 }
 0x424   : > { %v2536_v8 = vsel %vm2497_vm7, %v9408_v3, %v9407_v25  ;;  %v9409_v44 = vld [vmem:[#allocation271_spill] sm:$0xff]  ;;  %v2247_v28 = vsel %vm2207_vm6, %v9410_v19, %v9397_v60  ;;  %v2090_v30 = vadd.f32 %v9412_v36, %v1945_v26  ;;  %v2332_v3 = vmul.f32 %v2284_v50, %v2229_v21  ;;  %v2564_v47 = vld [vmem:[#allocation6 + $0x988] sm:$0xff]  ;;  %v9413_v51 = vld [vmem:[#allocation118_spill] sm:$0xff] }
 0x425   : > { %v2079_v52 = vadd.f32 %v9409_v44, %v1934_v58  ;;  %v2530_v58 = vsel %vm2497_vm7, %v9407_v25, %v9413_v51  ;;  %v9414_v63 = vld [vmem:[#allocation275_spill] sm:$0xff]  ;;  %v2611_v23 = vmul.f32 %v2563_v32, %v2536_v8  ;;  %v2565_v24 = vld [vmem:[#allocation6 + $0x990] sm:$0xff]  ;;  %v7092_v26 = vmul.f32 %v2281_v46, %v2247_v28  ;;  %v7106_v5 = vpop.permute.xlu1 %2999  ;;  %v9416_v46 = vld [vmem:[#allocation44_spill] sm:$0xff] }
 0x426   : > { %v7086_v49 = vadd.f32 %v9414_v63, %v1942_v55  ;;  %v9415_v44 = vld [vmem:[#allocation134_spill] sm:$0xff]  ;;  %v2566_v25 = vld [vmem:[#allocation6 + $0x998] sm:$0xff]  ;;  %v3010_v55 = vpop.permute.xlu0 %3009  ;;  %v2371_v21 = vadd.f32 %v2323_v6, %v2081_v61  ;;  %v7100_v32 = vadd.f32 %v2331_v20, %v2089_v35  ;;  %v2612_v8 = vmul.f32 %v2564_v47, %v2530_v58  ;;  %2461 = vrot.lane.b32.xlu0 %v9416_v46, %s4128_s10  ;;  %v2572_v61 = vld [vmem:[#allocation6 + $0x9c8] sm:$0xff] }
 0x427   : > { %v2369_v60 = vadd.f32 %v2321_v10, %v2079_v52  ;;  %v2524_v50 = vsel %vm2497_vm7, %v9413_v51, %v9415_v44  ;;  %v2518_v10 = vsel %vm2497_vm7, %v9415_v44, %v6486_v27  ;;  %v2854_v52 = vld [vmem:[#allocation6 + $0xb08] sm:$0xff]  ;;  %v2820_v51 = vsel %vm2787_vm8, %v6747_v57, %v6768_v2  ;;  %v2856_v28 = vld [vmem:[#allocation6 + $0xb18] sm:$0xff]  ;;  %v3145_v19 = vld [vmem:[#allocation6 + $0xc90] sm:$0xff] }
 0x428   : > { %v2372_v56 = vadd.f32 %v2324_v45, %v2082_v62  ;;  %v7110_v9 = vadd.f32 %v2332_v3, %v2090_v30  ;;  %v2613_v22 = vmul.f32 %v2565_v24, %v2524_v50  ;;  %v2808_v47 = vsel %vm2787_vm8, %v6810_v37, %v6847_v40  ;;  %v9417_v6 = vld [vmem:[#allocation127_spill] sm:$0xff]  ;;  %v2573_v3 = vld [vmem:[#allocation6 + $0x9d0] sm:$0xff]  ;;  %v9419_v30 = vld [vmem:[#allocation53_spill] sm:$0xff] }
 0x429   : > { %v7118_v35 = vadd.f32 %v2611_v23, %v2369_v60  ;;  %v9418_v20 = vld [vmem:[#allocation79_spill] sm:$0xff]  ;;  %v2525_v45 = vsel %vm2497_vm7, %v9417_v6, %v6495_v42  ;;  %v2614_v36 = vmul.f32 %v2566_v25, %v2518_v10  ;;  %v2519_v63 = vsel %vm2497_vm7, %v6495_v42, %v6515_v43  ;;  %v2855_v24 = vld [vmem:[#allocation6 + $0xb10] sm:$0xff]  ;;  %v2862_v10 = vld [vmem:[#allocation6 + $0xb48] sm:$0xff] }
 0x42a   : > { %v2531_v62 = vsel %vm2497_vm7, %v9418_v20, %v9417_v6  ;;  %v7132_v58 = vsel %vm2497_vm7, %v9419_v30, %v9418_v20  ;;  %v2574_v60 = vld [vmem:[#allocation6 + $0x9d8] sm:$0xff]  ;;  %v2902_v23 = vmul.f32 %v2854_v52, %v2820_v51  ;;  %v2814_v44 = vsel %vm2787_vm8, %v6768_v2, %v6810_v37  ;;  %v3022_v50 = vpop.permute.xlu0 %3021  ;;  %v3144_v30 = vld [vmem:[#allocation6 + $0xc88] sm:$0xff]  ;;  %v3012_v52 = vpop.permute.xlu1 %3011  ;;  %v9420_v51 = vld [vmem:[#allocation34_spill] sm:$0xff] }
 0x42b   : > { %v2660_v25 = vadd.f32 %v2612_v8, %v2370_v17  ;;  %v2821_v6 = vsel %vm2787_vm8, %v6778_v29, %v6819_v11  ;;  %v2904_v20 = vmul.f32 %v2856_v28, %v2808_v47  ;;  %v3110_v42 = vsel %vm3077_vm9, %v7067_v15, %v3010_v55  ;;  %2473 = vrot.lane.b32.xlu0 %v9420_v51, %s4128_s10  ;;  %v2863_v17 = vld [vmem:[#allocation6 + $0xb50] sm:$0xff]  ;;  %v9421_v28 = vld [vmem:[#allocation49_spill] sm:$0xff]  ;;  %v3146_v51 = vld [vmem:[#allocation6 + $0xc98] sm:$0xff] }
 0x42c   : > { %v2620_v40 = vmul.f32 %v2572_v61, %v2531_v62  ;;  %v2661_v2 = vadd.f32 %v2613_v22, %v2371_v21  ;;  %v2621_v37 = vmul.f32 %v2573_v3, %v2525_v45  ;;  %v2815_v8 = vsel %vm2787_vm8, %v6819_v11, %v6856_v7  ;;  %2463 = vrot.lane.b32.xlu1 %v9421_v28, %s4128_s10  ;;  %v2864_v22 = vld [vmem:[#allocation6 + $0xb58] sm:$0xff] }
 0x42d   : > { %v2662_v47 = vadd.f32 %v2614_v36, %v2372_v56  ;;  %v2622_v43 = vmul.f32 %v2574_v60, %v2519_v63  ;;  %v2903_v27 = vmul.f32 %v2855_v24, %v2814_v44  ;;  %v3104_v39 = vsel %vm3077_vm9, %v3010_v55, %v3022_v50  ;;  %v3152_v36 = vld [vmem:[#allocation6 + $0xcc8] sm:$0xff]  ;;  %v3153_v55 = vld [vmem:[#allocation6 + $0xcd0] sm:$0xff]  ;;  %v9423_v24 = vld [vmem:[#allocation47_spill] sm:$0xff] }
 0x42e   : > { %v2950_v61 = vadd.f32 %v2902_v23, %v2660_v25  ;;  %v2910_v21 = vmul.f32 %v2862_v10, %v2821_v6  ;;  %v2809_v62 = vsel %vm2787_vm8, %v6856_v7, %v6900_v34  ;;  %v3192_v11 = vmul.f32 %v3144_v30, %v3110_v42  ;;  %v7163_v3 = vpop.permute.xlu0 %3033  ;;  %v3024_v63 = vpop.permute.xlu1 %3023  ;;  %v2853_v7 = vld [vmem:[#allocation6 + $0xb00] sm:$0xff]  ;;  %v9424_v6 = vld [vmem:[#allocation38_spill] sm:$0xff] }
 0x42f   : > { %9422 = vst [vmem:[#allocation191_spill] sm:$0xff] %v7163_v3  ;;  %v2911_v45 = vmul.f32 %v2863_v17, %v2815_v8  ;;  %v2952_v56 = vadd.f32 %v2904_v20, %v2662_v47  ;;  %v3111_v60 = vsel %vm3077_vm9, %v7106_v5, %v3012_v52  ;;  %v3098_v23 = vsel %vm3077_vm9, %v3022_v50, %v7163_v3  ;;  %v2571_v8 = vld [vmem:[#allocation6 + $0x9c0] sm:$0xff] }
 0x430   : > { %2485 = vrot.lane.b32.xlu0 %v9423_v24, %s4128_s10  ;;  %v2826_v30 = vsel %vm2787_vm8, %v6890_v16, %v6747_v57  ;;  %v3193_v44 = vmul.f32 %v3145_v19, %v3104_v39  ;;  %v3105_v25 = vsel %vm3077_vm9, %v3012_v52, %v3024_v63  ;;  %v3194_v10 = vmul.f32 %v3146_v51, %v3098_v23  ;;  %v3154_v57 = vld [vmem:[#allocation6 + $0xcd8] sm:$0xff] }
 0x431   : > { %2475 = vrot.lane.b32.xlu1 %v9424_v6, %s4128_s10  ;;  %v2668_v20 = vadd.f32 %v2620_v40, %v7094_v53  ;;  %v2669_v50 = vadd.f32 %v2621_v37, %v7100_v32  ;;  %v2951_v42 = vadd.f32 %v2903_v27, %v2661_v2  ;;  %v2912_v17 = vmul.f32 %v2864_v22, %v2809_v62  ;;  %v2861_v27 = vld [vmem:[#allocation6 + $0xb40] sm:$0xff]  ;;  %v1824_v22 = vld [vmem:[#allocation6 + $0x490] sm:$0xff] }
 0x432   : > { %v3240_v47 = vadd.f32 %v3192_v11, %v2950_v61  ;;  %v3200_v3 = vmul.f32 %v3152_v36, %v3111_v60  ;;  %v3201_v34 = vmul.f32 %v3153_v55, %v3105_v25  ;;  %v3242_v24 = vadd.f32 %v3194_v10, %v2952_v56  ;;  %v7183_v19 = vpop.permute.xlu0 %3289  ;;  %v7186_v16 = vpop.permute.xlu1 %3035  ;;  %v3143_v61 = vld [vmem:[#allocation6 + $0xc80] sm:$0xff] }
 0x433   : > { %9425 = vst [vmem:[#allocation185_spill] sm:$0xff] %v7183_v19  ;;  %v2670_v39 = vadd.f32 %v2622_v43, %v7110_v9  ;;  %v2958_v52 = vadd.f32 %v2910_v21, %v2668_v20  ;;  %v2959_v51 = vadd.f32 %v2911_v45, %v2669_v50  ;;  %v2901_v23 = vmul.f32 %v2853_v7, %v2826_v30  ;;  %v9427_v43 = vld [vmem:[#allocation52_spill] sm:$0xff]  ;;  %v1832_v50 = vld [vmem:[#allocation6 + $0x4d0] sm:$0xff] }
 0x434   : > { %9426 = vst [vmem:[#allocation194_spill] sm:$0xff] %v7186_v16  ;;  %3045 = vrot.lane.b32.xlu0 %v9297_v14, %s4130_s3  ;;  %v2827_v40 = vsel %vm2787_vm8, %v6945_v38, %v6778_v29  ;;  %v3241_v53 = vadd.f32 %v3193_v44, %v2951_v42  ;;  %v3099_v32 = vsel %vm3077_vm9, %v3024_v63, %v7186_v16  ;;  %v9488_v38 = vld [vmem:[#allocation23_spill] sm:$0xff] }
 0x435   : > { %2487 = vrot.lane.b32.xlu1 %v9427_v43, %s4128_s10  ;;  %v3324_v9 = vadd.f32 %v7183_v19, %v3240_v47  ;;  %v2619_v2 = vmul.f32 %v2571_v8, %v7132_v58  ;;  %v2960_v37 = vadd.f32 %v2912_v17, %v2670_v39  ;;  %v3202_v14 = vmul.f32 %v3154_v57, %v3099_v32  ;;  %v1825_v17 = vld [vmem:[#allocation6 + $0x498] sm:$0xff]  ;;  %s4048_s10 = sshll.u32 %s4131_s18, 4  ;;  %s4049_s10 = int_to_ptr.vmem [resolvable:$false] %s4048_s10 }
 0x436   : > { %v3326_v21 = vadd.f32 %v7183_v19, %v3242_v24  ;;  %v2377_v29 = vadd.f32 %v7092_v26, %v7086_v49  ;;  %v3248_v62 = vadd.f32 %v3200_v3, %v2958_v52  ;;  %v3249_v11 = vadd.f32 %v3201_v34, %v2959_v51  ;;  %v7204_v45 = vpop.permute.xlu0 %2985  ;;  %v7208_v58 = vpop.permute.xlu1 %3294  ;;  %v9431_v8 = vld [vmem:[#allocation199_spill] sm:$0xff] }
 0x437   : > { %9428 = vst [vmem:[#allocation188_spill] sm:$0xff] %v7204_v45  ;;  %v3325_v56 = vadd.f32 %v7183_v19, %v3241_v53  ;;  %v2949_v36 = vadd.f32 %v2901_v23, %v7118_v35  ;;  %v2909_v60 = vmul.f32 %v2861_v27, %v2827_v40  ;;  %v3250_v55 = vadd.f32 %v3202_v14, %v2960_v37  ;;  %v1579_v52 = vld [vmem:[#allocation6 + $0x478] sm:$0xff] }
 0x438   : > { %9429 = vst [vmem:[#allocation107_spill] sm:$0xff] %v7208_v58  ;;  %v3116_v63 = vsel %vm3077_vm9, %v7204_v45, %v7067_v15  ;;  %3057 = vrot.lane.b32.xlu0 %v9302_v0, %s4130_s3  ;;  %v3332_v34 = vadd.f32 %v7208_v58, %v3248_v62  ;;  %v3372_v26 = vmax.f32 %v3324_v9, 0.0  ;;  %v3333_v35 = vadd.f32 %v7208_v58, %v3249_v11  ;;  %v3151_v15 = vld [vmem:[#allocation6 + $0xcc0] sm:$0xff]  ;;  %v9434_v62 = vld [vmem:[#allocation42_spill] sm:$0xff] }
 0x439   : > { %v3191_v49 = vmul.f32 %v3143_v61, %v3116_v63  ;;  %3047 = vrot.lane.b32.xlu1 %v9307_v54, %s4130_s3  ;;  %v1872_v3 = vmul.f32 %v1824_v22, %v7012_v59  ;;  %v2667_v24 = vadd.f32 %v2619_v2, %v2377_v29  ;;  %v3334_v7 = vadd.f32 %v7208_v58, %v3250_v55  ;;  %v9430_v54 = vld [vmem:[#allocation196_spill] sm:$0xff]  ;;  %v9436_v55 = vld [vmem:[#allocation205_spill] sm:$0xff] }
 0x43a   : > { %v3374_v30 = vmax.f32 %v3326_v21, 0.0  ;;  %v7222_v25 = vpop.permute.xlu0 %2703  ;;  %v3380_v0 = vmax.f32 %v3332_v34, 0.0  ;;  %v3373_v10 = vmax.f32 %v3325_v56, 0.0  ;;  %v3381_v20 = vmax.f32 %v3333_v35, 0.0  ;;  %v7232_v57 = vpop.permute.xlu1 %2987  ;;  %v1833_v56 = vld [vmem:[#allocation6 + $0x4d8] sm:$0xff]  ;;  %v9482_v45 = vld [vmem:[#allocation292_spill] sm:$0xff] }
 0x43b   : > { %v3239_v44 = vadd.f32 %v3191_v49, %v2949_v36  ;;  %v1804_v42 = vsel %vm1772_vm5, %v9373_v48, %v9430_v54  ;;  %v1797_v59 = vsel %vm1772_vm5, %v9387_v1, %v9431_v8  ;;  %v2957_v47 = vadd.f32 %v2909_v60, %v2667_v24  ;;  %9432 = vst [vmem:[#allocation90_spill] sm:$0xff] %v7232_v57  ;;  %v9435_v36 = vld [vmem:[#allocation202_spill] sm:$0xff]  ;;  %v1842_v49 = vld [vmem:[#allocation6 + $0x520] sm:$0xff]  ;;  %v9437_v34 = vld [vmem:[#allocation207_spill] sm:$0xff] }
 0x43c   : > { %3069 = vrot.lane.b32.xlu0 %v9317_v12, %s4130_s3  ;;  %v3382_v39 = vmax.f32 %v3334_v7, 0.0  ;;  %v3117_v51 = vsel %vm3077_vm9, %v7232_v57, %v7106_v5  ;;  %v3420_v48 = vmin.f32 %v3372_v26, 6.0  ;;  %v3428_v23 = vmin.f32 %v3380_v0, 6.0  ;;  %v9433_v5 = vld [vmem:[#allocation41_spill] sm:$0xff] }
 0x43d   : > { %3059 = vrot.lane.b32.xlu1 %v9319_v13, %s4130_s3  ;;  %v3429_v27 = vmin.f32 %v3381_v20, 6.0  ;;  %v3323_v1 = vadd.f32 %v7183_v19, %v3239_v44  ;;  %v3199_v40 = vmul.f32 %v3151_v15, %v3117_v51  ;;  %v3422_v53 = vmin.f32 %v3374_v30, 6.0  ;;  %v9439_v7 = vld [vmem:[#allocation29_spill] sm:$0xff]  ;;  %v9440_v30 = vld [vmem:[#allocation31_spill] sm:$0xff]  ;;  %v9441_v15 = vld [vmem:[#allocation40_spill] sm:$0xff] }
 0x43e   : > { %v3430_v32 = vmin.f32 %v3382_v39, 6.0  ;;  %v1880_v9 = vmul.f32 %v1832_v50, %v1804_v42  ;;  %v1873_v12 = vmul.f32 %v1825_v17, %v1797_v59  ;;  %v7243_v2 = vpop.permute.xlu0 %2715  ;;  %v3462_v37 = vpack.c.bf16 %v3428_v23, %v3420_v48  ;;  %v7248_v22 = vpop.permute.xlu1 %2705  ;;  %v9442_v20 = vld [vmem:[#allocation208_spill] sm:$0xff]  ;;  %v9444_v17 = vld [vmem:[#allocation145_spill] sm:$0xff]  ;;  %v9449_v48 = vld [vmem:[#allocation34_spill] sm:$0xff] }
 0x43f   : > { %v3421_v14 = vmin.f32 %v3373_v10, 6.0  ;;  %v1627_v61 = vmul.f32 %v1579_v52, %v7000_v4  ;;  %v1919_v21 = vadd.f32 %v7002_v31, %v9433_v5  ;;  %v3247_v13 = vadd.f32 %v3199_v40, %v2957_v47  ;;  %v1826_v31 = vld [vmem:[#allocation6 + $0x4a0] sm:$0xff]  ;;  %v9446_v59 = vld [vmem:[#allocation17_spill] sm:$0xff]  ;;  %v9447_v47 = vld [vmem:[#allocation150_spill] sm:$0xff] }
 0x440   : > { %2751 = vrot.lane.b32.xlu0 %v9416_v46, %s4129_s16  ;;  %v3464_v29 = vpack.c.bf16 %v3430_v32, %v3422_v53  ;;  %v1927_v11 = vadd.f32 %v7006_v41, %v9434_v62  ;;  %v1798_v60 = vsel %vm1772_vm5, %v9430_v54, %v9435_v36  ;;  %3510 = vmatprep.subr.bf16.mxu0 %v3462_v37  ;;  %v9438_v41 = vld [vmem:[#allocation201_spill] sm:$0xff]  ;;  %v3371_v35 = vmax.f32 %v3323_v1, 0.0  ;;  %v1834_v10 = vld [vmem:[#allocation6 + $0x4e0] sm:$0xff] }
 0x441   : > { %3071 = vrot.lane.b32.xlu1 %v9334_v18, %s4130_s3  ;;  %v3463_v4 = vpack.c.bf16 %v3429_v27, %v3421_v14  ;;  %v1791_v63 = vsel %vm1772_vm5, %v9431_v8, %v9436_v55  ;;  %v1793_v26 = vsel %vm1772_vm5, %v9438_v41, %v9437_v34  ;;  %v3331_v24 = vadd.f32 %v7208_v58, %v3247_v13  ;;  %v9443_v42 = vld [vmem:[#allocation108_spill] sm:$0xff]  ;;  %v9450_v23 = vld [vmem:[#allocation125_spill] sm:$0xff]  ;;  %v9451_v27 = vld [vmem:[#allocation82_spill] sm:$0xff] }
 0x442   : > { %3553 = vmatprep.subr.bf16.mxu1 %v3464_v29  ;;  %v1920_v18 = vadd.f32 %v1872_v3, %v9439_v7  ;;  %v1928_v44 = vadd.f32 %v1880_v9, %v9440_v30  ;;  %v1921_v0 = vadd.f32 %v1873_v12, %v9441_v15  ;;  %v1792_v50 = vsel %vm1772_vm5, %v9435_v36, %v9442_v20  ;;  %v7276_v54 = vpop.permute.xlu0 %2727  ;;  %v7286_v51 = vpop.permute.xlu1 %2717  ;;  %v9453_v40 = vld [vmem:[#allocation137_spill] sm:$0xff]  ;;  %v9455_v37 = vld [vmem:[#allocation268_spill] sm:$0xff]  ;;  %v9466_v15 = vld [vmem:[#allocation47_spill] sm:$0xff] }
 0x443   : > { %3554 = vmatpush1.bf16.msra.mxu1 %v3463_v4  ;;  %v7280_v8 = vadd.f32 %v9444_v17, %v9443_v42  ;;  %v7284_v3 = vadd.f32 %v9447_v47, %v9446_v59  ;;  %v1881_v39 = vmul.f32 %v1833_v56, %v1798_v60  ;;  %v3379_v52 = vmax.f32 %v3331_v24, 0.0  ;;  %v9456_v29 = vld [vmem:[#allocation272_spill] sm:$0xff]  ;;  %v9457_v56 = vld [vmem:[#allocation266_spill] sm:$0xff]  ;;  %v9458_v60 = vld [vmem:[#allocation269_spill] sm:$0xff] }
 0x444   : > { %2763 = vrot.lane.b32.xlu0 %v9449_v48, %s4129_s16  ;;  %v7292_v1 = vadd.f32 %v9451_v27, %v9450_v23  ;;  %v7295_v53 = vadd.f32 %v1627_v61, %v9453_v40  ;;  %v1874_v32 = vmul.f32 %v1826_v31, %v1791_v63  ;;  %v1890_v9 = vmul.f32 %v1842_v49, %v1793_v26  ;;  %v9459_v4 = vld [vmem:[#allocation270_spill] sm:$0xff]  ;;  %v9461_v49 = vld [vmem:[#allocation43_spill] sm:$0xff]  ;;  %v1858_v24 = vld [vmem:[#allocation6 + $0x5a0] sm:$0xff] }
 0x445   : > { %9445 = vst [vmem:[#allocation197_spill] sm:$0xff] %v7280_v8  ;;  %9448 = vst [vmem:[#allocation94_spill] sm:$0xff] %v7284_v3  ;;  %2753 = vrot.lane.b32.xlu1 %v9421_v28, %s4129_s16  ;;  %v1882_v12 = vmul.f32 %v1834_v10, %v1792_v50  ;;  %v7300_v14 = vadd.f32 %v9455_v37, %v1919_v21  ;;  %v3419_v5 = vmin.f32 %v3371_v35, 6.0  ;;  %v3427_v13 = vmin.f32 %v3379_v52, 6.0  ;;  %v1850_v21 = vld [vmem:[#allocation6 + $0x560] sm:$0xff]  ;;  %v9462_v26 = vld [vmem:[#allocation210_spill] sm:$0xff] }
 0x446   : > { %9452 = vst [vmem:[#allocation200_spill] sm:$0xff] %v7292_v1  ;;  %9454 = vst [vmem:[#allocation99_spill] sm:$0xff] %v7295_v53  ;;  %v7303_v62 = vadd.f32 %v9456_v29, %v1927_v11  ;;  %v7306_v36 = vadd.f32 %v9457_v56, %v1920_v18  ;;  %v7309_v61 = vadd.f32 %v9458_v60, %v1928_v44  ;;  %v7314_v63 = vpop.permute.xlu0 %2739  ;;  %v9463_v35 = vld [vmem:[#allocation204_spill] sm:$0xff]  ;;  %v9464_v7 = vld [vmem:[#allocation209_spill] sm:$0xff]  ;;  %v7325_v44 = vpop.permute.xlu1 %2729 }
 0x447   : > { %v7312_v31 = vadd.f32 %v9459_v4, %v1921_v0  ;;  %9460 = vst [vmem:[#allocation239_spill] sm:$0xff] %v7314_v63  ;;  %v1929_v41 = vadd.f32 %v1881_v39, %v9461_v49  ;;  %v1794_v11 = vsel %vm1772_vm5, %v9463_v35, %v9462_v26  ;;  %v9465_v18 = vld [vmem:[#allocation203_spill] sm:$0xff]  ;;  %v3461_v0 = vpack.c.bf16 %v3427_v13, %v3419_v5  ;;  %v9467_v10 = vld [vmem:[#allocation86_spill] sm:$0xff]  ;;  %v9468_v42 = vld [vmem:[#allocation129_spill] sm:$0xff] }
 0x448   : > { %v1795_v30 = vsel %vm1772_vm5, %v9465_v18, %v9464_v7  ;;  %2775 = vrot.lane.b32.xlu0 %v9466_v15, %s4129_s16  ;;  %v1922_v50 = vadd.f32 %v1874_v32, %v9467_v10  ;;  %v1938_v17 = vadd.f32 %v1890_v9, %v9468_v42  ;;  %v1866_v59 = vld [vmem:[#allocation6 + $0x5e0] sm:$0xff]  ;;  %v9470_v39 = vld [vmem:[#allocation206_spill] sm:$0xff]  ;;  %v1827_v23 = vld [vmem:[#allocation6 + $0x4a8] sm:$0xff] }
 0x449   : > { %v9469_v47 = vld [vmem:[#allocation212_spill] sm:$0xff]  ;;  %v9471_v27 = vld [vmem:[#allocation211_spill] sm:$0xff]  ;;  %2765 = vrot.lane.b32.xlu1 %v9424_v6, %s4129_s16  ;;  %v1835_v32 = vld [vmem:[#allocation6 + $0x4e8] sm:$0xff]  ;;  %3511 = vmatpush1.bf16.msra.mxu0 %v3461_v0  ;;  %v1906_v35 = vmul.f32 %v1858_v24, %v1795_v30 }
 0x44a   : > { %v1796_v52 = vsel %vm1772_vm5, %v9470_v39, %v9469_v47  ;;  %v1785_v40 = vsel %vm1772_vm5, %v9436_v55, %v9471_v27  ;;  %v9472_v37 = vld [vmem:[#allocation103_spill] sm:$0xff]  ;;  %v9473_v13 = vld [vmem:[#allocation214_spill] sm:$0xff]  ;;  %v1843_v29 = vld [vmem:[#allocation6 + $0x528] sm:$0xff] }
 0x44b   : > { %v1930_v5 = vadd.f32 %v1882_v12, %v9472_v37  ;;  %v1786_v9 = vsel %vm1772_vm5, %v9442_v20, %v9473_v13  ;;  %v9474_v56 = vld [vmem:[#allocation213_spill] sm:$0xff]  ;;  %v9475_v49 = vld [vmem:[#allocation215_spill] sm:$0xff]  ;;  %v1898_v12 = vmul.f32 %v1850_v21, %v1794_v11  ;;  %v9476_v10 = vld [vmem:[#allocation216_spill] sm:$0xff]  ;;  %v7362_v37 = vpop.permute.xlu0 %2691  ;;  %v1914_v57 = vmul.f32 %v1866_v59, %v1796_v52 }
 0x44c   : > { %v1787_v60 = vsel %vm1772_vm5, %v9437_v34, %v9474_v56  ;;  %v1859_v4 = vld [vmem:[#allocation6 + $0x5a8] sm:$0xff]  ;;  %v1789_v55 = vsel %vm1772_vm5, %v9464_v7, %v9475_v49  ;;  %v1788_v20 = vsel %vm1772_vm5, %v9462_v26, %v9476_v10  ;;  %v1828_v42 = vld [vmem:[#allocation6 + $0x4b0] sm:$0xff]  ;;  %9478 = vst [vmem:[#allocation163_spill] sm:$0xff] %v7362_v37  ;;  %v1875_v19 = vmul.f32 %v1827_v23, %v1785_v40  ;;  %v7371_v26 = vpop.permute.xlu1 %2741  ;;  %v9507_v53 = vld [vmem:[#allocation304_spill] sm:$0xff] }
 0x44d   : > { %v1851_v18 = vld [vmem:[#allocation6 + $0x568] sm:$0xff]  ;;  %v9479_v0 = vld [vmem:[#allocation218_spill] sm:$0xff]  ;;  %9481 = vst [vmem:[#allocation281_spill] sm:$0xff] %v7371_v26  ;;  %3041 = vrot.lane.b32.xlu0 %v9416_v46, %s4130_s3  ;;  %v1883_v30 = vmul.f32 %v1835_v32, %v1786_v9  ;;  %v1907_v58 = vmul.f32 %v1859_v4, %v1789_v55  ;;  %v7376_v59 = vadd.f32 %v9482_v45, %v1922_v50  ;;  %v9491_v45 = vld [vmem:[#allocation223_spill] sm:$0xff] }
 0x44e   : > { %v9477_v39 = vld [vmem:[#allocation217_spill] sm:$0xff]  ;;  %v1790_v21 = vsel %vm1772_vm5, %v9469_v47, %v9479_v0  ;;  %v9480_v11 = vld [vmem:[#allocation286_spill] sm:$0xff]  ;;  %2777 = vrot.lane.b32.xlu1 %v9427_v43, %s4129_s16  ;;  %v1899_v52 = vmul.f32 %v1851_v18, %v1788_v20  ;;  %v1946_v16 = vadd.f32 %v1898_v12, %v9488_v38  ;;  %v2848_v8 = vld [vmem:[#allocation6 + $0xad8] sm:$0xff]  ;;  %s4050_s16 = scalar_lea.vmem %s4049_s10, 4096 }
 0x44f   : > { %v1779_v34 = vsel %vm1772_vm5, %v9471_v27, %v9477_v39  ;;  %v1867_v7 = vld [vmem:[#allocation6 + $0x5e8] sm:$0xff]  ;;  %v7369_v24 = vadd.f32 %v9480_v11, %v1929_v41  ;;  %v1891_v27 = vmul.f32 %v1843_v29, %v1787_v60  ;;  %9483 = vst [vmem:[#allocation284_spill] sm:$0xff] %v7376_v59  ;;  %v9486_v41 = vld [vmem:[#allocation296_spill] sm:$0xff]  ;;  %v9489_v46 = vld [vmem:[#allocation14_spill] sm:$0xff]  ;;  %v7392_v4 = vpop.permute.xlu0 %2469 }
 0x450   : > { %v1876_v23 = vmul.f32 %v1828_v42, %v1779_v34  ;;  %v9484_v47 = vld [vmem:[#allocation293_spill] sm:$0xff]  ;;  %v7384_v11 = vadd.f32 %v9486_v41, %v1938_v17  ;;  %v1954_v32 = vadd.f32 %v1906_v35, %v9489_v46  ;;  %v1915_v9 = vmul.f32 %v1867_v7, %v1790_v21  ;;  %v1822_v29 = vld [vmem:[#allocation6 + $0x480] sm:$0xff]  ;;  %9492 = vst [vmem:[#allocation242_spill] sm:$0xff] %v7392_v4  ;;  %v1836_v42 = vld [vmem:[#allocation6 + $0x4f0] sm:$0xff]  ;;  %v7404_v7 = vpop.permute.xlu1 %2693 }
 0x451   : > { %v7381_v40 = vadd.f32 %v9484_v47, %v1930_v5  ;;  %v9490_v60 = vld [vmem:[#allocation181_spill] sm:$0xff]  ;;  %v9494_v5 = vld [vmem:[#allocation51_spill] sm:$0xff]  ;;  %v9495_v17 = vld [vmem:[#allocation220_spill] sm:$0xff]  ;;  %9497 = vst [vmem:[#allocation282_spill] sm:$0xff] %v7404_v7  ;;  %3053 = vrot.lane.b32.xlu0 %v9449_v48, %s4130_s3 }
 0x452   : > { %9487 = vst [vmem:[#allocation248_spill] sm:$0xff] %v7384_v11  ;;  %v1815_v50 = vsel %vm1772_vm5, %v9491_v45, %v9490_v60  ;;  %v9493_v55 = vld [vmem:[#allocation141_spill] sm:$0xff]  ;;  %v1923_v20 = vadd.f32 %v1875_v19, %v9494_v5  ;;  %v1780_v38 = vsel %vm1772_vm5, %v9473_v13, %v9495_v17  ;;  %v1844_v12 = vld [vmem:[#allocation6 + $0x530] sm:$0xff]  ;;  %v9496_v35 = vld [vmem:[#allocation219_spill] sm:$0xff]  ;;  %3043 = vrot.lane.b32.xlu1 %v9421_v28, %s4130_s3 }
 0x453   : > { %9485 = vst [vmem:[#allocation245_spill] sm:$0xff] %v7381_v40  ;;  %v1962_v18 = vadd.f32 %v1914_v57, %v9493_v55  ;;  %v1781_v34 = vsel %vm1772_vm5, %v9474_v56, %v9496_v35  ;;  %v9498_v57 = vld [vmem:[#allocation136_spill] sm:$0xff]  ;;  %v9499_v19 = vld [vmem:[#allocation18_spill] sm:$0xff]  ;;  %v9501_v55 = vld [vmem:[#allocation221_spill] sm:$0xff]  ;;  %v1870_v48 = vmul.f32 %v1822_v29, %v1815_v50  ;;  %v7427_v3 = vpop.permute.xlu0 %2481 }
 0x454   : > { %v1931_v21 = vadd.f32 %v1883_v30, %v9498_v57  ;;  %v1939_v47 = vadd.f32 %v1891_v27, %v9499_v19  ;;  %v9500_v41 = vld [vmem:[#allocation16_spill] sm:$0xff]  ;;  %v1860_v60 = vld [vmem:[#allocation6 + $0x5b0] sm:$0xff]  ;;  %v1783_v13 = vsel %vm1772_vm5, %v9475_v49, %v9501_v55  ;;  %v1892_v59 = vmul.f32 %v1844_v12, %v1781_v34  ;;  %9509 = vst [vmem:[#allocation285_spill] sm:$0xff] %v7427_v3 }
 0x455   : > { %v1955_v46 = vadd.f32 %v1907_v58, %v9500_v41  ;;  %v9502_v56 = vld [vmem:[#allocation142_spill] sm:$0xff]  ;;  %v9503_v40 = vld [vmem:[#allocation140_spill] sm:$0xff]  ;;  %v1884_v41 = vmul.f32 %v1836_v42, %v1780_v38  ;;  %v7425_v49 = vadd.f32 %v9507_v53, %v1954_v32  ;;  %v1908_v28 = vmul.f32 %v1860_v60, %v1783_v13  ;;  %3065 = vrot.lane.b32.xlu0 %v9466_v15, %s4130_s3  ;;  %v9523_v60 = vld [vmem:[#allocation301_spill] sm:$0xff] }
 0x456   : > { %v1947_v5 = vadd.f32 %v1899_v52, %v9502_v56  ;;  %v1924_v4 = vadd.f32 %v1876_v23, %v9503_v40  ;;  %v1830_v11 = vld [vmem:[#allocation6 + $0x4c0] sm:$0xff]  ;;  %v9505_v57 = vld [vmem:[#allocation226_spill] sm:$0xff]  ;;  %3055 = vrot.lane.b32.xlu1 %v9424_v6, %s4130_s3 }
 0x457   : > { %v9504_v30 = vld [vmem:[#allocation184_spill] sm:$0xff]  ;;  %9508 = vst [vmem:[#allocation251_spill] sm:$0xff] %v7425_v49  ;;  %v9514_v29 = vld [vmem:[#allocation294_spill] sm:$0xff] }
 0x458   : > { %v1816_v58 = vsel %vm1772_vm5, %v9505_v57, %v9504_v30  ;;  %v9506_v27 = vld [vmem:[#allocation144_spill] sm:$0xff]  ;;  %v7436_v50 = vadd.f32 %v9514_v29, %v1923_v20  ;;  %v7438_v30 = vpop.permute.xlu1 %2471  ;;  %v9517_v53 = vld [vmem:[#allocation222_spill] sm:$0xff]  ;;  %v9522_v20 = vld [vmem:[#allocation151_spill] sm:$0xff]  ;;  %v7459_v13 = vadd.f32 %v9523_v60, %v1947_v5 }
 0x459   : > { %v1963_v19 = vadd.f32 %v1915_v9, %v9506_v27  ;;  %v9510_v52 = vld [vmem:[#allocation300_spill] sm:$0xff]  ;;  %9516 = vst [vmem:[#allocation291_spill] sm:$0xff] %v7438_v30  ;;  %v1852_v9 = vld [vmem:[#allocation6 + $0x570] sm:$0xff]  ;;  %v1782_v32 = vsel %vm1772_vm5, %v9476_v10, %v9517_v53  ;;  %v1878_v42 = vmul.f32 %v1830_v11, %v1816_v58  ;;  %v1918_v34 = vadd.f32 %v1870_v48, %v9522_v20  ;;  %v9525_v10 = vld [vmem:[#allocation305_spill] sm:$0xff] }
 0x45a   : > { %v7430_v56 = vadd.f32 %v9510_v52, %v1946_v16  ;;  %v9512_v23 = vld [vmem:[#allocation32_spill] sm:$0xff]  ;;  %9515 = vst [vmem:[#allocation289_spill] sm:$0xff] %v7436_v50  ;;  %v9518_v16 = vld [vmem:[#allocation297_spill] sm:$0xff]  ;;  %9524 = vst [vmem:[#allocation95_spill] sm:$0xff] %v7459_v13  ;;  %v7462_v11 = vadd.f32 %v9525_v10, %v1955_v46  ;;  %v7480_v46 = vpop.permute.xlu0 %2493  ;;  %v7482_v20 = vmul.f32 %v1852_v9, %v1782_v32  ;;  %3067 = vrot.lane.b32.xlu1 %v9427_v43, %s4130_s3  ;;  %s3809_s3 = sshll.u32 %s4300_s14, 7 }
 0x45b   : > { %v7433_v40 = vadd.f32 %v9512_v23, %v1962_v18  ;;  %v7447_v38 = vadd.f32 %v9518_v16, %v1931_v21  ;;  %v9520_v18 = vld [vmem:[#allocation298_spill] sm:$0xff]  ;;  %v3477_v15 = vld [vmem:[%s8299_s6] sm:$0xff]  ;;  %v9527_v21 = vld [vmem:[#allocation299_spill] sm:$0xff]  ;;  %9536 = vst [vmem:[#allocation117_spill] sm:$0xff] %v7480_v46  ;;  %s8224_s19 = scalar_lea.vmem [#allocation9], %s3809_s3 }
 0x45c   : > { %9511 = vst [vmem:[#allocation254_spill] sm:$0xff] %v7430_v56  ;;  %v7450_v12 = vadd.f32 %v9520_v18, %v1939_v47  ;;  %9526 = vst [vmem:[#allocation81_spill] sm:$0xff] %v7462_v11  ;;  %v7465_v58 = vadd.f32 %v9527_v21, %v1924_v4  ;;  %v9529_v47 = vld [vmem:[#allocation55_spill] sm:$0xff]  ;;  %v2257_v23 = vld [vmem:[#allocation6 + $0x780] sm:$0xff]  ;;  %3481 = vperm.xlu0 %3949, %v3477_v15   ;;  %s3704_s22 = sshll.u32 %s8224_s19, 4  ;;  %s8248_s22 = int_to_ptr.vmem [resolvable:$true] %s3704_s22 }
 0x45d   : > { %9513 = vst [vmem:[#allocation280_spill] sm:$0xff] %v7433_v40  ;;  %9519 = vst [vmem:[#allocation283_spill] sm:$0xff] %v7447_v38  ;;  %v7468_v27 = vadd.f32 %v1884_v41, %v9529_v47  ;;  %v9531_v52 = vld [vmem:[#allocation147_spill] sm:$0xff]  ;;  %v9533_v16 = vld [vmem:[#allocation229_spill] sm:$0xff]  ;;  %v7495_v47 = vpop.permute.xlu1 %2483  ;;  %s4044_s17 = scalar_lea.vmem %s8248_s22, 2048  ;;  %p4051_p6 = scmp.lt.s32.totalorder %s8248_s22, %s4049_s10 }
 0x45e   : > { %9521 = vst [vmem:[#allocation68_spill] sm:$0xff] %v7450_v12  ;;  %9528 = vst [vmem:[#allocation101_spill] sm:$0xff] %v7465_v58  ;;  %v7471_v6 = vadd.f32 %v1892_v59, %v9531_v52  ;;  %v9532_v29 = vld [vmem:[#allocation235_spill] sm:$0xff]  ;;  %v1868_v41 = vld [vmem:[#allocation6 + $0x5f0] sm:$0xff]  ;;  %v1773_v59 = vsel %vm1772_vm5, %v9477_v39, %v9491_v45  ;;  %v7536_v49 = vpop.permute.xlu0 %2993  ;;  %p4045_p11 = scmp.ne.s32.totalorder %s8248_s22, %s4044_s17  ;;  %p4052_p12 = scmp.lt.s32.totalorder %s4050_s16, %s4044_s17 }
 0x45f   : > { %9530 = vst [vmem:[#allocation109_spill] sm:$0xff] %v7468_v27  ;;  %v2244_v48 = vsel %vm2207_vm6, %v9533_v16, %v9532_v29  ;;  %v9534_v5 = vld [vmem:[#allocation35_spill] sm:$0xff]  ;;  %v2258_v10 = vld [vmem:[#allocation6 + $0x788] sm:$0xff]  ;;  %9540 = vst [vmem:[#allocation112_spill] sm:$0xff] %v7495_v47 }
 0x460   : > { %v7478_v18 = vadd.f32 %v9534_v5, %v1963_v19  ;;  %v9537_v4 = vld [vmem:[#allocation143_spill] sm:$0xff]  ;;  %v9539_v21 = vld [vmem:[#allocation241_spill] sm:$0xff]  ;;  %v9543_v5 = vld [vmem:[#allocation238_spill] sm:$0xff]  ;;  %v2305_v16 = vmul.f32 %v2257_v23, %v2244_v48  ;;  %p4046_p1 = pnand %p4045_p11, %p9694_p10  ;;  %p4053_p3 = por %p4052_p12, %p4051_p6 }
 0x461   : > { %v7485_v60 = vadd.f32 %v1908_v28, %v9537_v4  ;;  %v2238_v19 = vsel %vm2207_vm6, %v9532_v29, %v9539_v21  ;;  %v9541_v9 = vld [vmem:[#allocation157_spill] sm:$0xff]  ;;  %v9542_v28 = vld [vmem:[#allocation244_spill] sm:$0xff]  ;;  %v2259_v58 = vld [vmem:[#allocation6 + $0x790] sm:$0xff] }
 0x462   : > { %9535 = vst [vmem:[#allocation102_spill] sm:$0xff] %v7478_v18  ;;  %v1926_v32 = vadd.f32 %v1878_v42, %v9541_v9  ;;  %v2266_v52 = vld [vmem:[#allocation6 + $0x7c8] sm:$0xff]  ;;  %v2239_v4 = vsel %vm2207_vm6, %v9543_v5, %v9542_v28  ;;  %v9544_v13 = vld [vmem:[#allocation247_spill] sm:$0xff]  ;;  %v2267_v45 = vld [vmem:[#allocation6 + $0x7d0] sm:$0xff]  ;;  %p4047_p2 = pneg %p4046_p1 }
 0x463   : > { %9538 = vst [vmem:[#allocation98_spill] sm:$0xff] %v7485_v60  ;;  %v2232_v39 = vsel %vm2207_vm6, %v9539_v21, %v9544_v13  ;;  %v9545_v12 = vld [vmem:[#allocation250_spill] sm:$0xff]  ;;  %v9546_v42 = vld [vmem:[#allocation224_spill] sm:$0xff]  ;;  %v1829_v9 = vld [vmem:[#allocation6 + $0x4b8] sm:$0xff]  ;;  %v2314_v30 = vmul.f32 %v2266_v52, %v2239_v4 }
 0x464   : > { %v2233_v15 = vsel %vm2207_vm6, %v9542_v28, %v9545_v12  ;;  %v1784_v29 = vsel %vm1772_vm5, %v9479_v0, %v9546_v42  ;;  %v9547_v38 = vld [vmem:[#allocation265_spill] sm:$0xff]  ;;  %v2260_v56 = vld [vmem:[#allocation6 + $0x798] sm:$0xff]  ;;  %v9549_v43 = vld [vmem:[#allocation232_spill] sm:$0xff]  ;;  %v2306_v0 = vmul.f32 %v2258_v10, %v2238_v19  ;;  %v2307_v3 = vmul.f32 %v2259_v58, %v2232_v39  ;;  %p4054_p7 = pnand %p4053_p3, %p4047_p2 }
 0x465   : > { %v2063_v50 = vadd.f32 %v9547_v38, %v1918_v34  ;;  %v9548_v21 = vld [vmem:[#allocation253_spill] sm:$0xff]  ;;  %v2245_v47 = vsel %vm2207_vm6, %v9549_v43, %v9543_v5  ;;  %v2268_v11 = vld [vmem:[#allocation6 + $0x7d8] sm:$0xff]  ;;  %v9550_v40 = vld [vmem:[#allocation256_spill] sm:$0xff]  ;;  %v2315_v1 = vmul.f32 %v2267_v45, %v2233_v15  ;;  %v7542_v43 = vpop.permute.xlu1 %2495 }
 0x466   : > { %v2226_v18 = vsel %vm2207_vm6, %v9544_v13, %v9548_v21  ;;  %v3478_v28 = vld [vmem:[%s8299_s6 + $0x8] sm:$0xff]  ;;  %v2227_v38 = vsel %vm2207_vm6, %v9545_v12, %v9550_v40  ;;  %v2547_v34 = vld [vmem:[#allocation6 + $0x900] sm:$0xff]  ;;  %v9552_v48 = vld [vmem:[#allocation46_spill] sm:$0xff]  ;;  %9554 = vst [vmem:[#allocation116_spill] sm:$0xff] %v7542_v43  ;;  %v7544_v12 = vmul.f32 %v1868_v41, %v1784_v29  ;;  %v7546_v40 = vmul.f32 %v1829_v9, %v1773_v59 }
 0x467   : > { %v9551_v23 = vld [vmem:[#allocation73_spill] sm:$0xff]  ;;  %v2265_v46 = vld [vmem:[#allocation6 + $0x7c0] sm:$0xff]  ;;  %v9553_v10 = vld [vmem:[#allocation83_spill] sm:$0xff]  ;;  %v2308_v21 = vmul.f32 %v2260_v56, %v2226_v18  ;;  %3486 = vperm.xlu1 %3950, %v3478_v28   ;;  %v2353_v52 = vadd.f32 %v2305_v16, %v2063_v50  ;;  %v2316_v58 = vmul.f32 %v2268_v11, %v2227_v38  ;;  %v2354_v41 = vadd.f32 %v2306_v0, %v7300_v14  ;;  %v3006_v50 = vpop.permute.xlu0 %3005 }
 0x468   : > { %v2534_v13 = vsel %vm2497_vm7, %v9552_v48, %v9551_v23  ;;  %v2548_v5 = vld [vmem:[#allocation6 + $0x908] sm:$0xff]  ;;  %v2528_v19 = vsel %vm2497_vm7, %v9551_v23, %v9553_v10  ;;  %v9555_v60 = vld [vmem:[#allocation267_spill] sm:$0xff]  ;;  %v9556_v45 = vld [vmem:[#allocation158_spill] sm:$0xff]  ;;  %v7555_v43 = vmul.f32 %v2265_v46, %v2245_v47  ;;  %v2362_v11 = vadd.f32 %v2314_v30, %v7303_v62 }
 0x469   : > { %v7549_v48 = vadd.f32 %v9555_v60, %v1926_v32  ;;  %v2595_v4 = vmul.f32 %v2547_v34, %v2534_v13  ;;  %v2556_v39 = vld [vmem:[#allocation6 + $0x948] sm:$0xff]  ;;  %v2549_v10 = vld [vmem:[#allocation6 + $0x910] sm:$0xff]  ;;  %v2596_v59 = vmul.f32 %v2548_v5, %v2528_v19  ;;  %v2550_v29 = vld [vmem:[#allocation6 + $0x918] sm:$0xff]  ;;  %v2355_v16 = vadd.f32 %v2307_v3, %v7306_v36  ;;  %v7569_v46 = vpop.permute.xlu1 %2995 }
 0x46a   : > { %v9557_v15 = vld [vmem:[#allocation77_spill] sm:$0xff]  ;;  %v9558_v60 = vld [vmem:[#allocation76_spill] sm:$0xff]  ;;  %v2363_v18 = vadd.f32 %v2315_v1, %v7309_v61  ;;  %v2818_v14 = vsel %vm2787_vm8, %v7222_v25, %v7243_v2  ;;  %v2356_v47 = vadd.f32 %v2308_v21, %v7312_v31  ;;  %v2839_v34 = vld [vmem:[#allocation6 + $0xa90] sm:$0xff]  ;;  %v2812_v3 = vsel %vm2787_vm8, %v7243_v2, %v7276_v54 }
 0x46b   : > { %v2529_v23 = vsel %vm2497_vm7, %v9557_v15, %v9556_v45  ;;  %v9559_v32 = vld [vmem:[#allocation156_spill] sm:$0xff]  ;;  %v2838_v9 = vld [vmem:[#allocation6 + $0xa88] sm:$0xff]  ;;  %v2364_v1 = vadd.f32 %v2316_v58, %v7369_v24  ;;  %v7578_v62 = vadd.f32 %v2595_v4, %v2353_v52  ;;  %v2557_v36 = vld [vmem:[#allocation6 + $0x950] sm:$0xff]  ;;  %v2806_v31 = vsel %vm2787_vm8, %v7276_v54, %v7314_v63  ;;  %v3018_v58 = vpop.permute.xlu0 %3017 }
 0x46c   : > { %v2516_v56 = vsel %vm2497_vm7, %v9559_v32, %v9558_v60  ;;  %v2604_v28 = vmul.f32 %v2556_v39, %v2529_v23  ;;  %v9560_v0 = vld [vmem:[#allocation160_spill] sm:$0xff]  ;;  %v2840_v30 = vld [vmem:[#allocation6 + $0xa98] sm:$0xff]  ;;  %v2644_v5 = vadd.f32 %v2596_v59, %v2354_v41  ;;  %v2886_v2 = vmul.f32 %v2838_v9, %v2818_v14  ;;  %v3128_v19 = vld [vmem:[#allocation6 + $0xc08] sm:$0xff] }
 0x46d   : > { %v2597_v38 = vmul.f32 %v2549_v10, %v9560_v0  ;;  %v2598_v61 = vmul.f32 %v2550_v29, %v2516_v56  ;;  %v9561_v21 = vld [vmem:[#allocation64_spill] sm:$0xff]  ;;  %v3108_v24 = vsel %vm3077_vm9, %v7536_v49, %v3006_v50  ;;  %v3129_v52 = vld [vmem:[#allocation6 + $0xc10] sm:$0xff]  ;;  %v2558_v4 = vld [vmem:[#allocation6 + $0x958] sm:$0xff]  ;;  %v2887_v10 = vmul.f32 %v2839_v34, %v2812_v3  ;;  %v3008_v41 = vpop.permute.xlu1 %3007 }
 0x46e   : > { %v7588_v13 = vsel %vm2497_vm7, %v9561_v21, %v9557_v15  ;;  %v9562_v39 = vld [vmem:[#allocation162_spill] sm:$0xff]  ;;  %v2846_v23 = vld [vmem:[#allocation6 + $0xac8] sm:$0xff]  ;;  %v2819_v15 = vsel %vm2787_vm8, %v7248_v22, %v7286_v51  ;;  %v3102_v59 = vsel %vm3077_vm9, %v3006_v50, %v3018_v58  ;;  %v2652_v29 = vadd.f32 %v2604_v28, %v2362_v11  ;;  %v9564_v56 = vld [vmem:[#allocation88_spill] sm:$0xff] }
 0x46f   : > { %v9563_v45 = vld [vmem:[#allocation154_spill] sm:$0xff]  ;;  %v2645_v32 = vadd.f32 %v2597_v38, %v2355_v16  ;;  %v2605_v9 = vmul.f32 %v2557_v36, %v9564_v56  ;;  %v2888_v14 = vmul.f32 %v2840_v30, %v2806_v31  ;;  %v2646_v0 = vadd.f32 %v2598_v61, %v2356_v47  ;;  %v3130_v60 = vld [vmem:[#allocation6 + $0xc18] sm:$0xff]  ;;  %v7612_v11 = vpop.permute.xlu0 %3029  ;;  %v2837_v47 = vld [vmem:[#allocation6 + $0xa80] sm:$0xff] }
 0x470   : > { %v2517_v54 = vsel %vm2497_vm7, %v9563_v45, %v9562_v39  ;;  %v2847_v21 = vld [vmem:[#allocation6 + $0xad0] sm:$0xff]  ;;  %v2813_v45 = vsel %vm2787_vm8, %v7286_v51, %v7325_v44  ;;  %v3176_v63 = vmul.f32 %v3128_v19, %v3108_v24  ;;  %v3177_v39 = vmul.f32 %v3129_v52, %v3102_v59  ;;  %9565 = vst [vmem:[#allocation21_spill] sm:$0xff] %v7612_v11  ;;  %v3136_v28 = vld [vmem:[#allocation6 + $0xc48] sm:$0xff]  ;;  %v3138_v59 = vld [vmem:[#allocation6 + $0xc58] sm:$0xff] }
 0x471   : > { %v2606_v34 = vmul.f32 %v2558_v4, %v2517_v54  ;;  %v2934_v3 = vadd.f32 %v2886_v2, %v2644_v5  ;;  %v2894_v27 = vmul.f32 %v2846_v23, %v2819_v15  ;;  %v2807_v50 = vsel %vm2787_vm8, %v7325_v44, %v7371_v26  ;;  %v3137_v36 = vld [vmem:[#allocation6 + $0xc50] sm:$0xff]  ;;  %v3020_v61 = vpop.permute.xlu1 %3019  ;;  %v2555_v4 = vld [vmem:[#allocation6 + $0x940] sm:$0xff] }
 0x472   : > { %v2935_v16 = vadd.f32 %v2887_v10, %v2645_v32  ;;  %v2824_v51 = vsel %vm2787_vm8, %v7362_v37, %v7222_v25  ;;  %v3109_v38 = vsel %vm3077_vm9, %v7569_v46, %v3008_v41  ;;  %v3096_v44 = vsel %vm3077_vm9, %v3018_v58, %v7612_v11  ;;  %v2845_v58 = vld [vmem:[#allocation6 + $0xac0] sm:$0xff]  ;;  %v2592_v11 = vld [vmem:[#allocation6 + $0xa68] sm:$0xff] }
 0x473   : > { %v2895_v30 = vmul.f32 %v2847_v21, %v2813_v45  ;;  %v2936_v31 = vadd.f32 %v2888_v14, %v2646_v0  ;;  %v3103_v5 = vsel %vm3077_vm9, %v3008_v41, %v3020_v61  ;;  %v3178_v2 = vmul.f32 %v3130_v60, %v3096_v44  ;;  %v7626_v32 = vpop.permute.xlu0 %3279  ;;  %v3127_v45 = vld [vmem:[#allocation6 + $0xc00] sm:$0xff] }
 0x474   : > { %v2653_v19 = vadd.f32 %v2605_v9, %v2363_v18  ;;  %v2896_v24 = vmul.f32 %v2848_v8, %v2807_v50  ;;  %v3224_v25 = vadd.f32 %v3176_v63, %v2934_v3  ;;  %v3225_v52 = vadd.f32 %v3177_v39, %v2935_v16  ;;  %9566 = vst [vmem:[#allocation89_spill] sm:$0xff] %v7626_v32  ;;  %v2873_v26 = vld [vmem:[#allocation6 + $0xba0] sm:$0xff] }
 0x475   : > { %v2885_v54 = vmul.f32 %v2837_v47, %v2824_v51  ;;  %v3184_v23 = vmul.f32 %v3136_v28, %v3109_v38  ;;  %v3185_v15 = vmul.f32 %v3137_v36, %v3103_v5  ;;  %v3226_v10 = vadd.f32 %v3178_v2, %v2936_v31  ;;  %v7632_v60 = vpop.permute.xlu1 %3031  ;;  %v9571_v31 = vld [vmem:[#allocation227_spill] sm:$0xff] }
 0x476   : > { %v2654_v56 = vadd.f32 %v2606_v34, %v2364_v1  ;;  %v2825_v21 = vsel %vm2787_vm8, %v7404_v7, %v7248_v22  ;;  %9567 = vst [vmem:[#allocation15_spill] sm:$0xff] %v7632_v60  ;;  %v3308_v8 = vadd.f32 %v7626_v32, %v3224_v25  ;;  %v3309_v63 = vadd.f32 %v7626_v32, %v3225_v52 }
 0x477   : > { %v2942_v18 = vadd.f32 %v2894_v27, %v2652_v29  ;;  %v2943_v39 = vadd.f32 %v2895_v30, %v2653_v19  ;;  %v3097_v41 = vsel %vm3077_vm9, %v3020_v61, %v7632_v60  ;;  %v3310_v1 = vadd.f32 %v7626_v32, %v3226_v10  ;;  %v7644_v29 = vpop.permute.xlu0 %2981  ;;  %v9570_v61 = vld [vmem:[#allocation225_spill] sm:$0xff]  ;;  %v3135_v19 = vld [vmem:[#allocation6 + $0xc40] sm:$0xff] }
 0x478   : > { %v2361_v9 = vadd.f32 %v7555_v43, %v7549_v48  ;;  %v2603_v14 = vmul.f32 %v2555_v4, %v7588_v13  ;;  %v2944_v22 = vadd.f32 %v2896_v24, %v2654_v56  ;;  %v3186_v0 = vmul.f32 %v3138_v59, %v3097_v41  ;;  %9568 = vst [vmem:[#allocation80_spill] sm:$0xff] %v7644_v29  ;;  %v9572_v4 = vld [vmem:[#allocation228_spill] sm:$0xff] }
 0x479   : > { %v2933_v34 = vadd.f32 %v2885_v54, %v7578_v62  ;;  %v2893_v3 = vmul.f32 %v2845_v58, %v2825_v21  ;;  %v3232_v50 = vadd.f32 %v3184_v23, %v2942_v18  ;;  %v3233_v27 = vadd.f32 %v3185_v15, %v2943_v39  ;;  %v7646_v47 = vpop.permute.xlu1 %3284  ;;  %v1853_v21 = vld [vmem:[#allocation6 + $0x578] sm:$0xff] }
 0x47a   : > { %v3234_v16 = vadd.f32 %v3186_v0, %v2944_v22  ;;  %9569 = vst [vmem:[#allocation96_spill] sm:$0xff] %v7646_v47  ;;  %v3114_v43 = vsel %vm3077_vm9, %v7644_v29, %v7536_v49  ;;  %v3356_v48 = vmax.f32 %v3308_v8, 0.0  ;;  %v3357_v13 = vmax.f32 %v3309_v63, 0.0  ;;  %v1861_v8 = vld [vmem:[#allocation6 + $0x5b8] sm:$0xff] }
 0x47b   : > { %v3175_v51 = vmul.f32 %v3127_v45, %v3114_v43  ;;  %v3316_v28 = vadd.f32 %v7646_v47, %v3232_v50  ;;  %v3358_v38 = vmax.f32 %v3310_v1, 0.0  ;;  %v3317_v62 = vadd.f32 %v7646_v47, %v3233_v27  ;;  %v7667_v24 = vpop.permute.xlu0 %2759  ;;  %v9575_v45 = vld [vmem:[#allocation13_spill] sm:$0xff] }
 0x47c   : > { %v1774_v36 = vsel %vm1772_vm5, %v9495_v17, %v9505_v57  ;;  %v1775_v44 = vsel %vm1772_vm5, %v9496_v35, %v9570_v61  ;;  %v2651_v30 = vadd.f32 %v2603_v14, %v2361_v9  ;;  %v3318_v49 = vadd.f32 %v7646_v47, %v3234_v16  ;;  %v1837_v17 = vld [vmem:[#allocation6 + $0x4f8] sm:$0xff]  ;;  %v9574_v14 = vld [vmem:[#allocation230_spill] sm:$0xff]  ;;  %v9576_v43 = vld [vmem:[#allocation149_spill] sm:$0xff] }
 0x47d   : > { %v1777_v5 = vsel %vm1772_vm5, %v9501_v55, %v9571_v31  ;;  %v3223_v2 = vadd.f32 %v3175_v51, %v2933_v34  ;;  %v3364_v25 = vmax.f32 %v3316_v28, 0.0  ;;  %v3365_v52 = vmax.f32 %v3317_v62, 0.0  ;;  %v1845_v57 = vld [vmem:[#allocation6 + $0x538] sm:$0xff]  ;;  %v7673_v23 = vpop.permute.xlu1 %2983  ;;  %v9577_v28 = vld [vmem:[#allocation308_spill] sm:$0xff] }
 0x47e   : > { %v1776_v35 = vsel %vm1772_vm5, %v9517_v53, %v9572_v4  ;;  %v2941_v54 = vadd.f32 %v2893_v3, %v2651_v30  ;;  %9573 = vst [vmem:[#allocation164_spill] sm:$0xff] %v7673_v23  ;;  %v3404_v15 = vmin.f32 %v3356_v48, 6.0  ;;  %v3366_v10 = vmax.f32 %v3318_v49, 0.0  ;;  %v1869_v9 = vld [vmem:[#allocation6 + $0x5f8] sm:$0xff]  ;;  %v9579_v30 = vld [vmem:[#allocation197_spill] sm:$0xff] }
 0x47f   : > { %v3115_v55 = vsel %vm3077_vm9, %v7673_v23, %v7569_v46  ;;  %v3412_v59 = vmin.f32 %v3364_v25, 6.0  ;;  %v3406_v56 = vmin.f32 %v3358_v38, 6.0  ;;  %v3405_v58 = vmin.f32 %v3357_v13, 6.0  ;;  %v7684_v0 = vpop.permute.xlu0 %2771  ;;  %v9583_v25 = vld [vmem:[#allocation259_spill] sm:$0xff]  ;;  %v9619_v23 = vld [vmem:[#allocation242_spill] sm:$0xff] }
 0x480   : > { %v3307_v63 = vadd.f32 %v7626_v32, %v3223_v2  ;;  %v3183_v18 = vmul.f32 %v3135_v19, %v3115_v55  ;;  %v3414_v39 = vmin.f32 %v3366_v10, 6.0  ;;  %v3413_v53 = vmin.f32 %v3365_v52, 6.0  ;;  %v9582_v2 = vld [vmem:[#allocation303_spill] sm:$0xff]  ;;  %v9584_v52 = vld [vmem:[#allocation253_spill] sm:$0xff]  ;;  %v9620_v32 = vld [vmem:[#allocation100_spill] sm:$0xff] }
 0x481   : > { %v1885_v41 = vmul.f32 %v1837_v17, %v1774_v36  ;;  %v1893_v1 = vmul.f32 %v1845_v57, %v1775_v44  ;;  %v1778_v22 = vsel %vm1772_vm5, %v9546_v42, %v9574_v14  ;;  %v3454_v46 = vpack.c.bf16 %v3412_v59, %v3404_v15  ;;  %v7688_v50 = vpop.permute.xlu1 %2761  ;;  %v9578_v42 = vld [vmem:[#allocation155_spill] sm:$0xff]  ;;  %v7699_v44 = vld [vmem:[#allocation8] sm:$0xff]   ;;  %v9594_v14 = vld [vmem:[#allocation314_spill] sm:$0xff] }
 0x482   : > { %v1948_v34 = vadd.f32 %v7482_v20, %v9575_v45  ;;  %v3231_v3 = vadd.f32 %v3183_v18, %v2941_v54  ;;  %v3456_v27 = vpack.c.bf16 %v3414_v39, %v3406_v56  ;;  %v3455_v16 = vpack.c.bf16 %v3413_v53, %v3405_v58  ;;  %v9585_v57 = vld [vmem:[#allocation311_spill] sm:$0xff]  ;;  %v9587_v54 = vld [vmem:[#allocation312_spill] sm:$0xff]  ;;  %v9589_v58 = vld [vmem:[#allocation94_spill] sm:$0xff] }
 0x483   : > { %v1925_v48 = vadd.f32 %v7546_v40, %v9576_v43  ;;  %v1901_v13 = vmul.f32 %v1853_v21, %v1776_v35  ;;  %v1909_v51 = vmul.f32 %v1861_v8, %v1777_v5  ;;  %v7694_v38 = vadd.f32 %v9577_v28, %v7471_v6  ;;  %3512 = vmatprep.subr.bf16.mxu0 %v3454_v46  ;;  %v9580_v40 = vld [vmem:[#allocation153_spill] sm:$0xff]  ;;  %v7707_v6 = vpop.permute.xlu0 %2783  ;;  %v9586_v35 = vld [vmem:[#allocation98_spill] sm:$0xff]  ;;  %v9588_v59 = vld [vmem:[#allocation200_spill] sm:$0xff] }
 0x484   : > { %v1964_v62 = vadd.f32 %v7544_v12, %v9578_v42  ;;  %v1917_v36 = vmul.f32 %v1869_v9, %v1778_v22  ;;  %v3355_v20 = vmax.f32 %v3307_v63, 0.0  ;;  %v3315_v61 = vadd.f32 %v7646_v47, %v3231_v3  ;;  %3555 = vmatprep.subr.bf16.mxu1 %v3456_v27  ;;  %v9581_v5 = vld [vmem:[#allocation109_spill] sm:$0xff]  ;;  %v2261_v12 = vld [vmem:[#allocation6 + $0x7a0] sm:$0xff]  ;;  %v9591_v18 = vld [vmem:[#allocation255_spill] sm:$0xff] }
 0x485   : > { %v1933_v49 = vadd.f32 %v1885_v41, %v9579_v30  ;;  %v1941_v31 = vadd.f32 %v1893_v1, %v9580_v40  ;;  %v7705_v19 = vadd.f32 %v9582_v2, %v9581_v5  ;;  %3556 = vmatpush1.bf16.msra.mxu1 %v3455_v16  ;;  %v2220_v17 = vsel %vm2207_vm6, %v9584_v52, %v9583_v25  ;;  %v7720_v55 = vpop.permute.xlu1 %2773  ;;  %v2277_v8 = vld [vmem:[#allocation6 + $0x820] sm:$0xff]  ;;  %v9590_v63 = vld [vmem:[#allocation261_spill] sm:$0xff]  ;;  %v9592_v53 = vld [vmem:[#allocation302_spill] sm:$0xff] }
 0x486   : > { %v7714_v4 = vadd.f32 %v9585_v57, %v1948_v34  ;;  %v7718_v15 = vadd.f32 %v9587_v54, %v9586_v35  ;;  %v3363_v10 = vmax.f32 %v3315_v61, 0.0  ;;  %v1949_v56 = vadd.f32 %v1901_v13, %v9588_v59  ;;  %v9593_v1 = vld [vmem:[#allocation99_spill] sm:$0xff]  ;;  %v2293_v3 = vld [vmem:[#allocation6 + $0x8a0] sm:$0xff]  ;;  %v9596_v16 = vld [vmem:[#allocation257_spill] sm:$0xff] }
 0x487   : > { %v1957_v21 = vadd.f32 %v1909_v51, %v9589_v58  ;;  %v2222_v39 = vsel %vm2207_vm6, %v9591_v18, %v9590_v63  ;;  %v7729_v41 = vadd.f32 %v9592_v53, %v1925_v48  ;;  %v1965_v9 = vadd.f32 %v1917_v36, %v9593_v1  ;;  %v9595_v27 = vld [vmem:[#allocation263_spill] sm:$0xff]  ;;  %v9598_v51 = vld [vmem:[#allocation310_spill] sm:$0xff]  ;;  %v7747_v42 = vpop.permute.xlu0 %2465  ;;  %v9601_v30 = vld [vmem:[#allocation260_spill] sm:$0xff] }
 0x488   : > { %v7733_v22 = vadd.f32 %v9594_v14, %v1964_v62  ;;  %v3403_v46 = vmin.f32 %v3355_v20, 6.0  ;;  %v3411_v45 = vmin.f32 %v3363_v10, 6.0  ;;  %3842 = vmatmul.mubr.msk.bf16.vlgmr.msra.gmra.mxu1 %vm3494_vm10, %v7699_v44  ;;  %v2309_v34 = vmul.f32 %v2261_v12, %v2220_v17  ;;  %v9597_v13 = vld [vmem:[#allocation307_spill] sm:$0xff]  ;;  %v2301_v20 = vld [vmem:[#allocation6 + $0x8e0] sm:$0xff]  ;;  %v2294_v5 = vld [vmem:[#allocation6 + $0x8a8] sm:$0xff] }
 0x489   : > { %v2224_v43 = vsel %vm2207_vm6, %v9596_v16, %v9595_v27  ;;  %v7742_v48 = vadd.f32 %v9597_v13, %v1933_v49  ;;  %v7745_v28 = vadd.f32 %v9598_v51, %v1941_v31  ;;  %v9599_v62 = vmov 0   ;;  %v9600_v61 = vld [vmem:[#allocation279_spill] sm:$0xff]  ;;  %v9602_v2 = vld [vmem:[#allocation306_spill] sm:$0xff]  ;;  %v7758_v12 = vpop.permute.xlu1 %2785  ;;  %v2269_v52 = vld [vmem:[#allocation6 + $0x7e0] sm:$0xff] }
 0x48a   : > { %3659 = vmatprep.mubr.bf16.mxu1 %v9599_v62  ;;  %v2325_v36 = vmul.f32 %v2277_v8, %v2222_v39  ;;  %v2225_v40 = vsel %vm2207_vm6, %v9601_v30, %v9600_v61  ;;  %v2218_v49 = vsel %vm2207_vm6, %v9595_v27, %v9602_v2  ;;  %v3453_v31 = vpack.c.bf16 %v3411_v45, %v3403_v46  ;;  %v9603_v17 = vld [vmem:[#allocation262_spill] sm:$0xff]  ;;  %v9604_v57 = vld [vmem:[#allocation256_spill] sm:$0xff]  ;;  %v9609_v39 = vld [vmem:[#allocation313_spill] sm:$0xff] }
 0x48b   : > { %v2221_v35 = vsel %vm2207_vm6, %v9604_v57, %v9603_v17  ;;  %v2285_v54 = vld [vmem:[#allocation6 + $0x860] sm:$0xff]  ;;  %v9606_v59 = vld [vmem:[#allocation258_spill] sm:$0xff]  ;;  %v2102_v53 = vadd.f32 %v9609_v39, %v1957_v21  ;;  %v2341_v1 = vmul.f32 %v2293_v3, %v2224_v43  ;;  %v2302_v14 = vld [vmem:[#allocation6 + $0x8e8] sm:$0xff]  ;;  %v2342_v57 = vmul.f32 %v2294_v5, %v2218_v49  ;;  %v7791_v39 = vpop.permute.xlu0 %2477 }
 0x48c   : > { %v9605_v10 = vld [vmem:[#allocation264_spill] sm:$0xff]  ;;  %v9610_v46 = vld [vmem:[#allocation25_spill] sm:$0xff]  ;;  %v2295_v27 = vld [vmem:[#allocation6 + $0x8b0] sm:$0xff]  ;;  %3513 = vmatpush1.bf16.msra.mxu0 %v3453_v31  ;;  %v7796_v31 = vmul.f32 %v2269_v52, %v2221_v35 }
 0x48d   : > { %v2223_v58 = vsel %vm2207_vm6, %v9606_v59, %v9605_v10  ;;  %v9607_v8 = vld [vmem:[#allocation84_spill] sm:$0xff]  ;;  %v2219_v45 = vsel %vm2207_vm6, %v9600_v61, %v9610_v46  ;;  %v9612_v51 = vld [vmem:[#allocation33_spill] sm:$0xff]  ;;  %v2296_v21 = vld [vmem:[#allocation6 + $0x8b8] sm:$0xff]  ;;  %v7803_v49 = vpop.permute.xlu1 %2467 }
 0x48e   : > { %v7769_v18 = vadd.f32 %v9607_v8, %v1949_v56  ;;  %v9611_v16 = vld [vmem:[#allocation28_spill] sm:$0xff]  ;;  %v7781_v30 = vadd.f32 %v9612_v51, %v1965_v9  ;;  %v2349_v56 = vmul.f32 %v2301_v20, %v2225_v40  ;;  %v9613_v3 = vld [vmem:[#allocation233_spill] sm:$0xff]  ;;  %v2303_v59 = vld [vmem:[#allocation6 + $0x8f0] sm:$0xff]  ;;  %v7801_v5 = vmul.f32 %v2285_v54, %v2223_v58 }
 0x48f   : > { %v2212_v13 = vsel %vm2207_vm6, %v9602_v2, %v9611_v16  ;;  %v2254_v43 = vsel %vm2207_vm6, %v9611_v16, %v9613_v3  ;;  %v9614_v61 = vld [vmem:[#allocation48_spill] sm:$0xff]  ;;  %v2350_v16 = vmul.f32 %v2302_v14, %v2219_v45  ;;  %v2584_v47 = vld [vmem:[#allocation6 + $0xa28] sm:$0xff]  ;;  %3841 = vmatmul.mubr.msk.bf16.vlgmr.msra.gmra.mxu0 %vm3494_vm10, %v7699_v44  ;;  %v9622_v58 = vld [vmem:[#allocation291_spill] sm:$0xff]  ;;  %v7831_v29 = vpop.permute.xlu0 %2489 }
 0x490   : > { %9608 = vst [vmem:[#allocation110_spill] sm:$0xff] %v7769_v18  ;;  %v2213_v8 = vsel %vm2207_vm6, %v9610_v46, %v9614_v61  ;;  %v9615_v2 = vld [vmem:[#allocation284_spill] sm:$0xff]  ;;  %v2343_v51 = vmul.f32 %v2295_v27, %v2212_v13  ;;  %v2514_v46 = vsel %vm2497_vm7, %v9620_v32, %v9619_v23  ;;  %v9623_v14 = vld [vmem:[#allocation106_spill] sm:$0xff]  ;;  %v9624_v13 = vld [vmem:[#allocation117_spill] sm:$0xff]  ;;  %3616 = vmatprep.mubr.bf16.mxu0 %v9599_v62 }
 0x491   : > { %v7794_v9 = vadd.f32 %v2309_v34, %v9615_v2  ;;  %v9617_v20 = vld [vmem:[#allocation248_spill] sm:$0xff]  ;;  %v9621_v34 = vld [vmem:[#allocation285_spill] sm:$0xff]  ;;  %v2351_v35 = vmul.f32 %v2303_v59, %v2213_v8  ;;  %v2515_v45 = vsel %vm2497_vm7, %v9623_v14, %v9622_v58  ;;  %v2585_v27 = vld [vmem:[#allocation6 + $0xa30] sm:$0xff] }
 0x492   : > { %v7799_v40 = vadd.f32 %v2325_v36, %v9617_v20  ;;  %v2583_v3 = vld [vmem:[#allocation6 + $0xa20] sm:$0xff]  ;;  %v2508_v52 = vsel %vm2497_vm7, %v9619_v23, %v9621_v34  ;;  %v2344_v36 = vmul.f32 %v2296_v21, %v2254_v43  ;;  %v2502_v32 = vsel %vm2497_vm7, %v9621_v34, %v9624_v13  ;;  %v9625_v23 = vld [vmem:[#allocation251_spill] sm:$0xff]  ;;  %v9627_v21 = vld [vmem:[#allocation81_spill] sm:$0xff] }
 0x493   : > { %9616 = vst [vmem:[#allocation92_spill] sm:$0xff] %v7794_v9  ;;  %v2591_v54 = vld [vmem:[#allocation6 + $0xa60] sm:$0xff]  ;;  %v2389_v2 = vadd.f32 %v2341_v1, %v9625_v23  ;;  %v2390_v43 = vadd.f32 %v2342_v57, %v9627_v21  ;;  %v2304_v59 = vld [vmem:[#allocation6 + $0x8f8] sm:$0xff]  ;;  %v2631_v7 = vmul.f32 %v2583_v3, %v2514_v46  ;;  %v2632_v60 = vmul.f32 %v2584_v47, %v2508_v52  ;;  %v7841_v23 = vpop.permute.xlu1 %2479  ;;  %v2874_v3 = vld [vmem:[#allocation6 + $0xba8] sm:$0xff] }
 0x494   : > { %9618 = vst [vmem:[#allocation87_spill] sm:$0xff] %v7799_v40  ;;  %v9626_v20 = vld [vmem:[#allocation280_spill] sm:$0xff]  ;;  %v2586_v1 = vld [vmem:[#allocation6 + $0xa38] sm:$0xff]  ;;  %v2639_v21 = vmul.f32 %v2591_v54, %v2515_v45  ;;  %v2798_v47 = vsel %vm2787_vm8, %v7667_v24, %v7684_v0  ;;  %v2391_v46 = vadd.f32 %v2343_v51, %v7718_v15  ;;  %v2392_v52 = vadd.f32 %v2344_v36, %v2102_v53  ;;  %v3050_v53 = vpop.permute.xlu0 %3049 }
 0x495   : > { %v2397_v44 = vadd.f32 %v2349_v56, %v9626_v20  ;;  %v9628_v8 = vld [vmem:[#allocation236_spill] sm:$0xff]  ;;  %v9630_v56 = vld [vmem:[#allocation67_spill] sm:$0xff]  ;;  %v9631_v20 = vld [vmem:[#allocation102_spill] sm:$0xff]  ;;  %v7852_v37 = vadd.f32 %v2351_v35, %v7733_v22  ;;  %v2679_v51 = vadd.f32 %v2631_v7, %v2389_v2  ;;  %v2680_v36 = vadd.f32 %v2632_v60, %v2390_v43 }
 0x496   : > { %v2255_v14 = vsel %vm2207_vm6, %v9614_v61, %v9628_v8  ;;  %v9629_v34 = vld [vmem:[#allocation112_spill] sm:$0xff]  ;;  %v2544_v57 = vsel %vm2497_vm7, %v9624_v13, %v9630_v56  ;;  %v2398_v61 = vadd.f32 %v2350_v16, %v9631_v20  ;;  %v2633_v8 = vmul.f32 %v2585_v27, %v2502_v32  ;;  %v9632_v16 = vld [vmem:[#allocation111_spill] sm:$0xff]  ;;  %v2875_v22 = vld [vmem:[#allocation6 + $0xbb0] sm:$0xff] }
 0x497   : > { %v2509_v62 = vsel %vm2497_vm7, %v9622_v58, %v9629_v34  ;;  %v7849_v58 = vmul.f32 %v2304_v59, %v2255_v14  ;;  %v2634_v56 = vmul.f32 %v2586_v1, %v2544_v57  ;;  %v2804_v54 = vsel %vm2787_vm8, %v9632_v16, %v7667_v24  ;;  %v2881_v45 = vld [vmem:[#allocation6 + $0xbe0] sm:$0xff]  ;;  %v7866_v35 = vpop.permute.xlu1 %2491  ;;  %v2593_v14 = vld [vmem:[#allocation6 + $0xa70] sm:$0xff]  ;;  %v9635_v7 = vld [vmem:[#allocation45_spill] sm:$0xff] }
 0x498   : > { %v2640_v13 = vmul.f32 %v2592_v11, %v2509_v62  ;;  %v9633_v27 = vld [vmem:[#allocation124_spill] sm:$0xff]  ;;  %v2922_v32 = vmul.f32 %v2874_v3, %v2798_v47  ;;  %v2792_v11 = vsel %vm2787_vm8, %v7684_v0, %v7707_v6  ;;  %v2687_v59 = vadd.f32 %v2639_v21, %v2397_v44  ;;  %v2882_v20 = vld [vmem:[#allocation6 + $0xbe8] sm:$0xff]  ;;  %v2876_v44 = vld [vmem:[#allocation6 + $0xbb8] sm:$0xff] }
 0x499   : > { %v2805_v15 = vsel %vm2787_vm8, %v9633_v27, %v7688_v50  ;;  %v2681_v24 = vadd.f32 %v2633_v8, %v2391_v46  ;;  %v9634_v62 = vld [vmem:[#allocation116_spill] sm:$0xff]  ;;  %v3094_v60 = vsel %vm3077_vm9, %v9635_v7, %v3050_v53  ;;  %v2921_v2 = vmul.f32 %v2873_v26, %v2804_v54  ;;  %v9636_v21 = vld [vmem:[#allocation126_spill] sm:$0xff]  ;;  %v2594_v46 = vld [vmem:[#allocation6 + $0xa78] sm:$0xff]  ;;  %v3062_v27 = vpop.permute.xlu0 %3061 }
 0x49a   : > { %v2503_v1 = vsel %vm2497_vm7, %v9629_v34, %v9634_v62  ;;  %v3163_v57 = vld [vmem:[#allocation6 + $0xd20] sm:$0xff]  ;;  %v2929_v43 = vmul.f32 %v2881_v45, %v2805_v15  ;;  %v2799_v0 = vsel %vm2787_vm8, %v7688_v50, %v7720_v55  ;;  %v2834_v8 = vsel %vm2787_vm8, %v7707_v6, %v9636_v21  ;;  %v3164_v34 = vld [vmem:[#allocation6 + $0xd28] sm:$0xff]  ;;  %v9637_v16 = vld [vmem:[#allocation59_spill] sm:$0xff] }
 0x49b   : > { %v2688_v3 = vadd.f32 %v2640_v13, %v2398_v61  ;;  %v2682_v47 = vadd.f32 %v2634_v56, %v2392_v52  ;;  %v2545_v26 = vsel %vm2497_vm7, %v9634_v62, %v9637_v16  ;;  %v2923_v54 = vmul.f32 %v2875_v22, %v2792_v11  ;;  %v3171_v45 = vld [vmem:[#allocation6 + $0xd60] sm:$0xff]  ;;  %v3052_v9 = vpop.permute.xlu1 %3051  ;;  %v9638_v61 = vld [vmem:[#allocation19_spill] sm:$0xff]  ;;  %v3165_v11 = vld [vmem:[#allocation6 + $0xd30] sm:$0xff] }
 0x49c   : > { %v2641_v15 = vmul.f32 %v2593_v14, %v2503_v1  ;;  %v2970_v50 = vadd.f32 %v2922_v32, %v2680_v36  ;;  %v3211_v7 = vmul.f32 %v3163_v57, %v3094_v60  ;;  %v3088_v40 = vsel %vm3077_vm9, %v3050_v53, %v3062_v27  ;;  %v2883_v14 = vld [vmem:[#allocation6 + $0xbf0] sm:$0xff]  ;;  %v3172_v57 = vld [vmem:[#allocation6 + $0xd68] sm:$0xff] }
 0x49d   : > { %v2930_v6 = vmul.f32 %v2882_v20, %v2799_v0  ;;  %v2924_v21 = vmul.f32 %v2876_v44, %v2834_v8  ;;  %v3095_v52 = vsel %vm3077_vm9, %v9638_v61, %v3052_v9  ;;  %v3212_v13 = vmul.f32 %v3164_v34, %v3088_v40  ;;  %v9639_v53 = vld [vmem:[#allocation26_spill] sm:$0xff]  ;;  %v3166_v40 = vld [vmem:[#allocation6 + $0xd38] sm:$0xff]  ;;  %v3074_v60 = vpop.permute.xlu0 %3073  ;;  %v9640_v20 = vld [vmem:[#allocation132_spill] sm:$0xff] }
 0x49e   : > { %v2642_v56 = vmul.f32 %v2594_v46, %v2545_v26  ;;  %v2969_v18 = vadd.f32 %v2921_v2, %v2679_v51  ;;  %v2977_v62 = vadd.f32 %v2929_v43, %v2687_v59  ;;  %v3219_v22 = vmul.f32 %v3171_v45, %v3095_v52  ;;  %v2884_v51 = vld [vmem:[#allocation6 + $0xbf8] sm:$0xff]  ;;  %v3173_v52 = vld [vmem:[#allocation6 + $0xd70] sm:$0xff] }
 0x49f   : > { %v2971_v16 = vadd.f32 %v2923_v54, %v2681_v24  ;;  %v2793_v36 = vsel %vm2787_vm8, %v7720_v55, %v7758_v12  ;;  %v2835_v32 = vsel %vm2787_vm8, %v7758_v12, %v9639_v53  ;;  %v3260_v1 = vadd.f32 %v3212_v13, %v2970_v50  ;;  %v3064_v43 = vpop.permute.xlu1 %3063  ;;  %v9641_v46 = vld [vmem:[#allocation139_spill] sm:$0xff] }
 0x4a0   : > { %v3259_v59 = vadd.f32 %v3211_v7, %v2969_v18  ;;  %v3267_v2 = vadd.f32 %v3219_v22, %v2977_v62  ;;  %v3082_v24 = vsel %vm3077_vm9, %v3062_v27, %v3074_v60  ;;  %v3124_v55 = vsel %vm3077_vm9, %v3074_v60, %v9640_v20  ;;  %v9642_v27 = vld [vmem:[#allocation138_spill] sm:$0xff] }
 0x4a1   : > { %v2978_v0 = vadd.f32 %v2930_v6, %v2688_v3  ;;  %v2972_v44 = vadd.f32 %v2924_v21, %v2682_v47  ;;  %v3089_v12 = vsel %vm3077_vm9, %v3052_v9, %v3064_v43  ;;  %v3213_v8 = vmul.f32 %v3165_v11, %v3082_v24  ;;  %v7911_v13 = vpop.permute.xlu0 %2755  ;;  %v3174_v21 = vld [vmem:[#allocation6 + $0xd78] sm:$0xff]  ;;  %v9643_v22 = vld [vmem:[#allocation274_spill] sm:$0xff]  ;;  %v9645_v24 = vld [vmem:[#allocation245_spill] sm:$0xff] }
 0x4a2   : > { %v2931_v34 = vmul.f32 %v2883_v14, %v2793_v36  ;;  %v3351_v26 = vadd.f32 %v9641_v46, %v3267_v2  ;;  %v3220_v54 = vmul.f32 %v3172_v57, %v3089_v12  ;;  %v3214_v18 = vmul.f32 %v3166_v40, %v3124_v55  ;;  %v9646_v55 = vld [vmem:[#allocation254_spill] sm:$0xff] }
 0x4a3   : > { %v2400_v45 = vadd.f32 %v7849_v58, %v7781_v30  ;;  %v2932_v50 = vmul.f32 %v2884_v51, %v2835_v32  ;;  %v3344_v7 = vadd.f32 %v9642_v27, %v3260_v1  ;;  %v3261_v61 = vadd.f32 %v3213_v8, %v2971_v16  ;;  %v3076_v62 = vpop.permute.xlu1 %3075  ;;  %v9644_v16 = vld [vmem:[#allocation133_spill] sm:$0xff] }
 0x4a4   : > { %v2689_v3 = vadd.f32 %v2641_v15, %v7852_v37  ;;  %v3343_v9 = vadd.f32 %v9642_v27, %v3259_v59  ;;  %v3268_v47 = vadd.f32 %v3220_v54, %v2978_v0  ;;  %v3262_v6 = vadd.f32 %v3214_v18, %v2972_v44  ;;  %v9647_v44 = vld [vmem:[#allocation290_spill] sm:$0xff]  ;;  %v2278_v18 = vld [vmem:[#allocation6 + $0x828] sm:$0xff] }
 0x4a5   : > { %v2214_v30 = vsel %vm2207_vm6, %v9583_v25, %v9643_v22  ;;  %v2690_v58 = vadd.f32 %v2642_v56, %v2400_v45  ;;  %v3083_v11 = vsel %vm3077_vm9, %v3064_v43, %v3076_v62  ;;  %v3125_v14 = vsel %vm3077_vm9, %v3076_v62, %v9644_v16  ;;  %v7926_v40 = vpop.permute.xlu0 %2767  ;;  %v2262_v56 = vld [vmem:[#allocation6 + $0x7a8] sm:$0xff] }
 0x4a6   : > { %v2979_v37 = vadd.f32 %v2931_v34, %v2689_v3  ;;  %v3399_v15 = vmax.f32 %v3351_v26, 0.0  ;;  %v3352_v36 = vadd.f32 %v9641_v46, %v3268_v47  ;;  %v3221_v53 = vmul.f32 %v3173_v52, %v3083_v11  ;;  %v2270_v34 = vld [vmem:[#allocation6 + $0x7e8] sm:$0xff]  ;;  %v9648_v26 = vld [vmem:[#allocation295_spill] sm:$0xff]  ;;  %v9650_v11 = vld [vmem:[#allocation24_spill] sm:$0xff] }
 0x4a7   : > { %v2980_v32 = vadd.f32 %v2932_v50, %v2690_v58  ;;  %v3345_v1 = vadd.f32 %v9642_v27, %v3261_v61  ;;  %v3222_v57 = vmul.f32 %v3174_v21, %v3125_v14  ;;  %v3392_v25 = vmax.f32 %v3344_v7, 0.0  ;;  %v7929_v2 = vpop.permute.xlu1 %2757  ;;  %v9649_v3 = vld [vmem:[#allocation309_spill] sm:$0xff]  ;;  %v2264_v14 = vld [vmem:[#allocation6 + $0x7b8] sm:$0xff] }
 0x4a8   : > { %v3391_v60 = vmax.f32 %v3343_v9, 0.0  ;;  %v3346_v51 = vadd.f32 %v9642_v27, %v3262_v6  ;;  %v3269_v59 = vadd.f32 %v3221_v53, %v2979_v37  ;;  %v3400_v43 = vmax.f32 %v3352_v36, 0.0  ;;  %v9651_v37 = vld [vmem:[#allocation229_spill] sm:$0xff] }
 0x4a9   : > { %v7933_v20 = vadd.f32 %v7796_v31, %v9645_v24  ;;  %v7937_v0 = vadd.f32 %v7801_v5, %v9646_v55  ;;  %v2216_v12 = vsel %vm2207_vm6, %v9590_v63, %v9647_v44  ;;  %v3270_v8 = vadd.f32 %v3222_v57, %v2980_v32  ;;  %v7949_v61 = vpop.permute.xlu0 %2779  ;;  %v2286_v63 = vld [vmem:[#allocation6 + $0x868] sm:$0xff]  ;;  %v2280_v57 = vld [vmem:[#allocation6 + $0x838] sm:$0xff]  ;;  %v2271_v24 = vld [vmem:[#allocation6 + $0x7f0] sm:$0xff] }
 0x4aa   : > { %v2215_v54 = vsel %vm2207_vm6, %v9603_v17, %v9648_v26  ;;  %v3447_v45 = vmin.f32 %v3399_v15, 6.0  ;;  %v3353_v31 = vadd.f32 %v9641_v46, %v3269_v59  ;;  %v3448_v50 = vmin.f32 %v3400_v43, 6.0  ;;  %v9654_v55 = vld [vmem:[#allocation36_spill] sm:$0xff] }
 0x4ab   : > { %v2310_v27 = vmul.f32 %v2262_v56, %v2214_v30  ;;  %v3393_v5 = vmax.f32 %v3345_v1, 0.0  ;;  %v3354_v7 = vadd.f32 %v9641_v46, %v3270_v8  ;;  %v3440_v52 = vmin.f32 %v3392_v25, 6.0  ;;  %v7955_v6 = vpop.permute.xlu1 %2769  ;;  %v2263_v30 = vld [vmem:[#allocation6 + $0x7b0] sm:$0xff]  ;;  %v9652_v25 = vld [vmem:[#allocation37_spill] sm:$0xff] }
 0x4ac   : > { %v2217_v9 = vsel %vm2207_vm6, %v9605_v10, %v9649_v3  ;;  %v3439_v47 = vmin.f32 %v3391_v60, 6.0  ;;  %v3401_v17 = vmax.f32 %v3353_v31, 0.0  ;;  %v3394_v21 = vmax.f32 %v3346_v51, 0.0  ;;  %v2279_v1 = vld [vmem:[#allocation6 + $0x830] sm:$0xff]  ;;  %v9653_v60 = vld [vmem:[#allocation231_spill] sm:$0xff] }
 0x4ad   : > { %v2318_v62 = vmul.f32 %v2270_v34, %v2215_v54  ;;  %v2326_v58 = vmul.f32 %v2278_v18, %v2216_v12  ;;  %v2208_v46 = vsel %vm2207_vm6, %v9643_v22, %v9650_v11  ;;  %v3474_v16 = vpack.c.bf16 %v3448_v50, %v3440_v52  ;;  %v7973_v59 = vpop.permute.xlu0 %2461  ;;  %v2272_v18 = vld [vmem:[#allocation6 + $0x7f8] sm:$0xff]  ;;  %v2287_v50 = vld [vmem:[#allocation6 + $0x870] sm:$0xff] }
 0x4ae   : > { %v2250_v10 = vsel %vm2207_vm6, %v9650_v11, %v9651_v37  ;;  %v3449_v15 = vmin.f32 %v3401_v17, 6.0  ;;  %v3473_v36 = vpack.c.bf16 %v3447_v45, %v3439_v47  ;;  %v3402_v53 = vmax.f32 %v3354_v7, 0.0  ;;  %v9655_v45 = vld [vmem:[#allocation232_spill] sm:$0xff]  ;;  %v9657_v47 = vld [vmem:[#allocation234_spill] sm:$0xff] }
 0x4af   : > { %v2334_v32 = vmul.f32 %v2286_v63, %v2217_v9  ;;  %v2210_v56 = vsel %vm2207_vm6, %v9647_v44, %v9652_v25  ;;  %v2252_v22 = vsel %vm2207_vm6, %v9652_v25, %v9653_v60  ;;  %v3441_v51 = vmin.f32 %v3393_v5, 6.0  ;;  %3594 = vmatprep.subr.bf16.mxu0 %v3474_v16  ;;  %v7979_v8 = vpop.permute.xlu1 %2781  ;;  %v9656_v5 = vld [vmem:[#allocation39_spill] sm:$0xff]  ;;  %v2568_v25 = vld [vmem:[#allocation6 + $0x9a8] sm:$0xff] }
 0x4b0   : > { %v2311_v43 = vmul.f32 %v2263_v30, %v2208_v46  ;;  %v2209_v12 = vsel %vm2207_vm6, %v9648_v26, %v9654_v55  ;;  %3595 = vmatpush1.bf16.msra.mxu0 %v3473_v36  ;;  %v3442_v44 = vmin.f32 %v3394_v21, 6.0  ;;  %v3450_v34 = vmin.f32 %v3402_v53, 6.0  ;;  %v2288_v9 = vld [vmem:[#allocation6 + $0x878] sm:$0xff]  ;;  %v9658_v30 = vld [vmem:[#allocation289_spill] sm:$0xff]  ;;  %v2567_v53 = vld [vmem:[#allocation6 + $0x9a0] sm:$0xff] }
 0x4b1   : > { %v2312_v54 = vmul.f32 %v2264_v14, %v2250_v10  ;;  %v2251_v31 = vsel %vm2207_vm6, %v9654_v55, %v9655_v45  ;;  %v2211_v7 = vsel %vm2207_vm6, %v9649_v3, %v9656_v5  ;;  %v3475_v52 = vpack.c.bf16 %v3449_v15, %v3441_v51  ;;  %v9659_v46 = vld [vmem:[#allocation283_spill] sm:$0xff]  ;;  %v9660_v14 = vld [vmem:[#allocation68_spill] sm:$0xff]  ;;  %v8000_v3 = vpop.permute.xlu0 %2473  ;;  %v9663_v60 = vld [vmem:[#allocation101_spill] sm:$0xff] }
 0x4b2   : > { %v2327_v26 = vmul.f32 %v2279_v1, %v2210_v56  ;;  %v2328_v63 = vmul.f32 %v2280_v57, %v2252_v22  ;;  %v2253_v17 = vsel %vm2207_vm6, %v9656_v5, %v9657_v47  ;;  %v3476_v21 = vpack.c.bf16 %v3450_v34, %v3442_v44  ;;  %v9661_v1 = vld [vmem:[#allocation130_spill] sm:$0xff]  ;;  %v2575_v44 = vld [vmem:[#allocation6 + $0x9e0] sm:$0xff]  ;;  %v9665_v45 = vld [vmem:[#allocation61_spill] sm:$0xff] }
 0x4b3   : > { %v7994_v11 = vadd.f32 %v2310_v27, %v9658_v30  ;;  %v7997_v16 = vadd.f32 %v2318_v62, %v9659_v46  ;;  %v2374_v37 = vadd.f32 %v2326_v58, %v9660_v14  ;;  %v2319_v10 = vmul.f32 %v2271_v24, %v2209_v12  ;;  %v8010_v62 = vpop.permute.xlu1 %2463  ;;  %v9662_v58 = vld [vmem:[#allocation95_spill] sm:$0xff]  ;;  %v2865_v30 = vld [vmem:[#allocation6 + $0xb60] sm:$0xff]  ;;  %v2858_v14 = vld [vmem:[#allocation6 + $0xb28] sm:$0xff] }
 0x4b4   : > { %v2320_v15 = vmul.f32 %v2272_v18, %v2251_v31  ;;  %v2335_v36 = vmul.f32 %v2287_v50, %v2211_v7  ;;  %v2512_v57 = vsel %vm2497_vm7, %v9661_v1, %v7747_v42  ;;  %v2506_v27 = vsel %vm2497_vm7, %v7747_v42, %v7791_v39  ;;  %3637 = vmatprep.subr.bf16.mxu1 %v3476_v21  ;;  %v9664_v42 = vld [vmem:[#allocation135_spill] sm:$0xff]  ;;  %v2569_v18 = vld [vmem:[#allocation6 + $0x9b0] sm:$0xff]  ;;  %v9668_v46 = vld [vmem:[#allocation148_spill] sm:$0xff] }
 0x4b5   : > { %v2382_v56 = vadd.f32 %v2334_v32, %v9662_v58  ;;  %v8014_v22 = vadd.f32 %v2311_v43, %v9663_v60  ;;  %v8017_v51 = vadd.f32 %v2312_v54, %v7729_v41  ;;  %v2336_v24 = vmul.f32 %v2288_v9, %v2253_v17  ;;  %3638 = vmatpush1.bf16.msra.mxu1 %v3475_v52  ;;  %v2576_v54 = vld [vmem:[#allocation6 + $0x9e8] sm:$0xff]  ;;  %v8037_v50 = vpop.permute.xlu0 %2485  ;;  %v2577_v52 = vld [vmem:[#allocation6 + $0x9f0] sm:$0xff]  ;;  %v2578_v58 = vld [vmem:[#allocation6 + $0x9f8] sm:$0xff] }
 0x4b6   : > { %v2375_v55 = vadd.f32 %v2327_v26, %v7694_v38  ;;  %v2376_v12 = vadd.f32 %v2328_v63, %v7745_v28  ;;  %v2513_v34 = vsel %vm2497_vm7, %v9664_v42, %v7803_v49  ;;  %v2500_v32 = vsel %vm2497_vm7, %v7791_v39, %v7831_v29  ;;  %v2570_v28 = vld [vmem:[#allocation6 + $0x9b8] sm:$0xff]  ;;  %v9666_v63 = vld [vmem:[#allocation110_spill] sm:$0xff]  ;;  %v9670_v60 = vld [vmem:[#allocation53_spill] sm:$0xff] }
 0x4b7   : > { %v2615_v41 = vmul.f32 %v2567_v53, %v2512_v57  ;;  %v2616_v43 = vmul.f32 %v2568_v25, %v2506_v27  ;;  %v2507_v38 = vsel %vm2497_vm7, %v7803_v49, %v7841_v23  ;;  %v2542_v31 = vsel %vm2497_vm7, %v7831_v29, %v9665_v45  ;;  %v8050_v26 = vpop.permute.xlu1 %2475  ;;  %v9667_v17 = vld [vmem:[#allocation50_spill] sm:$0xff]  ;;  %v2866_v42 = vld [vmem:[#allocation6 + $0xb68] sm:$0xff] }
 0x4b8   : > { %v8040_v5 = vadd.f32 %v2319_v10, %v7705_v19  ;;  %v8043_v39 = vadd.f32 %v2320_v15, %v7742_v48  ;;  %v2383_v7 = vadd.f32 %v2335_v36, %v7714_v4  ;;  %v2501_v49 = vsel %vm2497_vm7, %v7841_v23, %v7866_v35  ;;  %v2857_v19 = vld [vmem:[#allocation6 + $0xb20] sm:$0xff]  ;;  %v9669_v15 = vld [vmem:[#allocation87_spill] sm:$0xff]  ;;  %v2859_v57 = vld [vmem:[#allocation6 + $0xb30] sm:$0xff] }
 0x4b9   : > { %v8053_v29 = vadd.f32 %v2336_v24, %v9666_v63  ;;  %v2623_v9 = vmul.f32 %v2575_v44, %v2513_v34  ;;  %v2617_v47 = vmul.f32 %v2569_v18, %v2500_v32  ;;  %v2802_v48 = vsel %vm2787_vm8, %v9667_v17, %v7911_v13  ;;  %v3046_v27 = vpop.permute.xlu0 %3045  ;;  %v9671_v34 = vld [vmem:[#allocation152_spill] sm:$0xff] }
 0x4ba   : > { %v2624_v4 = vmul.f32 %v2576_v54, %v2507_v38  ;;  %v2618_v21 = vmul.f32 %v2570_v28, %v2542_v31  ;;  %v2803_v23 = vsel %vm2787_vm8, %v9668_v46, %v7929_v2  ;;  %v2796_v10 = vsel %vm2787_vm8, %v7911_v13, %v7926_v40  ;;  %v9672_v54 = vld [vmem:[#allocation191_spill] sm:$0xff]  ;;  %v3155_v17 = vld [vmem:[#allocation6 + $0xce0] sm:$0xff] }
 0x4bb   : > { %v2663_v36 = vadd.f32 %v2615_v41, %v9669_v15  ;;  %v2664_v53 = vadd.f32 %v2616_v43, %v2374_v37  ;;  %v2625_v1 = vmul.f32 %v2577_v52, %v2501_v49  ;;  %v2790_v25 = vsel %vm2787_vm8, %v7926_v40, %v7949_v61  ;;  %v2860_v37 = vld [vmem:[#allocation6 + $0xb38] sm:$0xff]  ;;  %v8084_v18 = vpop.permute.xlu1 %2487  ;;  %v3148_v52 = vld [vmem:[#allocation6 + $0xca8] sm:$0xff] }
 0x4bc   : > { %v2543_v24 = vsel %vm2497_vm7, %v7866_v35, %v9670_v60  ;;  %v2905_v44 = vmul.f32 %v2857_v19, %v2802_v48  ;;  %v2797_v13 = vsel %vm2787_vm8, %v7929_v2, %v7955_v6  ;;  %v2832_v40 = vsel %vm2787_vm8, %v7949_v61, %v9671_v34  ;;  %v3147_v35 = vld [vmem:[#allocation6 + $0xca0] sm:$0xff]  ;;  %v2868_v15 = vld [vmem:[#allocation6 + $0xb78] sm:$0xff] }
 0x4bd   : > { %v2671_v32 = vadd.f32 %v2623_v9, %v7937_v0  ;;  %v2913_v41 = vmul.f32 %v2865_v30, %v2803_v23  ;;  %v2906_v43 = vmul.f32 %v2858_v14, %v2796_v10  ;;  %v3092_v38 = vsel %vm3077_vm9, %v9672_v54, %v3046_v27  ;;  %v3058_v48 = vpop.permute.xlu0 %3057  ;;  %v2551_v0 = vld [vmem:[#allocation6 + $0x920] sm:$0xff]  ;;  %v2867_v10 = vld [vmem:[#allocation6 + $0xb70] sm:$0xff] }
 0x4be   : > { %v2672_v28 = vadd.f32 %v2624_v4, %v2382_v56  ;;  %v2665_v45 = vadd.f32 %v2617_v47, %v2375_v55  ;;  %v2666_v2 = vadd.f32 %v2618_v21, %v2376_v12  ;;  %v2907_v31 = vmul.f32 %v2859_v57, %v2790_v25  ;;  %v9673_v9 = vld [vmem:[#allocation76_spill] sm:$0xff]  ;;  %v9674_v47 = vld [vmem:[#allocation194_spill] sm:$0xff] }
 0x4bf   : > { %v2626_v49 = vmul.f32 %v2578_v58, %v2543_v24  ;;  %v2673_v63 = vadd.f32 %v2625_v1, %v2383_v7  ;;  %v2914_v19 = vmul.f32 %v2866_v42, %v2797_v13  ;;  %v2908_v61 = vmul.f32 %v2860_v37, %v2832_v40  ;;  %v3048_v14 = vpop.permute.xlu1 %3047  ;;  %v9675_v1 = vld [vmem:[#allocation78_spill] sm:$0xff]  ;;  %v3150_v42 = vld [vmem:[#allocation6 + $0xcb8] sm:$0xff] }
 0x4c0   : > { %v2953_v46 = vadd.f32 %v2905_v44, %v2663_v36  ;;  %v2510_v30 = vsel %vm2497_vm7, %v9673_v9, %v7973_v59  ;;  %v3195_v23 = vmul.f32 %v3147_v35, %v3092_v38  ;;  %v3086_v56 = vsel %vm3077_vm9, %v3046_v27, %v3058_v48  ;;  %v3156_v44 = vld [vmem:[#allocation6 + $0xce8] sm:$0xff]  ;;  %v3157_v9 = vld [vmem:[#allocation6 + $0xcf0] sm:$0xff] }
 0x4c1   : > { %v2961_v55 = vadd.f32 %v2913_v41, %v2671_v32  ;;  %v2954_v12 = vadd.f32 %v2906_v43, %v2664_v53  ;;  %v3093_v7 = vsel %vm3077_vm9, %v9674_v47, %v3048_v14  ;;  %v3196_v4 = vmul.f32 %v3148_v52, %v3086_v56  ;;  %v3149_v53 = vld [vmem:[#allocation6 + $0xcb0] sm:$0xff]  ;;  %v3070_v13 = vpop.permute.xlu0 %3069  ;;  %v9676_v32 = vld [vmem:[#allocation188_spill] sm:$0xff]  ;;  %v2552_v38 = vld [vmem:[#allocation6 + $0x928] sm:$0xff] }
 0x4c2   : > { %v2955_v21 = vadd.f32 %v2907_v31, %v2665_v45  ;;  %v2791_v36 = vsel %vm2787_vm8, %v7955_v6, %v7979_v8  ;;  %v2833_v57 = vsel %vm2787_vm8, %v7979_v8, %v9675_v1  ;;  %v3203_v25 = vmul.f32 %v3155_v17, %v3093_v7  ;;  %v9677_v45 = vld [vmem:[#allocation107_spill] sm:$0xff] }
 0x4c3   : > { %v2962_v27 = vadd.f32 %v2914_v19, %v2672_v28  ;;  %v2956_v58 = vadd.f32 %v2908_v61, %v2666_v2  ;;  %v2599_v60 = vmul.f32 %v2551_v0, %v2510_v30  ;;  %v3244_v24 = vadd.f32 %v3196_v4, %v2954_v12  ;;  %v3060_v40 = vpop.permute.xlu1 %3059  ;;  %v9678_v61 = vld [vmem:[#allocation92_spill] sm:$0xff]  ;;  %v3158_v47 = vld [vmem:[#allocation6 + $0xcf8] sm:$0xff] }
 0x4c4   : > { %v3243_v37 = vadd.f32 %v3195_v23, %v2953_v46  ;;  %v3251_v34 = vadd.f32 %v3203_v25, %v2961_v55  ;;  %v3080_v6 = vsel %vm3077_vm9, %v3058_v48, %v3070_v13  ;;  %v3122_v41 = vsel %vm3077_vm9, %v3070_v13, %v9676_v32  ;;  %v9679_v48 = vld [vmem:[#allocation185_spill] sm:$0xff]  ;;  %v2559_v23 = vld [vmem:[#allocation6 + $0x960] sm:$0xff] }
 0x4c5   : > { %v2915_v8 = vmul.f32 %v2867_v10, %v2791_v36  ;;  %v2916_v43 = vmul.f32 %v2868_v15, %v2833_v57  ;;  %v3087_v35 = vsel %vm3077_vm9, %v3048_v14, %v3060_v40  ;;  %v3197_v54 = vmul.f32 %v3149_v53, %v3080_v6  ;;  %v2752_v30 = vpop.permute.xlu0 %2751  ;;  %v9680_v14 = vld [vmem:[#allocation162_spill] sm:$0xff] }
 0x4c6   : > { %v2504_v28 = vsel %vm2497_vm7, %v7973_v59, %v8000_v3  ;;  %v3335_v2 = vadd.f32 %v9677_v45, %v3251_v34  ;;  %v3204_v31 = vmul.f32 %v3156_v44, %v3087_v35  ;;  %v3198_v52 = vmul.f32 %v3150_v42, %v3122_v41  ;;  %v2560_v41 = vld [vmem:[#allocation6 + $0x968] sm:$0xff] }
 0x4c7   : > { %v2674_v19 = vadd.f32 %v2626_v49, %v8053_v29  ;;  %v8121_v17 = vadd.f32 %v2599_v60, %v9678_v61  ;;  %v3328_v46 = vadd.f32 %v9679_v48, %v3244_v24  ;;  %v3245_v0 = vadd.f32 %v3197_v54, %v2955_v21  ;;  %v3072_v29 = vpop.permute.xlu1 %3071  ;;  %v9681_v21 = vld [vmem:[#allocation90_spill] sm:$0xff]  ;;  %v2841_v61 = vld [vmem:[#allocation6 + $0xaa0] sm:$0xff] }
 0x4c8   : > { %v2511_v59 = vsel %vm2497_vm7, %v9680_v14, %v8010_v62  ;;  %v3327_v56 = vadd.f32 %v9679_v48, %v3243_v37  ;;  %v3252_v55 = vadd.f32 %v3204_v31, %v2962_v27  ;;  %v3246_v12 = vadd.f32 %v3198_v52, %v2956_v58 }
 0x4c9   : > { %v2963_v49 = vadd.f32 %v2915_v8, %v2673_v63  ;;  %v2600_v7 = vmul.f32 %v2552_v38, %v2504_v28  ;;  %v3081_v4 = vsel %vm3077_vm9, %v3060_v40, %v3072_v29  ;;  %v3123_v10 = vsel %vm3077_vm9, %v3072_v29, %v9681_v21  ;;  %v2764_v58 = vpop.permute.xlu0 %2763  ;;  %v9682_v40 = vld [vmem:[#allocation46_spill] sm:$0xff] }
 0x4ca   : > { %v2964_v15 = vadd.f32 %v2916_v43, %v2674_v19  ;;  %v3383_v36 = vmax.f32 %v3335_v2, 0.0  ;;  %v3336_v1 = vadd.f32 %v9677_v45, %v3252_v55  ;;  %v3205_v57 = vmul.f32 %v3157_v9, %v3081_v4  ;;  %v2553_v43 = vld [vmem:[#allocation6 + $0x930] sm:$0xff] }
 0x4cb   : > { %v2607_v25 = vmul.f32 %v2559_v23, %v2511_v59  ;;  %v3329_v53 = vadd.f32 %v9679_v48, %v3245_v0  ;;  %v3206_v27 = vmul.f32 %v3158_v47, %v3123_v10  ;;  %v3376_v60 = vmax.f32 %v3328_v46, 0.0  ;;  %v2754_v42 = vpop.permute.xlu1 %2753 }
 0x4cc   : > { %v3375_v63 = vmax.f32 %v3327_v56, 0.0  ;;  %v3330_v24 = vadd.f32 %v9679_v48, %v3246_v12  ;;  %v3253_v44 = vadd.f32 %v3205_v57, %v2963_v49  ;;  %v3384_v13 = vmax.f32 %v3336_v1, 0.0  ;;  %v9683_v48 = vld [vmem:[#allocation239_spill] sm:$0xff]  ;;  %v2842_v56 = vld [vmem:[#allocation6 + $0xaa8] sm:$0xff]  ;;  %v2849_v49 = vld [vmem:[#allocation6 + $0xae0] sm:$0xff] }
 0x4cd   : > { %v8138_v37 = vadd.f32 %v2600_v7, %v7994_v11  ;;  %v2498_v34 = vsel %vm2497_vm7, %v8000_v3, %v8037_v50  ;;  %v2540_v6 = vsel %vm2497_vm7, %v8037_v50, %v9682_v40  ;;  %v3254_v32 = vadd.f32 %v3206_v27, %v2964_v15  ;;  %v2554_v11 = vld [vmem:[#allocation6 + $0x938] sm:$0xff]  ;;  %v2776_v50 = vpop.permute.xlu0 %2775  ;;  %v9684_v7 = vld [vmem:[#allocation281_spill] sm:$0xff]  ;;  %v2843_v15 = vld [vmem:[#allocation6 + $0xab0] sm:$0xff] }
 0x4ce   : > { %v2505_v8 = vsel %vm2497_vm7, %v8010_v62, %v8050_v26  ;;  %v3431_v35 = vmin.f32 %v3383_v36, 6.0  ;;  %v3337_v54 = vadd.f32 %v9677_v45, %v3253_v44  ;;  %v3432_v38 = vmin.f32 %v3384_v13, 6.0  ;;  %v2844_v36 = vld [vmem:[#allocation6 + $0xab8] sm:$0xff] }
 0x4cf   : > { %v8154_v3 = vadd.f32 %v2607_v25, %v7933_v20  ;;  %v3377_v28 = vmax.f32 %v3329_v53, 0.0  ;;  %v3338_v2 = vadd.f32 %v9677_v45, %v3254_v32  ;;  %v3424_v31 = vmin.f32 %v3376_v60, 6.0  ;;  %v2766_v46 = vpop.permute.xlu1 %2765  ;;  %v9685_v1 = vld [vmem:[#allocation163_spill] sm:$0xff]  ;;  %v3131_v25 = vld [vmem:[#allocation6 + $0xc20] sm:$0xff]  ;;  %v9686_v53 = vld [vmem:[#allocation21_spill] sm:$0xff] }
 0x4d0   : > { %v3423_v52 = vmin.f32 %v3375_v63, 6.0  ;;  %v3385_v19 = vmax.f32 %v3337_v54, 0.0  ;;  %v2800_v62 = vsel %vm2787_vm8, %v9683_v48, %v2752_v30  ;;  %v3378_v0 = vmax.f32 %v3330_v24, 0.0  ;;  %v2850_v32 = vld [vmem:[#allocation6 + $0xae8] sm:$0xff] }
 0x4d1   : > { %v2608_v9 = vmul.f32 %v2560_v41, %v2505_v8  ;;  %v2601_v23 = vmul.f32 %v2553_v43, %v2498_v34  ;;  %v2602_v14 = vmul.f32 %v2554_v11, %v2540_v6  ;;  %v3466_v59 = vpack.c.bf16 %v3432_v38, %v3424_v31  ;;  %v3042_v10 = vpop.permute.xlu0 %3041  ;;  %v3132_v43 = vld [vmem:[#allocation6 + $0xc28] sm:$0xff]  ;;  %v2562_v11 = vld [vmem:[#allocation6 + $0x978] sm:$0xff] }
 0x4d2   : > { %v3433_v20 = vmin.f32 %v3385_v19, 6.0  ;;  %v2794_v45 = vsel %vm2787_vm8, %v2752_v30, %v2764_v58  ;;  %v3465_v55 = vpack.c.bf16 %v3431_v35, %v3423_v52  ;;  %v3386_v12 = vmax.f32 %v3338_v2, 0.0  ;;  %v9687_v35 = vld [vmem:[#allocation64_spill] sm:$0xff] }
 0x4d3   : > { %v3425_v47 = vmin.f32 %v3377_v28, 6.0  ;;  %v2889_v29 = vmul.f32 %v2841_v61, %v2800_v62  ;;  %v2801_v4 = vsel %vm2787_vm8, %v9684_v7, %v2754_v42  ;;  %v2788_v21 = vsel %vm2787_vm8, %v2764_v58, %v2776_v50  ;;  %3596 = vmatprep.subr.bf16.mxu0 %v3466_v59  ;;  %v2778_v57 = vpop.permute.xlu1 %2777  ;;  %v2561_v58 = vld [vmem:[#allocation6 + $0x970] sm:$0xff]  ;;  %v3139_v28 = vld [vmem:[#allocation6 + $0xc60] sm:$0xff] }
 0x4d4   : > { %v2830_v30 = vsel %vm2787_vm8, %v2776_v50, %v9685_v1  ;;  %3597 = vmatpush1.bf16.msra.mxu0 %v3465_v55  ;;  %v3090_v27 = vsel %vm3077_vm9, %v9686_v53, %v3042_v10  ;;  %v3426_v60 = vmin.f32 %v3378_v0, 6.0  ;;  %v3434_v63 = vmin.f32 %v3386_v12, 6.0  ;;  %v3134_v55 = vld [vmem:[#allocation6 + $0xc38] sm:$0xff]  ;;  %v9692_v53 = vld [vmem:[#allocation89_spill] sm:$0xff] }
 0x4d5   : > { %v2649_v24 = vadd.f32 %v2601_v23, %v8014_v22  ;;  %v2499_v44 = vsel %vm2497_vm7, %v8050_v26, %v8084_v18  ;;  %v2890_v13 = vmul.f32 %v2842_v56, %v2794_v45  ;;  %v3467_v34 = vpack.c.bf16 %v3433_v20, %v3425_v47  ;;  %v3054_v2 = vpop.permute.xlu0 %3053  ;;  %v3140_v45 = vld [vmem:[#allocation6 + $0xc68] sm:$0xff]  ;;  %v2852_v47 = vld [vmem:[#allocation6 + $0xaf8] sm:$0xff] }
 0x4d6   : > { %v2650_v40 = vadd.f32 %v2602_v14, %v8017_v51  ;;  %v2897_v6 = vmul.f32 %v2849_v49, %v2801_v4  ;;  %v2795_v41 = vsel %vm2787_vm8, %v2754_v42, %v2766_v46  ;;  %v3468_v8 = vpack.c.bf16 %v3434_v63, %v3426_v60  ;;  %v3133_v14 = vld [vmem:[#allocation6 + $0xc30] sm:$0xff] }
 0x4d7   : > { %v2541_v22 = vsel %vm2497_vm7, %v8084_v18, %v9687_v35  ;;  %v2891_v54 = vmul.f32 %v2843_v15, %v2788_v21  ;;  %v2892_v38 = vmul.f32 %v2844_v36, %v2830_v30  ;;  %v3179_v26 = vmul.f32 %v3131_v25, %v3090_v27  ;;  %v3044_v42 = vpop.permute.xlu1 %3043  ;;  %v9688_v18 = vld [vmem:[#allocation15_spill] sm:$0xff]  ;;  %v9691_v30 = vld [vmem:[#allocation96_spill] sm:$0xff] }
 0x4d8   : > { %v2656_v51 = vadd.f32 %v2608_v9, %v7997_v16  ;;  %v2609_v50 = vmul.f32 %v2561_v58, %v2499_v44  ;;  %v2937_v31 = vadd.f32 %v2889_v29, %v8121_v17  ;;  %3639 = vmatprep.subr.bf16.mxu1 %v3468_v8  ;;  %v3084_v52 = vsel %vm3077_vm9, %v3042_v10, %v3054_v2  ;;  %v2851_v9 = vld [vmem:[#allocation6 + $0xaf0] sm:$0xff]  ;;  %v9693_v35 = vld [vmem:[#allocation164_spill] sm:$0xff] }
 0x4d9   : > { %v2938_v19 = vadd.f32 %v2890_v13, %v8138_v37  ;;  %v2898_v61 = vmul.f32 %v2850_v32, %v2795_v41  ;;  %3640 = vmatpush1.bf16.msra.mxu1 %v3467_v34  ;;  %v3091_v48 = vsel %vm3077_vm9, %v9688_v18, %v3044_v42  ;;  %v3180_v62 = vmul.f32 %v3132_v43, %v3084_v52  ;;  %v3066_v12 = vpop.permute.xlu0 %3065  ;;  %v9689_v29 = vld [vmem:[#allocation282_spill] sm:$0xff]  ;;  %v3142_v32 = vld [vmem:[#allocation6 + $0xc78] sm:$0xff] }
 0x4da   : > { %v2610_v0 = vmul.f32 %v2562_v11, %v2541_v22  ;;  %v2945_v16 = vadd.f32 %v2897_v6, %v8154_v3  ;;  %v2789_v17 = vsel %vm2787_vm8, %v2766_v46, %v2778_v57  ;;  %v3187_v23 = vmul.f32 %v3139_v28, %v3091_v48  ;;  %v9690_v46 = vld [vmem:[#allocation80_spill] sm:$0xff]  ;;  %v3141_v13 = vld [vmem:[#allocation6 + $0xc70] sm:$0xff] }
 0x4db   : > { %v2939_v59 = vadd.f32 %v2891_v54, %v2649_v24  ;;  %v2940_v20 = vadd.f32 %v2892_v38, %v2650_v40  ;;  %v3227_v56 = vadd.f32 %v3179_v26, %v2937_v31  ;;  %v3228_v37 = vadd.f32 %v3180_v62, %v2938_v19  ;;  %v3056_v3 = vpop.permute.xlu1 %3055 }
 0x4dc   : > { %v2831_v49 = vsel %vm2787_vm8, %v2778_v57, %v9689_v29  ;;  %v3235_v7 = vadd.f32 %v3187_v23, %v2945_v16  ;;  %v3078_v4 = vsel %vm3077_vm9, %v3054_v2, %v3066_v12  ;;  %v3120_v21 = vsel %vm3077_vm9, %v3066_v12, %v9690_v46 }
 0x4dd   : > { %v2946_v10 = vadd.f32 %v2898_v61, %v2656_v51  ;;  %v2899_v15 = vmul.f32 %v2851_v9, %v2789_v17  ;;  %v3085_v36 = vsel %vm3077_vm9, %v3044_v42, %v3056_v3  ;;  %v3181_v1 = vmul.f32 %v3133_v14, %v3078_v4  ;;  %v3482_v12 = vpop.permute.xlu0 %3481 }
 0x4de   : > { %v3319_v25 = vadd.f32 %v9691_v30, %v3235_v7  ;;  %v3312_v27 = vadd.f32 %v9692_v53, %v3228_v37  ;;  %v3188_v57 = vmul.f32 %v3140_v45, %v3085_v36  ;;  %v3182_v60 = vmul.f32 %v3134_v55, %v3120_v21  ;;  %v3963_v55 = vld [vmem:[#allocation8] sm:$0xff]  }
 0x4df   : > { %v2657_v63 = vadd.f32 %v2609_v50, %v8040_v5  ;;  %v2900_v24 = vmul.f32 %v2852_v47, %v2831_v49  ;;  %v3311_v58 = vadd.f32 %v9692_v53, %v3227_v56  ;;  %v3229_v44 = vadd.f32 %v3181_v1, %v2939_v59  ;;  %v3068_v41 = vpop.permute.xlu1 %3067 }
 0x4e0   : > { %v2658_v34 = vadd.f32 %v2610_v0, %v8043_v39  ;;  %v3236_v40 = vadd.f32 %v3188_v57, %v2946_v10  ;;  %v3230_v6 = vadd.f32 %v3182_v60, %v2940_v20  ;;  %v3367_v43 = vmax.f32 %v3319_v25, 0.0 }
 0x4e1   : > { %v2947_v8 = vadd.f32 %v2899_v15, %v2657_v63  ;;  %v3079_v11 = vsel %vm3077_vm9, %v3056_v3, %v3068_v41  ;;  %v3121_v5 = vsel %vm3077_vm9, %v3068_v41, %v9693_v35  ;;  %v3313_v54 = vadd.f32 %v9692_v53, %v3229_v44 }
 0x4e2   : > { %v3320_v22 = vadd.f32 %v9691_v30, %v3236_v40  ;;  %v3189_v38 = vmul.f32 %v3141_v13, %v3079_v11  ;;  %v3360_v26 = vmax.f32 %v3312_v27, 0.0  ;;  %v2948_v39 = vadd.f32 %v2900_v24, %v2658_v34 }
 0x4e3   : > { %v3359_v28 = vmax.f32 %v3311_v58, 0.0  ;;  %v3314_v2 = vadd.f32 %v9692_v53, %v3230_v6  ;;  %v3190_v51 = vmul.f32 %v3142_v32, %v3121_v5  ;;  %v3415_v42 = vmin.f32 %v3367_v43, 6.0  ;;  %v3487_v3 = vpop.permute.xlu1 %3486 }
 0x4e4   : > { %v3237_v50 = vadd.f32 %v3189_v38, %v2947_v8  ;;  %v3368_v31 = vmax.f32 %v3320_v22, 0.0  ;;  %v3361_v19 = vmax.f32 %v3313_v54, 0.0  ;;  %v3408_v33 = vmin.f32 %v3360_v26, 6.0 }
 0x4e5   : > { %v3238_v52 = vadd.f32 %v3190_v51, %v2948_v39  ;;  %v3407_v48 = vmin.f32 %v3359_v28, 6.0  ;;  %v3362_v0 = vmax.f32 %v3314_v2, 0.0 }
 0x4e6   : > { %v3321_v61 = vadd.f32 %v9691_v30, %v3237_v50  ;;  %v3416_v18 = vmin.f32 %v3368_v31, 6.0  ;;  %v3409_v14 = vmin.f32 %v3361_v19, 6.0 }
 0x4e7   : > { %v3322_v62 = vadd.f32 %v9691_v30, %v3238_v52  ;;  %v3457_v17 = vpack.c.bf16 %v3415_v42, %v3407_v48  ;;  %v3410_v20 = vmin.f32 %v3362_v0, 6.0 }
 0x4e8   : > { %v3369_v16 = vmax.f32 %v3321_v61, 0.0  ;;  %v3458_v9 = vpack.c.bf16 %v3416_v18, %v3408_v33 }
 0x4e9   : > { %v3370_v23 = vmax.f32 %v3322_v62, 0.0 }
 0x4ea   : > { %v3417_v59 = vmin.f32 %v3369_v16, 6.0  ;;  %3598 = vmatprep.subr.bf16.mxu0 %v3458_v9 }
 0x4eb   : > { %3599 = vmatpush1.bf16.msra.mxu0 %v3457_v17  ;;  %v3418_v56 = vmin.f32 %v3370_v23, 6.0 }
 0x4ec   : > { %v3459_v37 = vpack.c.bf16 %v3417_v59, %v3409_v14 }
 0x4ed   : > { %v3460_v45 = vpack.c.bf16 %v3418_v56, %v3410_v20 }
 0x4ee   : > { %3843 = vmatmul.mubr.msk.bf16.vlgmr.msra.gmra.mxu0 %vm3494_vm10, %v3963_v55 }
 0x4ef   : > { %3641 = vmatprep.subr.bf16.mxu1 %v3460_v45 }
 0x4f0   : > { %3642 = vmatpush1.bf16.msra.mxu1 %v3459_v37 }
 0x4f3   : > { %3844 = vmatmul.mubr.msk.bf16.vlgmr.msra.gmra.mxu1 %vm3494_vm10, %v3963_v55 }
 0x548   : > { %v3575_v47 = vpop.f32.mrf.mxu1 }
 0x549   : > { %v3576_v29 = vadd.f32 %v3575_v47, %v3482_v12 }
 0x54a   : > { %v3577_v49 = vpop.f32.mrf.mxu1 }
 0x54b   : > { %3845 = vst [vmem:[%s8224_s19 + $0x20] sm:$0xff] %v3576_v29  ;;  %v3578_v7 = vadd.f32 %v3577_v49, %v3482_v12 }
 0x54c   : > { %v3579_v4 = vpop.f32.mrf.mxu1 }
 0x54d   : > { %3846 = vst [vmem:[%s8224_s19 + $0x28] sm:$0xff] %v3578_v7  ;;  %v3580_v46 = vadd.f32 %v3579_v4, %v3487_v3 }
 0x54e   : > { %v3581_v21 = vpop.f32.mrf.mxu1 }
 0x54f   : > { %3847 = vst [vmem:[%s8224_s19 + $0x30] sm:$0xff] %v3580_v46  ;;  %v3582_v10 = vadd.f32 %v3581_v21, %v3487_v3  ;;  %v3532_v15 = vpop.f32.mrf.mxu0 }
 0x550   : > { %v3533_v36 = vadd.f32 %v3532_v15, %v3482_v12 }
 0x551   : > { %3848 = vst [vmem:[%s8224_s19 + $0x38] sm:$0xff] %v3582_v10  ;;  %v3534_v1 = vpop.f32.mrf.mxu0 }
 0x552   : > { %3670 = vst [vmem:[%s8224_s19] sm:$0xff] %v3533_v36  ;;  %v3535_v30 = vadd.f32 %v3534_v1, %v3482_v12 }
 0x553   : > { %v3536_v25 = vpop.f32.mrf.mxu0 }
 0x554   : > { %3671 = vst [vmem:[%s8224_s19 + $0x8] sm:$0xff] %v3535_v30  ;;  %v3537_v53 = vadd.f32 %v3536_v25, %v3487_v3 }
 0x555   : > { %v3538_v27 = vpop.f32.mrf.mxu0 }
 0x556   : > { %3672 = vst [vmem:[%s8224_s19 + $0x10] sm:$0xff] %v3537_v53  ;;  %v3539_v57 = vadd.f32 %v3538_v27, %v3487_v3 }
 0x558   : > { %3673 = vst [vmem:[%s8224_s19 + $0x18] sm:$0xff] %v3539_v57 }
 0x5ae   : > { %v3618_v60 = vpop.f32.mrf.mxu0 }
 0x5af   : > { %v3619_v63 = vadd.f32 %v3618_v60, %v3482_v12 }
 0x5b0   : > { %v3620_v24 = vpop.f32.mrf.mxu0 }
 0x5b1   : > { %3849 = vst [vmem:[%s8224_s19 + $0x40] sm:$0xff] %v3619_v63  ;;  %v3621_v58 = vadd.f32 %v3620_v24, %v3482_v12 }
 0x5b2   : > { %v3622_v44 = vpop.f32.mrf.mxu0 }
 0x5b3   : > { %3850 = vst [vmem:[%s8224_s19 + $0x48] sm:$0xff] %v3621_v58  ;;  %v3623_v13 = vadd.f32 %v3622_v44, %v3487_v3  ;;  %v3661_v34 = vpop.f32.mrf.mxu1 }
 0x5b4   : > { %v3662_v40 = vadd.f32 %v3661_v34, %v3482_v12  ;;  %v3624_v6 = vpop.f32.mrf.mxu0 }
 0x5b5   : > { %3851 = vst [vmem:[%s8224_s19 + $0x50] sm:$0xff] %v3623_v13  ;;  %v3625_v32 = vadd.f32 %v3624_v6, %v3487_v3  ;;  %v3663_v41 = vpop.f32.mrf.mxu1 }
 0x5b6   : > { %3853 = vst [vmem:[%s8224_s19 + $0x60] sm:$0xff] %v3662_v40  ;;  %v3664_v8 = vadd.f32 %v3663_v41, %v3482_v12 }
 0x5b7   : > { %3852 = vst [vmem:[%s8224_s19 + $0x58] sm:$0xff] %v3625_v32  ;;  %v3665_v43 = vpop.f32.mrf.mxu1 }
 0x5b8   : > { %3854 = vst [vmem:[%s8224_s19 + $0x68] sm:$0xff] %v3664_v8  ;;  %v3666_v11 = vadd.f32 %v3665_v43, %v3487_v3 }
 0x5b9   : > { %v3667_v35 = vpop.f32.mrf.mxu1 }
 0x5ba   : > { %3855 = vst [vmem:[%s8224_s19 + $0x70] sm:$0xff] %v3666_v11  ;;  %v3668_v5 = vadd.f32 %v3667_v35, %v3487_v3 }
 0x5bc   : > { %3856 = vst [vmem:[%s8224_s19 + $0x78] sm:$0xff] %v3668_v5 }
 0x5bd   : > { %4057 = shalt.err (!%p4054_p7)
}
 0x5be   : > { %s4058_s30 = scalar_lea.hbm %s8245_s11, 2048  ;;  %s4062_s19 = scalar_lea.hbm %s8300_s7, 4096 }
 0x5bf   : > { %p4059_p13 = scmp.ne.s32.totalorder %s8245_s11, %s4058_s30  ;;  %p4063_p4 = scmp.lt.s32.totalorder %s8245_s11, %s8300_s7 }
 0x5c0   : > { %p4064_p8 = scmp.lt.s32.totalorder %s4062_s19, %s4058_s30 }
 0x5c1   : > { %p4060_p5 = pnand %p4059_p13, %p9694_p10 }
 0x5c2   : > { %p4065_p9 = por %p4064_p8, %p4063_p4 }
 0x5c3   : > { %p4061_p0 = pneg %p4060_p5 }
 0x5c5   : > { %p4066_p11 = pnand %p4065_p9, %p4061_p0 }
 0x5c7   : > { %4069 = shalt.err (!%p4066_p11)
}
 0x5c8   : > { %s4132_s20 = smov 256  }
 0x5c9   : > { %3877 = dma.vmem_to_hbm [thread:$0]  (%p9694_p10), %s8248_s22, 2048, %s8245_s11, %s3690_s28, %s4132_s20, %s4132_s20, %s4124_s23  }
 0x5ca PF: > { %s3719_s17 = sand.u32 1, %s4100_s24   ;;  %p9695_p1 = scmp.ne.s32.totalorder %s8675_s8, 0 }
 0x5cb   : > { %p9696_p2 = scmp.ge.s32.totalorder %s4112_s27, 2  ;;  %s3720_s18 = scalar_lea.sflag [#allocation5], %s3719_s17 }
 0x5cd   : > { %p3891_p6 = pnand %p9696_p2, %p9695_p1 }
 0x5cf   : > { %p3892_p12 = pneg %p3891_p6 }
 0x5d1   : > { %4095 = dma.done.wait (%p3892_p12), %s3720_s18, 2048  }
 0x5d2   : > { %4097 = vsyncadd (%p3892_p12), %s3720_s18, 4294965248  ;;  %p21_p3 = scmp.ge.s32.totalorder %s4245_s29, 4   ;;  %s9697_s24 = smov %s4104_s25 }
 0x5d3   : > { %s9698_s25 = smov %s4108_s26  ;;  %s9699_s26 = smov %s4255_s12 }
 0x5d4   : > { %s9700_s27 = smov %s4245_s29  ;;  %23 = sbr.rel (!%p21_p3) target bundleno = 8 (0x8), region = 115 }
 0x5d9   :  { %3725 = vsyncpa [#allocation4], 1 }
 0x5da   :  { %3727 = vsyncpa [#allocation4 + $0x1], 1 }
 0x5db   :  { %3728 = vsyncpa [#allocation7], 1 }
 0x5dc   :  { %3729 = vsyncpa [#allocation5], 1 }
 0x5dd   :  { %3731 = vsyncpa [#allocation5 + $0x1], 1 }

</bundles_post_ra>
